<compile_context>
chip_gen: v5e
topology: v5e:2x2
jax: 0.10.0
libtpu: 0.0.40
codegen_flags: <defaults>
</compile_context>

<pallas_src>
import functools

import numpy as np
import jax
import jax.numpy as jnp
from jax import lax
from jax.experimental import pallas as pl
from jax.experimental.pallas import tpu as pltpu


# ---------------------------------------------------------------------------
# In-kernel folded conv: K rolls + masks -> one (C_out, K*C_in)x(K*C_in, L) dot
# ---------------------------------------------------------------------------

def _conv_folded(x, w, b, shifts, masks, relu):
    """x: (C_in, L) activation, lanes = batch*flattened-spatial.

    shifts[t] is the static flat lane offset of tap t; masks (if given) is a
    precomputed (K, L) 0/1 array zeroing taps that read across image borders
    (and, in the lane-batched layout, across neighbouring images)."""
    L = x.shape[-1]
    parts = []
    for t, s in enumerate(shifts):
        sh = x if s % L == 0 else pltpu.roll(x, (-s) % L, 1)   # sh[:, g]==x[:, g+s]
        if masks is not None:
            sh = sh * masks[t:t + 1, :]
        parts.append(sh)
    stacked = jnp.concatenate(parts, axis=0)                   # (K*C_in, L)
    acc = jnp.dot(w, stacked, preferred_element_type=jnp.float32) + b
    return jnp.maximum(acc, 0.0) if relu else acc


# ---------------------------------------------------------------------------
# The fused CVAE forward kernel (one grid step == one block of B images)
# ---------------------------------------------------------------------------

def _cvae_kernel(x_ref, y_ref, eps_ref,
                 m2a_ref, m3b_ref, maskv_ref,
                 wc1_ref, bc1_ref, wc2_ref, bc2_ref, sdn_ref,
                 wc3_ref, bc3_ref, wc4_ref, bc4_ref,
                 wfc_ref, bfc_ref, wml_ref, bml_ref,
                 wd1_ref, bd1_ref, wd2_ref, bd2_ref,
                 wt1_ref, bt1_ref, wt2_ref, bt2_ref,
                 uup_ref, wt3_ref, bt3_ref, wo_ref, bo_ref,
                 yout_ref, loss_ref,
                 *, H, W, C_in, C_h, D_h, D_z, B, Mpad, training):
    H2, W2 = H // 2, W // 2
    Hc, Wc = H + 3, W + 3                       # zero-inserted + pad-2 carrier
    M_b = H2 * W2

    # static tap offsets (row-major over (dh, dw))
    shifts2_full = [dh * W + dw for dh in range(2) for dw in range(2)]
    shifts3_half = [(dh - 1) * W2 + (dw - 1) for dh in range(3) for dw in range(3)]
    shifts3_car = [dh * Wc + dw for dh in range(3) for dw in range(3)]
    shifts2_car = [dh * Wc + dw for dh in range(2) for dw in range(2)]

    m2a = m2a_ref[...]                          # (4, B*H*W)   precomputed masks
    m3b = m3b_ref[...]                          # (9, B*M_b)

    # ------------------------------ encoder -------------------------------
    x = x_ref[0]                                # (C_in, B*H*W)
    # ZeroPad2d((0,1,0,1)) + Conv2d(C_in, C_h, 2) + ReLU
    h = _conv_folded(x, wc1_ref[...], bc1_ref[...], shifts2_full, m2a, True)
    # Conv2d(C_h, C_h, 2, stride=2) + ReLU: full-res folded conv, then a
    # block-diagonal 0/1 column-selection matmul (bf16, deep-K).
    r = _conv_folded(h, wc2_ref[...], bc2_ref[...], shifts2_full, None, True)
    h = jnp.dot(r.astype(jnp.bfloat16), sdn_ref[...],
                preferred_element_type=jnp.float32)            # (C_h, B*M_b)
    # two Conv2d(C_h, C_h, 3, padding=1) + ReLU
    h = _conv_folded(h, wc3_ref[...], bc3_ref[...], shifts3_half, m3b, True)
    h = _conv_folded(h, wc4_ref[...], bc4_ref[...], shifts3_half, m3b, True)

    # Flatten (NCHW order) + Linear(C_h*H2*W2, D_h): channel-batched GEMM
    h3 = h.reshape(C_h, B, M_b)
    part = lax.dot_general(h3, wfc_ref[...],
                           (((2,), (1,)), ((0,), (0,))),
                           preferred_element_type=jnp.float32)  # (C_h, B, D_h)
    hrow = jnp.sum(part, axis=0) + bfc_ref[...]                 # (B, D_h)

    # mean / log_var heads fused into one matmul + reparameterised sample
    ml = jnp.dot(hrow, wml_ref[...], preferred_element_type=jnp.float32) + bml_ref[...]
    mean = ml[:, :D_z]                                          # (B, D_z)
    log_var = ml[:, D_z:]                                       # (B, D_z)
    if training:
        z = mean + eps_ref[0] * jnp.exp(0.5 * log_var)
    else:
        z = mean

    # ------------------------------ decoder -------------------------------
    d1 = jnp.maximum(jnp.dot(z, wd1_ref[...],
                             preferred_element_type=jnp.float32) + bd1_ref[...], 0.0)
    # Linear(D_h, C_h*H2*W2) + ReLU + Reshape(C_h, H2, W2): one channel-batched
    # GEMM directly into the (C_h, B, M_b) conv layout (no scratch, no row loop)
    d1b = jnp.broadcast_to(d1[None], (C_h, B, D_h))
    g3 = lax.dot_general(d1b, wd2_ref[...],
                         (((2,), (1,)), ((0,), (0,))),
                         preferred_element_type=jnp.float32)    # (C_h, B, M_b)
    g3 = jnp.maximum(g3 + bd2_ref[...], 0.0)
    g = g3.reshape(C_h, B * M_b)

    # two ConvTranspose2d(C_h, C_h, 3, padding=1) + ReLU (flipped 3x3 convs)
    g = _conv_folded(g, wt1_ref[...], bt1_ref[...], shifts3_half, m3b, True)
    g = _conv_folded(g, wt2_ref[...], bt2_ref[...], shifts3_half, m3b, True)

    # ConvTranspose2d(C_h, C_h, 3, stride=2) + ReLU: block-diagonal 0/1 scatter
    # onto the zero-inserted, pre-padded, lane-padded carrier (bf16 matmul),
    # then a plain 3x3 folded conv on the carrier.
    gc = jnp.dot(g.astype(jnp.bfloat16), uup_ref[...],
                 preferred_element_type=jnp.float32)            # (C_h, B*Mpad)
    gc = _conv_folded(gc, wt3_ref[...], bt3_ref[...], shifts3_car, None, True)

    # Conv2d(C_h, C_in, 2) + Sigmoid, still on the carrier grid
    logits = _conv_folded(gc, wo_ref[...], bo_ref[...], shifts2_car, None, False)
    p = 1.0 / (1.0 + jnp.exp(-logits))                          # exact sigmoid
    yout_ref[0] = p                                             # (C_in, B*Mpad)

    # ------------------- ELBO: BCE(sum, torch clamp) + KLD ------------------
    yt = y_ref[0]                                               # target on carrier
    valid = maskv_ref[...]                                      # (1, B*Mpad)
    log_p = jnp.maximum(jnp.log(p), -100.0)
    log_1mp = jnp.maximum(jnp.log(1.0 - p), -100.0)
    bce = -jnp.sum(valid * (yt * log_p + (1.0 - yt) * log_1mp), keepdims=True)
    kld = -0.5 * jnp.sum(1.0 + log_var - mean * mean - jnp.exp(log_var),
                         keepdims=True)
    loss_ref[0] = bce + kld                                     # per-block loss


# ---------------------------------------------------------------------------
# Parameter init (PyTorch layouts) and kernel-ready preparation
# ---------------------------------------------------------------------------

def init_cvae_params(key, H, W, C_in, C_h, D_h, D_z):
    H2, W2 = H // 2, W // 2
    D_flat = C_h * H2 * W2
    keys = iter(jax.random.split(key, 40))

    def w_init(shape, scale=0.05):
        return (scale * jax.random.normal(next(keys), shape)).astype(jnp.float32)

    def b_init(shape):
        return (0.01 * jax.random.normal(next(keys), shape)).astype(jnp.float32)

    p = {}
    p["enc_c1_w"] = w_init((C_h, C_in, 2, 2)); p["enc_c1_b"] = b_init((C_h,))
    p["enc_c2_w"] = w_init((C_h, C_h, 2, 2));  p["enc_c2_b"] = b_init((C_h,))
    p["enc_c3_w"] = w_init((C_h, C_h, 3, 3));  p["enc_c3_b"] = b_init((C_h,))
    p["enc_c4_w"] = w_init((C_h, C_h, 3, 3));  p["enc_c4_b"] = b_init((C_h,))
    p["enc_fc_w"] = w_init((D_flat, D_h));     p["enc_fc_b"] = b_init((D_h,))
    p["mean_w"] = w_init((D_h, D_z));          p["mean_b"] = b_init((D_z,))
    p["lvar_w"] = w_init((D_h, D_z));          p["lvar_b"] = b_init((D_z,))
    p["dec_fc1_w"] = w_init((D_z, D_h));       p["dec_fc1_b"] = b_init((D_h,))
    p["dec_fc2_w"] = w_init((D_h, D_flat));    p["dec_fc2_b"] = b_init((D_flat,))
    # ConvTranspose2d weight layout: (C_in, C_out, kH, kW)
    p["dec_t1_w"] = w_init((C_h, C_h, 3, 3));  p["dec_t1_b"] = b_init((C_h,))
    p["dec_t2_w"] = w_init((C_h, C_h, 3, 3));  p["dec_t2_b"] = b_init((C_h,))
    p["dec_t3_w"] = w_init((C_h, C_h, 3, 3));  p["dec_t3_b"] = b_init((C_h,))
    p["dec_out_w"] = w_init((C_in, C_h, 2, 2)); p["dec_out_b"] = b_init((C_in,))
    return p


def prepare_params(p, H, W, C_in, C_h, D_h, D_z):
    """Fold conv weights tap-major into (C_out, K*C_in) MXU operands."""
    H2, W2 = H // 2, W // 2
    M_b = H2 * W2

    def fold_conv(w):               # (C_out, C_in, kh, kw) -> (C_out, kh*kw*C_in)
        co, ci, kh, kw = w.shape
        return jnp.transpose(w, (0, 2, 3, 1)).reshape(co, kh * kw * ci)

    def fold_convT(w):              # (C_in, C_out, kh, kw), flipped conv, folded
        ci, co, kh, kw = w.shape
        wf = w[:, :, ::-1, ::-1]
        return jnp.transpose(wf, (1, 2, 3, 0)).reshape(co, kh * kw * ci)

    q = {}
    q["wc1"] = fold_conv(p["enc_c1_w"]); q["bc1"] = p["enc_c1_b"].reshape(C_h, 1)
    q["wc2"] = fold_conv(p["enc_c2_w"]); q["bc2"] = p["enc_c2_b"].reshape(C_h, 1)
    q["wc3"] = fold_conv(p["enc_c3_w"]); q["bc3"] = p["enc_c3_b"].reshape(C_h, 1)
    q["wc4"] = fold_conv(p["enc_c4_w"]); q["bc4"] = p["enc_c4_b"].reshape(C_h, 1)
    q["wfc"] = p["enc_fc_w"].reshape(C_h, M_b, D_h)
    q["bfc"] = p["enc_fc_b"].reshape(1, D_h)
    q["wml"] = jnp.concatenate([p["mean_w"], p["lvar_w"]], axis=1)   # (D_h, 2*D_z)
    q["bml"] = jnp.concatenate([p["mean_b"], p["lvar_b"]]).reshape(1, 2 * D_z)
    q["wd1"] = p["dec_fc1_w"]
    q["bd1"] = p["dec_fc1_b"].reshape(1, D_h)
    q["wd2"] = jnp.transpose(p["dec_fc2_w"].reshape(D_h, C_h, M_b), (1, 0, 2))
    q["bd2"] = p["dec_fc2_b"].reshape(C_h, 1, M_b)
    q["wt1"] = fold_convT(p["dec_t1_w"]); q["bt1"] = p["dec_t1_b"].reshape(C_h, 1)
    q["wt2"] = fold_convT(p["dec_t2_w"]); q["bt2"] = p["dec_t2_b"].reshape(C_h, 1)
    q["wt3"] = fold_convT(p["dec_t3_w"]); q["bt3"] = p["dec_t3_b"].reshape(C_h, 1)
    q["wo"] = fold_conv(p["dec_out_w"]);  q["bo"] = p["dec_out_b"].reshape(C_in, 1)
    return q


def make_constants(H, W, B):
    """Precomputed tap masks, block-diag selection/scatter matrices, BCE mask."""
    assert H % 2 == 0 and W % 2 == 0  # TODO(synk): odd H/W ZeroPad2d branch
    H2, W2 = H // 2, W // 2
    Hc, Wc = H + 3, W + 3
    M_a, M_b, M_c = H * W, H2 * W2, Hc * Wc
    Mpad = ((M_c + 127) // 128) * 128          # lane-dense carrier (e.g. 361->384)

    def tap_mask(Hg, Wg, kh, kw, pt, pw):
        i = np.repeat(np.arange(Hg), Wg)
        j = np.tile(np.arange(Wg), Hg)
        rows = []
        for dh in range(kh):
            for dw in range(kw):
                si, sj = i + dh - pt, j + dw - pw
                ok = (si >= 0) & (si < Hg) & (sj >= 0) & (sj < Wg)
                rows.append(ok.astype(np.float32))
        return np.stack(rows, 0)                               # (kh*kw, Hg*Wg)

    m2a = np.tile(tap_mask(H, W, 2, 2, 0, 0), (1, B))          # (4, B*M_a)
    m3b = np.tile(tap_mask(H2, W2, 3, 3, 1, 1), (1, B))        # (9, B*M_b)

    m = np.arange(M_b)
    # stride-2 conv: pick full-res columns (2i, 2j)
    sdn0 = np.zeros((M_a, M_b), np.float32)
    sdn0[(2 * (m // W2)) * W + 2 * (m % W2), m] = 1.0
    # stride-2 transposed conv: scatter (i, j) -> (2i+2, 2j+2) on the carrier
    uup0 = np.zeros((M_b, Mpad), np.float32)
    uup0[m, (2 * (m // W2) + 2) * Wc + (2 * (m % W2) + 2)] = 1.0

    # block-diagonal (per image in the block); bf16 is exact for 0/1 entries
    sdn = np.zeros((B * M_a, B * M_b), np.float32)
    uup = np.zeros((B * M_b, B * Mpad), np.float32)
    for b in range(B):
        sdn[b * M_a:(b + 1) * M_a, b * M_b:(b + 1) * M_b] = sdn0
        uup[b * M_b:(b + 1) * M_b, b * Mpad:(b + 1) * Mpad] = uup0

    mv = np.zeros((Hc, Wc), np.float32)
    mv[:H, :W] = 1.0
    mvp = np.zeros((Mpad,), np.float32)
    mvp[:M_c] = mv.reshape(-1)
    maskv = np.tile(mvp.reshape(1, Mpad), (1, B))              # (1, B*Mpad)

    # Geometry invariant for the unmasked carrier convs: every carrier read
    # needed by the kept HxW output stays inside one image's M_c lanes.
    assert (H + 2) * Wc + (W + 2) < M_c <= Mpad

    return {"m2a": jnp.asarray(m2a), "m3b": jnp.asarray(m3b),
            "maskv": jnp.asarray(maskv),
            "sdn": jnp.asarray(sdn, dtype=jnp.bfloat16),
            "uup": jnp.asarray(uup, dtype=jnp.bfloat16)}


# ---------------------------------------------------------------------------
# Forward wrapper: one pallas_call for the whole model
# ---------------------------------------------------------------------------

def _batch_index_map(nd):
    def imap(n):
        return (n,) + (0,) * (nd - 1)
    return imap


def _const_index_map(nd):
    def imap(n):
        return (0,) * nd
    return imap


def cvae_forward(prep, consts, x_nchw, y_nchw, eps,
                 *, H, W, C_in, C_h, D_h, D_z, batch_block, training=True):
    N = x_nchw.shape[0]
    B = batch_block
    assert N % B == 0  # TODO(synk): pad ragged final block
    G = N // B
    H2, W2 = H // 2, W // 2
    Hc, Wc = H + 3, W + 3
    M_a, M_b, M_c = H * W, H2 * W2, Hc * Wc
    Mpad = ((M_c + 127) // 128) * 128

    # wrapper-side layout plumbing: channels on sublanes, (image, spatial) on lanes
    x_cm = (x_nchw.reshape(G, B, C_in, M_a)
            .transpose(0, 2, 1, 3).reshape(G, C_in, B * M_a))
    y_car = jnp.pad(y_nchw, ((0, 0), (0, 0), (0, Hc - H), (0, Wc - W)))
    y_car = y_car.reshape(N, C_in, M_c)
    y_car = jnp.pad(y_car, ((0, 0), (0, 0), (0, Mpad - M_c)))
    y_car = (y_car.reshape(G, B, C_in, Mpad)
             .transpose(0, 2, 1, 3).reshape(G, C_in, B * Mpad))
    eps3 = eps.reshape(G, B, D_z)

    batched = [x_cm, y_car, eps3]
    consts_w = [consts["m2a"], consts["m3b"], consts["maskv"],
                prep["wc1"], prep["bc1"], prep["wc2"], prep["bc2"], consts["sdn"],
                prep["wc3"], prep["bc3"], prep["wc4"], prep["bc4"],
                prep["wfc"], prep["bfc"], prep["wml"], prep["bml"],
                prep["wd1"], prep["bd1"], prep["wd2"], prep["bd2"],
                prep["wt1"], prep["bt1"], prep["wt2"], prep["bt2"],
                consts["uup"], prep["wt3"], prep["bt3"],
                prep["wo"], prep["bo"]]

    in_specs = [pl.BlockSpec((1,) + a.shape[1:], _batch_index_map(a.ndim))
                for a in batched]
    in_specs += [pl.BlockSpec(a.shape, _const_index_map(a.ndim))
                 for a in consts_w]

    kernel = functools.partial(_cvae_kernel, H=H, W=W, C_in=C_in, C_h=C_h,
                               D_h=D_h, D_z=D_z, B=B, Mpad=Mpad,
                               training=training)

    y_carrier, loss_parts = pl.pallas_call(
        kernel,
        grid=(G,),
        out_shape=(jax.ShapeDtypeStruct((G, C_in, B * Mpad), jnp.float32),
                   jax.ShapeDtypeStruct((G, 1, 1), jnp.float32)),
        in_specs=in_specs,
        out_specs=(pl.BlockSpec((1, C_in, B * Mpad), lambda n: (n, 0, 0)),
                   pl.BlockSpec((1, 1, 1), lambda n: (n, 0, 0))),
        compiler_params=pltpu.CompilerParams(
            dimension_semantics=("parallel",)),
    )(*(batched + consts_w))

    # only the returned image is re-laid-out / sliced in the wrapper
    y_img = (y_carrier.reshape(G, C_in, B, Mpad)
             .transpose(0, 2, 1, 3).reshape(N, C_in, Mpad))
    y_prd = y_img[:, :, :M_c].reshape(N, C_in, Hc, Wc)[:, :, :H, :W]
    loss = jnp.sum(loss_parts)
    return y_prd, loss


# TODO(synk): RMSprop optimizer construction in __init__ is training-time
# state, not part of the forward pass, so it is not translated.

if __name__ == "__main__":
    H, W, C_in, C_h, D_h, D_z = 16, 16, 4, 8, 32, 8
    N, B = 8, 4                     # grid = (2,): both v7x TensorCores busy
    key = jax.random.PRNGKey(0)
    k_params, k_x, k_y, k_eps = jax.random.split(key, 4)

    params = init_cvae_params(k_params, H, W, C_in, C_h, D_h, D_z)
    prep = prepare_params(params, H, W, C_in, C_h, D_h, D_z)
    consts = make_constants(H, W, B)

    x = jax.random.uniform(k_x, (N, C_in, H, W), dtype=jnp.float32)   # NCHW
    y = jax.random.uniform(k_y, (N, C_in, H, W), dtype=jnp.float32)   # NCHW
    # torch.randn_like replaced by deterministic host-supplied eps
    eps = jax.random.normal(k_eps, (N, D_z), dtype=jnp.float32)

    fwd = jax.jit(functools.partial(cvae_forward, H=H, W=W, C_in=C_in, C_h=C_h,
                                    D_h=D_h, D_z=D_z, batch_block=B,
                                    training=True))
    y_prd, loss = fwd(prep, consts, x, y, eps)
    jax.block_until_ready((y_prd, loss))

    assert y_prd.shape == (N, C_in, H, W), y_prd.shape
    assert bool(jnp.all(jnp.isfinite(y_prd))) and bool(jnp.isfinite(loss))
    print("KERNEL_OK")
</pallas_src>

<mosaic_0001>
module attributes {stable_mosaic.version = 11 : i64} {
  func.func @_cvae_kernel(%arg0: i32, %arg1: memref<1x4x1024xf32, #tpu.memory_space<vmem>>, %arg2: memref<1x4x1536xf32, #tpu.memory_space<vmem>>, %arg3: memref<1x4x8xf32, #tpu.memory_space<vmem>>, %arg4: memref<4x1024xf32, #tpu.memory_space<vmem>>, %arg5: memref<9x256xf32, #tpu.memory_space<vmem>>, %arg6: memref<1x1536xf32, #tpu.memory_space<vmem>>, %arg7: memref<8x16xf32, #tpu.memory_space<vmem>>, %arg8: memref<8x1xf32, #tpu.memory_space<vmem>>, %arg9: memref<8x32xf32, #tpu.memory_space<vmem>>, %arg10: memref<8x1xf32, #tpu.memory_space<vmem>>, %arg11: memref<1024x256xbf16, #tpu.memory_space<vmem>>, %arg12: memref<8x72xf32, #tpu.memory_space<vmem>>, %arg13: memref<8x1xf32, #tpu.memory_space<vmem>>, %arg14: memref<8x72xf32, #tpu.memory_space<vmem>>, %arg15: memref<8x1xf32, #tpu.memory_space<vmem>>, %arg16: memref<8x64x32xf32, #tpu.memory_space<vmem>>, %arg17: memref<1x32xf32, #tpu.memory_space<vmem>>, %arg18: memref<32x16xf32, #tpu.memory_space<vmem>>, %arg19: memref<1x16xf32, #tpu.memory_space<vmem>>, %arg20: memref<8x32xf32, #tpu.memory_space<vmem>>, %arg21: memref<1x32xf32, #tpu.memory_space<vmem>>, %arg22: memref<8x32x64xf32, #tpu.memory_space<vmem>>, %arg23: memref<8x1x64xf32, #tpu.memory_space<vmem>>, %arg24: memref<8x72xf32, #tpu.memory_space<vmem>>, %arg25: memref<8x1xf32, #tpu.memory_space<vmem>>, %arg26: memref<8x72xf32, #tpu.memory_space<vmem>>, %arg27: memref<8x1xf32, #tpu.memory_space<vmem>>, %arg28: memref<256x1536xbf16, #tpu.memory_space<vmem>>, %arg29: memref<8x72xf32, #tpu.memory_space<vmem>>, %arg30: memref<8x1xf32, #tpu.memory_space<vmem>>, %arg31: memref<4x32xf32, #tpu.memory_space<vmem>>, %arg32: memref<4x1xf32, #tpu.memory_space<vmem>>, %arg33: memref<1x4x1536xf32, #tpu.memory_space<vmem>>, %arg34: memref<1x1x1xf32, #tpu.memory_space<vmem>>) attributes {dimension_semantics = [#tpu.dimension_semantics<parallel>], iteration_bounds = array<i64: 2>, scalar_prefetch = 0 : i64, scratch_operands = 0 : i64, tpu.core_type = #tpu.core_type<tc>, window_params = [{transform_indices = @transform_0, window_bounds = array<i64: 1, 4, 1024>}, {transform_indices = @transform_1, window_bounds = array<i64: 1, 4, 1536>}, {transform_indices = @transform_2, window_bounds = array<i64: 1, 4, 8>}, {pipeline_mode = #tpu.pipeline_mode<synchronous>, transform_indices = @transform_3, window_bounds = array<i64: 4, 1024>}, {pipeline_mode = #tpu.pipeline_mode<synchronous>, transform_indices = @transform_4, window_bounds = array<i64: 9, 256>}, {pipeline_mode = #tpu.pipeline_mode<synchronous>, transform_indices = @transform_5, window_bounds = array<i64: 1, 1536>}, {pipeline_mode = #tpu.pipeline_mode<synchronous>, transform_indices = @transform_6, window_bounds = array<i64: 8, 16>}, {pipeline_mode = #tpu.pipeline_mode<synchronous>, transform_indices = @transform_7, window_bounds = array<i64: 8, 1>}, {pipeline_mode = #tpu.pipeline_mode<synchronous>, transform_indices = @transform_8, window_bounds = array<i64: 8, 32>}, {pipeline_mode = #tpu.pipeline_mode<synchronous>, transform_indices = @transform_9, window_bounds = array<i64: 8, 1>}, {pipeline_mode = #tpu.pipeline_mode<synchronous>, transform_indices = @transform_10, window_bounds = array<i64: 1024, 256>}, {pipeline_mode = #tpu.pipeline_mode<synchronous>, transform_indices = @transform_11, window_bounds = array<i64: 8, 72>}, {pipeline_mode = #tpu.pipeline_mode<synchronous>, transform_indices = @transform_12, window_bounds = array<i64: 8, 1>}, {pipeline_mode = #tpu.pipeline_mode<synchronous>, transform_indices = @transform_13, window_bounds = array<i64: 8, 72>}, {pipeline_mode = #tpu.pipeline_mode<synchronous>, transform_indices = @transform_14, window_bounds = array<i64: 8, 1>}, {pipeline_mode = #tpu.pipeline_mode<synchronous>, transform_indices = @transform_15, window_bounds = array<i64: 8, 64, 32>}, {pipeline_mode = #tpu.pipeline_mode<synchronous>, transform_indices = @transform_16, window_bounds = array<i64: 1, 32>}, {pipeline_mode = #tpu.pipeline_mode<synchronous>, transform_indices = @transform_17, window_bounds = array<i64: 32, 16>}, {pipeline_mode = #tpu.pipeline_mode<synchronous>, transform_indices = @transform_18, window_bounds = array<i64: 1, 16>}, {pipeline_mode = #tpu.pipeline_mode<synchronous>, transform_indices = @transform_19, window_bounds = array<i64: 8, 32>}, {pipeline_mode = #tpu.pipeline_mode<synchronous>, transform_indices = @transform_20, window_bounds = array<i64: 1, 32>}, {pipeline_mode = #tpu.pipeline_mode<synchronous>, transform_indices = @transform_21, window_bounds = array<i64: 8, 32, 64>}, {pipeline_mode = #tpu.pipeline_mode<synchronous>, transform_indices = @transform_22, window_bounds = array<i64: 8, 1, 64>}, {pipeline_mode = #tpu.pipeline_mode<synchronous>, transform_indices = @transform_23, window_bounds = array<i64: 8, 72>}, {pipeline_mode = #tpu.pipeline_mode<synchronous>, transform_indices = @transform_24, window_bounds = array<i64: 8, 1>}, {pipeline_mode = #tpu.pipeline_mode<synchronous>, transform_indices = @transform_25, window_bounds = array<i64: 8, 72>}, {pipeline_mode = #tpu.pipeline_mode<synchronous>, transform_indices = @transform_26, window_bounds = array<i64: 8, 1>}, {pipeline_mode = #tpu.pipeline_mode<synchronous>, transform_indices = @transform_27, window_bounds = array<i64: 256, 1536>}, {pipeline_mode = #tpu.pipeline_mode<synchronous>, transform_indices = @transform_28, window_bounds = array<i64: 8, 72>}, {pipeline_mode = #tpu.pipeline_mode<synchronous>, transform_indices = @transform_29, window_bounds = array<i64: 8, 1>}, {pipeline_mode = #tpu.pipeline_mode<synchronous>, transform_indices = @transform_30, window_bounds = array<i64: 4, 32>}, {pipeline_mode = #tpu.pipeline_mode<synchronous>, transform_indices = @transform_31, window_bounds = array<i64: 4, 1>}, {transform_indices = @transform_32, window_bounds = array<i64: 1, 4, 1536>}, {transform_indices = @transform_33, window_bounds = array<i64: 1, 1, 1>}]} {
    %c0 = arith.constant 0 : index
    %c0_0 = arith.constant 0 : index
    %0 = vector.load %arg4[%c0, %c0_0] : memref<4x1024xf32, #tpu.memory_space<vmem>>, vector<4x1024xf32>
    %c0_1 = arith.constant 0 : index
    %c0_2 = arith.constant 0 : index
    %1 = vector.load %arg5[%c0_1, %c0_2] : memref<9x256xf32, #tpu.memory_space<vmem>>, vector<9x256xf32>
    %c0_3 = arith.constant 0 : index
    %c0_4 = arith.constant 0 : index
    %c0_5 = arith.constant 0 : index
    %2 = vector.load %arg1[%c0_3, %c0_4, %c0_5] : memref<1x4x1024xf32, #tpu.memory_space<vmem>>, vector<1x4x1024xf32>
    %3 = vector.shape_cast %2 : vector<1x4x1024xf32> to vector<4x1024xf32>
    %c0_6 = arith.constant 0 : index
    %c0_7 = arith.constant 0 : index
    %4 = vector.load %arg7[%c0_6, %c0_7] : memref<8x16xf32, #tpu.memory_space<vmem>>, vector<8x16xf32>
    %c0_8 = arith.constant 0 : index
    %c0_9 = arith.constant 0 : index
    %5 = vector.load %arg8[%c0_8, %c0_9] : memref<8x1xf32, #tpu.memory_space<vmem>>, vector<8x1xf32>
    %6 = vector.extract_strided_slice %0 {offsets = [0, 0], sizes = [1, 1024], strides = [1, 1]} : vector<4x1024xf32> to vector<1x1024xf32>
    %7 = vector.broadcast %6 : vector<1x1024xf32> to vector<4x1024xf32>
    %8 = arith.mulf %3, %7 : vector<4x1024xf32>
    %c1023_i32 = arith.constant 1023 : i32
    %9 = tpu.dynamic_rotate %3 by %c1023_i32 dim 1 : vector<4x1024xf32>, i32 -> vector<4x1024xf32>
    %10 = vector.extract_strided_slice %0 {offsets = [1, 0], sizes = [1, 1024], strides = [1, 1]} : vector<4x1024xf32> to vector<1x1024xf32>
    %11 = vector.broadcast %10 : vector<1x1024xf32> to vector<4x1024xf32>
    %12 = arith.mulf %9, %11 : vector<4x1024xf32>
    %c1008_i32 = arith.constant 1008 : i32
    %13 = tpu.dynamic_rotate %3 by %c1008_i32 dim 1 : vector<4x1024xf32>, i32 -> vector<4x1024xf32>
    %14 = vector.extract_strided_slice %0 {offsets = [2, 0], sizes = [1, 1024], strides = [1, 1]} : vector<4x1024xf32> to vector<1x1024xf32>
    %15 = vector.broadcast %14 : vector<1x1024xf32> to vector<4x1024xf32>
    %16 = arith.mulf %13, %15 : vector<4x1024xf32>
    %c1007_i32 = arith.constant 1007 : i32
    %17 = tpu.dynamic_rotate %3 by %c1007_i32 dim 1 : vector<4x1024xf32>, i32 -> vector<4x1024xf32>
    %18 = vector.extract_strided_slice %0 {offsets = [3, 0], sizes = [1, 1024], strides = [1, 1]} : vector<4x1024xf32> to vector<1x1024xf32>
    %19 = vector.broadcast %18 : vector<1x1024xf32> to vector<4x1024xf32>
    %20 = arith.mulf %17, %19 : vector<4x1024xf32>
    %21 = tpu.concatenate %8, %12, %16, %20 in 0 : vector<4x1024xf32>, vector<4x1024xf32>, vector<4x1024xf32>, vector<4x1024xf32> -> vector<16x1024xf32>
    %cst = arith.constant dense<0.000000e+00> : vector<8x1024xf32>
    %22 = tpu.matmul %4, %21, %cst {dimension_numbers = #tpu.dot_dimension_numbers<[1], [0], [0], [1], [0, 0, 1, 1], [], []>} : vector<8x16xf32>, vector<16x1024xf32>, vector<8x1024xf32> -> vector<8x1024xf32>
    %23 = vector.broadcast %5 : vector<8x1xf32> to vector<8x1024xf32>
    %24 = arith.addf %22, %23 : vector<8x1024xf32>
    %cst_10 = arith.constant 0.000000e+00 : f32
    %25 = vector.broadcast %cst_10 : f32 to vector<8x1024xf32>
    %26 = arith.maximumf %24, %25 : vector<8x1024xf32>
    %c0_11 = arith.constant 0 : index
    %c0_12 = arith.constant 0 : index
    %27 = vector.load %arg9[%c0_11, %c0_12] : memref<8x32xf32, #tpu.memory_space<vmem>>, vector<8x32xf32>
    %c0_13 = arith.constant 0 : index
    %c0_14 = arith.constant 0 : index
    %28 = vector.load %arg10[%c0_13, %c0_14] : memref<8x1xf32, #tpu.memory_space<vmem>>, vector<8x1xf32>
    %c1023_i32_15 = arith.constant 1023 : i32
    %29 = tpu.dynamic_rotate %26 by %c1023_i32_15 dim 1 : vector<8x1024xf32>, i32 -> vector<8x1024xf32>
    %c1008_i32_16 = arith.constant 1008 : i32
    %30 = tpu.dynamic_rotate %26 by %c1008_i32_16 dim 1 : vector<8x1024xf32>, i32 -> vector<8x1024xf32>
    %c1007_i32_17 = arith.constant 1007 : i32
    %31 = tpu.dynamic_rotate %26 by %c1007_i32_17 dim 1 : vector<8x1024xf32>, i32 -> vector<8x1024xf32>
    %32 = tpu.concatenate %26, %29, %30, %31 in 0 : vector<8x1024xf32>, vector<8x1024xf32>, vector<8x1024xf32>, vector<8x1024xf32> -> vector<32x1024xf32>
    %cst_18 = arith.constant dense<0.000000e+00> : vector<8x1024xf32>
    %33 = tpu.matmul %27, %32, %cst_18 {dimension_numbers = #tpu.dot_dimension_numbers<[1], [0], [0], [1], [0, 0, 1, 1], [], []>} : vector<8x32xf32>, vector<32x1024xf32>, vector<8x1024xf32> -> vector<8x1024xf32>
    %34 = vector.broadcast %28 : vector<8x1xf32> to vector<8x1024xf32>
    %35 = arith.addf %33, %34 : vector<8x1024xf32>
    %cst_19 = arith.constant 0.000000e+00 : f32
    %36 = vector.broadcast %cst_19 : f32 to vector<8x1024xf32>
    %37 = arith.maximumf %35, %36 : vector<8x1024xf32>
    %38 = arith.truncf %37 : vector<8x1024xf32> to vector<8x1024xbf16>
    %c0_20 = arith.constant 0 : index
    %c0_21 = arith.constant 0 : index
    %39 = vector.load %arg11[%c0_20, %c0_21] : memref<1024x256xbf16, #tpu.memory_space<vmem>>, vector<1024x256xbf16>
    %cst_22 = arith.constant dense<0.000000e+00> : vector<8x256xf32>
    %40 = tpu.matmul %38, %39, %cst_22 {dimension_numbers = #tpu.dot_dimension_numbers<[1], [0], [0], [1], [0, 0, 1, 1], [], []>} : vector<8x1024xbf16>, vector<1024x256xbf16>, vector<8x256xf32> -> vector<8x256xf32>
    %c0_23 = arith.constant 0 : index
    %c0_24 = arith.constant 0 : index
    %41 = vector.load %arg12[%c0_23, %c0_24] : memref<8x72xf32, #tpu.memory_space<vmem>>, vector<8x72xf32>
    %c0_25 = arith.constant 0 : index
    %c0_26 = arith.constant 0 : index
    %42 = vector.load %arg13[%c0_25, %c0_26] : memref<8x1xf32, #tpu.memory_space<vmem>>, vector<8x1xf32>
    %c9_i32 = arith.constant 9 : i32
    %43 = tpu.dynamic_rotate %40 by %c9_i32 dim 1 : vector<8x256xf32>, i32 -> vector<8x256xf32>
    %44 = vector.extract_strided_slice %1 {offsets = [0, 0], sizes = [1, 256], strides = [1, 1]} : vector<9x256xf32> to vector<1x256xf32>
    %45 = vector.broadcast %44 : vector<1x256xf32> to vector<8x256xf32>
    %46 = arith.mulf %43, %45 : vector<8x256xf32>
    %c8_i32 = arith.constant 8 : i32
    %47 = tpu.dynamic_rotate %40 by %c8_i32 dim 1 : vector<8x256xf32>, i32 -> vector<8x256xf32>
    %48 = vector.extract_strided_slice %1 {offsets = [1, 0], sizes = [1, 256], strides = [1, 1]} : vector<9x256xf32> to vector<1x256xf32>
    %49 = vector.broadcast %48 : vector<1x256xf32> to vector<8x256xf32>
    %50 = arith.mulf %47, %49 : vector<8x256xf32>
    %c7_i32 = arith.constant 7 : i32
    %51 = tpu.dynamic_rotate %40 by %c7_i32 dim 1 : vector<8x256xf32>, i32 -> vector<8x256xf32>
    %52 = vector.extract_strided_slice %1 {offsets = [2, 0], sizes = [1, 256], strides = [1, 1]} : vector<9x256xf32> to vector<1x256xf32>
    %53 = vector.broadcast %52 : vector<1x256xf32> to vector<8x256xf32>
    %54 = arith.mulf %51, %53 : vector<8x256xf32>
    %c1_i32 = arith.constant 1 : i32
    %55 = tpu.dynamic_rotate %40 by %c1_i32 dim 1 : vector<8x256xf32>, i32 -> vector<8x256xf32>
    %56 = vector.extract_strided_slice %1 {offsets = [3, 0], sizes = [1, 256], strides = [1, 1]} : vector<9x256xf32> to vector<1x256xf32>
    %57 = vector.broadcast %56 : vector<1x256xf32> to vector<8x256xf32>
    %58 = arith.mulf %55, %57 : vector<8x256xf32>
    %59 = vector.extract_strided_slice %1 {offsets = [4, 0], sizes = [1, 256], strides = [1, 1]} : vector<9x256xf32> to vector<1x256xf32>
    %60 = vector.broadcast %59 : vector<1x256xf32> to vector<8x256xf32>
    %61 = arith.mulf %40, %60 : vector<8x256xf32>
    %c255_i32 = arith.constant 255 : i32
    %62 = tpu.dynamic_rotate %40 by %c255_i32 dim 1 : vector<8x256xf32>, i32 -> vector<8x256xf32>
    %63 = vector.extract_strided_slice %1 {offsets = [5, 0], sizes = [1, 256], strides = [1, 1]} : vector<9x256xf32> to vector<1x256xf32>
    %64 = vector.broadcast %63 : vector<1x256xf32> to vector<8x256xf32>
    %65 = arith.mulf %62, %64 : vector<8x256xf32>
    %c249_i32 = arith.constant 249 : i32
    %66 = tpu.dynamic_rotate %40 by %c249_i32 dim 1 : vector<8x256xf32>, i32 -> vector<8x256xf32>
    %67 = vector.extract_strided_slice %1 {offsets = [6, 0], sizes = [1, 256], strides = [1, 1]} : vector<9x256xf32> to vector<1x256xf32>
    %68 = vector.broadcast %67 : vector<1x256xf32> to vector<8x256xf32>
    %69 = arith.mulf %66, %68 : vector<8x256xf32>
    %c248_i32 = arith.constant 248 : i32
    %70 = tpu.dynamic_rotate %40 by %c248_i32 dim 1 : vector<8x256xf32>, i32 -> vector<8x256xf32>
    %71 = vector.extract_strided_slice %1 {offsets = [7, 0], sizes = [1, 256], strides = [1, 1]} : vector<9x256xf32> to vector<1x256xf32>
    %72 = vector.broadcast %71 : vector<1x256xf32> to vector<8x256xf32>
    %73 = arith.mulf %70, %72 : vector<8x256xf32>
    %c247_i32 = arith.constant 247 : i32
    %74 = tpu.dynamic_rotate %40 by %c247_i32 dim 1 : vector<8x256xf32>, i32 -> vector<8x256xf32>
    %75 = vector.extract_strided_slice %1 {offsets = [8, 0], sizes = [1, 256], strides = [1, 1]} : vector<9x256xf32> to vector<1x256xf32>
    %76 = vector.broadcast %75 : vector<1x256xf32> to vector<8x256xf32>
    %77 = arith.mulf %74, %76 : vector<8x256xf32>
    %78 = tpu.concatenate %46, %50, %54, %58, %61, %65, %69, %73, %77 in 0 : vector<8x256xf32>, vector<8x256xf32>, vector<8x256xf32>, vector<8x256xf32>, vector<8x256xf32>, vector<8x256xf32>, vector<8x256xf32>, vector<8x256xf32>, vector<8x256xf32> -> vector<72x256xf32>
    %cst_27 = arith.constant dense<0.000000e+00> : vector<8x256xf32>
    %79 = tpu.matmul %41, %78, %cst_27 {dimension_numbers = #tpu.dot_dimension_numbers<[1], [0], [0], [1], [0, 0, 1, 1], [], []>} : vector<8x72xf32>, vector<72x256xf32>, vector<8x256xf32> -> vector<8x256xf32>
    %80 = vector.broadcast %42 : vector<8x1xf32> to vector<8x256xf32>
    %81 = arith.addf %79, %80 : vector<8x256xf32>
    %cst_28 = arith.constant 0.000000e+00 : f32
    %82 = vector.broadcast %cst_28 : f32 to vector<8x256xf32>
    %83 = arith.maximumf %81, %82 : vector<8x256xf32>
    %c0_29 = arith.constant 0 : index
    %c0_30 = arith.constant 0 : index
    %84 = vector.load %arg14[%c0_29, %c0_30] : memref<8x72xf32, #tpu.memory_space<vmem>>, vector<8x72xf32>
    %c0_31 = arith.constant 0 : index
    %c0_32 = arith.constant 0 : index
    %85 = vector.load %arg15[%c0_31, %c0_32] : memref<8x1xf32, #tpu.memory_space<vmem>>, vector<8x1xf32>
    %c9_i32_33 = arith.constant 9 : i32
    %86 = tpu.dynamic_rotate %83 by %c9_i32_33 dim 1 : vector<8x256xf32>, i32 -> vector<8x256xf32>
    %87 = vector.extract_strided_slice %1 {offsets = [0, 0], sizes = [1, 256], strides = [1, 1]} : vector<9x256xf32> to vector<1x256xf32>
    %88 = vector.broadcast %87 : vector<1x256xf32> to vector<8x256xf32>
    %89 = arith.mulf %86, %88 : vector<8x256xf32>
    %c8_i32_34 = arith.constant 8 : i32
    %90 = tpu.dynamic_rotate %83 by %c8_i32_34 dim 1 : vector<8x256xf32>, i32 -> vector<8x256xf32>
    %91 = vector.extract_strided_slice %1 {offsets = [1, 0], sizes = [1, 256], strides = [1, 1]} : vector<9x256xf32> to vector<1x256xf32>
    %92 = vector.broadcast %91 : vector<1x256xf32> to vector<8x256xf32>
    %93 = arith.mulf %90, %92 : vector<8x256xf32>
    %c7_i32_35 = arith.constant 7 : i32
    %94 = tpu.dynamic_rotate %83 by %c7_i32_35 dim 1 : vector<8x256xf32>, i32 -> vector<8x256xf32>
    %95 = vector.extract_strided_slice %1 {offsets = [2, 0], sizes = [1, 256], strides = [1, 1]} : vector<9x256xf32> to vector<1x256xf32>
    %96 = vector.broadcast %95 : vector<1x256xf32> to vector<8x256xf32>
    %97 = arith.mulf %94, %96 : vector<8x256xf32>
    %c1_i32_36 = arith.constant 1 : i32
    %98 = tpu.dynamic_rotate %83 by %c1_i32_36 dim 1 : vector<8x256xf32>, i32 -> vector<8x256xf32>
    %99 = vector.extract_strided_slice %1 {offsets = [3, 0], sizes = [1, 256], strides = [1, 1]} : vector<9x256xf32> to vector<1x256xf32>
    %100 = vector.broadcast %99 : vector<1x256xf32> to vector<8x256xf32>
    %101 = arith.mulf %98, %100 : vector<8x256xf32>
    %102 = vector.extract_strided_slice %1 {offsets = [4, 0], sizes = [1, 256], strides = [1, 1]} : vector<9x256xf32> to vector<1x256xf32>
    %103 = vector.broadcast %102 : vector<1x256xf32> to vector<8x256xf32>
    %104 = arith.mulf %83, %103 : vector<8x256xf32>
    %c255_i32_37 = arith.constant 255 : i32
    %105 = tpu.dynamic_rotate %83 by %c255_i32_37 dim 1 : vector<8x256xf32>, i32 -> vector<8x256xf32>
    %106 = vector.extract_strided_slice %1 {offsets = [5, 0], sizes = [1, 256], strides = [1, 1]} : vector<9x256xf32> to vector<1x256xf32>
    %107 = vector.broadcast %106 : vector<1x256xf32> to vector<8x256xf32>
    %108 = arith.mulf %105, %107 : vector<8x256xf32>
    %c249_i32_38 = arith.constant 249 : i32
    %109 = tpu.dynamic_rotate %83 by %c249_i32_38 dim 1 : vector<8x256xf32>, i32 -> vector<8x256xf32>
    %110 = vector.extract_strided_slice %1 {offsets = [6, 0], sizes = [1, 256], strides = [1, 1]} : vector<9x256xf32> to vector<1x256xf32>
    %111 = vector.broadcast %110 : vector<1x256xf32> to vector<8x256xf32>
    %112 = arith.mulf %109, %111 : vector<8x256xf32>
    %c248_i32_39 = arith.constant 248 : i32
    %113 = tpu.dynamic_rotate %83 by %c248_i32_39 dim 1 : vector<8x256xf32>, i32 -> vector<8x256xf32>
    %114 = vector.extract_strided_slice %1 {offsets = [7, 0], sizes = [1, 256], strides = [1, 1]} : vector<9x256xf32> to vector<1x256xf32>
    %115 = vector.broadcast %114 : vector<1x256xf32> to vector<8x256xf32>
    %116 = arith.mulf %113, %115 : vector<8x256xf32>
    %c247_i32_40 = arith.constant 247 : i32
    %117 = tpu.dynamic_rotate %83 by %c247_i32_40 dim 1 : vector<8x256xf32>, i32 -> vector<8x256xf32>
    %118 = vector.extract_strided_slice %1 {offsets = [8, 0], sizes = [1, 256], strides = [1, 1]} : vector<9x256xf32> to vector<1x256xf32>
    %119 = vector.broadcast %118 : vector<1x256xf32> to vector<8x256xf32>
    %120 = arith.mulf %117, %119 : vector<8x256xf32>
    %121 = tpu.concatenate %89, %93, %97, %101, %104, %108, %112, %116, %120 in 0 : vector<8x256xf32>, vector<8x256xf32>, vector<8x256xf32>, vector<8x256xf32>, vector<8x256xf32>, vector<8x256xf32>, vector<8x256xf32>, vector<8x256xf32>, vector<8x256xf32> -> vector<72x256xf32>
    %cst_41 = arith.constant dense<0.000000e+00> : vector<8x256xf32>
    %122 = tpu.matmul %84, %121, %cst_41 {dimension_numbers = #tpu.dot_dimension_numbers<[1], [0], [0], [1], [0, 0, 1, 1], [], []>} : vector<8x72xf32>, vector<72x256xf32>, vector<8x256xf32> -> vector<8x256xf32>
    %123 = vector.broadcast %85 : vector<8x1xf32> to vector<8x256xf32>
    %124 = arith.addf %122, %123 : vector<8x256xf32>
    %cst_42 = arith.constant 0.000000e+00 : f32
    %125 = vector.broadcast %cst_42 : f32 to vector<8x256xf32>
    %126 = arith.maximumf %124, %125 : vector<8x256xf32>
    %127 = vector.shape_cast %126 : vector<8x256xf32> to vector<8x4x64xf32>
    %c0_43 = arith.constant 0 : index
    %c0_44 = arith.constant 0 : index
    %c0_45 = arith.constant 0 : index
    %128 = vector.load %arg16[%c0_43, %c0_44, %c0_45] : memref<8x64x32xf32, #tpu.memory_space<vmem>>, vector<8x64x32xf32>
    %cst_46 = arith.constant dense<0.000000e+00> : vector<8x4x32xf32>
    %129 = tpu.matmul %127, %128, %cst_46 {dimension_numbers = #tpu.dot_dimension_numbers<[2], [1], [1], [2], [0, 0, 0, 1, 1, 2], [0], [0]>} : vector<8x4x64xf32>, vector<8x64x32xf32>, vector<8x4x32xf32> -> vector<8x4x32xf32>
    %cst_47 = arith.constant dense<0.000000e+00> : vector<4x32xf32>
    %130 = vector.multi_reduction <add>, %129, %cst_47 [0] : vector<8x4x32xf32> to vector<4x32xf32>
    %c0_48 = arith.constant 0 : index
    %c0_49 = arith.constant 0 : index
    %131 = vector.load %arg17[%c0_48, %c0_49] : memref<1x32xf32, #tpu.memory_space<vmem>>, vector<1x32xf32>
    %132 = vector.broadcast %131 : vector<1x32xf32> to vector<4x32xf32>
    %133 = arith.addf %130, %132 : vector<4x32xf32>
    %c0_50 = arith.constant 0 : index
    %c0_51 = arith.constant 0 : index
    %134 = vector.load %arg18[%c0_50, %c0_51] : memref<32x16xf32, #tpu.memory_space<vmem>>, vector<32x16xf32>
    %cst_52 = arith.constant dense<0.000000e+00> : vector<4x16xf32>
    %135 = tpu.matmul %133, %134, %cst_52 {dimension_numbers = #tpu.dot_dimension_numbers<[1], [0], [0], [1], [0, 0, 1, 1], [], []>} : vector<4x32xf32>, vector<32x16xf32>, vector<4x16xf32> -> vector<4x16xf32>
    %c0_53 = arith.constant 0 : index
    %c0_54 = arith.constant 0 : index
    %136 = vector.load %arg19[%c0_53, %c0_54] : memref<1x16xf32, #tpu.memory_space<vmem>>, vector<1x16xf32>
    %137 = vector.broadcast %136 : vector<1x16xf32> to vector<4x16xf32>
    %138 = arith.addf %135, %137 : vector<4x16xf32>
    %139 = vector.extract_strided_slice %138 {offsets = [0, 0], sizes = [4, 8], strides = [1, 1]} : vector<4x16xf32> to vector<4x8xf32>
    %140 = vector.extract_strided_slice %138 {offsets = [0, 8], sizes = [4, 8], strides = [1, 1]} : vector<4x16xf32> to vector<4x8xf32>
    %c0_55 = arith.constant 0 : index
    %c0_56 = arith.constant 0 : index
    %c0_57 = arith.constant 0 : index
    %141 = vector.load %arg3[%c0_55, %c0_56, %c0_57] : memref<1x4x8xf32, #tpu.memory_space<vmem>>, vector<1x4x8xf32>
    %142 = vector.shape_cast %141 : vector<1x4x8xf32> to vector<4x8xf32>
    %cst_58 = arith.constant 5.000000e-01 : f32
    %143 = vector.broadcast %cst_58 : f32 to vector<4x8xf32>
    %144 = arith.mulf %143, %140 : vector<4x8xf32>
    %145 = math.exp %144 : vector<4x8xf32>
    %146 = arith.mulf %142, %145 : vector<4x8xf32>
    %147 = arith.addf %139, %146 : vector<4x8xf32>
    %c0_59 = arith.constant 0 : index
    %c0_60 = arith.constant 0 : index
    %148 = vector.load %arg20[%c0_59, %c0_60] : memref<8x32xf32, #tpu.memory_space<vmem>>, vector<8x32xf32>
    %cst_61 = arith.constant dense<0.000000e+00> : vector<4x32xf32>
    %149 = tpu.matmul %147, %148, %cst_61 {dimension_numbers = #tpu.dot_dimension_numbers<[1], [0], [0], [1], [0, 0, 1, 1], [], []>} : vector<4x8xf32>, vector<8x32xf32>, vector<4x32xf32> -> vector<4x32xf32>
    %c0_62 = arith.constant 0 : index
    %c0_63 = arith.constant 0 : index
    %150 = vector.load %arg21[%c0_62, %c0_63] : memref<1x32xf32, #tpu.memory_space<vmem>>, vector<1x32xf32>
    %151 = vector.broadcast %150 : vector<1x32xf32> to vector<4x32xf32>
    %152 = arith.addf %149, %151 : vector<4x32xf32>
    %cst_64 = arith.constant 0.000000e+00 : f32
    %153 = vector.broadcast %cst_64 : f32 to vector<4x32xf32>
    %154 = arith.maximumf %152, %153 : vector<4x32xf32>
    %155 = vector.shape_cast %154 : vector<4x32xf32> to vector<1x4x32xf32>
    %156 = vector.shape_cast %155 : vector<1x4x32xf32> to vector<1x4x32xf32>
    %157 = vector.broadcast %156 : vector<1x4x32xf32> to vector<8x4x32xf32>
    %c0_65 = arith.constant 0 : index
    %c0_66 = arith.constant 0 : index
    %c0_67 = arith.constant 0 : index
    %158 = vector.load %arg22[%c0_65, %c0_66, %c0_67] : memref<8x32x64xf32, #tpu.memory_space<vmem>>, vector<8x32x64xf32>
    %cst_68 = arith.constant dense<0.000000e+00> : vector<8x4x64xf32>
    %159 = tpu.matmul %157, %158, %cst_68 {dimension_numbers = #tpu.dot_dimension_numbers<[2], [1], [1], [2], [0, 0, 0, 1, 1, 2], [0], [0]>} : vector<8x4x32xf32>, vector<8x32x64xf32>, vector<8x4x64xf32> -> vector<8x4x64xf32>
    %c0_69 = arith.constant 0 : index
    %c0_70 = arith.constant 0 : index
    %c0_71 = arith.constant 0 : index
    %160 = vector.load %arg23[%c0_69, %c0_70, %c0_71] : memref<8x1x64xf32, #tpu.memory_space<vmem>>, vector<8x1x64xf32>
    %161 = vector.broadcast %160 : vector<8x1x64xf32> to vector<8x4x64xf32>
    %162 = arith.addf %159, %161 : vector<8x4x64xf32>
    %cst_72 = arith.constant 0.000000e+00 : f32
    %163 = vector.broadcast %cst_72 : f32 to vector<8x4x64xf32>
    %164 = arith.maximumf %162, %163 : vector<8x4x64xf32>
    %165 = vector.shape_cast %164 : vector<8x4x64xf32> to vector<8x256xf32>
    %c0_73 = arith.constant 0 : index
    %c0_74 = arith.constant 0 : index
    %166 = vector.load %arg24[%c0_73, %c0_74] : memref<8x72xf32, #tpu.memory_space<vmem>>, vector<8x72xf32>
    %c0_75 = arith.constant 0 : index
    %c0_76 = arith.constant 0 : index
    %167 = vector.load %arg25[%c0_75, %c0_76] : memref<8x1xf32, #tpu.memory_space<vmem>>, vector<8x1xf32>
    %c9_i32_77 = arith.constant 9 : i32
    %168 = tpu.dynamic_rotate %165 by %c9_i32_77 dim 1 : vector<8x256xf32>, i32 -> vector<8x256xf32>
    %169 = vector.extract_strided_slice %1 {offsets = [0, 0], sizes = [1, 256], strides = [1, 1]} : vector<9x256xf32> to vector<1x256xf32>
    %170 = vector.broadcast %169 : vector<1x256xf32> to vector<8x256xf32>
    %171 = arith.mulf %168, %170 : vector<8x256xf32>
    %c8_i32_78 = arith.constant 8 : i32
    %172 = tpu.dynamic_rotate %165 by %c8_i32_78 dim 1 : vector<8x256xf32>, i32 -> vector<8x256xf32>
    %173 = vector.extract_strided_slice %1 {offsets = [1, 0], sizes = [1, 256], strides = [1, 1]} : vector<9x256xf32> to vector<1x256xf32>
    %174 = vector.broadcast %173 : vector<1x256xf32> to vector<8x256xf32>
    %175 = arith.mulf %172, %174 : vector<8x256xf32>
    %c7_i32_79 = arith.constant 7 : i32
    %176 = tpu.dynamic_rotate %165 by %c7_i32_79 dim 1 : vector<8x256xf32>, i32 -> vector<8x256xf32>
    %177 = vector.extract_strided_slice %1 {offsets = [2, 0], sizes = [1, 256], strides = [1, 1]} : vector<9x256xf32> to vector<1x256xf32>
    %178 = vector.broadcast %177 : vector<1x256xf32> to vector<8x256xf32>
    %179 = arith.mulf %176, %178 : vector<8x256xf32>
    %c1_i32_80 = arith.constant 1 : i32
    %180 = tpu.dynamic_rotate %165 by %c1_i32_80 dim 1 : vector<8x256xf32>, i32 -> vector<8x256xf32>
    %181 = vector.extract_strided_slice %1 {offsets = [3, 0], sizes = [1, 256], strides = [1, 1]} : vector<9x256xf32> to vector<1x256xf32>
    %182 = vector.broadcast %181 : vector<1x256xf32> to vector<8x256xf32>
    %183 = arith.mulf %180, %182 : vector<8x256xf32>
    %184 = vector.extract_strided_slice %1 {offsets = [4, 0], sizes = [1, 256], strides = [1, 1]} : vector<9x256xf32> to vector<1x256xf32>
    %185 = vector.broadcast %184 : vector<1x256xf32> to vector<8x256xf32>
    %186 = arith.mulf %165, %185 : vector<8x256xf32>
    %c255_i32_81 = arith.constant 255 : i32
    %187 = tpu.dynamic_rotate %165 by %c255_i32_81 dim 1 : vector<8x256xf32>, i32 -> vector<8x256xf32>
    %188 = vector.extract_strided_slice %1 {offsets = [5, 0], sizes = [1, 256], strides = [1, 1]} : vector<9x256xf32> to vector<1x256xf32>
    %189 = vector.broadcast %188 : vector<1x256xf32> to vector<8x256xf32>
    %190 = arith.mulf %187, %189 : vector<8x256xf32>
    %c249_i32_82 = arith.constant 249 : i32
    %191 = tpu.dynamic_rotate %165 by %c249_i32_82 dim 1 : vector<8x256xf32>, i32 -> vector<8x256xf32>
    %192 = vector.extract_strided_slice %1 {offsets = [6, 0], sizes = [1, 256], strides = [1, 1]} : vector<9x256xf32> to vector<1x256xf32>
    %193 = vector.broadcast %192 : vector<1x256xf32> to vector<8x256xf32>
    %194 = arith.mulf %191, %193 : vector<8x256xf32>
    %c248_i32_83 = arith.constant 248 : i32
    %195 = tpu.dynamic_rotate %165 by %c248_i32_83 dim 1 : vector<8x256xf32>, i32 -> vector<8x256xf32>
    %196 = vector.extract_strided_slice %1 {offsets = [7, 0], sizes = [1, 256], strides = [1, 1]} : vector<9x256xf32> to vector<1x256xf32>
    %197 = vector.broadcast %196 : vector<1x256xf32> to vector<8x256xf32>
    %198 = arith.mulf %195, %197 : vector<8x256xf32>
    %c247_i32_84 = arith.constant 247 : i32
    %199 = tpu.dynamic_rotate %165 by %c247_i32_84 dim 1 : vector<8x256xf32>, i32 -> vector<8x256xf32>
    %200 = vector.extract_strided_slice %1 {offsets = [8, 0], sizes = [1, 256], strides = [1, 1]} : vector<9x256xf32> to vector<1x256xf32>
    %201 = vector.broadcast %200 : vector<1x256xf32> to vector<8x256xf32>
    %202 = arith.mulf %199, %201 : vector<8x256xf32>
    %203 = tpu.concatenate %171, %175, %179, %183, %186, %190, %194, %198, %202 in 0 : vector<8x256xf32>, vector<8x256xf32>, vector<8x256xf32>, vector<8x256xf32>, vector<8x256xf32>, vector<8x256xf32>, vector<8x256xf32>, vector<8x256xf32>, vector<8x256xf32> -> vector<72x256xf32>
    %cst_85 = arith.constant dense<0.000000e+00> : vector<8x256xf32>
    %204 = tpu.matmul %166, %203, %cst_85 {dimension_numbers = #tpu.dot_dimension_numbers<[1], [0], [0], [1], [0, 0, 1, 1], [], []>} : vector<8x72xf32>, vector<72x256xf32>, vector<8x256xf32> -> vector<8x256xf32>
    %205 = vector.broadcast %167 : vector<8x1xf32> to vector<8x256xf32>
    %206 = arith.addf %204, %205 : vector<8x256xf32>
    %cst_86 = arith.constant 0.000000e+00 : f32
    %207 = vector.broadcast %cst_86 : f32 to vector<8x256xf32>
    %208 = arith.maximumf %206, %207 : vector<8x256xf32>
    %c0_87 = arith.constant 0 : index
    %c0_88 = arith.constant 0 : index
    %209 = vector.load %arg26[%c0_87, %c0_88] : memref<8x72xf32, #tpu.memory_space<vmem>>, vector<8x72xf32>
    %c0_89 = arith.constant 0 : index
    %c0_90 = arith.constant 0 : index
    %210 = vector.load %arg27[%c0_89, %c0_90] : memref<8x1xf32, #tpu.memory_space<vmem>>, vector<8x1xf32>
    %c9_i32_91 = arith.constant 9 : i32
    %211 = tpu.dynamic_rotate %208 by %c9_i32_91 dim 1 : vector<8x256xf32>, i32 -> vector<8x256xf32>
    %212 = vector.extract_strided_slice %1 {offsets = [0, 0], sizes = [1, 256], strides = [1, 1]} : vector<9x256xf32> to vector<1x256xf32>
    %213 = vector.broadcast %212 : vector<1x256xf32> to vector<8x256xf32>
    %214 = arith.mulf %211, %213 : vector<8x256xf32>
    %c8_i32_92 = arith.constant 8 : i32
    %215 = tpu.dynamic_rotate %208 by %c8_i32_92 dim 1 : vector<8x256xf32>, i32 -> vector<8x256xf32>
    %216 = vector.extract_strided_slice %1 {offsets = [1, 0], sizes = [1, 256], strides = [1, 1]} : vector<9x256xf32> to vector<1x256xf32>
    %217 = vector.broadcast %216 : vector<1x256xf32> to vector<8x256xf32>
    %218 = arith.mulf %215, %217 : vector<8x256xf32>
    %c7_i32_93 = arith.constant 7 : i32
    %219 = tpu.dynamic_rotate %208 by %c7_i32_93 dim 1 : vector<8x256xf32>, i32 -> vector<8x256xf32>
    %220 = vector.extract_strided_slice %1 {offsets = [2, 0], sizes = [1, 256], strides = [1, 1]} : vector<9x256xf32> to vector<1x256xf32>
    %221 = vector.broadcast %220 : vector<1x256xf32> to vector<8x256xf32>
    %222 = arith.mulf %219, %221 : vector<8x256xf32>
    %c1_i32_94 = arith.constant 1 : i32
    %223 = tpu.dynamic_rotate %208 by %c1_i32_94 dim 1 : vector<8x256xf32>, i32 -> vector<8x256xf32>
    %224 = vector.extract_strided_slice %1 {offsets = [3, 0], sizes = [1, 256], strides = [1, 1]} : vector<9x256xf32> to vector<1x256xf32>
    %225 = vector.broadcast %224 : vector<1x256xf32> to vector<8x256xf32>
    %226 = arith.mulf %223, %225 : vector<8x256xf32>
    %227 = vector.extract_strided_slice %1 {offsets = [4, 0], sizes = [1, 256], strides = [1, 1]} : vector<9x256xf32> to vector<1x256xf32>
    %228 = vector.broadcast %227 : vector<1x256xf32> to vector<8x256xf32>
    %229 = arith.mulf %208, %228 : vector<8x256xf32>
    %c255_i32_95 = arith.constant 255 : i32
    %230 = tpu.dynamic_rotate %208 by %c255_i32_95 dim 1 : vector<8x256xf32>, i32 -> vector<8x256xf32>
    %231 = vector.extract_strided_slice %1 {offsets = [5, 0], sizes = [1, 256], strides = [1, 1]} : vector<9x256xf32> to vector<1x256xf32>
    %232 = vector.broadcast %231 : vector<1x256xf32> to vector<8x256xf32>
    %233 = arith.mulf %230, %232 : vector<8x256xf32>
    %c249_i32_96 = arith.constant 249 : i32
    %234 = tpu.dynamic_rotate %208 by %c249_i32_96 dim 1 : vector<8x256xf32>, i32 -> vector<8x256xf32>
    %235 = vector.extract_strided_slice %1 {offsets = [6, 0], sizes = [1, 256], strides = [1, 1]} : vector<9x256xf32> to vector<1x256xf32>
    %236 = vector.broadcast %235 : vector<1x256xf32> to vector<8x256xf32>
    %237 = arith.mulf %234, %236 : vector<8x256xf32>
    %c248_i32_97 = arith.constant 248 : i32
    %238 = tpu.dynamic_rotate %208 by %c248_i32_97 dim 1 : vector<8x256xf32>, i32 -> vector<8x256xf32>
    %239 = vector.extract_strided_slice %1 {offsets = [7, 0], sizes = [1, 256], strides = [1, 1]} : vector<9x256xf32> to vector<1x256xf32>
    %240 = vector.broadcast %239 : vector<1x256xf32> to vector<8x256xf32>
    %241 = arith.mulf %238, %240 : vector<8x256xf32>
    %c247_i32_98 = arith.constant 247 : i32
    %242 = tpu.dynamic_rotate %208 by %c247_i32_98 dim 1 : vector<8x256xf32>, i32 -> vector<8x256xf32>
    %243 = vector.extract_strided_slice %1 {offsets = [8, 0], sizes = [1, 256], strides = [1, 1]} : vector<9x256xf32> to vector<1x256xf32>
    %244 = vector.broadcast %243 : vector<1x256xf32> to vector<8x256xf32>
    %245 = arith.mulf %242, %244 : vector<8x256xf32>
    %246 = tpu.concatenate %214, %218, %222, %226, %229, %233, %237, %241, %245 in 0 : vector<8x256xf32>, vector<8x256xf32>, vector<8x256xf32>, vector<8x256xf32>, vector<8x256xf32>, vector<8x256xf32>, vector<8x256xf32>, vector<8x256xf32>, vector<8x256xf32> -> vector<72x256xf32>
    %cst_99 = arith.constant dense<0.000000e+00> : vector<8x256xf32>
    %247 = tpu.matmul %209, %246, %cst_99 {dimension_numbers = #tpu.dot_dimension_numbers<[1], [0], [0], [1], [0, 0, 1, 1], [], []>} : vector<8x72xf32>, vector<72x256xf32>, vector<8x256xf32> -> vector<8x256xf32>
    %248 = vector.broadcast %210 : vector<8x1xf32> to vector<8x256xf32>
    %249 = arith.addf %247, %248 : vector<8x256xf32>
    %cst_100 = arith.constant 0.000000e+00 : f32
    %250 = vector.broadcast %cst_100 : f32 to vector<8x256xf32>
    %251 = arith.maximumf %249, %250 : vector<8x256xf32>
    %252 = arith.truncf %251 : vector<8x256xf32> to vector<8x256xbf16>
    %c0_101 = arith.constant 0 : index
    %c0_102 = arith.constant 0 : index
    %253 = vector.load %arg28[%c0_101, %c0_102] : memref<256x1536xbf16, #tpu.memory_space<vmem>>, vector<256x1536xbf16>
    %cst_103 = arith.constant dense<0.000000e+00> : vector<8x1536xf32>
    %254 = tpu.matmul %252, %253, %cst_103 {dimension_numbers = #tpu.dot_dimension_numbers<[1], [0], [0], [1], [0, 0, 1, 1], [], []>} : vector<8x256xbf16>, vector<256x1536xbf16>, vector<8x1536xf32> -> vector<8x1536xf32>
    %c0_104 = arith.constant 0 : index
    %c0_105 = arith.constant 0 : index
    %255 = vector.load %arg29[%c0_104, %c0_105] : memref<8x72xf32, #tpu.memory_space<vmem>>, vector<8x72xf32>
    %c0_106 = arith.constant 0 : index
    %c0_107 = arith.constant 0 : index
    %256 = vector.load %arg30[%c0_106, %c0_107] : memref<8x1xf32, #tpu.memory_space<vmem>>, vector<8x1xf32>
    %c1535_i32 = arith.constant 1535 : i32
    %257 = tpu.dynamic_rotate %254 by %c1535_i32 dim 1 : vector<8x1536xf32>, i32 -> vector<8x1536xf32>
    %c1534_i32 = arith.constant 1534 : i32
    %258 = tpu.dynamic_rotate %254 by %c1534_i32 dim 1 : vector<8x1536xf32>, i32 -> vector<8x1536xf32>
    %c1517_i32 = arith.constant 1517 : i32
    %259 = tpu.dynamic_rotate %254 by %c1517_i32 dim 1 : vector<8x1536xf32>, i32 -> vector<8x1536xf32>
    %c1516_i32 = arith.constant 1516 : i32
    %260 = tpu.dynamic_rotate %254 by %c1516_i32 dim 1 : vector<8x1536xf32>, i32 -> vector<8x1536xf32>
    %c1515_i32 = arith.constant 1515 : i32
    %261 = tpu.dynamic_rotate %254 by %c1515_i32 dim 1 : vector<8x1536xf32>, i32 -> vector<8x1536xf32>
    %c1498_i32 = arith.constant 1498 : i32
    %262 = tpu.dynamic_rotate %254 by %c1498_i32 dim 1 : vector<8x1536xf32>, i32 -> vector<8x1536xf32>
    %c1497_i32 = arith.constant 1497 : i32
    %263 = tpu.dynamic_rotate %254 by %c1497_i32 dim 1 : vector<8x1536xf32>, i32 -> vector<8x1536xf32>
    %c1496_i32 = arith.constant 1496 : i32
    %264 = tpu.dynamic_rotate %254 by %c1496_i32 dim 1 : vector<8x1536xf32>, i32 -> vector<8x1536xf32>
    %265 = tpu.concatenate %254, %257, %258, %259, %260, %261, %262, %263, %264 in 0 : vector<8x1536xf32>, vector<8x1536xf32>, vector<8x1536xf32>, vector<8x1536xf32>, vector<8x1536xf32>, vector<8x1536xf32>, vector<8x1536xf32>, vector<8x1536xf32>, vector<8x1536xf32> -> vector<72x1536xf32>
    %cst_108 = arith.constant dense<0.000000e+00> : vector<8x1536xf32>
    %266 = tpu.matmul %255, %265, %cst_108 {dimension_numbers = #tpu.dot_dimension_numbers<[1], [0], [0], [1], [0, 0, 1, 1], [], []>} : vector<8x72xf32>, vector<72x1536xf32>, vector<8x1536xf32> -> vector<8x1536xf32>
    %267 = vector.broadcast %256 : vector<8x1xf32> to vector<8x1536xf32>
    %268 = arith.addf %266, %267 : vector<8x1536xf32>
    %cst_109 = arith.constant 0.000000e+00 : f32
    %269 = vector.broadcast %cst_109 : f32 to vector<8x1536xf32>
    %270 = arith.maximumf %268, %269 : vector<8x1536xf32>
    %c0_110 = arith.constant 0 : index
    %c0_111 = arith.constant 0 : index
    %271 = vector.load %arg31[%c0_110, %c0_111] : memref<4x32xf32, #tpu.memory_space<vmem>>, vector<4x32xf32>
    %c0_112 = arith.constant 0 : index
    %c0_113 = arith.constant 0 : index
    %272 = vector.load %arg32[%c0_112, %c0_113] : memref<4x1xf32, #tpu.memory_space<vmem>>, vector<4x1xf32>
    %c1535_i32_114 = arith.constant 1535 : i32
    %273 = tpu.dynamic_rotate %270 by %c1535_i32_114 dim 1 : vector<8x1536xf32>, i32 -> vector<8x1536xf32>
    %c1517_i32_115 = arith.constant 1517 : i32
    %274 = tpu.dynamic_rotate %270 by %c1517_i32_115 dim 1 : vector<8x1536xf32>, i32 -> vector<8x1536xf32>
    %c1516_i32_116 = arith.constant 1516 : i32
    %275 = tpu.dynamic_rotate %270 by %c1516_i32_116 dim 1 : vector<8x1536xf32>, i32 -> vector<8x1536xf32>
    %276 = tpu.concatenate %270, %273, %274, %275 in 0 : vector<8x1536xf32>, vector<8x1536xf32>, vector<8x1536xf32>, vector<8x1536xf32> -> vector<32x1536xf32>
    %cst_117 = arith.constant dense<0.000000e+00> : vector<4x1536xf32>
    %277 = tpu.matmul %271, %276, %cst_117 {dimension_numbers = #tpu.dot_dimension_numbers<[1], [0], [0], [1], [0, 0, 1, 1], [], []>} : vector<4x32xf32>, vector<32x1536xf32>, vector<4x1536xf32> -> vector<4x1536xf32>
    %278 = vector.broadcast %272 : vector<4x1xf32> to vector<4x1536xf32>
    %279 = arith.addf %277, %278 : vector<4x1536xf32>
    %cst_118 = arith.constant 0.000000e+00 : f32
    %280 = vector.broadcast %cst_118 : f32 to vector<4x1536xf32>
    %281 = arith.subf %280, %279 : vector<4x1536xf32>
    %282 = math.exp %281 : vector<4x1536xf32>
    %cst_119 = arith.constant 1.000000e+00 : f32
    %283 = vector.broadcast %cst_119 : f32 to vector<4x1536xf32>
    %284 = arith.addf %283, %282 : vector<4x1536xf32>
    %cst_120 = arith.constant 1.000000e+00 : f32
    %285 = vector.broadcast %cst_120 : f32 to vector<4x1536xf32>
    %286 = arith.divf %285, %284 : vector<4x1536xf32>
    %c0_121 = arith.constant 0 : index
    %c0_122 = arith.constant 0 : index
    %c0_123 = arith.constant 0 : index
    %287 = vector.load %arg33[%c0_121, %c0_122, %c0_123] : memref<1x4x1536xf32, #tpu.memory_space<vmem>>, vector<1x4x1536xf32>
    %288 = vector.shape_cast %287 : vector<1x4x1536xf32> to vector<4x1536xf32>
    %289 = vector.shape_cast %286 : vector<4x1536xf32> to vector<1x4x1536xf32>
    tpu.vector_store %arg33[%c0_121, %c0_122, %c0_123], %289 {strides = array<i32>} : memref<1x4x1536xf32, #tpu.memory_space<vmem>>, vector<1x4x1536xf32>,
    %c0_124 = arith.constant 0 : index
    %c0_125 = arith.constant 0 : index
    %c0_126 = arith.constant 0 : index
    %290 = vector.load %arg2[%c0_124, %c0_125, %c0_126] : memref<1x4x1536xf32, #tpu.memory_space<vmem>>, vector<1x4x1536xf32>
    %291 = vector.shape_cast %290 : vector<1x4x1536xf32> to vector<4x1536xf32>
    %c0_127 = arith.constant 0 : index
    %c0_128 = arith.constant 0 : index
    %292 = vector.load %arg6[%c0_127, %c0_128] : memref<1x1536xf32, #tpu.memory_space<vmem>>, vector<1x1536xf32>
    %293 = math.log %286 : vector<4x1536xf32>
    %cst_129 = arith.constant -1.000000e+02 : f32
    %294 = vector.broadcast %cst_129 : f32 to vector<4x1536xf32>
    %295 = arith.maximumf %293, %294 : vector<4x1536xf32>
    %cst_130 = arith.constant 1.000000e+00 : f32
    %296 = vector.broadcast %cst_130 : f32 to vector<4x1536xf32>
    %297 = arith.subf %296, %286 : vector<4x1536xf32>
    %298 = math.log %297 : vector<4x1536xf32>
    %cst_131 = arith.constant -1.000000e+02 : f32
    %299 = vector.broadcast %cst_131 : f32 to vector<4x1536xf32>
    %300 = arith.maximumf %298, %299 : vector<4x1536xf32>
    %301 = arith.mulf %291, %295 : vector<4x1536xf32>
    %cst_132 = arith.constant 1.000000e+00 : f32
    %302 = vector.broadcast %cst_132 : f32 to vector<4x1536xf32>
    %303 = arith.subf %302, %291 : vector<4x1536xf32>
    %304 = arith.mulf %303, %300 : vector<4x1536xf32>
    %305 = arith.addf %301, %304 : vector<4x1536xf32>
    %306 = vector.broadcast %292 : vector<1x1536xf32> to vector<4x1536xf32>
    %307 = arith.mulf %306, %305 : vector<4x1536xf32>
    %308 = vector.shape_cast %307 : vector<4x1536xf32> to vector<1x4x1536xf32>
    %cst_133 = arith.constant dense<0.000000e+00> : vector<1xf32>
    %309 = vector.multi_reduction <add>, %308, %cst_133 [1, 2] : vector<1x4x1536xf32> to vector<1xf32>
    %310 = vector.shape_cast %309 : vector<1xf32> to vector<1x1x1xf32>
    %311 = vector.extract %310[0, 0, 0] : f32 from vector<1x1x1xf32>
    %312 = vector.broadcast %311 : f32 to vector<1x1xf32>
    %cst_134 = arith.constant 0.000000e+00 : f32
    %313 = vector.broadcast %cst_134 : f32 to vector<1x1xf32>
    %314 = arith.subf %313, %312 : vector<1x1xf32>
    %cst_135 = arith.constant 1.000000e+00 : f32
    %315 = vector.broadcast %cst_135 : f32 to vector<4x8xf32>
    %316 = arith.addf %315, %140 : vector<4x8xf32>
    %317 = arith.mulf %139, %139 : vector<4x8xf32>
    %318 = arith.subf %316, %317 : vector<4x8xf32>
    %319 = math.exp %140 : vector<4x8xf32>
    %320 = arith.subf %318, %319 : vector<4x8xf32>
    %321 = vector.shape_cast %320 : vector<4x8xf32> to vector<1x4x8xf32>
    %cst_136 = arith.constant dense<0.000000e+00> : vector<1xf32>
    %322 = vector.multi_reduction <add>, %321, %cst_136 [1, 2] : vector<1x4x8xf32> to vector<1xf32>
    %323 = vector.shape_cast %322 : vector<1xf32> to vector<1x1x1xf32>
    %324 = vector.extract %323[0, 0, 0] : f32 from vector<1x1x1xf32>
    %325 = vector.broadcast %324 : f32 to vector<1x1xf32>
    %cst_137 = arith.constant -5.000000e-01 : f32
    %326 = vector.broadcast %cst_137 : f32 to vector<1x1xf32>
    %327 = arith.mulf %326, %325 : vector<1x1xf32>
    %328 = arith.addf %314, %327 : vector<1x1xf32>
    %c0_138 = arith.constant 0 : index
    %c0_139 = arith.constant 0 : index
    %c0_140 = arith.constant 0 : index
    %329 = vector.load %arg34[%c0_138, %c0_139, %c0_140] : memref<1x1x1xf32, #tpu.memory_space<vmem>>, vector<1x1x1xf32>
    %330 = vector.shape_cast %329 : vector<1x1x1xf32> to vector<1x1xf32>
    %331 = vector.shape_cast %328 : vector<1x1xf32> to vector<1x1x1xf32>
    tpu.vector_store %arg34[%c0_138, %c0_139, %c0_140], %331 {strides = array<i32>} : memref<1x1x1xf32, #tpu.memory_space<vmem>>, vector<1x1x1xf32>,
    return
  }
  func.func @transform_0(%arg0: i32) -> (i32, i32, i32) {
    %c0_i32 = arith.constant 0 : i32
    %c0_i32_0 = arith.constant 0 : i32
    %c0_i32_1 = arith.constant 0 : i32
    return %arg0, %c0_i32, %c0_i32_0 : i32, i32, i32
  }
  func.func @transform_1(%arg0: i32) -> (i32, i32, i32) {
    %c0_i32 = arith.constant 0 : i32
    %c0_i32_0 = arith.constant 0 : i32
    %c0_i32_1 = arith.constant 0 : i32
    return %arg0, %c0_i32, %c0_i32_0 : i32, i32, i32
  }
  func.func @transform_2(%arg0: i32) -> (i32, i32, i32) {
    %c0_i32 = arith.constant 0 : i32
    %c0_i32_0 = arith.constant 0 : i32
    %c0_i32_1 = arith.constant 0 : i32
    return %arg0, %c0_i32, %c0_i32_0 : i32, i32, i32
  }
  func.func @transform_3(%arg0: i32) -> (i32, i32) {
    %c0_i32 = arith.constant 0 : i32
    %c0_i32_0 = arith.constant 0 : i32
    %c0_i32_1 = arith.constant 0 : i32
    return %c0_i32, %c0_i32_0 : i32, i32
  }
  func.func @transform_4(%arg0: i32) -> (i32, i32) {
    %c0_i32 = arith.constant 0 : i32
    %c0_i32_0 = arith.constant 0 : i32
    %c0_i32_1 = arith.constant 0 : i32
    return %c0_i32, %c0_i32_0 : i32, i32
  }
  func.func @transform_5(%arg0: i32) -> (i32, i32) {
    %c0_i32 = arith.constant 0 : i32
    %c0_i32_0 = arith.constant 0 : i32
    %c0_i32_1 = arith.constant 0 : i32
    return %c0_i32, %c0_i32_0 : i32, i32
  }
  func.func @transform_6(%arg0: i32) -> (i32, i32) {
    %c0_i32 = arith.constant 0 : i32
    %c0_i32_0 = arith.constant 0 : i32
    %c0_i32_1 = arith.constant 0 : i32
    return %c0_i32, %c0_i32_0 : i32, i32
  }
  func.func @transform_7(%arg0: i32) -> (i32, i32) {
    %c0_i32 = arith.constant 0 : i32
    %c0_i32_0 = arith.constant 0 : i32
    %c0_i32_1 = arith.constant 0 : i32
    return %c0_i32, %c0_i32_0 : i32, i32
  }
  func.func @transform_8(%arg0: i32) -> (i32, i32) {
    %c0_i32 = arith.constant 0 : i32
    %c0_i32_0 = arith.constant 0 : i32
    %c0_i32_1 = arith.constant 0 : i32
    return %c0_i32, %c0_i32_0 : i32, i32
  }
  func.func @transform_9(%arg0: i32) -> (i32, i32) {
    %c0_i32 = arith.constant 0 : i32
    %c0_i32_0 = arith.constant 0 : i32
    %c0_i32_1 = arith.constant 0 : i32
    return %c0_i32, %c0_i32_0 : i32, i32
  }
  func.func @transform_10(%arg0: i32) -> (i32, i32) {
    %c0_i32 = arith.constant 0 : i32
    %c0_i32_0 = arith.constant 0 : i32
    %c0_i32_1 = arith.constant 0 : i32
    return %c0_i32, %c0_i32_0 : i32, i32
  }
  func.func @transform_11(%arg0: i32) -> (i32, i32) {
    %c0_i32 = arith.constant 0 : i32
    %c0_i32_0 = arith.constant 0 : i32
    %c0_i32_1 = arith.constant 0 : i32
    return %c0_i32, %c0_i32_0 : i32, i32
  }
  func.func @transform_12(%arg0: i32) -> (i32, i32) {
    %c0_i32 = arith.constant 0 : i32
    %c0_i32_0 = arith.constant 0 : i32
    %c0_i32_1 = arith.constant 0 : i32
    return %c0_i32, %c0_i32_0 : i32, i32
  }
  func.func @transform_13(%arg0: i32) -> (i32, i32) {
    %c0_i32 = arith.constant 0 : i32
    %c0_i32_0 = arith.constant 0 : i32
    %c0_i32_1 = arith.constant 0 : i32
    return %c0_i32, %c0_i32_0 : i32, i32
  }
  func.func @transform_14(%arg0: i32) -> (i32, i32) {
    %c0_i32 = arith.constant 0 : i32
    %c0_i32_0 = arith.constant 0 : i32
    %c0_i32_1 = arith.constant 0 : i32
    return %c0_i32, %c0_i32_0 : i32, i32
  }
  func.func @transform_15(%arg0: i32) -> (i32, i32, i32) {
    %c0_i32 = arith.constant 0 : i32
    %c0_i32_0 = arith.constant 0 : i32
    %c0_i32_1 = arith.constant 0 : i32
    %c0_i32_2 = arith.constant 0 : i32
    return %c0_i32, %c0_i32_0, %c0_i32_1 : i32, i32, i32
  }
  func.func @transform_16(%arg0: i32) -> (i32, i32) {
    %c0_i32 = arith.constant 0 : i32
    %c0_i32_0 = arith.constant 0 : i32
    %c0_i32_1 = arith.constant 0 : i32
    return %c0_i32, %c0_i32_0 : i32, i32
  }
  func.func @transform_17(%arg0: i32) -> (i32, i32) {
    %c0_i32 = arith.constant 0 : i32
    %c0_i32_0 = arith.constant 0 : i32
    %c0_i32_1 = arith.constant 0 : i32
    return %c0_i32, %c0_i32_0 : i32, i32
  }
  func.func @transform_18(%arg0: i32) -> (i32, i32) {
    %c0_i32 = arith.constant 0 : i32
    %c0_i32_0 = arith.constant 0 : i32
    %c0_i32_1 = arith.constant 0 : i32
    return %c0_i32, %c0_i32_0 : i32, i32
  }
  func.func @transform_19(%arg0: i32) -> (i32, i32) {
    %c0_i32 = arith.constant 0 : i32
    %c0_i32_0 = arith.constant 0 : i32
    %c0_i32_1 = arith.constant 0 : i32
    return %c0_i32, %c0_i32_0 : i32, i32
  }
  func.func @transform_20(%arg0: i32) -> (i32, i32) {
    %c0_i32 = arith.constant 0 : i32
    %c0_i32_0 = arith.constant 0 : i32
    %c0_i32_1 = arith.constant 0 : i32
    return %c0_i32, %c0_i32_0 : i32, i32
  }
  func.func @transform_21(%arg0: i32) -> (i32, i32, i32) {
    %c0_i32 = arith.constant 0 : i32
    %c0_i32_0 = arith.constant 0 : i32
    %c0_i32_1 = arith.constant 0 : i32
    %c0_i32_2 = arith.constant 0 : i32
    return %c0_i32, %c0_i32_0, %c0_i32_1 : i32, i32, i32
  }
  func.func @transform_22(%arg0: i32) -> (i32, i32, i32) {
    %c0_i32 = arith.constant 0 : i32
    %c0_i32_0 = arith.constant 0 : i32
    %c0_i32_1 = arith.constant 0 : i32
    %c0_i32_2 = arith.constant 0 : i32
    return %c0_i32, %c0_i32_0, %c0_i32_1 : i32, i32, i32
  }
  func.func @transform_23(%arg0: i32) -> (i32, i32) {
    %c0_i32 = arith.constant 0 : i32
    %c0_i32_0 = arith.constant 0 : i32
    %c0_i32_1 = arith.constant 0 : i32
    return %c0_i32, %c0_i32_0 : i32, i32
  }
  func.func @transform_24(%arg0: i32) -> (i32, i32) {
    %c0_i32 = arith.constant 0 : i32
    %c0_i32_0 = arith.constant 0 : i32
    %c0_i32_1 = arith.constant 0 : i32
    return %c0_i32, %c0_i32_0 : i32, i32
  }
  func.func @transform_25(%arg0: i32) -> (i32, i32) {
    %c0_i32 = arith.constant 0 : i32
    %c0_i32_0 = arith.constant 0 : i32
    %c0_i32_1 = arith.constant 0 : i32
    return %c0_i32, %c0_i32_0 : i32, i32
  }
  func.func @transform_26(%arg0: i32) -> (i32, i32) {
    %c0_i32 = arith.constant 0 : i32
    %c0_i32_0 = arith.constant 0 : i32
    %c0_i32_1 = arith.constant 0 : i32
    return %c0_i32, %c0_i32_0 : i32, i32
  }
  func.func @transform_27(%arg0: i32) -> (i32, i32) {
    %c0_i32 = arith.constant 0 : i32
    %c0_i32_0 = arith.constant 0 : i32
    %c0_i32_1 = arith.constant 0 : i32
    return %c0_i32, %c0_i32_0 : i32, i32
  }
  func.func @transform_28(%arg0: i32) -> (i32, i32) {
    %c0_i32 = arith.constant 0 : i32
    %c0_i32_0 = arith.constant 0 : i32
    %c0_i32_1 = arith.constant 0 : i32
    return %c0_i32, %c0_i32_0 : i32, i32
  }
  func.func @transform_29(%arg0: i32) -> (i32, i32) {
    %c0_i32 = arith.constant 0 : i32
    %c0_i32_0 = arith.constant 0 : i32
    %c0_i32_1 = arith.constant 0 : i32
    return %c0_i32, %c0_i32_0 : i32, i32
  }
  func.func @transform_30(%arg0: i32) -> (i32, i32) {
    %c0_i32 = arith.constant 0 : i32
    %c0_i32_0 = arith.constant 0 : i32
    %c0_i32_1 = arith.constant 0 : i32
    return %c0_i32, %c0_i32_0 : i32, i32
  }
  func.func @transform_31(%arg0: i32) -> (i32, i32) {
    %c0_i32 = arith.constant 0 : i32
    %c0_i32_0 = arith.constant 0 : i32
    %c0_i32_1 = arith.constant 0 : i32
    return %c0_i32, %c0_i32_0 : i32, i32
  }
  func.func @transform_32(%arg0: i32) -> (i32, i32, i32) {
    %c0_i32 = arith.constant 0 : i32
    %c0_i32_0 = arith.constant 0 : i32
    %c0_i32_1 = arith.constant 0 : i32
    return %arg0, %c0_i32, %c0_i32_0 : i32, i32, i32
  }
  func.func @transform_33(%arg0: i32) -> (i32, i32, i32) {
    %c0_i32 = arith.constant 0 : i32
    %c0_i32_0 = arith.constant 0 : i32
    %c0_i32_1 = arith.constant 0 : i32
    return %arg0, %c0_i32, %c0_i32_0 : i32, i32, i32
  }
}

</mosaic_0001>

<bundles_post_ra>
// kernel: cvae_forward.1
= control target key start
LH: loop header
LB: loop body
LE: loop exit
PB: predicated region body
PF: predicated region fallthrough
CT: control target
= control target key end

     0   :  { %s9403_s6 = smov 1   ;;  %s9404_s10 = smov 2   ;;  %s12490_s0 = inlined_call_operand.smem [shape: u32[34], index: -1, kind: input, shape index: {}] }
   0x1   :  { %s9465_s5 = sld [smem:[%s12490_s0]]   ;;  %s9405_s14 = smov 3  }
   0x2   :  { %s9470_s9 = sld [smem:[%s12490_s0 + %s9403_s6]]   ;;  %s9406_s18 = smov 4  }
   0x3   :  { %s9475_s13 = sld [smem:[%s12490_s0 + %s9404_s10]]   ;;  %s9407_s22 = smov 5  }
   0x4   :  { %s9480_s17 = sld [smem:[%s12490_s0 + %s9405_s14]]   ;;  %s9408_s26 = smov 6  }
   0x5   :  { %s9485_s21 = sld [smem:[%s12490_s0 + %s9406_s18]]   ;;  %s9409_s30 = smov 7  }
   0x6   :  { %s9490_s25 = sld [smem:[%s12490_s0 + %s9407_s22]]   ;;  %s9410_s4 = smov 8  }
   0x7   :  { %s9495_s29 = sld [smem:[%s12490_s0 + %s9408_s26]]   ;;  %s9411_s10 = smov 9  }
   0x8   :  { %12513 = sst [smem:[#allocation2_spill]] %s9470_s9  ;;  %s9412_s15 = smov 10  }
   0x9   :  { %12514 = sst [smem:[#allocation3_spill]] %s9475_s13  ;;  %s9413_s20 = smov 11  }
   0xa   :  { %s9500_s3 = sld [smem:[%s12490_s0 + %s9409_s30]]   ;;  %s9414_s26 = smov 12  }
   0xb   :  { %s9505_s8 = sld [smem:[%s12490_s0 + %s9410_s4]]   ;;  %s9415_s1 = smov 13  }
   0xc   :  { %12515 = sst [smem:[#allocation4_spill]] %s9490_s25  ;;  %s9416_s7 = smov 14  }
   0xd   :  { %s9510_s14 = sld [smem:[%s12490_s0 + %s9411_s10]]   ;;  %s9418_s22 = smov 16  }
   0xe   :  { %s9515_s19 = sld [smem:[%s12490_s0 + %s9412_s15]]   ;;  %s9417_s15 = smov 15  }
   0xf   :  { %s9520_s24 = sld [smem:[%s12490_s0 + %s9413_s20]]   ;;  %s9419_s28 = smov 17  }
  0x10   :  { %s9525_s30 = sld [smem:[%s12490_s0 + %s9414_s26]]  }
  0x11   :  { %s9530_s6 = sld [smem:[%s12490_s0 + %s9415_s1]]  }
  0x12   :  { %s9535_s12 = sld [smem:[%s12490_s0 + %s9416_s7]]   ;;  %s9420_s7 = smov 18  }
  0x13   :  { %s9540_s20 = sld [smem:[%s12490_s0 + %s9417_s15]]   ;;  %s9421_s15 = smov 19  }
  0x14   :  { %s9545_s27 = sld [smem:[%s12490_s0 + %s9418_s22]]   ;;  %s9422_s22 = smov 20  }
  0x15   :  { %s9550_s4 = sld [smem:[%s12490_s0 + %s9419_s28]]   ;;  %s9423_s28 = smov 21  }
  0x16   :  { %s9555_s25 = sld [smem:[%s12490_s0 + %s9420_s7]]   ;;  %s9424_s7 = smov 22  }
  0x17   :  { %s9560_s9 = sld [smem:[%s12490_s0 + %s9421_s15]]   ;;  %s9425_s15 = smov 23  }
  0x18   :  { %s9565_s13 = sld [smem:[%s12490_s0 + %s9422_s22]]   ;;  %s9426_s22 = smov 24  }
  0x1a   :  { %12516 = sst [smem:[#allocation5_spill]] %s9545_s27 }
  0x1b   :  { %s9570_s27 = sld [smem:[%s12490_s0 + %s9423_s28]]   ;;  %s9427_s28 = smov 25  }
  0x1c   :  { %12517 = sst [smem:[#allocation6_spill]] %s9555_s25 }
  0x1d   :  { %12518 = sst [smem:[#allocation7_spill]] %s9560_s9 }
  0x1e   :  { %12519 = sst [smem:[#allocation8_spill]] %s9565_s13 }
  0x1f   :  { %s9575_s25 = sld [smem:[%s12490_s0 + %s9424_s7]]   ;;  %s9428_s7 = smov 26  }
  0x20   :  { %s9580_s9 = sld [smem:[%s12490_s0 + %s9425_s15]]   ;;  %s9429_s15 = smov 27  }
  0x21   :  { %12520 = sst [smem:[#allocation9_spill]] %s9570_s27 }
  0x22   :  { %s9585_s13 = sld [smem:[%s12490_s0 + %s9426_s22]]   ;;  %s9430_s22 = smov 28  }
  0x23   :  { %s9590_s27 = sld [smem:[%s12490_s0 + %s9427_s28]]   ;;  %s9431_s28 = smov 29  }
  0x25   :  { %12521 = sst [smem:[#allocation10_spill]] %s9575_s25 }
  0x26   :  { %12522 = sst [smem:[#allocation11_spill]] %s9580_s9 }
  0x27   :  { %s9595_s25 = sld [smem:[%s12490_s0 + %s9428_s7]]   ;;  %s9432_s7 = smov 30  }
  0x28   :  { %12523 = sst [smem:[#allocation12_spill]] %s9585_s13 }
  0x29   :  { %12524 = sst [smem:[#allocation13_spill]] %s9590_s27 }
  0x2a   :  { %s9600_s9 = sld [smem:[%s12490_s0 + %s9429_s15]]   ;;  %s9433_s15 = smov 31  }
  0x2b   :  { %s9605_s13 = sld [smem:[%s12490_s0 + %s9430_s22]]   ;;  %s9434_s22 = smov 32  }
  0x2c   :  { %s9610_s27 = sld [smem:[%s12490_s0 + %s9431_s28]]   ;;  %s9435_s28 = smov 33  }
  0x2d   :  { %12525 = sst [smem:[#allocation14_spill]] %s9595_s25 }
  0x2e   :  { %s9615_s25 = sld [smem:[%s12490_s0 + %s9432_s7]]   ;;  %s9632_s7 = smov 0  }
  0x30   :  { %12526 = sst [smem:[#allocation15_spill]] %s9600_s9 }
  0x31   :  { %12527 = sst [smem:[#allocation16_spill]] %s9605_s13 }
  0x32   :  { %12528 = sst [smem:[#allocation17_spill]] %s9610_s27 }
  0x33   :  { %s9620_s9 = sld [smem:[%s12490_s0 + %s9433_s15]]  }
  0x34   :  { %s9625_s13 = sld [smem:[%s12490_s0 + %s9434_s22]]  }
  0x35   :  { %s9630_s27 = sld [smem:[%s12490_s0 + %s9435_s28]]  }
  0x36 LB: > { %s7181_s10 = sadd.s32 4294967295, %s9401_s7   ;;  %p7185_p0 = scmp.ge.s32.totalorder %s9401_s7, 1  ;;  %s9401_s7 = sphi %s9632_s7, %s78_s7  }
  0x37   : > { %p943_p1 = scmp.lt.s32.totalorder %s9401_s7, 3 }
  0x39   : > { %p944_p2 = pnand %p7185_p0, %p943_p1 }
  0x3a   : > { %p1039_p3 = scmp.lt.s32.totalorder (!%p944_p2), %s7181_s10, 1  ;;  %s12504_s15 = smov (!%p944_p2), 127  }
  0x3b   : > { %947 = sbr.rel (%p944_p2) target bundleno = 4022 (0xfb6), region = 148  ;;  %s9437_s16 = smov (!%p944_p2), 112  }
  0x3c   : > { %s9438_s18 = smov (!%p944_p2), 111   ;;  %s9440_s22 = smov (!%p944_p2), 121  }
  0x3d   : > { %s12503_s23 = smov (!%p944_p2), 120   ;;  %s9442_s26 = smov (!%p944_p2), 119  }
  0x3e   : > { %s12501_s28 = smov (!%p944_p2), 7   ;;  %s12499_s1 = smov (!%p944_p2), 1  }
  0x3f   : > { %s12497_s2 = smov (!%p944_p2), 8  }
  0x40   : > { %s12569_s10 = smov (!%p1039_p3, %s7181_s10), 1  ;;  %v9654_v3 = vld [vmem:[%s9480_s17 + $0x10] sm:$0xff]  ;;  %v9657_v4 = vld [vmem:[%s9480_s17 + $0x8] sm:$0xff]  ;;  %v9665_v8 = vld [vmem:[%s9480_s17] sm:$0xff]  ;;  %vm1115_vm0 = vcmask 1043456   ;;  %vm1470_vm4 = vcmask 130048  }
  0x41   : > { %s8539_s0 = sshll.u32 %s12569_s10, 5  ;;  %v1084_v6 = vperm.slane %v9654_v3, 4  ;;  %v1082_v7 = vperm.slane %v9657_v4, 4  ;;  %v1083_v13 = vperm.slane %v9654_v3, 0  ;;  %v1081_v17 = vperm.slane %v9657_v4, 0  ;;  %v9692_v37 = vld [vmem:[%s9480_s17 + $0x18] sm:$0xff] }
  0x42   : > { %s1043_s11 = scalar_lea.vmem %s9465_s5, %s8539_s0  ;;  %v1080_v19 = vperm.slane %v9665_v8, 4  ;;  %v1079_v26 = vperm.slane %v9665_v8, 0  ;;  %v1085_v40 = vperm.slane %v9692_v37, 0  ;;  %v1086_v41 = vperm.slane %v9692_v37, 4  ;;  %s12495_s0 = smov 9  }
  0x43   : > { %v9644_v0 = vld [vmem:[%s1043_s11 + $0x8] sm:$0xff]  ;;  %v9646_v1 = vld [vmem:[%s1043_s11] sm:$0xff]  ;;  %v9648_v2 = vld [vmem:[%s1043_s11 + $0x10] sm:$0xff]  ;;  %v1100_v15 = vperm.slane %v1084_v6, 0  ;;  %v1098_v18 = vperm.slane %v1082_v7, 0  ;;  %v1099_v22 = vperm.slane %v1083_v13, 0  ;;  %v1171_v6 = vlaneseq }
  0x44   : > { %1134 = vst [vmem:[#allocation1 + $0x10] ss:$2 sm:$0xff] %v9644_v0  ;;  %v9659_v5 = vld [vmem:[%s1043_s11 + $0x18] sm:$0xff]  ;;  %v1097_v24 = vperm.slane %v1081_v17, 0  ;;  %v1096_v27 = vperm.slane %v1080_v19, 0  ;;  %v1095_v34 = vperm.slane %v1079_v26, 0 }
  0x45   : > { %1132 = vst [vmem:[#allocation1] ss:$2 sm:$0xff] %v9646_v1  ;;  %v1113_v23 = vrot.slane %v1100_v15, 4  ;;  %v1112_v25 = vrot.slane %v1098_v18, 4  ;;  %v1102_v45 = vperm.slane %v1086_v41, 0  ;;  %v1101_v47 = vperm.slane %v1085_v40, 0 }
  0x46   : > { %1136 = vst [vmem:[#allocation1 + $0x20] ss:$2 sm:$0xff] %v9648_v2  ;;  %v1111_v35 = vrot.slane %v1096_v27, 4  ;;  %v9735_v7 = vand.u32 127, %v1171_v6  ;;  %v1184_v13 = vperm.slane %v9657_v4, 1  ;;  %v1185_v15 = vperm.slane %v9657_v4, 5 }
  0x47   : > { %1138 = vst [vmem:[#allocation1 + $0x30] ss:$2 sm:$0xff] %v9659_v5  ;;  %v1117_v36 = vsel %vm1115_vm0, %v1097_v24, %v1112_v25  ;;  %v1118_v39 = vsel %vm1115_vm0, %v1099_v22, %v1113_v23  ;;  %v1114_v54 = vrot.slane %v1102_v45, 4  ;;  %v1344_v18 = vperm.slane %v9657_v4, 3  ;;  %s9447_s11 = smov 64  }
  0x48   : > { %v1116_v43 = vsel %vm1115_vm0, %v1095_v34, %v1111_v35  ;;  %v1125_v44 = vmul.f32 %v1117_v36, %v9644_v0  ;;  %v1126_v46 = vmul.f32 %v1118_v39, %v9648_v2  ;;  %vm1173_vm1 = vcmp.lt.s32.totalorder %v9735_v7, 127  ;;  %v1074_v39 = vld [vmem:[%s9500_s3] sm:$0xff] }
  0x49   : > { %v1124_v49 = vmul.f32 %v1116_v43, %v9646_v1  ;;  %v1119_v56 = vsel %vm1115_vm0, %v1101_v47, %v1114_v54  ;;  %v1262_v19 = vperm.slane %v9665_v8, 2  ;;  %v1343_v22 = vperm.slane %v9665_v8, 7 }
  0x4a   : > { %v1127_v57 = vmul.f32 %v1119_v56, %v9659_v5  ;;  %v1200_v23 = vperm.slane %v1184_v13, 1  ;;  %v1201_v25 = vperm.slane %v1185_v15, 1  ;;  %vm1253_vm2 = vcmp.lt.s32.totalorder %v9735_v7, 112 }
  0x4b   : > { %v1141_v9 = vld.sshfl [vmem:[#allocation1 + $0x10] sm:$0xff pattern:$0x75316420]  ;;  %v1142_v10 = vld.sshfl [vmem:[#allocation1 + $0x18] sm:$0xff pattern:$0x75316420] }
  0x4c   : > { %1159 = vrot.lane.b32.xlu1 %v1141_v9, %s12504_s15  ;;  %v1140_v11 = vld.sshfl [vmem:[#allocation1 + $0x8] sm:$0xff pattern:$0x75316420]  ;;  %v1139_v12 = vld.sshfl [vmem:[#allocation1] sm:$0xff pattern:$0x75316420] }
  0x4d   : > { %1157 = vrot.lane.b32.xlu0 %v1140_v11, %s12504_s15  ;;  %1155 = vrot.lane.b32.xlu2 %v1139_v12, %s12504_s15  ;;  %1214 = vst [vmem:[#allocation1] ss:$2 sm:$0xff] %v9646_v1  ;;  %v1143_v14 = vld.sshfl [vmem:[#allocation1 + $0x20] sm:$0xff pattern:$0x75316420]  ;;  %v1182_v9 = vperm.slane %v9665_v8, 1 }
  0x4e   : > { %v9672_v16 = vld.sshfl [vmem:[#allocation1 + $0x28] sm:$0xff pattern:$0x75316420]  ;;  %1216 = vst [vmem:[#allocation1 + $0x10] ss:$2 sm:$0xff] %v9644_v0  ;;  %vm1333_vm3 = vcmp.lt.s32.totalorder %v9735_v7, 111 }
  0x4f   : > { %1218 = vst [vmem:[#allocation1 + $0x20] ss:$2 sm:$0xff] %v9648_v2  ;;  %v9678_v20 = vld.sshfl [vmem:[#allocation1 + $0x30] sm:$0xff pattern:$0x75316420]  ;;  %v1198_v17 = vperm.slane %v1182_v9, 1 }
  0x50   : > { %v9680_v21 = vld.sshfl [vmem:[#allocation1 + $0x38] sm:$0xff pattern:$0x75316420]  ;;  %v1359_v35 = vperm.slane %v1343_v22, 3  ;;  %v1264_v47 = vperm.slane %v9657_v4, 2  ;;  %v1186_v13 = vperm.slane %v9654_v3, 1 }
  0x51   : > { %1220 = vst [vmem:[#allocation1 + $0x30] ss:$2 sm:$0xff] %v9659_v5  ;;  %v9796_v22 = vld [vmem:[%s9495_s29] sm:$0xff]  ;;  %vm1721_vm5 = vcmask 261120   ;;  %vm2963_vm6 = vcmp.lt.s32.totalorder %v9735_v7, 119  ;;  %vm2952_vm7 = vcmp.lt.s32.totalorder %v9735_v7, 120 }
  0x52   : > { %vm2941_vm8 = vcmp.lt.s32.totalorder %v9735_v7, 121  ;;  %vm2916_vm9 = vcmp.lt.s32.totalorder %v9735_v7, 1  ;;  %vm2905_vm10 = vcmp.lt.s32.totalorder %v9735_v7, 7  ;;  %vm2894_vm11 = vcmp.lt.s32.totalorder %v9735_v7, 8 }
  0x53   : > { %vm2883_vm12 = vcmp.lt.s32.totalorder %v9735_v7, 9  ;;  %vm2975_vm13 = vcmask 588800   ;;  %vm3148_vm14 = vcmask 1047556   ;;  %vm3268_vm15 = vcmask 523264  }
  0x54   : > { %v1221_v28 = vld.sshfl [vmem:[#allocation1] sm:$0xff pattern:$0x75316420]  ;;  %v1222_v29 = vld.sshfl [vmem:[#allocation1 + $0x8] sm:$0xff pattern:$0x75316420] }
  0x55   : > { %1163 = vrot.lane.b32.xlu0 %v1143_v14, %s12504_s15  ;;  %v1223_v30 = vld.sshfl [vmem:[#allocation1 + $0x10] sm:$0xff pattern:$0x75316420]  ;;  %v1224_v31 = vld.sshfl [vmem:[#allocation1 + $0x18] sm:$0xff pattern:$0x75316420]  ;;  %1161 = vrot.lane.b32.xlu2 %v1142_v10, %s12504_s15 }
  0x56   : > { %v1225_v32 = vld.sshfl [vmem:[#allocation1 + $0x20] sm:$0xff pattern:$0x75316420]  ;;  %v1226_v33 = vld.sshfl [vmem:[#allocation1 + $0x28] sm:$0xff pattern:$0x75316420]  ;;  %1237 = vrot.lane.b32.xlu1 %v1221_v28, %s9437_s16 }
  0x57   : > { %1298 = vst [vmem:[#allocation1 + $0x20] ss:$2 sm:$0xff] %v9648_v2  ;;  %v1183_v14 = vperm.slane %v9665_v8, 5 }
  0x58   : > { %1296 = vst [vmem:[#allocation1 + $0x10] ss:$2 sm:$0xff] %v9644_v0  ;;  %v1227_v38 = vld.sshfl [vmem:[#allocation1 + $0x30] sm:$0xff pattern:$0x75316420] }
  0x59   : > { %1294 = vst [vmem:[#allocation1] ss:$2 sm:$0xff] %v9646_v1  ;;  %v1228_v42 = vld.sshfl [vmem:[#allocation1 + $0x38] sm:$0xff pattern:$0x75316420]  ;;  %v1199_v24 = vperm.slane %v1183_v14, 1 }
  0x5a   : > { %1300 = vst [vmem:[#allocation1 + $0x30] ss:$2 sm:$0xff] %v9659_v5 }
  0x5d   : > { %1239 = vrot.lane.b32.xlu2 %v1222_v29, %s9437_s16  ;;  %v1360_v29 = vperm.slane %v1344_v18, 3 }
  0x5e   : > { %v1305_v48 = vld.sshfl [vmem:[#allocation1 + $0x20] sm:$0xff pattern:$0x75316420]  ;;  %v1306_v50 = vld.sshfl [vmem:[#allocation1 + $0x28] sm:$0xff pattern:$0x75316420] }
  0x5f   : > { %v1303_v51 = vld.sshfl [vmem:[#allocation1 + $0x10] sm:$0xff pattern:$0x75316420]  ;;  %v1304_v52 = vld.sshfl [vmem:[#allocation1 + $0x18] sm:$0xff pattern:$0x75316420] }
  0x60   : > { %1321 = vrot.lane.b32.xlu1 %v1303_v51, %s9438_s18  ;;  %v1301_v53 = vld.sshfl [vmem:[#allocation1] sm:$0xff pattern:$0x75316420]  ;;  %1380 = vst [vmem:[#allocation1 + $0x10] ss:$2 sm:$0xff] %v1125_v44  ;;  %v1265_v44 = vperm.slane %v9657_v4, 6 }
  0x61   : > { %1317 = vrot.lane.b32.xlu0 %v1301_v53, %s9438_s18  ;;  %v1302_v55 = vld.sshfl [vmem:[#allocation1 + $0x8] sm:$0xff pattern:$0x75316420]  ;;  %1382 = vst [vmem:[#allocation1 + $0x20] ss:$2 sm:$0xff] %v1126_v46 }
  0x62   : > { %1378 = vst [vmem:[#allocation1] ss:$2 sm:$0xff] %v1124_v49  ;;  %v1308_v58 = vld.sshfl [vmem:[#allocation1 + $0x38] sm:$0xff pattern:$0x75316420] }
  0x63   : > { %v1307_v59 = vld.sshfl [vmem:[#allocation1 + $0x30] sm:$0xff pattern:$0x75316420] }
  0x64   : > { %1384 = vst [vmem:[#allocation1 + $0x30] ss:$2 sm:$0xff] %v1127_v57 }
  0x65   : > { %1325 = vrot.lane.b32.xlu2 %v1305_v48, %s9438_s18 }
  0x68   : > { %1323 = vrot.lane.b32.xlu1 %v1304_v52, %s9438_s18 }
  0x69   : > { %1319 = vrot.lane.b32.xlu0 %v1302_v55, %s9438_s18  ;;  %v1385_v55 = vld.sshfl [vmem:[#allocation1] sm:$0xff pattern:$0x75316420] }
  0x6d   : > { %1245 = vrot.lane.b32.xlu2 %v1225_v32, %s9437_s16  ;;  %v9439_v32 = vmov 0  }
  0x6e   : > { %8927 = vset.pattern.permute.xlu0 %v9439_v32  ;;  %8973 = vset.pattern.permute.xlu2 %v9439_v32 }
  0x6f   : > { %8974 = vset.pattern.permute.xlu1 %v9439_v32 }
  0x70   : > { %1243 = vrot.lane.b32.xlu1 %v1224_v31, %s9437_s16  ;;  %v1278_v31 = vperm.slane %v1262_v19, 2 }
  0x71   : > { %1241 = vrot.lane.b32.xlu0 %v1223_v30, %s9437_s16 }
  0x75   : > { %1247 = vrot.lane.b32.xlu2 %v1226_v33, %s9437_s16 }
  0x78   : > { %1165 = vrot.lane.b32.xlu1 %v9672_v16, %s12504_s15  ;;  %v1342_v16 = vperm.slane %v9665_v8, 3 }
  0x79   : > { %1327 = vrot.lane.b32.xlu0 %v1306_v50, %s9438_s18 }
  0x7a   : > { %v1358_v26 = vperm.slane %v1342_v16, 3 }
  0x7d   : > { %1167 = vrot.lane.b32.xlu2 %v9678_v20, %s12504_s15 }
  0x80   : > { %1331 = vrot.lane.b32.xlu1 %v1308_v58, %s9438_s18  ;;  %v1281_v58 = vperm.slane %v1265_v44, 2 }
  0x81   : > { %1329 = vrot.lane.b32.xlu0 %v1307_v59, %s9438_s18 }
  0x85   : > { %1251 = vrot.lane.b32.xlu2 %v1228_v42, %s9437_s16 }
  0x88   : > { %1249 = vrot.lane.b32.xlu1 %v1227_v38, %s9437_s16  ;;  %v1263_v38 = vperm.slane %v9665_v8, 6 }
  0x89   : > { %1169 = vrot.lane.b32.xlu0 %v9680_v21, %s12504_s15  ;;  %v1345_v21 = vperm.slane %v9657_v4, 7  ;;  %v1280_v4 = vperm.slane %v1264_v47, 2  ;;  %v1349_v47 = vperm.slane %v9692_v37, 7 }
  0x8a   : > { %v1279_v57 = vperm.slane %v1263_v38, 2 }
  0x8b   : > { %v1361_v34 = vperm.slane %v1345_v21, 3 }
  0x91   : > { %1467 = vperm.xlu0 %8927, %v1074_v39  }
  0xa7   : > { %v9725_v60 = vpop.permute.xlu2 %1155 }
  0xaf   : > { %v1162_v61 = vpop.permute.xlu2 %1161 }
  0xb7   : > { %v9727_v62 = vpop.permute.xlu2 %1239 }
  0xbe   : > { %v1160_v63 = vpop.permute.xlu1 %1159 }
  0xbf   : > { %v1158_v0 = vpop.permute.xlu0 %1157  ;;  %v9729_v1 = vpop.permute.xlu2 %1325  ;;  %v1178_v27 = vsel %vm1173_vm1, %v1160_v63, %v1162_v61 }
  0xc0   : > { %v1180_v20 = vsel %vm1173_vm1, %v9725_v60, %v1158_v0  ;;  %v1179_v33 = vsel %vm1173_vm1, %v1158_v0, %v1160_v63  ;;  %v1208_v8 = vmul.f32 %v1200_v23, %v1178_v27  ;;  %v1388_v27 = vld.sshfl [vmem:[#allocation1 + $0x18] sm:$0xff pattern:$0x75316420] }
  0xc1   : > { %v1206_v28 = vmul.f32 %v1198_v17, %v1180_v20  ;;  %v1207_v48 = vmul.f32 %v1199_v24, %v1179_v33  ;;  %v1346_v17 = vperm.slane %v9654_v3, 3 }
  0xc3   : > { %v1409_v51 = vrot.slane %v1206_v28, 4  ;;  %v1410_v9 = vrot.slane %v1207_v48, 4  ;;  %v1362_v39 = vperm.slane %v1346_v17, 3 }
  0xc5   : > { %v1449_v6 = vsel %vm1115_vm0, %v1385_v55, %v1409_v51  ;;  %v1348_v51 = vperm.slane %v9692_v37, 3  ;;  %v1365_v55 = vperm.slane %v1349_v47, 3 }
  0xc7   : > { %v9733_v5 = vpop.permute.xlu0 %1163  ;;  %v9738_v10 = vpop.permute.xlu2 %1245 }
  0xc8   : > { %v9731_v2 = vpop.permute.xlu1 %1237  ;;  %v1177_v40 = vsel %vm1173_vm1, %v1162_v61, %v9733_v5 }
  0xc9   : > { %v1260_v41 = vsel %vm1253_vm2, %v9731_v2, %v9727_v62  ;;  %v1209_v52 = vmul.f32 %v1201_v25, %v1177_v40 }
  0xca   : > { %v1286_v53 = vmul.f32 %v1278_v31, %v1260_v41  ;;  %v1387_v31 = vld.sshfl [vmem:[#allocation1 + $0x10] sm:$0xff pattern:$0x75316420] }
  0xcb   : > { %v1412_v16 = vrot.slane %v1209_v52, 4 }
  0xcf   : > { %v9769_v42 = vpop.permute.xlu2 %1247 }
  0xd2   : > { %v1322_v11 = vpop.permute.xlu1 %1321 }
  0xd3   : > { %v9740_v12 = vpop.permute.xlu0 %1317 }
  0xd7   : > { %v9800_v28 = vpop.permute.xlu2 %1167 }
  0xda   : > { %v1324_v30 = vpop.permute.xlu1 %1323 }
  0xdb   : > { %v1320_v36 = vpop.permute.xlu0 %1319  ;;  %v1337_v45 = vsel %vm1333_vm3, %v1324_v30, %v9729_v1  ;;  %v1338_v49 = vsel %vm1333_vm3, %v1322_v11, %v1324_v30  ;;  %v1386_v30 = vld.sshfl [vmem:[#allocation1 + $0x8] sm:$0xff pattern:$0x75316420] }
  0xdc   : > { %v1340_v43 = vsel %vm1333_vm3, %v9740_v12, %v1320_v36  ;;  %v1339_v50 = vsel %vm1333_vm3, %v1320_v36, %v1322_v11  ;;  %v1369_v56 = vmul.f32 %v1361_v34, %v1337_v45  ;;  %v1368_v59 = vmul.f32 %v1360_v29, %v1338_v49 }
  0xdd   : > { %v1366_v46 = vmul.f32 %v1358_v26, %v1340_v43  ;;  %v1367_v61 = vmul.f32 %v1359_v35, %v1339_v50  ;;  %v1411_v11 = vrot.slane %v1208_v8, 4  ;;  %v1452_v34 = vsel %vm1115_vm0, %v1388_v27, %v1412_v16 }
  0xde   : > { %v1436_v21 = vrot.slane %v1369_v56, 4  ;;  %v1435_v26 = vrot.slane %v1368_v59, 4  ;;  %v1202_v35 = vperm.slane %v1186_v13, 1  ;;  %v1450_v36 = vsel %vm1115_vm0, %v1386_v30, %v1410_v9 }
  0xdf   : > { %v1433_v54 = vrot.slane %v1366_v46, 4  ;;  %v1434_v24 = vrot.slane %v1367_v61, 4  ;;  %v1451_v38 = vsel %vm1115_vm0, %v1387_v31, %v1411_v11  ;;  %v1256_v8 = vsel %vm1253_vm2, %v9738_v10, %v9769_v42 }
  0xe0   : > { %v1187_v49 = vperm.slane %v9654_v3, 5  ;;  %v1347_v50 = vperm.slane %v9654_v3, 7  ;;  %v1188_v16 = vperm.slane %v9692_v37, 1 }
  0xe1   : > { %v1457_v63 = vsel %vm1115_vm0, %v1286_v53, %v1433_v54  ;;  %v1252_v54 = vpop.permute.xlu2 %1251 }
  0xe2   : > { %1488 = vmatpush.msra.mxu0 %v1457_v63  ;;  %v1244_v0 = vpop.permute.xlu1 %1243  ;;  %v1363_v61 = vperm.slane %v1347_v50, 3  ;;  %v1364_v63 = vperm.slane %v1348_v51, 3 }
  0xe3   : > { %v1257_v14 = vsel %vm1253_vm2, %v1244_v0, %v9738_v10  ;;  %v1242_v15 = vpop.permute.xlu0 %1241 }
  0xe4   : > { %v1258_v18 = vsel %vm1253_vm2, %v1242_v15, %v1244_v0  ;;  %v1259_v19 = vsel %vm1253_vm2, %v9727_v62, %v1242_v15  ;;  %1489 = vmatpush.msra.mxu0 %v1449_v6  ;;  %v1289_v20 = vmul.f32 %v1281_v58, %v1257_v14  ;;  %v1266_v62 = vperm.slane %v9654_v3, 2 }
  0xe5   : > { %v1287_v23 = vmul.f32 %v1279_v57, %v1259_v19  ;;  %v1288_v25 = vmul.f32 %v1280_v4, %v1258_v18  ;;  %7191 = vmatmul.msk.f32.vlgmr.msra.gmra.mxu0 %vm1470_vm4, %v9796_v22  ;;  %v1203_v58 = vperm.slane %v1187_v49, 1  ;;  %v1267_v4 = vperm.slane %v9654_v3, 6 }
  0xe6   : > { %v1460_v29 = vsel %vm1115_vm0, %v1289_v20, %v1436_v21  ;;  %v1282_v41 = vperm.slane %v1266_v62, 2  ;;  %v1261_v0 = vsel %vm1253_vm2, %v1252_v54, %v9731_v2  ;;  %v1268_v2 = vperm.slane %v9692_v37, 2 }
  0xe7   : > { %v1458_v32 = vsel %vm1115_vm0, %v1287_v23, %v1434_v24  ;;  %v1459_v33 = vsel %vm1115_vm0, %v1288_v25, %v1435_v26  ;;  %1548 = vmatpush.msra.mxu3 %v1460_v29  ;;  %v1283_v24 = vperm.slane %v1267_v4, 2  ;;  %v1204_v26 = vperm.slane %v1188_v16, 1 }
  0xe8   : > { %1508 = vmatpush.msra.mxu1 %v1458_v32  ;;  %1528 = vmatpush.msra.mxu2 %v1459_v33  ;;  %v1290_v10 = vmul.f32 %v1282_v41, %v1256_v8  ;;  %v1284_v25 = vperm.slane %v1268_v2, 2  ;;  %v1390_v41 = vld.sshfl [vmem:[#allocation1 + $0x28] sm:$0xff pattern:$0x75316420] }
  0xe9   : > { %1549 = vmatpush.msra.mxu3 %v1452_v34  ;;  %v1392_v8 = vld.sshfl [vmem:[#allocation1 + $0x38] sm:$0xff pattern:$0x75316420] }
  0xea   : > { %1509 = vmatpush.msra.mxu1 %v1450_v36  ;;  %1529 = vmatpush.msra.mxu2 %v1451_v38  ;;  %v1166_v40 = vpop.permute.xlu1 %1165 }
  0xeb   : > { %7194 = vmatmul.msk.f32.vlgmr.msra.gmra.mxu3 %vm1470_vm4, %v9796_v22  ;;  %v1176_v43 = vsel %vm1173_vm1, %v9733_v5, %v1166_v40  ;;  %7193 = vmatmul.msk.f32.vlgmr.msra.gmra.mxu2 %vm1470_vm4, %v9796_v22  ;;  %v1328_v44 = vpop.permute.xlu0 %1327  ;;  %v1269_v5 = vperm.slane %v9692_v37, 6  ;;  %v1175_v6 = vsel %vm1173_vm1, %v1166_v40, %v9800_v28 }
  0xec   : > { %v1210_v45 = vmul.f32 %v1202_v35, %v1176_v43  ;;  %v1336_v46 = vsel %vm1333_vm3, %v9729_v1, %v1328_v44  ;;  %7192 = vmatmul.msk.f32.vlgmr.msra.gmra.mxu1 %vm1470_vm4, %v9796_v22  ;;  %v1389_v1 = vld.sshfl [vmem:[#allocation1 + $0x20] sm:$0xff pattern:$0x75316420]  ;;  %v1211_v18 = vmul.f32 %v1203_v58, %v1175_v6 }
  0xed   : > { %v1370_v48 = vmul.f32 %v1362_v39, %v1336_v46  ;;  %v1285_v56 = vperm.slane %v1269_v5, 2 }
  0xee   : > { %v1413_v53 = vrot.slane %v1210_v45, 4  ;;  %v1414_v30 = vrot.slane %v1211_v18, 4 }
  0xef   : > { %v1437_v52 = vrot.slane %v1370_v48, 4  ;;  %v1293_v17 = vmul.f32 %v1285_v56, %v1261_v0 }
  0xf0   : > { %v1453_v13 = vsel %vm1115_vm0, %v1389_v1, %v1413_v53  ;;  %v1454_v47 = vsel %vm1115_vm0, %v1390_v41, %v1414_v30 }
  0xf1   : > { %v1461_v57 = vsel %vm1115_vm0, %v1290_v10, %v1437_v52 }
  0xf2   : > { %1568 = vmatpush.msrb.mxu0 %v1461_v57  ;;  %v1332_v59 = vpop.permute.xlu1 %1331 }
  0xf3   : > { %v1341_v9 = vsel %vm1333_vm3, %v1332_v59, %v9740_v12  ;;  %v1330_v11 = vpop.permute.xlu0 %1329  ;;  %v1189_v12 = vperm.slane %v9692_v37, 5 }
  0xf4   : > { %v1373_v14 = vmul.f32 %v1365_v55, %v1341_v9  ;;  %v1334_v15 = vsel %vm1333_vm3, %v1330_v11, %v1332_v59  ;;  %v1335_v3 = vsel %vm1333_vm3, %v1328_v44, %v1330_v11  ;;  %1569 = vmatpush.msrb.mxu0 %v1453_v13  ;;  %v1391_v44 = vld.sshfl [vmem:[#allocation1 + $0x30] sm:$0xff pattern:$0x75316420] }
  0xf5   : > { %7195 = vmatmul.msk.f32.vlgmr.msrb.gmra.mxu0 %vm1470_vm4, %v9796_v22  ;;  %v1371_v20 = vmul.f32 %v1363_v61, %v1335_v3  ;;  %v1372_v21 = vmul.f32 %v1364_v63, %v1334_v15  ;;  %v1205_v27 = vperm.slane %v1189_v12, 1 }
  0xf6   : > { %v1440_v19 = vrot.slane %v1373_v14, 4 }
  0xf7   : > { %v1438_v32 = vrot.slane %v1371_v20, 4  ;;  %v1439_v33 = vrot.slane %v1372_v21, 4 }
  0xf8   : > { %v1464_v23 = vsel %vm1115_vm0, %v1293_v17, %v1440_v19 }
  0xf9   : > { %1628 = vmatpush.msrb.mxu3 %v1464_v23 }
  0xfa   : > { %v1250_v29 = vpop.permute.xlu1 %1249 }
  0xfb   : > { %v1254_v31 = vsel %vm1253_vm2, %v1250_v29, %v1252_v54  ;;  %v1255_v37 = vsel %vm1253_vm2, %v9769_v42, %v1250_v29  ;;  %v1170_v62 = vpop.permute.xlu0 %1169 }
  0xfc   : > { %v1291_v34 = vmul.f32 %v1283_v24, %v1255_v37  ;;  %v1292_v35 = vmul.f32 %v1284_v25, %v1254_v31  ;;  %v1174_v36 = vsel %vm1173_vm1, %v9800_v28, %v1170_v62  ;;  %v1181_v38 = vsel %vm1173_vm1, %v1170_v62, %v9725_v60 }
  0xfd   : > { %v1212_v39 = vmul.f32 %v1204_v26, %v1174_v36  ;;  %v1213_v40 = vmul.f32 %v1205_v27, %v1181_v38 }
  0xfe   : > { %v1462_v43 = vsel %vm1115_vm0, %v1291_v34, %v1438_v32  ;;  %v1463_v42 = vsel %vm1115_vm0, %v1292_v35, %v1439_v33  ;;  %v9942_v35 = vld [vmem:[%s9505_s8] sm:$0xff] }
  0xff   : > { %1588 = vmatpush.msrb.mxu1 %v1462_v43  ;;  %1608 = vmatpush.msrb.mxu2 %v1463_v42  ;;  %v1415_v45 = vrot.slane %v1212_v39, 4  ;;  %v1416_v46 = vrot.slane %v1213_v40, 4 }
 0x101   : > { %1589 = vmatpush.msrb.mxu1 %v1454_v47  ;;  %v1455_v28 = vsel %vm1115_vm0, %v1391_v44, %v1415_v45  ;;  %v1456_v60 = vsel %vm1115_vm0, %v1392_v8, %v1416_v46  ;;  %v1643_v44 = vld [vmem:[%s9510_s14] sm:$0xff] }
 0x102   : > { %1609 = vmatpush.msrb.mxu2 %v1455_v28  ;;  %1629 = vmatpush.msrb.mxu3 %v1456_v60 }
 0x103   : > { %7196 = vmatmul.msk.f32.vlgmr.msrb.gmra.mxu1 %vm1470_vm4, %v9796_v22  ;;  %7197 = vmatmul.msk.f32.vlgmr.msrb.gmra.mxu2 %vm1470_vm4, %v9796_v22  ;;  %v1468_v48 = vpop.permute.xlu0 %1467 }
 0x104   : > { %7198 = vmatmul.msk.f32.vlgmr.msrb.gmra.mxu3 %vm1470_vm4, %v9796_v22  ;;  %vm5832_vm4 = vcmp.lt.s32.totalorder %v9735_v7, 88 }
 0x162   : > { %v1491_v5 = vpop.f32.mrf.mxu0 }
 0x163   : > { %v9878_v52 = vadd.f32 %v1491_v5, %v1468_v48 }
 0x165   : > { %v1634_v56 = vmax.f32 %v9878_v52, 0.0 }
 0x169   : > { %v1511_v59 = vpop.f32.mrf.mxu1 }
 0x16a   : > { %v1512_v61 = vadd.f32 %v1511_v59, %v1468_v48 }
 0x16c   : > { %v9900_v0 = vmax.f32 %v1512_v61, 0.0 }
 0x16e   : > { %v1531_v49 = vpop.f32.mrf.mxu2  ;;  %v1551_v50 = vpop.f32.mrf.mxu3 }
 0x16f   : > { %v9874_v51 = vadd.f32 %v1531_v49, %v1468_v48  ;;  %v9876_v10 = vadd.f32 %v1551_v50, %v1468_v48 }
 0x171   : > { %v1636_v53 = vmax.f32 %v9874_v51, 0.0  ;;  %v1637_v54 = vmax.f32 %v9876_v10, 0.0 }
 0x172   : > { %v1571_v55 = vpop.f32.mrf.mxu0 }
 0x173   : > { %v9882_v1 = vadd.f32 %v1571_v55, %v1468_v48  ;;  %v8933_v22 = vpack.i.bf16 %v1637_v54, %v1636_v53 }
 0x175   : > { %v1638_v57 = vmax.f32 %v9882_v1, 0.0  ;;  %8934 = vrot.lane.b32.xlu2 %v8933_v22, %s9437_s16  ;;  %8929 = vrot.lane.b32.xlu1 %v8933_v22, %s9438_s18  ;;  %v7361_v1 = vld [vmem:[%s9515_s19 + $0x130] sm:$0xf] }
 0x177   : > { %v8948_v58 = vpack.i.bf16 %v1634_v56, %v1638_v57 }
 0x179   : > { %8949 = vrot.lane.b32.xlu0 %v8948_v58, %s9437_s16 }
 0x17d   : > { %8939 = vrot.lane.b32.xlu2 %v8933_v22, %s12504_s15  ;;  %8944 = vrot.lane.b32.xlu1 %v8948_v58, %s9438_s18 }
 0x180   : > { %v1591_v15 = vpop.f32.mrf.mxu1 }
 0x181   : > { %v1592_v2 = vadd.f32 %v1591_v15, %v1468_v48 }
 0x183   : > { %v9919_v16 = vmax.f32 %v1592_v2, 0.0 }
 0x185   : > { %8954 = vrot.lane.b32.xlu1 %v8948_v58, %s12504_s15 }
 0x186   : > { %v1611_v63 = vpop.f32.mrf.mxu2 }
 0x187   : > { %v1612_v4 = vadd.f32 %v1611_v63, %v1468_v48  ;;  %v1631_v9 = vpop.f32.mrf.mxu3 }
 0x188   : > { %v1632_v13 = vadd.f32 %v1631_v9, %v1468_v48  ;;  %v8587_v9 = vld [vmem:[%s9515_s19 + $0x174] sm:$0xf0] }
 0x189   : > { %v9902_v6 = vmax.f32 %v1612_v4, 0.0 }
 0x18a   : > { %v9910_v14 = vmax.f32 %v1632_v13, 0.0  ;;  %v8603_v13 = vld [vmem:[%s9515_s19 + $0x1f4] sm:$0xf0] }
 0x18b   : > { %v8958_v11 = vpack.i.bf16 %v9902_v6, %v9900_v0 }
 0x18c   : > { %v8968_v3 = vpack.i.bf16 %v9910_v14, %v9902_v6 }
 0x18d   : > { %8959 = vrot.lane.b32.xlu2 %v8958_v11, %s9438_s18  ;;  %8964 = vrot.lane.b32.xlu0 %v8958_v11, %s9437_s16  ;;  %v7457_v11 = vld [vmem:[%s9515_s19 + $0x1f0] sm:$0xf] }
 0x18e   : > { %1646 = vrot.lane.b32.xlu1 %v9900_v0, %s12504_s15 }
 0x195   : > { %1706 = vrot.lane.b32.xlu2 %v9910_v14, %s9438_s18  ;;  %1682 = vrot.lane.b32.xlu0 %v9910_v14, %s9437_s16 }
 0x196   : > { %8969 = vrot.lane.b32.xlu1 %v8968_v3, %s12504_s15 }
 0x19d   : > { %1702 = vrot.lane.b32.xlu2 %v9919_v16, %s9438_s18  ;;  %1678 = vrot.lane.b32.xlu0 %v9919_v16, %s9437_s16  ;;  %s12529_s16 = sld [smem:[#allocation5_spill]] }
 0x19e   : > { %1654 = vrot.lane.b32.xlu1 %v9919_v16, %s12504_s15  ;;  %s12530_s18 = sld [smem:[#allocation6_spill]] }
 0x1a5   : > { %1718 = vperm.xlu2 %8973, %v1643_v44   ;;  %v8569_v44 = vld [vmem:[%s9515_s19 + $0xe4] sm:$0xf0] }
 0x1cf   : > { %v8935_v12 = vpop.permute.xlu2 %8934 }
 0x1d0   : > { %v8937_v18 = vunpack.i.h.bf16 %v8935_v12  ;;  %v8936_v21 = vunpack.i.l.bf16 %v8935_v12  ;;  %v7385_v12 = vld [vmem:[%s9515_s19 + $0x160] sm:$0xf] }
 0x1d2   : > { %v1688_v31 = vsel %vm1253_vm2, %v8936_v21, %v8937_v18 }
 0x1d7   : > { %v8940_v17 = vpop.permute.xlu2 %8939 }
 0x1d8   : > { %v8942_v26 = vunpack.i.h.bf16 %v8940_v17  ;;  %v8941_v27 = vunpack.i.l.bf16 %v8940_v17  ;;  %v8585_v17 = vld [vmem:[%s9515_s19 + $0x164] sm:$0xf0] }
 0x1da   : > { %v1664_v32 = vsel %vm1173_vm1, %v8941_v27, %v8942_v26 }
 0x1e7   : > { %v8930_v19 = vpop.permute.xlu1 %8929  ;;  %v9927_v20 = vpop.permute.xlu2 %8959 }
 0x1e8   : > { %v8932_v23 = vunpack.i.h.bf16 %v8930_v19  ;;  %v8931_v24 = vunpack.i.l.bf16 %v8930_v19  ;;  %v8961_v25 = vunpack.i.l.bf16 %v9927_v20  ;;  %v8962_v37 = vunpack.i.h.bf16 %v9927_v20  ;;  %v7449_v19 = vld [vmem:[%s9515_s19 + $0x1e0] sm:$0xf]  ;;  %v8601_v20 = vld [vmem:[%s9515_s19 + $0x1e4] sm:$0xf0] }
 0x1ea   : > { %v1713_v29 = vsel %vm1333_vm3, %v8961_v25, %v8931_v24  ;;  %v1712_v30 = vsel %vm1333_vm3, %v8931_v24, %v8932_v23  ;;  %v7377_v24 = vld [vmem:[%s9515_s19 + $0x150] sm:$0xf] }
 0x1eb   : > { %1757 = vmatpush.msra.mxu1 %v1713_v29  ;;  %1777 = vmatpush.msra.mxu2 %v1712_v30  ;;  %v9937_v62 = vpop.permute.xlu0 %8949  ;;  %v7329_v29 = vld [vmem:[%s9515_s19 + $0xf0] sm:$0xf]  ;;  %v8571_v30 = vld [vmem:[%s9515_s19 + $0xf4] sm:$0xf0] }
 0x1ec   : > { %v8951_v40 = vunpack.i.l.bf16 %v9937_v62  ;;  %v8952_v60 = vunpack.i.h.bf16 %v9937_v62  ;;  %v7441_v62 = vld [vmem:[%s9515_s19 + $0x1d0] sm:$0xf] }
 0x1ed   : > { %1778 = vmatpush.msra.mxu2 %v1688_v31  ;;  %v7450_v31 = vor.u32 %v8601_v20, %v7449_v19  ;;  %v8575_v19 = vld [vmem:[%s9515_s19 + $0x114] sm:$0xf0]  ;;  %v7409_v20 = vld [vmem:[%s9515_s19 + $0x190] sm:$0xf] }
 0x1ee   : > { %v1687_v42 = vsel %vm1253_vm2, %v8937_v18, %v8951_v40  ;;  %v7458_v18 = vor.u32 %v8603_v13, %v7457_v11 }
 0x1ef   : > { %1779 = vmatpush.msra.mxu2 %v1664_v32  ;;  %v1707_v33 = vpop.permute.xlu2 %1706  ;;  %v8945_v34 = vpop.permute.xlu1 %8944  ;;  %v8599_v32 = vld [vmem:[%s9515_s19 + $0x1d4] sm:$0xf0] }
 0x1f0   : > { %v8947_v36 = vunpack.i.h.bf16 %v8945_v34  ;;  %v8946_v38 = vunpack.i.l.bf16 %v8945_v34  ;;  %v1708_v39 = vsel %vm1333_vm3, %v8962_v37, %v1707_v33 }
 0x1f1   : > { %1780 = vmatpush.msra.mxu2 %v1636_v53 }
 0x1f2   : > { %7201 = vmatmul.msk.f32.vlgmr.msra.gmra.mxu2 %vm1721_vm5, %v9942_v35  ;;  %v1714_v41 = vsel %vm1333_vm3, %v8947_v36, %v8961_v25  ;;  %v1711_v43 = vsel %vm1333_vm3, %v8932_v23, %v8946_v38  ;;  %v1715_v47 = vsel %vm1333_vm3, %v1707_v33, %v8947_v36  ;;  %v7386_v23 = vor.u32 %v8585_v17, %v7385_v12  ;;  %v7265_v25 = vld [vmem:[%s9515_s19 + $0x70] sm:$0xf]  ;;  %v7369_v36 = vld [vmem:[%s9515_s19 + $0x140] sm:$0xf]  ;;  %v8563_v17 = vld [vmem:[%s9515_s19 + $0xb4] sm:$0xf0] }
 0x1f3   : > { %1857 = vmatpush.msrb.mxu2 %v1708_v39  ;;  %1737 = vmatpush.msra.mxu0 %v1714_v41  ;;  %v7330_v39 = vor.u32 %v8571_v30, %v7329_v29  ;;  %v7297_v12 = vld [vmem:[%s9515_s19 + $0xb0] sm:$0xf]  ;;  %v7289_v29 = vld [vmem:[%s9515_s19 + $0xa0] sm:$0xf]  ;;  %v8561_v30 = vld [vmem:[%s9515_s19 + $0xa4] sm:$0xf0] }
 0x1f4   : > { %1797 = vmatpush.msra.mxu3 %v1711_v43  ;;  %v8553_v43 = vld [vmem:[%s9515_s19 + $0x64] sm:$0xf0] }
 0x1f6   : > { %1798 = vmatpush.msra.mxu3 %v1687_v42  ;;  %v7321_v42 = vld [vmem:[%s9515_s19 + $0xe0] sm:$0xf] }
 0x1f7   : > { %v9960_v8 = vpop.permute.xlu1 %8954  ;;  %v1703_v10 = vpop.permute.xlu2 %1702 }
 0x1f8   : > { %v8956_v45 = vunpack.i.l.bf16 %v9960_v8  ;;  %v8957_v49 = vunpack.i.h.bf16 %v9960_v8  ;;  %v1710_v58 = vsel %vm1333_vm3, %v8946_v38, %v1703_v10  ;;  %v1709_v61 = vsel %vm1333_vm3, %v1703_v10, %v8962_v37  ;;  %v8583_v37 = vld [vmem:[%s9515_s19 + $0x154] sm:$0xf0] }
 0x1f9   : > { %v7378_v41 = vor.u32 %v8583_v37, %v7377_v24  ;;  %v7442_v8 = vor.u32 %v8599_v32, %v7441_v62  ;;  %v8595_v10 = vld [vmem:[%s9515_s19 + $0x1b4] sm:$0xf0]  ;;  %v8573_v24 = vld [vmem:[%s9515_s19 + $0x104] sm:$0xf0]  ;;  %v7649_v37 = vld [vmem:[%s9515_s19 + $0x370] sm:$0xf] }
 0x1fa   : > { %v1663_v46 = vsel %vm1173_vm1, %v8942_v26, %v8956_v45  ;;  %v7401_v62 = vld [vmem:[%s9515_s19 + $0x180] sm:$0xf]  ;;  %v8589_v32 = vld [vmem:[%s9515_s19 + $0x184] sm:$0xf0]  ;;  %vm3520_vm3 = vcmask 64512  }
 0x1fb   : > { %1799 = vmatpush.msra.mxu3 %v1663_v46  ;;  %v7433_v46 = vld [vmem:[%s9515_s19 + $0x1c0] sm:$0xf] }
 0x1fd   : > { %1800 = vmatpush.msra.mxu3 %v1637_v54 }
 0x1fe   : > { %7202 = vmatmul.msk.f32.vlgmr.msra.gmra.mxu3 %vm1721_vm5, %v9942_v35 }
 0x1ff   : > { %1877 = vmatpush.msrb.mxu3 %v1715_v47  ;;  %v8965_v28 = vpop.permute.xlu0 %8964  ;;  %v8597_v47 = vld [vmem:[%s9515_s19 + $0x1c4] sm:$0xf0] }
 0x200   : > { %v8966_v5 = vunpack.i.l.bf16 %v8965_v28  ;;  %v1647_v48 = vpop.permute.xlu1 %1646  ;;  %v8967_v55 = vunpack.i.h.bf16 %v8965_v28  ;;  %v7249_v28 = vld [vmem:[%s9515_s19 + $0x50] sm:$0xf] }
 0x201   : > { %v1666_v53 = vsel %vm1173_vm1, %v8957_v49, %v1647_v48  ;;  %v1665_v54 = vsel %vm1173_vm1, %v1647_v48, %v8941_v27  ;;  %v8555_v27 = vld [vmem:[%s9515_s19 + $0x74] sm:$0xf0]  ;;  %v7313_v48 = vld [vmem:[%s9515_s19 + $0xd0] sm:$0xf] }
 0x202   : > { %v1690_v50 = vsel %vm1253_vm2, %v8952_v60, %v8966_v5  ;;  %v1689_v51 = vsel %vm1253_vm2, %v8966_v5, %v8936_v21  ;;  %v7266_v38 = vor.u32 %v8555_v27, %v7265_v25  ;;  %v8551_v5 = vld [vmem:[%s9515_s19 + $0x54] sm:$0xf0]  ;;  %v8545_v27 = vld [vmem:[%s9515_s19 + $0x24] sm:$0xf0] }
 0x203   : > { %1738 = vmatpush.msra.mxu0 %v1690_v50  ;;  %1758 = vmatpush.msra.mxu1 %v1689_v51  ;;  %v7434_v50 = vor.u32 %v8597_v47, %v7433_v46  ;;  %v7425_v51 = vld [vmem:[%s9515_s19 + $0x1b0] sm:$0xf]  ;;  %v7641_v46 = vld [vmem:[%s9515_s19 + $0x360] sm:$0xf] }
 0x205   : > { %1739 = vmatpush.msra.mxu0 %v1666_v53  ;;  %1759 = vmatpush.msra.mxu1 %v1665_v54  ;;  %v7353_v53 = vld [vmem:[%s9515_s19 + $0x120] sm:$0xf]  ;;  %v7250_v54 = vor.u32 %v8551_v5, %v7249_v28 }
 0x206   : > { %v7209_v5 = vld [vmem:[%s9515_s19] sm:$0xf] }
 0x207   : > { %v1683_v22 = vpop.permute.xlu0 %1682  ;;  %1760 = vmatpush.msra.mxu1 %v9900_v0  ;;  %1740 = vmatpush.msra.mxu0 %v1634_v56  ;;  %v7393_v56 = vld [vmem:[%s9515_s19 + $0x170] sm:$0xf] }
 0x208   : > { %v8970_v59 = vpop.permute.xlu1 %8969  ;;  %7199 = vmatmul.msk.f32.vlgmr.msra.gmra.mxu0 %vm1721_vm5, %v9942_v35  ;;  %7200 = vmatmul.msk.f32.vlgmr.msra.gmra.mxu1 %vm1721_vm5, %v9942_v35  ;;  %v1684_v63 = vsel %vm1253_vm2, %v8967_v55, %v1683_v22  ;;  %v1691_v52 = vsel %vm1253_vm2, %v1683_v22, %v8952_v60  ;;  %v7394_v2 = vor.u32 %v8587_v9, %v7393_v56  ;;  %v7241_v22 = vld [vmem:[%s9515_s19 + $0x40] sm:$0xf]  ;;  %v8577_v56 = vld [vmem:[%s9515_s19 + $0x124] sm:$0xf0]  ;;  %v7345_v9 = vld [vmem:[%s9515_s19 + $0x110] sm:$0xf] }
 0x209   : > { %v8972_v4 = vunpack.i.h.bf16 %v8970_v59  ;;  %v8971_v0 = vunpack.i.l.bf16 %v8970_v59  ;;  %1817 = vmatpush.msrb.mxu0 %v1710_v58  ;;  %1837 = vmatpush.msrb.mxu1 %v1709_v61  ;;  %v8549_v59 = vld [vmem:[%s9515_s19 + $0x44] sm:$0xf0]  ;;  %v7305_v61 = vld [vmem:[%s9515_s19 + $0xc0] sm:$0xf] }
 0x20a   : > { %1858 = vmatpush.msrb.mxu2 %v1684_v63  ;;  %1878 = vmatpush.msrb.mxu3 %v1691_v52  ;;  %v8565_v63 = vld [vmem:[%s9515_s19 + $0xc4] sm:$0xf0]  ;;  %v7426_v52 = vor.u32 %v8595_v10, %v7425_v51  ;;  %v7242_v11 = vor.u32 %v8549_v59, %v7241_v22  ;;  %v7521_v51 = vld [vmem:[%s9515_s19 + $0x270] sm:$0xf] }
 0x20b   : > { %v1660_v15 = vsel %vm1173_vm1, %v8971_v0, %v8972_v4  ;;  %v1667_v3 = vsel %vm1173_vm1, %v8972_v4, %v8957_v49  ;;  %v8567_v49 = vld [vmem:[%s9515_s19 + $0xd4] sm:$0xf0]  ;;  %v7417_v4 = vld [vmem:[%s9515_s19 + $0x1a0] sm:$0xf]  ;;  %v7306_v13 = vor.u32 %v8565_v63, %v7305_v61  ;;  %v7697_v59 = vld [vmem:[%s9515_s19 + $0x3d0] sm:$0xf] }
 0x20c   : > { %1859 = vmatpush.msrb.mxu2 %v1660_v15  ;;  %1879 = vmatpush.msrb.mxu3 %v1667_v3  ;;  %v7233_v15 = vld [vmem:[%s9515_s19 + $0x30] sm:$0xf]  ;;  %v7354_v3 = vor.u32 %v8577_v56, %v7353_v53  ;;  %v8619_v53 = vld [vmem:[%s9515_s19 + $0x274] sm:$0xf0] }
 0x20d   : > { %v8663_v61 = vld [vmem:[%s9515_s19 + $0x3d4] sm:$0xf0]  ;;  %v7522_v56 = vor.u32 %v8619_v53, %v7521_v51  ;;  %v7481_v51 = vld [vmem:[%s9515_s19 + $0x220] sm:$0xf] }
 0x20e   : > { %1860 = vmatpush.msrb.mxu2 %v9902_v6  ;;  %1880 = vmatpush.msrb.mxu3 %v9910_v14  ;;  %v7545_v53 = vld [vmem:[%s9515_s19 + $0x2a0] sm:$0xf] }
 0x20f   : > { %7205 = vmatmul.msk.f32.vlgmr.msrb.gmra.mxu2 %vm1721_vm5, %v9942_v35  ;;  %7206 = vmatmul.msk.f32.vlgmr.msrb.gmra.mxu3 %vm1721_vm5, %v9942_v35  ;;  %v1679_v21 = vpop.permute.xlu0 %1678 }
 0x210   : > { %v1655_v26 = vpop.permute.xlu1 %1654  ;;  %v1686_v6 = vsel %vm1253_vm2, %v8951_v40, %v1679_v21  ;;  %v1685_v14 = vsel %vm1253_vm2, %v1679_v21, %v8967_v55  ;;  %2695 = vmatpush.bf16.msra.mxu2 %v7394_v2  ;;  %2708 = vmatpush.bf16.msra.mxu3 %v7458_v18  ;;  %v7257_v40 = vld [vmem:[%s9515_s19 + $0x60] sm:$0xf]  ;;  %v7314_v55 = vor.u32 %v8567_v49, %v7313_v48  ;;  %v8547_v2 = vld [vmem:[%s9515_s19 + $0x34] sm:$0xf0]  ;;  %v8541_v48 = vld [vmem:[%s9515_s19 + $0x4] sm:$0xf0] }
 0x211   : > { %1818 = vmatpush.msrb.mxu0 %v1686_v6  ;;  %1838 = vmatpush.msrb.mxu1 %v1685_v14  ;;  %v1662_v33 = vsel %vm1173_vm1, %v8956_v45, %v1655_v26  ;;  %v1661_v34 = vsel %vm1173_vm1, %v1655_v26, %v8971_v0  ;;  %v8581_v45 = vld [vmem:[%s9515_s19 + $0x144] sm:$0xf0]  ;;  %v8591_v21 = vld [vmem:[%s9515_s19 + $0x194] sm:$0xf0]  ;;  %v7234_v25 = vor.u32 %v8547_v2, %v7233_v15  ;;  %v7225_v6 = vld [vmem:[%s9515_s19 + $0x20] sm:$0xf] }
 0x212   : > { %v7370_v60 = vor.u32 %v8581_v45, %v7369_v36  ;;  %v8593_v0 = vld [vmem:[%s9515_s19 + $0x1a4] sm:$0xf0]  ;;  %v7298_v26 = vor.u32 %v8563_v17, %v7297_v12  ;;  %v7346_v14 = vor.u32 %v8575_v19, %v7345_v9  ;;  %v8667_v36 = vld [vmem:[%s9515_s19 + $0x3f4] sm:$0xf0]  ;;  %v7633_v49 = vld [vmem:[%s9515_s19 + $0x350] sm:$0xf]  ;;  %v7210_v63 = vor.u32 %v8541_v48, %v7209_v5 }
 0x213   : > { %1819 = vmatpush.msrb.mxu0 %v1662_v33  ;;  %1839 = vmatpush.msrb.mxu1 %v1661_v34  ;;  %v7418_v18 = vor.u32 %v8593_v0, %v7417_v4  ;;  %v8651_v33 = vld [vmem:[%s9515_s19 + $0x374] sm:$0xf0]  ;;  %v7713_v34 = vld [vmem:[%s9515_s19 + $0x3f0] sm:$0xf]  ;;  %v7513_v0 = vld [vmem:[%s9515_s19 + $0x260] sm:$0xf] }
 0x214   : > { %2696 = vmatpush.bf16.msra.mxu2 %v7386_v23  ;;  %2709 = vmatpush.bf16.msra.mxu3 %v7450_v31  ;;  %v7337_v23 = vld [vmem:[%s9515_s19 + $0x100] sm:$0xf]  ;;  %v7410_v31 = vor.u32 %v8591_v21, %v7409_v20  ;;  %v7650_v45 = vor.u32 %v8651_v33, %v7649_v37  ;;  %v7714_v47 = vor.u32 %v8667_v36, %v7713_v34  ;;  %v8633_v15 = vld [vmem:[%s9515_s19 + $0x2e4] sm:$0xf0]  ;;  %v7617_v20 = vld [vmem:[%s9515_s19 + $0x330] sm:$0xf] }
 0x215   : > { %1820 = vmatpush.msrb.mxu0 %v1638_v57  ;;  %1840 = vmatpush.msrb.mxu1 %v9919_v16  ;;  %v7258_v57 = vor.u32 %v8553_v43, %v7257_v40  ;;  %v7322_v16 = vor.u32 %v8569_v44, %v7321_v42  ;;  %v7217_v40 = vld [vmem:[%s9515_s19 + $0x10] sm:$0xf]  ;;  %v8543_v43 = vld [vmem:[%s9515_s19 + $0x14] sm:$0xf0]  ;;  %v7625_v2 = vld [vmem:[%s9515_s19 + $0x340] sm:$0xf] }
 0x216   : > { %7203 = vmatmul.msk.f32.vlgmr.msrb.gmra.mxu0 %vm1721_vm5, %v9942_v35  ;;  %7204 = vmatmul.msk.f32.vlgmr.msrb.gmra.mxu1 %vm1721_vm5, %v9942_v35  ;;  %v8579_v35 = vld [vmem:[%s9515_s19 + $0x134] sm:$0xf0]  ;;  %v7281_v42 = vld [vmem:[%s9515_s19 + $0x90] sm:$0xf]  ;;  %v7218_v28 = vor.u32 %v8543_v43, %v7217_v40  ;;  %v8645_v12 = vld [vmem:[%s9515_s19 + $0x344] sm:$0xf0] }
 0x217   : > { %2669 = vmatpush.bf16.msra.mxu0 %v7266_v38  ;;  %2682 = vmatpush.bf16.msra.mxu1 %v7330_v39  ;;  %v7362_v58 = vor.u32 %v8579_v35, %v7361_v1  ;;  %v7226_v38 = vor.u32 %v8545_v27, %v7225_v6  ;;  %v7290_v39 = vor.u32 %v8561_v30, %v7289_v29  ;;  %v8559_v44 = vld [vmem:[%s9515_s19 + $0x94] sm:$0xf0]  ;;  %v8649_v1 = vld [vmem:[%s9515_s19 + $0x364] sm:$0xf0]  ;;  %v7505_v6 = vld [vmem:[%s9515_s19 + $0x250] sm:$0xf] }
 0x218   : > { %2697 = vmatpush.bf16.msra.mxu2 %v7378_v41  ;;  %2710 = vmatpush.bf16.msra.mxu3 %v7442_v8  ;;  %v7338_v41 = vor.u32 %v8573_v24, %v7337_v23  ;;  %v7402_v8 = vor.u32 %v8589_v32, %v7401_v62  ;;  %v8557_v35 = vld [vmem:[%s9515_s19 + $0x84] sm:$0xf0]  ;;  %v7642_v10 = vor.u32 %v8649_v1, %v7641_v46  ;;  %v8643_v21 = vld [vmem:[%s9515_s19 + $0x334] sm:$0xf0]  ;;  %v7609_v24 = vld [vmem:[%s9515_s19 + $0x320] sm:$0xf] }
 0x219   : > { %v7626_v19 = vor.u32 %v8645_v12, %v7625_v2  ;;  %v7618_v23 = vor.u32 %v8643_v21, %v7617_v20  ;;  %v7569_v27 = vld [vmem:[%s9515_s19 + $0x2d0] sm:$0xf]  ;;  %v8631_v30 = vld [vmem:[%s9515_s19 + $0x2d4] sm:$0xf0]  ;;  %v7689_v33 = vld [vmem:[%s9515_s19 + $0x3c0] sm:$0xf]  ;;  %v10155_v20 = vpop.permute.xlu2 %1718 }
 0x21a   : > { %v8639_v37 = vld [vmem:[%s9515_s19 + $0x314] sm:$0xf0]  ;;  %v7570_v62 = vor.u32 %v8631_v30, %v7569_v27  ;;  %v8661_v34 = vld [vmem:[%s9515_s19 + $0x3c4] sm:$0xf0]  ;;  %v7497_v36 = vld [vmem:[%s9515_s19 + $0x240] sm:$0xf] }
 0x21b   : > { %2670 = vmatpush.bf16.msra.mxu0 %v7258_v57  ;;  %2683 = vmatpush.bf16.msra.mxu1 %v7322_v16  ;;  %v7705_v57 = vld [vmem:[%s9515_s19 + $0x3e0] sm:$0xf]  ;;  %v8665_v16 = vld [vmem:[%s9515_s19 + $0x3e4] sm:$0xf0]  ;;  %v8627_v5 = vld [vmem:[%s9515_s19 + $0x2b4] sm:$0xf0] }
 0x21c   : > { %2698 = vmatpush.bf16.msra.mxu2 %v7370_v60  ;;  %2711 = vmatpush.bf16.msra.mxu3 %v7434_v50  ;;  %v7282_v60 = vor.u32 %v8559_v44, %v7281_v42  ;;  %v7273_v50 = vld [vmem:[%s9515_s19 + $0x80] sm:$0xf]  ;;  %v7706_v22 = vor.u32 %v8665_v16, %v7705_v57  ;;  %v7489_v57 = vld [vmem:[%s9515_s19 + $0x230] sm:$0xf]  ;;  %v8611_v16 = vld [vmem:[%s9515_s19 + $0x234] sm:$0xf0] }
 0x21d   : > { %v7561_v40 = vld [vmem:[%s9515_s19 + $0x2c0] sm:$0xf]  ;;  %v8605_v2 = vld [vmem:[%s9515_s19 + $0x204] sm:$0xf0]  ;;  %v8584_v27 = vld [vmem:[%s9515_s19 + $0x164] sm:$0xf] }
 0x21e   : > { %v7593_v44 = vld [vmem:[%s9515_s19 + $0x300] sm:$0xf]  ;;  %vm3453_vm2 = vcmask 257024  }
 0x21f   : > { %2671 = vmatpush.bf16.msra.mxu0 %v7250_v54  ;;  %2684 = vmatpush.bf16.msra.mxu1 %v7314_v55  ;;  %v7585_v54 = vld [vmem:[%s9515_s19 + $0x2f0] sm:$0xf]  ;;  %v8635_v55 = vld [vmem:[%s9515_s19 + $0x2f4] sm:$0xf0]  ;;  %v7673_v48 = vld [vmem:[%s9515_s19 + $0x3a0] sm:$0xf] }
 0x220   : > { %2699 = vmatpush.bf16.msra.mxu2 %v7362_v58  ;;  %2712 = vmatpush.bf16.msra.mxu3 %v7426_v52  ;;  %v8647_v58 = vld [vmem:[%s9515_s19 + $0x354] sm:$0xf0]  ;;  %v7274_v52 = vor.u32 %v8557_v35, %v7273_v50  ;;  %v7586_v4 = vor.u32 %v8635_v55, %v7585_v54  ;;  %v8625_v55 = vld [vmem:[%s9515_s19 + $0x2a4] sm:$0xf0]  ;;  %v7529_v12 = vld [vmem:[%s9515_s19 + $0x280] sm:$0xf] }
 0x221   : > { %v7634_v9 = vor.u32 %v8647_v58, %v7633_v49  ;;  %v8657_v49 = vld [vmem:[%s9515_s19 + $0x3a4] sm:$0xf0]  ;;  %v8655_v58 = vld [vmem:[%s9515_s19 + $0x394] sm:$0xf0] }
 0x222   : > { %v7674_v35 = vor.u32 %v8657_v49, %v7673_v48  ;;  %v7451_v48 = vld [vmem:[%s9515_s19 + $0x1e8] sm:$0xf0] }
 0x223   : > { %2672 = vmatpush.bf16.msra.mxu0 %v7242_v11  ;;  %2685 = vmatpush.bf16.msra.mxu1 %v7306_v13  ;;  %v8617_v11 = vld [vmem:[%s9515_s19 + $0x264] sm:$0xf0]  ;;  %v7577_v13 = vld [vmem:[%s9515_s19 + $0x2e0] sm:$0xf] }
 0x224   : > { %2700 = vmatpush.bf16.msra.mxu2 %v7354_v3  ;;  %2713 = vmatpush.bf16.msra.mxu3 %v7418_v18  ;;  %v7698_v3 = vor.u32 %v8663_v61, %v7697_v59  ;;  %v7514_v17 = vor.u32 %v8617_v11, %v7513_v0  ;;  %v7578_v18 = vor.u32 %v8633_v15, %v7577_v13  ;;  %v8623_v0 = vld [vmem:[%s9515_s19 + $0x294] sm:$0xf0]  ;;  %v8653_v11 = vld [vmem:[%s9515_s19 + $0x384] sm:$0xf0] }
 0x225   : > { %v7546_v59 = vor.u32 %v8625_v55, %v7545_v53  ;;  %v7259_v53 = vld [vmem:[%s9515_s19 + $0x68] sm:$0xf0] }
 0x227   : > { %2673 = vmatpush.bf16.msra.mxu0 %v7234_v25  ;;  %2686 = vmatpush.bf16.msra.mxu1 %v7298_v26  ;;  %v8641_v25 = vld [vmem:[%s9515_s19 + $0x324] sm:$0xf0] }
 0x228   : > { %2701 = vmatpush.bf16.msra.mxu2 %v7346_v14  ;;  %2714 = vmatpush.bf16.msra.mxu3 %v7410_v31  ;;  %v7610_v26 = vor.u32 %v8641_v25, %v7609_v24  ;;  %v8615_v14 = vld [vmem:[%s9515_s19 + $0x254] sm:$0xf0]  ;;  %v7601_v31 = vld [vmem:[%s9515_s19 + $0x310] sm:$0xf]  ;;  %v8586_v24 = vld [vmem:[%s9515_s19 + $0x174] sm:$0xf] }
 0x229   : > { %v7506_v29 = vor.u32 %v8615_v14, %v7505_v6  ;;  %v7602_v32 = vor.u32 %v8639_v37, %v7601_v31  ;;  %v7395_v25 = vld [vmem:[%s9515_s19 + $0x178] sm:$0xf0]  ;;  %v8582_v31 = vld [vmem:[%s9515_s19 + $0x154] sm:$0xf] }
 0x22a   : > { %v7398_v6 = vor.u32 %v8586_v24, %v7395_v25  ;;  %v7379_v37 = vld [vmem:[%s9515_s19 + $0x158] sm:$0xf0] }
 0x22b   : > { %2674 = vmatpush.bf16.msra.mxu0 %v7226_v38  ;;  %2687 = vmatpush.bf16.msra.mxu1 %v7290_v39  ;;  %v7690_v38 = vor.u32 %v8661_v34, %v7689_v33  ;;  %v8613_v39 = vld [vmem:[%s9515_s19 + $0x244] sm:$0xf0]  ;;  %v8580_v33 = vld [vmem:[%s9515_s19 + $0x144] sm:$0xf] }
 0x22c   : > { %2702 = vmatpush.bf16.msra.mxu2 %v7338_v41  ;;  %2715 = vmatpush.bf16.msra.mxu3 %v7402_v8  ;;  %v8629_v41 = vld [vmem:[%s9515_s19 + $0x2c4] sm:$0xf0]  ;;  %v7498_v43 = vor.u32 %v8613_v39, %v7497_v36  ;;  %v7371_v36 = vld [vmem:[%s9515_s19 + $0x148] sm:$0xf0]  ;;  %v7459_v39 = vld [vmem:[%s9515_s19 + $0x1f8] sm:$0xf0] }
 0x22d   : > { %v7562_v42 = vor.u32 %v8629_v41, %v7561_v40  ;;  %v8637_v8 = vld [vmem:[%s9515_s19 + $0x304] sm:$0xf0] }
 0x22e   : > { %v7594_v46 = vor.u32 %v8637_v8, %v7593_v44  ;;  %v8554_v8 = vld [vmem:[%s9515_s19 + $0x74] sm:$0xf] }
 0x22f   : > { %2675 = vmatpush.bf16.msra.mxu0 %v7218_v28  ;;  %2688 = vmatpush.bf16.msra.mxu1 %v7282_v60  ;;  %v7553_v28 = vld [vmem:[%s9515_s19 + $0x2b0] sm:$0xf]  ;;  %v7490_v60 = vor.u32 %v8611_v16, %v7489_v57  ;;  %v8570_v57 = vld [vmem:[%s9515_s19 + $0xf4] sm:$0xf]  ;;  %v7331_v16 = vld [vmem:[%s9515_s19 + $0xf8] sm:$0xf0] }
 0x230   : > { %2747 = vmatpush.bf16.msrb.mxu2 %v7650_v45  ;;  %2760 = vmatpush.bf16.msrb.mxu3 %v7714_v47  ;;  %v7681_v45 = vld [vmem:[%s9515_s19 + $0x3b0] sm:$0xf]  ;;  %v8659_v47 = vld [vmem:[%s9515_s19 + $0x3b4] sm:$0xf0]  ;;  %v7554_v50 = vor.u32 %v8627_v5, %v7553_v28  ;;  %v8578_v28 = vld [vmem:[%s9515_s19 + $0x134] sm:$0xf] }
 0x231   : > { %v7682_v1 = vor.u32 %v8659_v47, %v7681_v45  ;;  %v7267_v45 = vld [vmem:[%s9515_s19 + $0x78] sm:$0xf0]  ;;  %v8600_v5 = vld [vmem:[%s9515_s19 + $0x1e4] sm:$0xf] }
 0x233   : > { %2676 = vmatpush.bf16.msra.mxu0 %v7210_v63  ;;  %2689 = vmatpush.bf16.msra.mxu1 %v7274_v52  ;;  %v7473_v63 = vld [vmem:[%s9515_s19 + $0x210] sm:$0xf]  ;;  %v8607_v52 = vld [vmem:[%s9515_s19 + $0x214] sm:$0xf0] }
 0x234   : > { %2748 = vmatpush.bf16.msrb.mxu2 %v7642_v10  ;;  %2761 = vmatpush.bf16.msrb.mxu3 %v7706_v22  ;;  %v8609_v10 = vld [vmem:[%s9515_s19 + $0x224] sm:$0xf0]  ;;  %v7665_v22 = vld [vmem:[%s9515_s19 + $0x390] sm:$0xf] }
 0x235   : > { %v7482_v54 = vor.u32 %v8609_v10, %v7481_v51  ;;  %v7666_v61 = vor.u32 %v8655_v58, %v7665_v22  ;;  %v7334_v51 = vor.u32 %v8570_v57, %v7331_v16  ;;  %v8552_v10 = vld [vmem:[%s9515_s19 + $0x64] sm:$0xf]  ;;  %v7454_v58 = vor.u32 %v8600_v5, %v7451_v48  ;;  %v8546_v16 = vld [vmem:[%s9515_s19 + $0x34] sm:$0xf] }
 0x237   : > { %2721 = vmatpush.bf16.msrb.mxu0 %v7522_v56  ;;  %2734 = vmatpush.bf16.msrb.mxu1 %v7586_v4  ;;  %v7537_v56 = vld [vmem:[%s9515_s19 + $0x290] sm:$0xf]  ;;  %v7474_v4 = vor.u32 %v8607_v52, %v7473_v63  ;;  %v8576_v63 = vld [vmem:[%s9515_s19 + $0x124] sm:$0xf]  ;;  %v7355_v52 = vld [vmem:[%s9515_s19 + $0x128] sm:$0xf0] }
 0x238   : > { %2749 = vmatpush.bf16.msrb.mxu2 %v7634_v9  ;;  %2762 = vmatpush.bf16.msrb.mxu3 %v7698_v3  ;;  %v7657_v9 = vld [vmem:[%s9515_s19 + $0x380] sm:$0xf]  ;;  %v7538_v13 = vor.u32 %v8623_v0, %v7537_v56  ;;  %v8598_v56 = vld [vmem:[%s9515_s19 + $0x1d4] sm:$0xf]  ;;  %v7262_v0 = vor.u32 %v8552_v10, %v7259_v53  ;;  %v8592_v10 = vld [vmem:[%s9515_s19 + $0x1a4] sm:$0xf] }
 0x239   : > { %v7658_v15 = vor.u32 %v8653_v11, %v7657_v9  ;;  %v7465_v3 = vld [vmem:[%s9515_s19 + $0x200] sm:$0xf]  ;;  %v8550_v11 = vld [vmem:[%s9515_s19 + $0x54] sm:$0xf]  ;;  %v7419_v53 = vld [vmem:[%s9515_s19 + $0x1a8] sm:$0xf0] }
 0x23b   : > { %2722 = vmatpush.bf16.msrb.mxu0 %v7514_v17  ;;  %2735 = vmatpush.bf16.msrb.mxu1 %v7578_v18  ;;  %v7466_v17 = vor.u32 %v8605_v2, %v7465_v3  ;;  %v8621_v18 = vld [vmem:[%s9515_s19 + $0x284] sm:$0xf0]  ;;  %v8566_v2 = vld [vmem:[%s9515_s19 + $0xd4] sm:$0xf] }
 0x23c   : > { %2750 = vmatpush.bf16.msrb.mxu2 %v7626_v19  ;;  %2763 = vmatpush.bf16.msrb.mxu3 %v7690_v38  ;;  %v7530_v19 = vor.u32 %v8621_v18, %v7529_v12  ;;  %v8602_v38 = vld [vmem:[%s9515_s19 + $0x1f4] sm:$0xf]  ;;  %v7315_v12 = vld [vmem:[%s9515_s19 + $0xd8] sm:$0xf0] }
 0x23d   : > { %v7462_v44 = vor.u32 %v8602_v38, %v7459_v39  ;;  %v7347_v18 = vld [vmem:[%s9515_s19 + $0x118] sm:$0xf0]  ;;  %v7318_v24 = vor.u32 %v8566_v2, %v7315_v12  ;;  %v7339_v38 = vld [vmem:[%s9515_s19 + $0x108] sm:$0xf0]  ;;  %v8646_v2 = vld [vmem:[%s9515_s19 + $0x354] sm:$0xf] }
 0x23e   : > { %v7635_v12 = vld [vmem:[%s9515_s19 + $0x358] sm:$0xf0] }
 0x23f   : > { %2723 = vmatpush.bf16.msrb.mxu0 %v7506_v29  ;;  %2736 = vmatpush.bf16.msrb.mxu1 %v7570_v62  ;;  %v7387_v29 = vld [vmem:[%s9515_s19 + $0x168] sm:$0xf0] }
 0x240   : > { %2751 = vmatpush.bf16.msrb.mxu2 %v7618_v23  ;;  %2764 = vmatpush.bf16.msrb.mxu3 %v7682_v1  ;;  %v7390_v30 = vor.u32 %v8584_v27, %v7387_v29  ;;  %v8548_v29 = vld [vmem:[%s9515_s19 + $0x44] sm:$0xf] }
 0x243   : > { %2724 = vmatpush.bf16.msrb.mxu0 %v7498_v43  ;;  %2737 = vmatpush.bf16.msrb.mxu1 %v7562_v42  ;;  %v7374_v42 = vor.u32 %v8580_v33, %v7371_v36  ;;  %v8572_v36 = vld [vmem:[%s9515_s19 + $0x104] sm:$0xf] }
 0x244   : > { %2752 = vmatpush.bf16.msrb.mxu2 %v7610_v26  ;;  %2765 = vmatpush.bf16.msrb.mxu3 %v7674_v35  ;;  %v7270_v35 = vor.u32 %v8554_v8, %v7267_v45  ;;  %v8650_v8 = vld [vmem:[%s9515_s19 + $0x374] sm:$0xf]  ;;  %v7651_v45 = vld [vmem:[%s9515_s19 + $0x378] sm:$0xf0] }
 0x247   : > { %2725 = vmatpush.bf16.msrb.mxu0 %v7490_v60  ;;  %2738 = vmatpush.bf16.msrb.mxu1 %v7554_v50  ;;  %v7363_v60 = vld [vmem:[%s9515_s19 + $0x138] sm:$0xf0] }
 0x248   : > { %2753 = vmatpush.bf16.msrb.mxu2 %v7602_v32  ;;  %2766 = vmatpush.bf16.msrb.mxu3 %v7666_v61  ;;  %v7382_v32 = vor.u32 %v8582_v31, %v7379_v37  ;;  %v7366_v22 = vor.u32 %v8578_v28, %v7363_v60  ;;  %v7323_v61 = vld [vmem:[%s9515_s19 + $0xe8] sm:$0xf0]  ;;  %v8564_v31 = vld [vmem:[%s9515_s19 + $0xc4] sm:$0xf]  ;;  %v7235_v28 = vld [vmem:[%s9515_s19 + $0x38] sm:$0xf0] }
 0x24b   : > { %2726 = vmatpush.bf16.msrb.mxu0 %v7482_v54  ;;  %2739 = vmatpush.bf16.msrb.mxu1 %v7546_v59  ;;  %v8568_v59 = vld [vmem:[%s9515_s19 + $0xe4] sm:$0xf] }
 0x24c   : > { %2754 = vmatpush.bf16.msrb.mxu2 %v7594_v46  ;;  %2767 = vmatpush.bf16.msrb.mxu3 %v7658_v15  ;;  %v7326_v9 = vor.u32 %v8568_v59, %v7323_v61  ;;  %v7358_v15 = vor.u32 %v8576_v63, %v7355_v52  ;;  %v7238_v61 = vor.u32 %v8546_v16, %v7235_v28  ;;  %v8544_v52 = vld [vmem:[%s9515_s19 + $0x24] sm:$0xf]  ;;  %v7707_v16 = vld [vmem:[%s9515_s19 + $0x3e8] sm:$0xf0] }
 0x24f   : > { %2727 = vmatpush.bf16.msrb.mxu0 %v7474_v4  ;;  %2740 = vmatpush.bf16.msrb.mxu1 %v7538_v13  ;;  %v7443_v4 = vld [vmem:[%s9515_s19 + $0x1d8] sm:$0xf0] }
 0x250   : > { %v7251_v13 = vld [vmem:[%s9515_s19 + $0x58] sm:$0xf0]  ;;  %v7446_v3 = vor.u32 %v8598_v56, %v7443_v4  ;;  %v7422_v4 = vor.u32 %v8592_v10, %v7419_v53  ;;  %v7579_v53 = vld [vmem:[%s9515_s19 + $0x2e8] sm:$0xf0] }
 0x253   : > { %2728 = vmatpush.bf16.msrb.mxu0 %v7466_v17  ;;  %2741 = vmatpush.bf16.msrb.mxu1 %v7530_v19  ;;  %v8574_v17 = vld [vmem:[%s9515_s19 + $0x114] sm:$0xf]  ;;  %v8596_v19 = vld [vmem:[%s9515_s19 + $0x1c4] sm:$0xf] }
 0x275   : > { %v1782_v21 = vpop.f32.mrf.mxu2 }
 0x276   : > { %v1783_v23 = vadd.f32 %v1782_v21, %v10155_v20  ;;  %v7435_v21 = vld [vmem:[%s9515_s19 + $0x1c8] sm:$0xf0] }
 0x277   : > { %v7438_v27 = vor.u32 %v8596_v19, %v7435_v21  ;;  %v8542_v19 = vld [vmem:[%s9515_s19 + $0x14] sm:$0xf] }
 0x278   : > { %v1887_v26 = vmax.f32 %v1783_v23, 0.0  ;;  %v7254_v23 = vor.u32 %v8550_v11, %v7251_v13  ;;  %v7291_v11 = vld [vmem:[%s9515_s19 + $0xa8] sm:$0xf0] }
 0x27a   : > { %v10160_v14 = vpack.c.bf16 %v1887_v26, %v1887_v26 }
 0x27c   : > { %2703 = vmatmul.bf16.vlgmr.msra.gmra.mxu2 %v10160_v14 }
 0x27d   : > { %2799 = vmatpush.bf16.msra.mxu2 %v7398_v6  ;;  %v7350_v6 = vor.u32 %v8574_v17, %v7347_v18 }
 0x281   : > { %2800 = vmatpush.bf16.msra.mxu2 %v7390_v30  ;;  %v1802_v62 = vpop.f32.mrf.mxu3  ;;  %v7243_v30 = vld [vmem:[%s9515_s19 + $0x48] sm:$0xf0] }
 0x282   : > { %v1803_v34 = vadd.f32 %v1802_v62, %v10155_v20 }
 0x284   : > { %v1888_v40 = vmax.f32 %v1803_v34, 0.0  ;;  %v7307_v34 = vld [vmem:[%s9515_s19 + $0xc8] sm:$0xf0] }
 0x285   : > { %2801 = vmatpush.bf16.msra.mxu2 %v7382_v32  ;;  %v1742_v41 = vpop.f32.mrf.mxu0  ;;  %v1762_v43 = vpop.f32.mrf.mxu1  ;;  %v7310_v57 = vor.u32 %v8564_v31, %v7307_v34  ;;  %v8666_v31 = vld [vmem:[%s9515_s19 + $0x3f4] sm:$0xf] }
 0x286   : > { %v10174_v46 = vpack.c.bf16 %v1888_v40, %v1888_v40  ;;  %v1743_v47 = vadd.f32 %v1742_v41, %v10155_v20  ;;  %v1763_v1 = vadd.f32 %v1762_v43, %v10155_v20  ;;  %v8594_v41 = vld [vmem:[%s9515_s19 + $0x1b4] sm:$0xf]  ;;  %v7427_v43 = vld [vmem:[%s9515_s19 + $0x1b8] sm:$0xf0] }
 0x288   : > { %v1885_v49 = vmax.f32 %v1743_v47, 0.0  ;;  %v1886_v50 = vmax.f32 %v1763_v1, 0.0  ;;  %2716 = vmatmul.bf16.vlgmr.msra.gmra.mxu3 %v10174_v46  ;;  %v7246_v1 = vor.u32 %v8548_v29, %v7243_v30  ;;  %v8644_v29 = vld [vmem:[%s9515_s19 + $0x344] sm:$0xf]  ;;  %v7627_v30 = vld [vmem:[%s9515_s19 + $0x348] sm:$0xf0] }
 0x289   : > { %2802 = vmatpush.bf16.msra.mxu2 %v7374_v42  ;;  %2812 = vmatpush.bf16.msra.mxu3 %v7462_v44 }
 0x28a   : > { %v10187_v54 = vpack.c.bf16 %v1885_v49, %v1885_v49  ;;  %v10189_v55 = vpack.c.bf16 %v1886_v50, %v1886_v50  ;;  %v7430_v49 = vor.u32 %v8594_v41, %v7427_v43  ;;  %v8562_v50 = vld [vmem:[%s9515_s19 + $0xb4] sm:$0xf] }
 0x28b   : > { %v8618_v43 = vld [vmem:[%s9515_s19 + $0x274] sm:$0xf] }
 0x28c   : > { %2677 = vmatmul.bf16.vlgmr.msra.gmra.mxu0 %v10187_v54  ;;  %2690 = vmatmul.bf16.vlgmr.msra.gmra.mxu1 %v10189_v55 }
 0x28d   : > { %2773 = vmatpush.bf16.msra.mxu0 %v7270_v35  ;;  %2786 = vmatpush.bf16.msra.mxu1 %v7334_v51  ;;  %v7299_v35 = vld [vmem:[%s9515_s19 + $0xb8] sm:$0xf0]  ;;  %v7654_v51 = vor.u32 %v8650_v8, %v7651_v45  ;;  %v8642_v45 = vld [vmem:[%s9515_s19 + $0x334] sm:$0xf] }
 0x28e   : > { %2803 = vmatpush.bf16.msra.mxu2 %v7366_v22  ;;  %2813 = vmatpush.bf16.msra.mxu3 %v7454_v58  ;;  %v8648_v22 = vld [vmem:[%s9515_s19 + $0x364] sm:$0xf]  ;;  %v7643_v58 = vld [vmem:[%s9515_s19 + $0x368] sm:$0xf0]  ;;  %v7302_v63 = vor.u32 %v8562_v50, %v7299_v35  ;;  %v7587_v8 = vld [vmem:[%s9515_s19 + $0x2f8] sm:$0xf0] }
 0x28f   : > { %v7646_v13 = vor.u32 %v8648_v22, %v7643_v58  ;;  %v8616_v50 = vld [vmem:[%s9515_s19 + $0x264] sm:$0xf]  ;;  %v7515_v35 = vld [vmem:[%s9515_s19 + $0x268] sm:$0xf0] }
 0x290   : > { %v8640_v22 = vld [vmem:[%s9515_s19 + $0x324] sm:$0xf]  ;;  %v7611_v58 = vld [vmem:[%s9515_s19 + $0x328] sm:$0xf0] }
 0x291   : > { %2774 = vmatpush.bf16.msra.mxu0 %v7262_v0  ;;  %2787 = vmatpush.bf16.msra.mxu1 %v7326_v9  ;;  %v7227_v0 = vld [vmem:[%s9515_s19 + $0x28] sm:$0xf0]  ;;  %v8560_v9 = vld [vmem:[%s9515_s19 + $0xa4] sm:$0xf] }
 0x292   : > { %2804 = vmatpush.bf16.msra.mxu2 %v7358_v15  ;;  %2814 = vmatpush.bf16.msra.mxu3 %v7446_v3  ;;  %v1862_v25 = vpop.f32.mrf.mxu2  ;;  %v1882_v26 = vpop.f32.mrf.mxu3  ;;  %v8590_v15 = vld [vmem:[%s9515_s19 + $0x194] sm:$0xf]  ;;  %v7411_v3 = vld [vmem:[%s9515_s19 + $0x198] sm:$0xf0]  ;;  %v7230_v17 = vor.u32 %v8544_v52, %v7227_v0  ;;  %v7294_v18 = vor.u32 %v8560_v9, %v7291_v11  ;;  %v7518_v52 = vor.u32 %v8616_v50, %v7515_v35  ;;  %v8652_v50 = vld [vmem:[%s9515_s19 + $0x384] sm:$0xf] }
 0x293   : > { %v1863_v37 = vadd.f32 %v1862_v25, %v10155_v20  ;;  %v1883_v62 = vadd.f32 %v1882_v26, %v10155_v20  ;;  %v1822_v32 = vpop.f32.mrf.mxu0  ;;  %v1842_v33 = vpop.f32.mrf.mxu1  ;;  %v7414_v21 = vor.u32 %v8590_v15, %v7411_v3  ;;  %v7283_v25 = vld [vmem:[%s9515_s19 + $0x98] sm:$0xf0]  ;;  %v7638_v26 = vor.u32 %v8646_v2, %v7635_v12  ;;  %v8614_v0 = vld [vmem:[%s9515_s19 + $0x254] sm:$0xf]  ;;  %v8660_v2 = vld [vmem:[%s9515_s19 + $0x3c4] sm:$0xf] }
 0x294   : > { %v1823_v39 = vadd.f32 %v1822_v32, %v10155_v20  ;;  %v1843_v40 = vadd.f32 %v1842_v33, %v10155_v20  ;;  %v7342_v20 = vor.u32 %v8572_v36, %v7339_v38  ;;  %v8540_v33 = vld [vmem:[%s9515_s19 + $0x4] sm:$0xf]  ;;  %v7211_v36 = vld [vmem:[%s9515_s19 + $0x8] sm:$0xf0]  ;;  %v7507_v9 = vld [vmem:[%s9515_s19 + $0x258] sm:$0xf0] }
 0x295   : > { %v1891_v42 = vmax.f32 %v1863_v37, 0.0  ;;  %v1892_v44 = vmax.f32 %v1883_v62, 0.0  ;;  %2775 = vmatpush.bf16.msra.mxu0 %v7254_v23  ;;  %2788 = vmatpush.bf16.msra.mxu1 %v7318_v24  ;;  %v7219_v23 = vld [vmem:[%s9515_s19 + $0x18] sm:$0xf0]  ;;  %v8558_v24 = vld [vmem:[%s9515_s19 + $0x94] sm:$0xf] }
 0x296   : > { %v1889_v47 = vmax.f32 %v1823_v39, 0.0  ;;  %2805 = vmatpush.bf16.msra.mxu2 %v7350_v6  ;;  %2815 = vmatpush.bf16.msra.mxu3 %v7438_v27  ;;  %v1890_v48 = vmax.f32 %v1843_v40, 0.0  ;;  %v8588_v6 = vld [vmem:[%s9515_s19 + $0x184] sm:$0xf]  ;;  %v7403_v27 = vld [vmem:[%s9515_s19 + $0x188] sm:$0xf0]  ;;  %v7222_v62 = vor.u32 %v8542_v19, %v7219_v23  ;;  %v7286_v32 = vor.u32 %v8558_v24, %v7283_v25 }
 0x297   : > { %v10223_v60 = vpack.c.bf16 %v1891_v42, %v1891_v42  ;;  %v10225_v5 = vpack.c.bf16 %v1892_v44, %v1892_v44  ;;  %v7715_v37 = vld [vmem:[%s9515_s19 + $0x3f8] sm:$0xf0]  ;;  %v7406_v34 = vor.u32 %v8588_v6, %v7403_v27  ;;  %v8556_v38 = vld [vmem:[%s9515_s19 + $0x84] sm:$0xf]  ;;  %v7275_v39 = vld [vmem:[%s9515_s19 + $0x88] sm:$0xf0]  ;;  %v7630_v40 = vor.u32 %v8644_v29, %v7627_v30 }
 0x298   : > { %v10235_v59 = vpack.c.bf16 %v1889_v47, %v1889_v47  ;;  %v10238_v56 = vpack.c.bf16 %v1890_v48, %v1890_v48  ;;  %v7718_v41 = vor.u32 %v8666_v31, %v7715_v37  ;;  %v7523_v42 = vld [vmem:[%s9515_s19 + $0x278] sm:$0xf0]  ;;  %v8634_v44 = vld [vmem:[%s9515_s19 + $0x2f4] sm:$0xf]  ;;  %v7691_v12 = vld [vmem:[%s9515_s19 + $0x3c8] sm:$0xf0] }
 0x299   : > { %2755 = vmatmul.bf16.vlgmr.msrb.gmra.mxu2 %v10223_v60  ;;  %2768 = vmatmul.bf16.vlgmr.msrb.gmra.mxu3 %v10225_v5  ;;  %v7619_v47 = vld [vmem:[%s9515_s19 + $0x338] sm:$0xf0]  ;;  %v7526_v28 = vor.u32 %v8618_v43, %v7523_v42  ;;  %v7590_v48 = vor.u32 %v8634_v44, %v7587_v8  ;;  %v8630_v11 = vld [vmem:[%s9515_s19 + $0x2d4] sm:$0xf]  ;;  %v8612_v19 = vld [vmem:[%s9515_s19 + $0x244] sm:$0xf]  ;;  %v7694_v24 = vor.u32 %v8660_v2, %v7691_v12 }
 0x29a   : > { %2776 = vmatpush.bf16.msra.mxu0 %v7246_v1  ;;  %2789 = vmatpush.bf16.msra.mxu1 %v7310_v57  ;;  %v7214_v1 = vor.u32 %v8540_v33, %v7211_v36  ;;  %v7278_v57 = vor.u32 %v8556_v38, %v7275_v39  ;;  %v7571_v15 = vld [vmem:[%s9515_s19 + $0x2d8] sm:$0xf0]  ;;  %v8628_v23 = vld [vmem:[%s9515_s19 + $0x2c4] sm:$0xf]  ;;  %v8658_v6 = vld [vmem:[%s9515_s19 + $0x3b4] sm:$0xf] }
 0x29b   : > { %2806 = vmatpush.bf16.msra.mxu2 %v7342_v20  ;;  %2816 = vmatpush.bf16.msra.mxu3 %v7430_v49  ;;  %v8664_v20 = vld [vmem:[%s9515_s19 + $0x3e4] sm:$0xf]  ;;  %v7622_v49 = vor.u32 %v8642_v45, %v7619_v47  ;;  %v7603_v3 = vld [vmem:[%s9515_s19 + $0x318] sm:$0xf0]  ;;  %v8610_v37 = vld [vmem:[%s9515_s19 + $0x234] sm:$0xf] }
 0x29c   : > { %2729 = vmatmul.bf16.vlgmr.msrb.gmra.mxu0 %v10235_v59  ;;  %2742 = vmatmul.bf16.vlgmr.msrb.gmra.mxu1 %v10238_v56  ;;  %v7710_v10 = vor.u32 %v8664_v20, %v7707_v16  ;;  %v8636_v25 = vld [vmem:[%s9515_s19 + $0x304] sm:$0xf]  ;;  %v7683_v27 = vld [vmem:[%s9515_s19 + $0x3b8] sm:$0xf0]  ;;  %v8626_v33 = vld [vmem:[%s9515_s19 + $0x2b4] sm:$0xf] }
 0x29d   : > { %v8656_v36 = vld [vmem:[%s9515_s19 + $0x3a4] sm:$0xf]  ;;  %v7675_v38 = vld [vmem:[%s9515_s19 + $0x3a8] sm:$0xf0]  ;;  %v8654_v45 = vld [vmem:[%s9515_s19 + $0x394] sm:$0xf] }
 0x29e   : > { %2777 = vmatpush.bf16.msra.mxu0 %v7238_v61  ;;  %2790 = vmatpush.bf16.msra.mxu1 %v7302_v63  ;;  %v8662_v61 = vld [vmem:[%s9515_s19 + $0x3d4] sm:$0xf]  ;;  %v7699_v63 = vld [vmem:[%s9515_s19 + $0x3d8] sm:$0xf0]  ;;  %v7483_v43 = vld [vmem:[%s9515_s19 + $0x228] sm:$0xf0]  ;;  %v7678_v42 = vor.u32 %v8656_v36, %v7675_v38 }
 0x29f   : > { %2851 = vmatpush.bf16.msrb.mxu2 %v7654_v51  ;;  %2817 = vmatpush.bf16.msra.mxu3 %v7422_v4  ;;  %v8632_v51 = vld [vmem:[%s9515_s19 + $0x2e4] sm:$0xf]  ;;  %v7614_v4 = vor.u32 %v8640_v22, %v7611_v58  ;;  %v7547_v8 = vld [vmem:[%s9515_s19 + $0x2a8] sm:$0xf0]  ;;  %v7667_v47 = vld [vmem:[%s9515_s19 + $0x398] sm:$0xf0] }
 0x2a0   : > { %v8624_v44 = vld [vmem:[%s9515_s19 + $0x2a4] sm:$0xf]  ;;  %v8606_v20 = vld [vmem:[%s9515_s19 + $0x214] sm:$0xf]  ;;  %v7475_v16 = vld [vmem:[%s9515_s19 + $0x218] sm:$0xf0] }
 0x2a1   : > { %v7659_v35 = vld [vmem:[%s9515_s19 + $0x388] sm:$0xf0]  ;;  %v8620_v58 = vld [vmem:[%s9515_s19 + $0x284] sm:$0xf] }
 0x2a2   : > { %2778 = vmatpush.bf16.msra.mxu0 %v7230_v17  ;;  %2791 = vmatpush.bf16.msra.mxu1 %v7294_v18  ;;  %v7510_v17 = vor.u32 %v8614_v0, %v7507_v9  ;;  %v7574_v18 = vor.u32 %v8630_v11, %v7571_v15  ;;  %v7662_v22 = vor.u32 %v8652_v50, %v7659_v35  ;;  %v2878_v50 = vld [vmem:[%s9525_s30] sm:$0xff] }
 0x2a3   : > { %2852 = vmatpush.bf16.msrb.mxu2 %v7646_v13  ;;  %2818 = vmatpush.bf16.msra.mxu3 %v7414_v21  ;;  %v7702_v13 = vor.u32 %v8662_v61, %v7699_v63  ;;  %v7499_v21 = vld [vmem:[%s9515_s19 + $0x248] sm:$0xf0] }
 0x2a4   : > { %v7502_v29 = vor.u32 %v8612_v19, %v7499_v21  ;;  %v7531_v61 = vld [vmem:[%s9515_s19 + $0x288] sm:$0xf0] }
 0x2a6   : > { %2779 = vmatpush.bf16.msra.mxu0 %v7222_v62  ;;  %2792 = vmatpush.bf16.msra.mxu1 %v7286_v32  ;;  %v7491_v62 = vld [vmem:[%s9515_s19 + $0x238] sm:$0xf0]  ;;  %v7686_v32 = vor.u32 %v8658_v6, %v7683_v27 }
 0x2a7   : > { %2853 = vmatpush.bf16.msrb.mxu2 %v7638_v26  ;;  %2819 = vmatpush.bf16.msra.mxu3 %v7406_v34  ;;  %v7595_v26 = vld [vmem:[%s9515_s19 + $0x308] sm:$0xf0]  ;;  %v7555_v34 = vld [vmem:[%s9515_s19 + $0x2b8] sm:$0xf0]  ;;  %v7494_v39 = vor.u32 %v8610_v37, %v7491_v62 }
 0x2a8   : > { %v7598_v31 = vor.u32 %v8636_v25, %v7595_v26 }
 0x2a9   : > { %2807 = vmatmul.bf16.vlgmr.msra.gmra.mxu2 %v10160_v14  ;;  %v7582_v14 = vor.u32 %v8632_v51, %v7579_v53  ;;  %v7478_v51 = vor.u32 %v8606_v20, %v7475_v16  ;;  %v7467_v53 = vld [vmem:[%s9515_s19 + $0x208] sm:$0xf0] }
 0x2aa   : > { %2780 = vmatpush.bf16.msra.mxu0 %v7214_v1  ;;  %2793 = vmatpush.bf16.msra.mxu1 %v7278_v57  ;;  %v7550_v57 = vor.u32 %v8624_v44, %v7547_v8 }
 0x2ab   : > { %2854 = vmatpush.bf16.msrb.mxu2 %v7630_v40  ;;  %2864 = vmatpush.bf16.msrb.mxu3 %v7718_v41  ;;  %v7558_v40 = vor.u32 %v8626_v33, %v7555_v34  ;;  %v8608_v41 = vld [vmem:[%s9515_s19 + $0x224] sm:$0xf] }
 0x2ac   : > { %2820 = vmatmul.bf16.vlgmr.msra.gmra.mxu3 %v10174_v46  ;;  %v8638_v46 = vld [vmem:[%s9515_s19 + $0x314] sm:$0xf]  ;;  %v7486_v1 = vor.u32 %v8608_v41, %v7483_v43 }
 0x2ad   : > { %2781 = vmatmul.bf16.vlgmr.msra.gmra.mxu0 %v10187_v54  ;;  %2794 = vmatmul.bf16.vlgmr.msra.gmra.mxu1 %v10189_v55  ;;  %v7606_v54 = vor.u32 %v8638_v46, %v7603_v3  ;;  %v7563_v55 = vld [vmem:[%s9515_s19 + $0x2c8] sm:$0xf0] }
 0x2ae   : > { %2825 = vmatpush.bf16.msrb.mxu0 %v7526_v28  ;;  %2838 = vmatpush.bf16.msrb.mxu1 %v7590_v48  ;;  %v7566_v30 = vor.u32 %v8628_v23, %v7563_v55  ;;  %v7670_v28 = vor.u32 %v8654_v45, %v7667_v47  ;;  %v8622_v48 = vld [vmem:[%s9515_s19 + $0x294] sm:$0xf] }
 0x2af   : > { %2855 = vmatpush.bf16.msrb.mxu2 %v7622_v49  ;;  %2865 = vmatpush.bf16.msrb.mxu3 %v7710_v10  ;;  %v7539_v49 = vld [vmem:[%s9515_s19 + $0x298] sm:$0xf0]  ;;  %v8604_v10 = vld [vmem:[%s9515_s19 + $0x204] sm:$0xf] }
 0x2b0   : > { %v7470_v63 = vor.u32 %v8604_v10, %v7467_v53  ;;  %v10371_v10 = vld [vmem:[%s9485_s21 + $0x18] ss:$0 sm:$0xff]  ;;  %v10374_v53 = vld [vmem:[%s9485_s21] sm:$0xff] }
 0x2b2   : > { %2826 = vmatpush.bf16.msrb.mxu0 %v7518_v52  ;;  %2839 = vmatpush.bf16.msrb.mxu1 %v7582_v14  ;;  %v7534_v52 = vor.u32 %v8620_v58, %v7531_v61  ;;  %v10382_v61 = vperm.slane %v10374_v53, 7 }
 0x2b3   : > { %2856 = vmatpush.bf16.msrb.mxu2 %v7614_v4  ;;  %2866 = vmatpush.bf16.msrb.mxu3 %v7702_v13 }
 0x2b6   : > { %2827 = vmatpush.bf16.msrb.mxu0 %v7510_v17  ;;  %2840 = vmatpush.bf16.msrb.mxu1 %v7574_v18 }
 0x2b7   : > { %2857 = vmatpush.bf16.msrb.mxu2 %v7606_v54  ;;  %2867 = vmatpush.bf16.msrb.mxu3 %v7694_v24 }
 0x2ba   : > { %2828 = vmatpush.bf16.msrb.mxu0 %v7502_v29  ;;  %2841 = vmatpush.bf16.msrb.mxu1 %v7566_v30 }
 0x2bb   : > { %2858 = vmatpush.bf16.msrb.mxu2 %v7598_v31  ;;  %2868 = vmatpush.bf16.msrb.mxu3 %v7686_v32 }
 0x2be   : > { %2859 = vmatmul.bf16.vlgmr.msrb.gmra.mxu2 %v10223_v60  ;;  %2829 = vmatpush.bf16.msrb.mxu0 %v7494_v39  ;;  %v7542_v60 = vor.u32 %v8622_v48, %v7539_v49 }
 0x2bf   : > { %2842 = vmatpush.bf16.msrb.mxu1 %v7558_v40  ;;  %2869 = vmatpush.bf16.msrb.mxu3 %v7678_v42 }
 0x2c2   : > { %2830 = vmatpush.bf16.msrb.mxu0 %v7486_v1 }
 0x2c3   : > { %2843 = vmatpush.bf16.msrb.mxu1 %v7550_v57  ;;  %2870 = vmatpush.bf16.msrb.mxu3 %v7670_v28 }
 0x2c6   : > { %2831 = vmatpush.bf16.msrb.mxu0 %v7478_v51 }
 0x2c7   : > { %2844 = vmatpush.bf16.msrb.mxu1 %v7542_v60  ;;  %2871 = vmatpush.bf16.msrb.mxu3 %v7662_v22  ;;  %v10368_v60 = vld [vmem:[%s9485_s21 + $0x10] ss:$0 sm:$0xff]  ;;  %v10377_v22 = vld [vmem:[%s9485_s21 + $0x8] sm:$0xff] }
 0x2ca   : > { %2832 = vmatpush.bf16.msrb.mxu0 %v7470_v63  ;;  %2872 = vmatmul.bf16.vlgmr.msrb.gmra.mxu3 %v10225_v5  ;;  %v10385_v63 = vperm.slane %v10377_v22, 7 }
 0x2cb   : > { %2845 = vmatpush.bf16.msrb.mxu1 %v7534_v52  ;;  %v10388_v52 = vperm.slane %v10374_v53, 6 }
 0x2cd   : > { %2833 = vmatmul.bf16.vlgmr.msrb.gmra.mxu0 %v10235_v59 }
 0x2ce   : > { %2846 = vmatmul.bf16.vlgmr.msrb.gmra.mxu1 %v10238_v56 }
 0x2ff   : > { %v2704_v14 = vpop.f32.mrf.mxu2 }
 0x307   : > { %v2706_v4 = vpop.f32.mrf.mxu2 }
 0x309   : > { %v2678_v0 = vpop.f32.mrf.mxu0  ;;  %v2691_v9 = vpop.f32.mrf.mxu1 }
 0x30a   : > { %v2692_v13 = vadd.f32 %v2691_v9, %v2678_v0 }
 0x30b   : > { %v2717_v11 = vpop.f32.mrf.mxu3 }
 0x30c   : > { %v2705_v2 = vadd.f32 %v2704_v14, %v2692_v13  ;;  %v10391_v14 = vperm.slane %v10377_v22, 6 }
 0x30e   : > { %v2718_v12 = vadd.f32 %v2717_v11, %v2705_v2 }
 0x311   : > { %v2680_v15 = vpop.f32.mrf.mxu0  ;;  %v2693_v46 = vpop.f32.mrf.mxu1 }
 0x313   : > { %v2719_v3 = vpop.f32.mrf.mxu3 }
 0x319   : > { %v2730_v17 = vpop.f32.mrf.mxu0  ;;  %v2743_v54 = vpop.f32.mrf.mxu1 }
 0x31a   : > { %v2731_v18 = vadd.f32 %v2730_v17, %v2718_v12 }
 0x31c   : > { %v2744_v5 = vadd.f32 %v2743_v54, %v2731_v18  ;;  %v2756_v19 = vpop.f32.mrf.mxu2  ;;  %v2769_v21 = vpop.f32.mrf.mxu3 }
 0x31e   : > { %v2757_v59 = vadd.f32 %v2756_v19, %v2744_v5  ;;  %v10412_v5 = vperm.slane %v10374_v53, 5  ;;  %v10415_v19 = vperm.slane %v10377_v22, 5 }
 0x320   : > { %v10325_v23 = vadd.f32 %v2769_v21, %v2757_v59 }
 0x321   : > { %v2732_v56 = vpop.f32.mrf.mxu0  ;;  %v2745_v24 = vpop.f32.mrf.mxu1 }
 0x322   : > { %2937 = vrot.lane.b32.xlu1 %v10325_v23, %s9440_s22  ;;  %2948 = vrot.lane.b32.xlu2 %v10325_v23, %s12503_s23  ;;  %v10419_v56 = vperm.slane %v10374_v53, 4  ;;  %v10422_v24 = vperm.slane %v10377_v22, 4 }
 0x323   : > { %2959 = vrot.lane.b32.xlu0 %v10325_v23, %s9442_s26 }
 0x324   : > { %v2758_v55 = vpop.f32.mrf.mxu2  ;;  %v2771_v25 = vpop.f32.mrf.mxu3 }
 0x32a   : > { %v2782_v26 = vpop.f32.mrf.mxu0  ;;  %2901 = vrot.lane.b32.xlu1 %v10325_v23, %s12501_s28  ;;  %2912 = vrot.lane.b32.xlu2 %v10325_v23, %s12499_s1  ;;  %v2795_v6 = vpop.f32.mrf.mxu1 }
 0x32b   : > { %2927 = vrot.lane.b32.xlu0 %v10325_v23, %s12504_s15  ;;  %v2796_v32 = vadd.f32 %v2795_v6, %v2782_v26 }
 0x32c   : > { %v2808_v27 = vpop.f32.mrf.mxu2 }
 0x32d   : > { %v2809_v34 = vadd.f32 %v2808_v27, %v2796_v32  ;;  %v2925_v32 = vmul.f32 %v10419_v56, %v10325_v23 }
 0x32f   : > { %v2821_v29 = vpop.f32.mrf.mxu3 }
 0x330   : > { %v2822_v36 = vadd.f32 %v2821_v29, %v2809_v34  ;;  %v10432_v29 = vperm.slane %v10374_v53, 3  ;;  %v10449_v34 = vperm.slane %v10377_v22, 2 }
 0x332   : > { %v2784_v30 = vpop.f32.mrf.mxu0  ;;  %v2797_v31 = vpop.f32.mrf.mxu1 }
 0x333   : > { %2890 = vrot.lane.b32.xlu0 %v10325_v23, %s12497_s2  ;;  %v10435_v30 = vperm.slane %v10377_v22, 3 }
 0x334   : > { %v2810_v37 = vpop.f32.mrf.mxu2 }
 0x337   : > { %v2823_v62 = vpop.f32.mrf.mxu3 }
 0x338   : > { %v10442_v62 = vperm.slane %v10374_v53, 2 }
 0x341   : > { %v2860_v33 = vpop.f32.mrf.mxu2 }
 0x349   : > { %v2862_v38 = vpop.f32.mrf.mxu2 }
 0x34a   : > { %v2834_v39 = vpop.f32.mrf.mxu0  ;;  %v10456_v38 = vperm.slane %v10374_v53, 1 }
 0x34b   : > { %v2835_v40 = vadd.f32 %v2834_v39, %v2822_v36  ;;  %v2847_v41 = vpop.f32.mrf.mxu1 }
 0x34d   : > { %v2848_v43 = vadd.f32 %v2847_v41, %v2835_v40  ;;  %v2873_v42 = vpop.f32.mrf.mxu3  ;;  %v10464_v41 = vperm.slane %v10377_v22, 1 }
 0x34f   : > { %v2861_v44 = vadd.f32 %v2860_v33, %v2848_v43 }
 0x351   : > { %v10341_v8 = vadd.f32 %v2873_v42, %v2861_v44  ;;  %v10469_v44 = vperm.slane %v10374_v53, 0 }
 0x352   : > { %v2836_v45 = vpop.f32.mrf.mxu0 }
 0x353   : > { %v2849_v47 = vpop.f32.mrf.mxu1  ;;  %2961 = vrot.lane.b32.xlu1 %v10341_v8, %s9442_s26  ;;  %2939 = vrot.lane.b32.xlu2 %v10341_v8, %s9440_s22  ;;  %v2926_v33 = vmul.f32 %v10422_v24, %v10341_v8 }
 0x354   : > { %2950 = vrot.lane.b32.xlu0 %v10341_v8, %s12503_s23 }
 0x355   : > { %v2875_v1 = vpop.f32.mrf.mxu3 }
 0x35b   : > { %2929 = vrot.lane.b32.xlu1 %v10341_v8, %s12504_s15  ;;  %2903 = vrot.lane.b32.xlu2 %v10341_v8, %s12501_s28 }
 0x35c   : > { %2914 = vrot.lane.b32.xlu0 %v10341_v8, %s12499_s1 }
 0x363   : > { %2892 = vrot.lane.b32.xlu1 %v10341_v8, %s12497_s2  ;;  %2879 = vrot.lane.b32.xlu2 %v10325_v23, %s12495_s0 }
 0x364   : > { %2881 = vrot.lane.b32.xlu0 %v10341_v8, %s12495_s0 }
 0x36b   : > { %2972 = vperm.xlu1 %8974, %v2878_v50  }
 0x37c   : > { %v2949_v20 = vpop.permute.xlu2 %2948 }
 0x384   : > { %v2913_v48 = vpop.permute.xlu2 %2912 }
 0x394   : > { %v2938_v16 = vpop.permute.xlu1 %2937 }
 0x395   : > { %v2960_v57 = vpop.permute.xlu0 %2959 }
 0x39c   : > { %v10361_v49 = vpop.permute.xlu1 %2901 }
 0x39d   : > { %v2928_v28 = vpop.permute.xlu0 %2927 }
 0x3a5   : > { %v10364_v35 = vpop.permute.xlu0 %2890 }
 0x3ad   : > { %v2940_v51 = vpop.permute.xlu2 %2939 }
 0x3ae   : > { %v2942_v3 = vsel %vm2941_vm8, %v2938_v16, %v2940_v51  ;;  %v2943_v2 = vsel %vm2941_vm8, %v2940_v51, %v2938_v16 }
 0x3af   : > { %v2946_v18 = vmul.f32 %v10388_v52, %v2942_v3  ;;  %v2947_v54 = vmul.f32 %v10391_v14, %v2943_v2 }
 0x3b5   : > { %v2904_v21 = vpop.permute.xlu2 %2903 }
 0x3b6   : > { %v2907_v36 = vsel %vm2905_vm10, %v2904_v21, %v10361_v49  ;;  %v2906_v39 = vsel %vm2905_vm10, %v10361_v49, %v2904_v21 }
 0x3b7   : > { %v2910_v43 = vmul.f32 %v10442_v62, %v2907_v36  ;;  %v2911_v8 = vmul.f32 %v10449_v34, %v2906_v39 }
 0x3bd   : > { %v2880_v45 = vpop.permute.xlu2 %2879 }
 0x3c5   : > { %v2962_v58 = vpop.permute.xlu1 %2961 }
 0x3c6   : > { %v2964_v4 = vsel %vm2963_vm6, %v2960_v57, %v2962_v58  ;;  %v2965_v0 = vsel %vm2963_vm6, %v2962_v58, %v2960_v57  ;;  %v2951_v9 = vpop.permute.xlu0 %2950  ;;  %v10479_v57 = vperm.slane %v10377_v22, 0 }
 0x3c7   : > { %v2968_v11 = vmul.f32 %v10368_v60, %v2964_v4  ;;  %v2969_v13 = vmul.f32 %v10371_v10, %v2965_v0  ;;  %v2953_v15 = vsel %vm2952_vm7, %v2949_v20, %v2951_v9  ;;  %v2954_v46 = vsel %vm2952_vm7, %v2951_v9, %v2949_v20 }
 0x3c8   : > { %v2957_v12 = vmul.f32 %v10382_v61, %v2953_v15  ;;  %v2958_v17 = vmul.f32 %v10385_v63, %v2954_v46 }
 0x3c9   : > { %2986 = vmatpush.msra.mxu0 %v2968_v11  ;;  %3006 = vmatpush.msra.mxu1 %v2969_v13  ;;  %v3022_v13 = vld [vmem:[%s9535_s12] sm:$0xff] }
 0x3cb   : > { %2987 = vmatpush.msra.mxu0 %v2957_v12  ;;  %3007 = vmatpush.msra.mxu1 %v2958_v17 }
 0x3cd   : > { %v2930_v59 = vpop.permute.xlu1 %2929  ;;  %2988 = vmatpush.msra.mxu0 %v2946_v18  ;;  %3008 = vmatpush.msra.mxu1 %v2947_v54 }
 0x3ce   : > { %v2931_v55 = vsel %vm1173_vm1, %v2928_v28, %v2930_v59  ;;  %v2932_v25 = vsel %vm1173_vm1, %v2930_v59, %v2928_v28  ;;  %v2915_v26 = vpop.permute.xlu0 %2914 }
 0x3cf   : > { %v2935_v6 = vmul.f32 %v10412_v5, %v2931_v55  ;;  %v2936_v27 = vmul.f32 %v10415_v19, %v2932_v25  ;;  %v2917_v31 = vsel %vm2916_vm9, %v2913_v48, %v2915_v26  ;;  %v2918_v37 = vsel %vm2916_vm9, %v2915_v26, %v2913_v48 }
 0x3d0   : > { %v2921_v23 = vmul.f32 %v10432_v29, %v2918_v37  ;;  %v2922_v40 = vmul.f32 %v10435_v30, %v2917_v31 }
 0x3d1   : > { %2989 = vmatpush.msra.mxu0 %v2935_v6  ;;  %3009 = vmatpush.msra.mxu1 %v2936_v27 }
 0x3d3   : > { %2990 = vmatpush.msra.mxu0 %v2925_v32  ;;  %3010 = vmatpush.msra.mxu1 %v2926_v33 }
 0x3d5   : > { %v2893_v42 = vpop.permute.xlu1 %2892  ;;  %3011 = vmatpush.msra.mxu1 %v2922_v40  ;;  %2991 = vmatpush.msra.mxu0 %v2921_v23 }
 0x3d6   : > { %v2895_v47 = vsel %vm2894_vm11, %v10364_v35, %v2893_v42  ;;  %v2896_v1 = vsel %vm2894_vm11, %v2893_v42, %v10364_v35  ;;  %v2882_v20 = vpop.permute.xlu0 %2881  ;;  %v2877_v35 = vld [vmem:[%s9520_s24] sm:$0xff] }
 0x3d7   : > { %v2899_v16 = vmul.f32 %v10456_v38, %v2896_v1  ;;  %v2900_v28 = vmul.f32 %v10464_v41, %v2895_v47  ;;  %v2884_v48 = vsel %vm2883_vm12, %v2880_v45, %v2882_v20  ;;  %v2885_v49 = vsel %vm2883_vm12, %v2882_v20, %v2880_v45  ;;  %2992 = vmatpush.msra.mxu0 %v2910_v43 }
 0x3d8   : > { %3012 = vmatpush.msra.mxu1 %v2911_v8  ;;  %v2888_v50 = vmul.f32 %v10469_v44, %v2885_v49  ;;  %v2889_v51 = vmul.f32 %v10479_v57, %v2884_v48 }
 0x3d9   : > { %2993 = vmatpush.msra.mxu0 %v2899_v16 }
 0x3da   : > { %3013 = vmatpush.msra.mxu1 %v2900_v28 }
 0x3db   : > { %2994 = vmatpush.msra.mxu0 %v2888_v50 }
 0x3dc   : > { %3014 = vmatpush.msra.mxu1 %v2889_v51  ;;  %7719 = vmatmul.msk.f32.vlgmr.msra.gmra.mxu0 %vm2975_vm13, %v2877_v35 }
 0x3dd   : > { %7720 = vmatmul.msk.f32.vlgmr.msra.gmra.mxu1 %vm2975_vm13, %v2877_v35  ;;  %v2973_v53 = vpop.permute.xlu1 %2972 }
 0x459   : > { %v2996_v22 = vpop.f32.mrf.mxu0 }
 0x45a   : > { %v2997_v58 = vadd.f32 %v2996_v22, %v2973_v53  ;;  %v3016_v4 = vpop.f32.mrf.mxu1 }
 0x45b   : > { %v3017_v0 = vadd.f32 %v3016_v4, %v2973_v53 }
 0x45c   : > { %v3019_v9 = vmax.f32 %v2997_v58, 0.0 }
 0x45d   : > { %v3020_v11 = vmax.f32 %v3017_v0, 0.0 }
 0x45e   : > { %3073 = vrot.lane.b32.xlu1 %v3019_v9, %s12503_s23  ;;  %3081 = vrot.lane.b32.xlu2 %v3019_v9, %s9442_s26  ;;  %v3055_v45 = vmul.f32 %v3019_v9, %v10419_v56 }
 0x45f   : > { %3083 = vrot.lane.b32.xlu0 %v3020_v11, %s9442_s26  ;;  %v3056_v47 = vmul.f32 %v3020_v11, %v10422_v24 }
 0x466   : > { %3067 = vrot.lane.b32.xlu1 %v3020_v11, %s9440_s22  ;;  %3075 = vrot.lane.b32.xlu2 %v3020_v11, %s12503_s23 }
 0x467   : > { %3065 = vrot.lane.b32.xlu0 %v3019_v9, %s9440_s22 }
 0x46e   : > { %3047 = vrot.lane.b32.xlu1 %v3019_v9, %s12499_s1  ;;  %3057 = vrot.lane.b32.xlu2 %v3019_v9, %s12504_s15 }
 0x46f   : > { %3059 = vrot.lane.b32.xlu0 %v3020_v11, %s12504_s15 }
 0x476   : > { %3041 = vrot.lane.b32.xlu1 %v3020_v11, %s12501_s28  ;;  %3049 = vrot.lane.b32.xlu2 %v3020_v11, %s12499_s1  ;;  %s12533_s1 = sld [smem:[#allocation3_spill]] }
 0x477   : > { %3039 = vrot.lane.b32.xlu0 %v3019_v9, %s12501_s28 }
 0x47e   : > { %3023 = vrot.lane.b32.xlu1 %v3019_v9, %s12495_s0  ;;  %3031 = vrot.lane.b32.xlu2 %v3019_v9, %s12497_s2 }
 0x47f   : > { %3033 = vrot.lane.b32.xlu0 %v3020_v11, %s12497_s2  ;;  %s12532_s2 = sld [smem:[#allocation9_spill]] }
 0x486   : > { %3025 = vrot.lane.b32.xlu2 %v3020_v11, %s12495_s0  ;;  %s12531_s0 = sld [smem:[#allocation7_spill]] }
 0x487   : > { %3091 = vperm.xlu0 %8927, %v3022_v13  }
 0x4b8   : > { %v3082_v15 = vpop.permute.xlu2 %3081 }
 0x4c0   : > { %v3076_v46 = vpop.permute.xlu2 %3075 }
 0x4c8   : > { %v3058_v21 = vpop.permute.xlu2 %3057 }
 0x4d0   : > { %v3074_v3 = vpop.permute.xlu1 %3073  ;;  %v3050_v32 = vpop.permute.xlu2 %3049 }
 0x4d1   : > { %v3084_v2 = vpop.permute.xlu0 %3083  ;;  %v3077_v18 = vsel %vm2952_vm7, %v3074_v3, %v3076_v46  ;;  %v3078_v54 = vsel %vm2952_vm7, %v3076_v46, %v3074_v3 }
 0x4d2   : > { %v3085_v12 = vsel %vm2963_vm6, %v3082_v15, %v3084_v2  ;;  %v3086_v17 = vsel %vm2963_vm6, %v3084_v2, %v3082_v15  ;;  %v3079_v25 = vmul.f32 %v3077_v18, %v10382_v61  ;;  %v3080_v26 = vmul.f32 %v3078_v54, %v10385_v63  ;;  %v3021_v2 = vld [vmem:[%s9530_s6] sm:$0xff] }
 0x4d3   : > { %v3087_v59 = vmul.f32 %v10368_v60, %v3085_v12  ;;  %v3088_v55 = vmul.f32 %v10371_v10, %v3086_v17 }
 0x4d5   : > { %3104 = vmatpush.msra.mxu2 %v3087_v59  ;;  %3124 = vmatpush.msra.mxu3 %v3088_v55 }
 0x4d7   : > { %3105 = vmatpush.msra.mxu2 %v3079_v25  ;;  %3125 = vmatpush.msra.mxu3 %v3080_v26 }
 0x4d8   : > { %v3068_v6 = vpop.permute.xlu1 %3067  ;;  %v3032_v1 = vpop.permute.xlu2 %3031 }
 0x4d9   : > { %v3066_v27 = vpop.permute.xlu0 %3065 }
 0x4da   : > { %v3069_v31 = vsel %vm2941_vm8, %v3066_v27, %v3068_v6  ;;  %v3070_v37 = vsel %vm2941_vm8, %v3068_v6, %v3066_v27 }
 0x4db   : > { %v3071_v60 = vmul.f32 %v3069_v31, %v10388_v52  ;;  %v3072_v10 = vmul.f32 %v3070_v37, %v10391_v14  ;;  %v3227_v31 = vld [vmem:[%s9540_s20 + $0xb8] sm:$0xff] }
 0x4dc   : > { %v3211_v37 = vld [vmem:[%s9540_s20 + $0x38] sm:$0xff] }
 0x4dd   : > { %3106 = vmatpush.msra.mxu2 %v3071_v60  ;;  %3126 = vmatpush.msra.mxu3 %v3072_v10  ;;  %v3226_v60 = vld [vmem:[%s9540_s20 + $0xb0] sm:$0xff]  ;;  %v3235_v10 = vld [vmem:[%s9540_s20 + $0xf8] sm:$0xff] }
 0x4de   : > { %3280 = vmatpush.msrb.mxu0 %v3211_v37  ;;  %v3249_v37 = vld [vmem:[%s9540_s20 + $0x168] sm:$0xff] }
 0x4e0   : > { %v3048_v33 = vpop.permute.xlu1 %3047  ;;  %v3026_v22 = vpop.permute.xlu2 %3025 }
 0x4e1   : > { %v3060_v36 = vpop.permute.xlu0 %3059  ;;  %v3051_v42 = vsel %vm2916_vm9, %v3048_v33, %v3050_v32  ;;  %v3052_v8 = vsel %vm2916_vm9, %v3050_v32, %v3048_v33  ;;  %v3210_v32 = vld [vmem:[%s9540_s20 + $0x30] sm:$0xff]  ;;  %v3225_v33 = vld [vmem:[%s9540_s20 + $0xa8] sm:$0xff] }
 0x4e2   : > { %v3061_v39 = vsel %vm1173_vm1, %v3058_v21, %v3060_v36  ;;  %v3062_v23 = vsel %vm1173_vm1, %v3060_v36, %v3058_v21  ;;  %v3053_v20 = vmul.f32 %v3052_v8, %v10432_v29  ;;  %v3054_v16 = vmul.f32 %v3051_v42, %v10435_v30  ;;  %v3219_v36 = vld [vmem:[%s9540_s20 + $0x78] sm:$0xff]  ;;  %3281 = vmatpush.msrb.mxu0 %v3210_v32  ;;  %v3224_v42 = vld [vmem:[%s9540_s20 + $0xa0] sm:$0xff]  ;;  %v3254_v32 = vld [vmem:[%s9540_s20 + $0x190] sm:$0xff] }
 0x4e3   : > { %v3063_v40 = vmul.f32 %v3061_v39, %v10412_v5  ;;  %v3064_v43 = vmul.f32 %v3062_v23, %v10415_v19  ;;  %v3234_v39 = vld [vmem:[%s9540_s20 + $0xf0] sm:$0xff]  ;;  %v3209_v23 = vld [vmem:[%s9540_s20 + $0x28] sm:$0xff]  ;;  %3303 = vmatpush.msrb.mxu1 %v3219_v36  ;;  %v3208_v8 = vld [vmem:[%s9540_s20 + $0x20] sm:$0xff] }
 0x4e4   : > { %3282 = vmatpush.msrb.mxu0 %v3209_v23  ;;  %v3263_v36 = vld [vmem:[%s9540_s20 + $0x1d8] sm:$0xff]  ;;  %v3253_v23 = vld [vmem:[%s9540_s20 + $0x188] sm:$0xff] }
 0x4e5   : > { %3107 = vmatpush.msra.mxu2 %v3063_v40  ;;  %3127 = vmatpush.msra.mxu3 %v3064_v43  ;;  %v3218_v40 = vld [vmem:[%s9540_s20 + $0x70] sm:$0xff]  ;;  %v3233_v43 = vld [vmem:[%s9540_s20 + $0xe8] sm:$0xff] }
 0x4e6   : > { %3304 = vmatpush.msrb.mxu1 %v3218_v40  ;;  %3283 = vmatpush.msrb.mxu0 %v3208_v8  ;;  %v3247_v40 = vld [vmem:[%s9540_s20 + $0x158] sm:$0xff]  ;;  %v3252_v8 = vld [vmem:[%s9540_s20 + $0x180] sm:$0xff] }
 0x4e7   : > { %3108 = vmatpush.msra.mxu2 %v3055_v45  ;;  %3128 = vmatpush.msra.mxu3 %v3056_v47  ;;  %v3217_v45 = vld [vmem:[%s9540_s20 + $0x68] sm:$0xff]  ;;  %v3232_v47 = vld [vmem:[%s9540_s20 + $0xe0] sm:$0xff] }
 0x4e8   : > { %v3042_v28 = vpop.permute.xlu1 %3041  ;;  %3305 = vmatpush.msrb.mxu1 %v3217_v45  ;;  %v3246_v45 = vld [vmem:[%s9540_s20 + $0x150] sm:$0xff] }
 0x4e9   : > { %v3040_v48 = vpop.permute.xlu0 %3039  ;;  %3109 = vmatpush.msra.mxu2 %v3053_v20  ;;  %3129 = vmatpush.msra.mxu3 %v3054_v16  ;;  %v3207_v20 = vld [vmem:[%s9540_s20 + $0x18] sm:$0xff]  ;;  %v3216_v16 = vld [vmem:[%s9540_s20 + $0x60] sm:$0xff] }
 0x4ea   : > { %v3043_v49 = vsel %vm2905_vm10, %v3040_v48, %v3042_v28  ;;  %v3044_v50 = vsel %vm2905_vm10, %v3042_v28, %v3040_v48  ;;  %v3231_v28 = vld [vmem:[%s9540_s20 + $0xd8] sm:$0xff]  ;;  %v3222_v48 = vld [vmem:[%s9540_s20 + $0x90] sm:$0xff]  ;;  %3284 = vmatpush.msrb.mxu0 %v3207_v20  ;;  %3306 = vmatpush.msrb.mxu1 %v3216_v16  ;;  %v3245_v20 = vld [vmem:[%s9540_s20 + $0x148] sm:$0xff] }
 0x4eb   : > { %v3045_v35 = vmul.f32 %v3044_v50, %v10442_v62  ;;  %v3046_v51 = vmul.f32 %v3043_v49, %v10449_v34  ;;  %v3206_v49 = vld [vmem:[%s9540_s20 + $0x10] sm:$0xff]  ;;  %v3215_v50 = vld [vmem:[%s9540_s20 + $0x58] sm:$0xff]  ;;  %v3260_v16 = vld [vmem:[%s9540_s20 + $0x1c0] sm:$0xff] }
 0x4ec   : > { %3285 = vmatpush.msrb.mxu0 %v3206_v49  ;;  %3307 = vmatpush.msrb.mxu1 %v3215_v50 }
 0x4ed   : > { %3110 = vmatpush.msra.mxu2 %v3045_v35  ;;  %3130 = vmatpush.msra.mxu3 %v3046_v51  ;;  %v3230_v35 = vld [vmem:[%s9540_s20 + $0xd0] sm:$0xff]  ;;  %v3221_v51 = vld [vmem:[%s9540_s20 + $0x88] sm:$0xff] }
 0x4f0   : > { %v3024_v53 = vpop.permute.xlu1 %3023 }
 0x4f1   : > { %v3034_v58 = vpop.permute.xlu0 %3033  ;;  %v3027_v9 = vsel %vm2883_vm12, %v3024_v53, %v3026_v22  ;;  %v3028_v11 = vsel %vm2883_vm12, %v3026_v22, %v3024_v53  ;;  %v3205_v53 = vld [vmem:[%s9540_s20 + $0x8] sm:$0xff]  ;;  %v3220_v22 = vld [vmem:[%s9540_s20 + $0x80] sm:$0xff] }
 0x4f2   : > { %v3035_v4 = vsel %vm2894_vm11, %v3032_v1, %v3034_v58  ;;  %v3036_v0 = vsel %vm2894_vm11, %v3034_v58, %v3032_v1  ;;  %v3029_v46 = vmul.f32 %v3028_v11, %v10469_v44  ;;  %v3030_v3 = vmul.f32 %v3027_v9, %v10479_v57  ;;  %v3223_v1 = vld [vmem:[%s9540_s20 + $0x98] sm:$0xff]  ;;  %3286 = vmatpush.msrb.mxu0 %v3205_v53  ;;  %v3214_v58 = vld [vmem:[%s9540_s20 + $0x50] sm:$0xff]  ;;  %v3204_v9 = vld [vmem:[%s9540_s20] sm:$0xff] }
 0x4f3   : > { %v3037_v13 = vmul.f32 %v3036_v0, %v10456_v38  ;;  %v3038_v15 = vmul.f32 %v3035_v4, %v10464_v41  ;;  %v3229_v4 = vld [vmem:[%s9540_s20 + $0xc8] sm:$0xff]  ;;  %v3259_v0 = vld [vmem:[%s9540_s20 + $0x1b8] sm:$0xff]  ;;  %3308 = vmatpush.msrb.mxu1 %v3214_v58 }
 0x4f4   : > { %3287 = vmatpush.msrb.mxu0 %v3204_v9  ;;  %v3213_v11 = vld [vmem:[%s9540_s20 + $0x48] sm:$0xff] }
 0x4f5   : > { %3111 = vmatpush.msra.mxu2 %v3037_v13  ;;  %3131 = vmatpush.msra.mxu3 %v3038_v15  ;;  %v3228_v13 = vld [vmem:[%s9540_s20 + $0xc0] sm:$0xff]  ;;  %v3243_v15 = vld [vmem:[%s9540_s20 + $0x138] sm:$0xff] }
 0x4f6   : > { %3309 = vmatpush.msrb.mxu1 %v3213_v11  ;;  %3372 = vmatpush.msra.mxu0 %v3243_v15 }
 0x4f7   : > { %3112 = vmatpush.msra.mxu2 %v3029_v46  ;;  %3132 = vmatpush.msra.mxu3 %v3030_v3  ;;  %v3258_v46 = vld [vmem:[%s9540_s20 + $0x1b0] sm:$0xff]  ;;  %v3267_v3 = vld [vmem:[%s9540_s20 + $0x1f8] sm:$0xff] }
 0x4f8   : > { %7721 = vmatmul.msk.f32.vlgmr.msra.gmra.mxu2 %vm2975_vm13, %v3021_v2  ;;  %7722 = vmatmul.msk.f32.vlgmr.msra.gmra.mxu3 %vm2975_vm13, %v3021_v2  ;;  %v3212_v2 = vld [vmem:[%s9540_s20 + $0x40] sm:$0xff] }
 0x4f9   : > { %v3092_v12 = vpop.permute.xlu0 %3091  ;;  %3326 = vmatpush.msrb.mxu2 %v3227_v31  ;;  %3349 = vmatpush.msrb.mxu3 %v3235_v10  ;;  %v3255_v31 = vld [vmem:[%s9540_s20 + $0x198] sm:$0xff] }
 0x4fa   : > { %3310 = vmatpush.msrb.mxu1 %v3212_v2  ;;  %v3239_v10 = vld [vmem:[%s9540_s20 + $0x118] sm:$0xff] }
 0x4fb   : > { %3327 = vmatpush.msrb.mxu2 %v3226_v60  ;;  %3350 = vmatpush.msrb.mxu3 %v3234_v39  ;;  %v3264_v60 = vld [vmem:[%s9540_s20 + $0x1e0] sm:$0xff]  ;;  %v3238_v39 = vld [vmem:[%s9540_s20 + $0x110] sm:$0xff] }
 0x4fd   : > { %3328 = vmatpush.msrb.mxu2 %v3225_v33  ;;  %3351 = vmatpush.msrb.mxu3 %v3233_v43  ;;  %v3248_v33 = vld [vmem:[%s9540_s20 + $0x160] sm:$0xff]  ;;  %v3262_v43 = vld [vmem:[%s9540_s20 + $0x1d0] sm:$0xff] }
 0x4ff   : > { %3329 = vmatpush.msrb.mxu2 %v3224_v42  ;;  %3352 = vmatpush.msrb.mxu3 %v3232_v47  ;;  %v3237_v42 = vld [vmem:[%s9540_s20 + $0x108] sm:$0xff] }
 0x500   : > { %v3261_v47 = vld [vmem:[%s9540_s20 + $0x1c8] sm:$0xff] }
 0x501   : > { %3330 = vmatpush.msrb.mxu2 %v3223_v1  ;;  %3353 = vmatpush.msrb.mxu3 %v3231_v28  ;;  %v3236_v1 = vld [vmem:[%s9540_s20 + $0x100] sm:$0xff] }
 0x502   : > { %v3244_v28 = vld [vmem:[%s9540_s20 + $0x140] sm:$0xff] }
 0x503   : > { %3331 = vmatpush.msrb.mxu2 %v3222_v48  ;;  %3354 = vmatpush.msrb.mxu3 %v3230_v35  ;;  %v9448_v48 = vmov 1983009808  }
 0x504   : > { %v3153_v49 = vunpack.c.l.s4 %v9448_v48 }
 0x505   : > { %3332 = vmatpush.msrb.mxu2 %v3221_v51  ;;  %3355 = vmatpush.msrb.mxu3 %v3229_v4  ;;  %v9449_v4 = vmov 1934713408  }
 0x506   : > { %v10634_v50 = vunpack.c.0.s8 %v3153_v49 }
 0x507   : > { %3333 = vmatpush.msrb.mxu2 %v3220_v22  ;;  %3356 = vmatpush.msrb.mxu3 %v3228_v13 }
 0x509   : > { %3418 = vmatpush.msra.mxu2 %v3259_v0  ;;  %3441 = vmatpush.msra.mxu3 %v3267_v3  ;;  %v3177_v0 = vunpack.c.l.s4 %v9449_v4 }
 0x50b   : > { %3419 = vmatpush.msra.mxu2 %v3258_v46 }
 0x57b   : > { %v3114_v17 = vpop.f32.mrf.mxu2  ;;  %v3134_v18 = vpop.f32.mrf.mxu3 }
 0x57c   : > { %v3115_v54 = vadd.f32 %v3114_v17, %v3092_v12  ;;  %v3135_v21 = vadd.f32 %v3134_v18, %v3092_v12  ;;  %v3242_v12 = vld [vmem:[%s9540_s20 + $0x130] sm:$0xff]  ;;  %v3257_v17 = vld [vmem:[%s9540_s20 + $0x1a8] sm:$0xff]  ;;  %v3251_v18 = vld [vmem:[%s9540_s20 + $0x178] sm:$0xff] }
 0x57d   : > { %3373 = vmatpush.msra.mxu0 %v3242_v12  ;;  %3420 = vmatpush.msra.mxu2 %v3257_v17  ;;  %v10644_v12 = vunpack.c.0.s8 %v3177_v0 }
 0x57e   : > { %v3137_v59 = vmax.f32 %v3115_v54, 0.0  ;;  %v3138_v55 = vmax.f32 %v3135_v21, 0.0  ;;  %v3266_v54 = vld [vmem:[%s9540_s20 + $0x1f0] sm:$0xff]  ;;  %v3241_v21 = vld [vmem:[%s9540_s20 + $0x128] sm:$0xff]  ;;  %3395 = vmatpush.msra.mxu1 %v3251_v18 }
 0x57f   : > { %3442 = vmatpush.msra.mxu3 %v3266_v54  ;;  %3374 = vmatpush.msra.mxu0 %v3241_v21 }
 0x580   : > { %v3150_v25 = vrot.slane %v3137_v59, 4  ;;  %v3147_v26 = vrot.slane %v3138_v55, 4  ;;  %3144 = vrot.lane.b32.xlu1 %v3138_v55, %s9447_s11  ;;  %3140 = vrot.lane.b32.xlu2 %v3137_v59, %s9447_s11 }
 0x582   : > { %v10565_v6 = vsel %vm3148_vm14, %v3147_v26, %v3137_v59  ;;  %v10568_v27 = vsel %vm3148_vm14, %v3138_v55, %v3150_v25  ;;  %v3256_v59 = vld [vmem:[%s9540_s20 + $0x1a0] sm:$0xff]  ;;  %v3250_v55 = vld [vmem:[%s9540_s20 + $0x170] sm:$0xff]  ;;  %v3265_v25 = vld [vmem:[%s9540_s20 + $0x1e8] sm:$0xff] }
 0x583   : > { %v3240_v26 = vld [vmem:[%s9540_s20 + $0x120] sm:$0xff]  ;;  %3421 = vmatpush.msra.mxu2 %v3256_v59  ;;  %3396 = vmatpush.msra.mxu1 %v3250_v55  ;;  %v3155_v53 = vperm.slane %v10565_v6, %v10634_v50  ;;  %v3159_v58 = vperm.slane %v10568_v27, %v10634_v50 }
 0x584   : > { %3443 = vmatpush.msra.mxu3 %v3265_v25  ;;  %3375 = vmatpush.msra.mxu0 %v3240_v26 }
 0x585   : > { %3422 = vmatpush.msra.mxu2 %v3255_v31  ;;  %3397 = vmatpush.msra.mxu1 %v3249_v37  ;;  %v3174_v46 = vrot.slane %v3155_v53, 4  ;;  %v3186_v2 = vrot.slane %v3159_v58, 4 }
 0x586   : > { %3444 = vmatpush.msra.mxu3 %v3264_v60  ;;  %3376 = vmatpush.msra.mxu0 %v3239_v10 }
 0x587   : > { %3423 = vmatpush.msra.mxu2 %v3254_v32  ;;  %3398 = vmatpush.msra.mxu1 %v3248_v33 }
 0x588   : > { %3445 = vmatpush.msra.mxu3 %v3263_v36  ;;  %3377 = vmatpush.msra.mxu0 %v3238_v39 }
 0x589   : > { %3424 = vmatpush.msra.mxu2 %v3253_v23  ;;  %3399 = vmatpush.msra.mxu1 %v3247_v40  ;;  %v3477_v23 = vld [vmem:[%s9550_s4 + $0x18] sm:$0xff]  ;;  %v3476_v40 = vld [vmem:[%s9550_s4 + $0x10] sm:$0xff] }
 0x58a   : > { %3446 = vmatpush.msra.mxu3 %v3262_v43  ;;  %3378 = vmatpush.msra.mxu0 %v3237_v42  ;;  %v3475_v43 = vld [vmem:[%s9550_s4 + $0x8] sm:$0xff]  ;;  %v3474_v42 = vld [vmem:[%s9550_s4] sm:$0xff] }
 0x58b   : > { %3425 = vmatpush.msra.mxu2 %v3252_v8  ;;  %3400 = vmatpush.msra.mxu1 %v3246_v45 }
 0x58c   : > { %3447 = vmatpush.msra.mxu3 %v3261_v47  ;;  %3379 = vmatpush.msra.mxu0 %v3236_v1 }
 0x58d   : > { %3401 = vmatpush.msra.mxu1 %v3245_v20 }
 0x58e   : > { %3448 = vmatpush.msra.mxu3 %v3260_v16 }
 0x58f   : > { %3402 = vmatpush.msra.mxu1 %v3244_v28 }
 0x5da   : > { %v3141_v35 = vpop.permute.xlu2 %3140 }
 0x5db   : > { %v3162_v51 = vrot.slane %v3141_v35, 4 }
 0x5f2   : > { %v3145_v22 = vpop.permute.xlu1 %3144 }
 0x5f3   : > { %v3160_v9 = vrot.slane %v3145_v22, 4  ;;  %v3163_v11 = vsel %vm3148_vm14, %v3145_v22, %v3162_v51 }
 0x5f4   : > { %v3171_v13 = vperm.slane %v3163_v11, %v10634_v50 }
 0x5f5   : > { %v3161_v15 = vsel %vm3148_vm14, %v3160_v9, %v3141_v35 }
 0x5f6   : > { %v3167_v3 = vperm.slane %v3161_v15, %v10634_v50  ;;  %v3184_v18 = vrot.slane %v3171_v13, 4  ;;  %v3187_v54 = vsel %vm3148_vm14, %v3171_v13, %v3186_v2 }
 0x5f7   : > { %v3195_v26 = vperm.slane %v3187_v54, %v10644_v12 }
 0x5f8   : > { %v3172_v6 = vrot.slane %v3167_v3, 4  ;;  %v3175_v17 = vsel %vm3148_vm14, %v3167_v3, %v3174_v46  ;;  %v3185_v25 = vsel %vm3148_vm14, %v3184_v18, %v3159_v58  ;;  %v9282_v3 = vld [vmem:[%s12529_s16] ss:$0 sm:$0xff]  ;;  %s7189_s16 = sshll.u32 %s12569_s10, 2 }
 0x5f9   : > { %v3183_v27 = vperm.slane %v3175_v17, %v10644_v12  ;;  %v3191_v60 = vperm.slane %v3185_v25, %v10644_v12  ;;  %v3202_v32 = vrot.slane %v3195_v26, 4  ;;  %v9283_v18 = vld [vmem:[%s12530_s18] ss:$0 sm:$0xff]  ;;  %s1052_s18 = scalar_lea.vmem %s12533_s1, %s7189_s16  ;;  %s12534_s1 = sld [smem:[#allocation8_spill]] }
 0x5fa   : > { %v3173_v21 = vsel %vm3148_vm14, %v3172_v6, %v3155_v53  ;;  %v3515_v25 = vld [vmem:[%s12531_s0] sm:$0xff]  ;;  %s12535_s0 = sld [smem:[#allocation10_spill]] }
 0x5fb   : > { %7725 = vmatmul.msk.f32.vlgmr.msrb.gmra.mxu2 %vm3268_vm15, %v3183_v27  ;;  %v3179_v59 = vperm.slane %v3173_v21, %v10644_v12  ;;  %v3198_v55 = vrot.slane %v3183_v27, 4  ;;  %v3200_v33 = vrot.slane %v3191_v60, 4  ;;  %v3203_v36 = vsel %vm3148_vm14, 0.0, %v3202_v32  ;;  %s12536_s16 = sld [smem:[#allocation12_spill]] }
 0x5fd   : > { %7723 = vmatmul.msk.f32.vlgmr.msrb.gmra.mxu0 %vm3268_vm15, %v3179_v59  ;;  %v3199_v31 = vsel %vm3148_vm14, 0.0, %v3198_v55  ;;  %v3196_v37 = vrot.slane %v3179_v59, 4  ;;  %v3201_v39 = vsel %vm3148_vm14, 0.0, %v3200_v33 }
 0x5fe   : > { %7726 = vmatmul.msk.f32.vlgmr.msrb.gmra.mxu3 %vm3268_vm15, %v3199_v31  ;;  %3497 = vmatpush.msrb.mxu0 %v3477_v23  ;;  %v3552_v31 = vld [vmem:[%s12532_s2 + $0x38] sm:$0xff]  ;;  %v3551_v23 = vld [vmem:[%s12532_s2 + $0x30] sm:$0xff] }
 0x5ff   : > { %v3197_v10 = vsel %vm3148_vm14, 0.0, %v3196_v37  ;;  %v3556_v37 = vld [vmem:[%s12532_s2 + $0x58] sm:$0xff]  ;;  %3644 = vmatpush.msrb.mxu3 %v3552_v31 }
 0x600   : > { %7724 = vmatmul.msk.f32.vlgmr.msrb.gmra.mxu1 %vm3268_vm15, %v3197_v10  ;;  %3498 = vmatpush.msrb.mxu0 %v3476_v40  ;;  %v3505_v10 = vld [vmem:[%s1052_s18] sm:$0xf]  ;;  %v3555_v40 = vld [vmem:[%s12532_s2 + $0x50] sm:$0xff]  ;;  %s12538_s18 = smov 8  }
 0x601   : > { %3539 = vmatpush.msrb.mxu1 %v3515_v25  ;;  %3645 = vmatpush.msrb.mxu3 %v3551_v23  ;;  %v9290_v23 = vld [vmem:[%s12535_s0 + $0x7] ss:$0 sm:$0xff] }
 0x602   : > { %3499 = vmatpush.msrb.mxu0 %v3475_v43  ;;  %v3559_v43 = vld [vmem:[%s12532_s2 + $0x70] sm:$0xff] }
 0x603   : > { %7729 = vmatmul.msk.f32.vlgmr.msra.gmra.mxu2 %vm3268_vm15, %v3195_v26  ;;  %v3548_v26 = vld [vmem:[%s12532_s2 + $0x18] sm:$0xff] }
 0x604   : > { %3500 = vmatpush.msrb.mxu0 %v3474_v42  ;;  %3624 = vmatpush.msrb.mxu2 %v3548_v26  ;;  %v3546_v42 = vld [vmem:[%s12532_s2 + $0x8] sm:$0xff] }
 0x605   : > { %7727 = vmatmul.msk.f32.vlgmr.msra.gmra.mxu0 %vm3268_vm15, %v3191_v60  ;;  %v3560_v60 = vld [vmem:[%s12532_s2 + $0x78] sm:$0xff] }
 0x606   : > { %7730 = vmatmul.msk.f32.vlgmr.msra.gmra.mxu3 %vm3268_vm15, %v3203_v36  ;;  %3664 = vmatpush.msra.mxu0 %v3556_v37  ;;  %v9287_v37 = vld [vmem:[%s12535_s0] ss:$0 sm:$0xff] }
 0x608   : > { %7728 = vmatmul.msk.f32.vlgmr.msra.gmra.mxu1 %vm3268_vm15, %v3201_v39  ;;  %v3547_v39 = vld [vmem:[%s12532_s2 + $0x10] sm:$0xff]  ;;  %3665 = vmatpush.msra.mxu0 %v3555_v40 }
 0x609   : > { %3684 = vmatpush.msra.mxu1 %v3560_v60  ;;  %3625 = vmatpush.msrb.mxu2 %v3547_v39  ;;  %v9288_v60 = vld [vmem:[%s12535_s0 + $0x1] ss:$0 sm:$0xff]  ;;  %v9289_v39 = vld [vmem:[%s12535_s0 + $0x6] ss:$0 sm:$0xff] }
 0x60b   : > { %3685 = vmatpush.msra.mxu1 %v3559_v43  ;;  %3626 = vmatpush.msrb.mxu2 %v3546_v42 }
 0x67a   : > { %v3289_v8 = vpop.f32.mrf.mxu0 }
 0x67b   : > { %v3454_v47 = vsel %vm3453_vm2, %v3289_v8, 0.0  ;;  %v3550_v8 = vld [vmem:[%s12532_s2 + $0x28] sm:$0xff] }
 0x67c   : > { %3646 = vmatpush.msrb.mxu3 %v3550_v8 }
 0x67d   : > { %v3312_v45 = vpop.f32.mrf.mxu1 }
 0x67e   : > { %v3455_v1 = vsel %vm3453_vm2, %v3312_v45, 0.0  ;;  %v3335_v20 = vpop.f32.mrf.mxu2  ;;  %v3554_v45 = vld [vmem:[%s12532_s2 + $0x48] sm:$0xff] }
 0x67f   : > { %v3456_v16 = vadd.f32 %v3455_v1, %v3454_v47  ;;  %v3457_v28 = vsel %vm3453_vm2, %v3335_v20, 0.0  ;;  %v3558_v47 = vld [vmem:[%s12532_s2 + $0x68] sm:$0xff]  ;;  %v3545_v1 = vld [vmem:[%s12532_s2] sm:$0xff]  ;;  %3666 = vmatpush.msra.mxu0 %v3554_v45 }
 0x680   : > { %v3549_v20 = vld [vmem:[%s12532_s2 + $0x20] sm:$0xff]  ;;  %3686 = vmatpush.msra.mxu1 %v3558_v47  ;;  %3627 = vmatpush.msrb.mxu2 %v3545_v1 }
 0x681   : > { %v3458_v48 = vadd.f32 %v3457_v28, %v3456_v16  ;;  %v3358_v49 = vpop.f32.mrf.mxu3  ;;  %v3553_v16 = vld [vmem:[%s12532_s2 + $0x40] sm:$0xff]  ;;  %3647 = vmatpush.msrb.mxu3 %v3549_v20 }
 0x682   : > { %v3459_v35 = vsel %vm3453_vm2, %v3358_v49, 0.0  ;;  %v3381_v51 = vpop.f32.mrf.mxu0  ;;  %v3557_v28 = vld [vmem:[%s12532_s2 + $0x60] sm:$0xff]  ;;  %3667 = vmatpush.msra.mxu0 %v3553_v16  ;;  %v3568_v49 = vld [vmem:[%s12532_s2 + $0xb8] sm:$0xff] }
 0x683   : > { %v3460_v53 = vadd.f32 %v3459_v35, %v3458_v48  ;;  %v3461_v22 = vsel %vm3453_vm2, %v3381_v51, 0.0  ;;  %3687 = vmatpush.msra.mxu1 %v3557_v28  ;;  %v3564_v48 = vld [vmem:[%s12532_s2 + $0x98] sm:$0xff]  ;;  %3724 = vmatpush.msra.mxu3 %v3568_v49 }
 0x684   : > { %v3572_v35 = vld [vmem:[%s12532_s2 + $0xd8] sm:$0xff]  ;;  %3704 = vmatpush.msra.mxu2 %v3564_v48 }
 0x685   : > { %v3462_v58 = vadd.f32 %v3461_v22, %v3460_v53  ;;  %v3404_v4 = vpop.f32.mrf.mxu1  ;;  %v3576_v51 = vld [vmem:[%s12532_s2 + $0xf8] sm:$0xff]  ;;  %v3563_v53 = vld [vmem:[%s12532_s2 + $0x90] sm:$0xff] }
 0x686   : > { %v3463_v0 = vsel %vm3453_vm2, %v3404_v4, 0.0  ;;  %v3427_v9 = vpop.f32.mrf.mxu2  ;;  %v3567_v22 = vld [vmem:[%s12532_s2 + $0xb0] sm:$0xff]  ;;  %3705 = vmatpush.msra.mxu2 %v3563_v53 }
 0x687   : > { %v3464_v11 = vadd.f32 %v3463_v0, %v3462_v58  ;;  %v3465_v13 = vsel %vm3453_vm2, %v3427_v9, 0.0  ;;  %v3571_v58 = vld [vmem:[%s12532_s2 + $0xd0] sm:$0xff]  ;;  %v3562_v0 = vld [vmem:[%s12532_s2 + $0x88] sm:$0xff]  ;;  %3725 = vmatpush.msra.mxu3 %v3567_v22 }
 0x688   : > { %v3575_v4 = vld [vmem:[%s12532_s2 + $0xf0] sm:$0xff]  ;;  %v3566_v9 = vld [vmem:[%s12532_s2 + $0xa8] sm:$0xff]  ;;  %3706 = vmatpush.msra.mxu2 %v3562_v0 }
 0x689   : > { %v3466_v15 = vadd.f32 %v3465_v13, %v3464_v11  ;;  %v3450_v46 = vpop.f32.mrf.mxu3  ;;  %v3570_v11 = vld [vmem:[%s12532_s2 + $0xc8] sm:$0xff]  ;;  %3726 = vmatpush.msra.mxu3 %v3566_v9 }
 0x68a   : > { %v3467_v2 = vsel %vm3453_vm2, %v3450_v46, 0.0  ;;  %v3574_v13 = vld [vmem:[%s12532_s2 + $0xe8] sm:$0xff]  ;;  %v3565_v46 = vld [vmem:[%s12532_s2 + $0xa0] sm:$0xff] }
 0x68b   : > { %v3468_v6 = vadd.f32 %v3467_v2, %v3466_v15  ;;  %v3561_v15 = vld [vmem:[%s12532_s2 + $0x80] sm:$0xff]  ;;  %3727 = vmatpush.msra.mxu3 %v3565_v46 }
 0x68c   : > { %v3573_v2 = vld [vmem:[%s12532_s2 + $0xe0] sm:$0xff]  ;;  %3707 = vmatpush.msra.mxu2 %v3561_v15 }
 0x68d   : > { %v3473_v17 = vadd.f32 %v9282_v3, %v3468_v6  ;;  %v3569_v3 = vld [vmem:[%s12532_s2 + $0xc0] sm:$0xff] }
 0x68e   : > { %v9284_v6 = vld [vmem:[%s12534_s1] ss:$0 sm:$0xff]  ;;  %s12539_s1 = smov 9  }
 0x68f   : > { %7731 = vmatmul.msk.f32.vlgmr.msrb.gmra.mxu0 %vm1721_vm5, %v3473_v17 }
 0x690   : > { %3744 = vmatpush.msrb.mxu0 %v3572_v35  ;;  %v9291_v35 = vld [vmem:[%s12535_s0 + $0x4] ss:$0 sm:$0xff] }
 0x692   : > { %3745 = vmatpush.msrb.mxu0 %v3571_v58 }
 0x694   : > { %3746 = vmatpush.msrb.mxu0 %v3570_v11 }
 0x696   : > { %3747 = vmatpush.msrb.mxu0 %v3569_v3 }
 0x70c   : > { %v3502_v27 = vpop.f32.mrf.mxu0 }
 0x70d   : > { %v10681_v54 = vadd.f32 %v9283_v18, %v3502_v27 }
 0x70f   : > { %v3506_v21 = vmul.f32 0.5, %v10681_v54 }
 0x711   : > { %v3507_v59 = vmul.f32 1.442695, %v3506_v21  ;;  %v9285_v21 = vld [vmem:[%s12535_s0 + $0x2] ss:$0 sm:$0xff] }
 0x713   : > { %9293 = vpow2.f32 %v3507_v59  ;;  %v9286_v59 = vld [vmem:[%s12535_s0 + $0x3] ss:$0 sm:$0xff] }
 0x719   : > { %v9294_v55 = vpop.eup %9293 }
 0x71a   : > { %3510 = vrot.lane.b32.xlu0 %v9294_v55, %s12503_s23 }
 0x78c   : > { %v3511_v32 = vpop.permute.xlu0 %3510 }
 0x78d   : > { %v3513_v33 = vmul.f32 %v3511_v32, %v3505_v10 }
 0x78f   : > { %v3514_v36 = vadd.f32 %v3513_v33, %v10681_v54 }
 0x791   : > { %7732 = vmatmul.msk.f32.vlgmr.msrb.gmra.mxu1 %vm3520_vm3, %v3514_v36 }
 0x792   : > { %3764 = vmatpush.msrb.mxu1 %v3576_v51  ;;  %v9292_v51 = vld [vmem:[%s12535_s0 + $0x5] ss:$0 sm:$0xff]  ;;  %s12548_s0 = smov 126  }
 0x794   : > { %3765 = vmatpush.msrb.mxu1 %v3575_v4 }
 0x796   : > { %3766 = vmatpush.msrb.mxu1 %v3574_v13 }
 0x798   : > { %3767 = vmatpush.msrb.mxu1 %v3573_v2 }
 0x80e   : > { %v3541_v17 = vpop.f32.mrf.mxu1 }
 0x80f   : > { %v3542_v18 = vadd.f32 %v9284_v6, %v3541_v17 }
 0x811   : > { %v3544_v27 = vmax.f32 %v3542_v18, 0.0 }
 0x813   : > { %7733 = vmatmul.msk.f32.vlgmr.msrb.gmra.mxu2 %vm1721_vm5, %v3544_v27  ;;  %7734 = vmatmul.msk.f32.vlgmr.msrb.gmra.mxu3 %vm1721_vm5, %v3544_v27 }
 0x814   : > { %7735 = vmatmul.msk.f32.vlgmr.msra.gmra.mxu0 %vm1721_vm5, %v3544_v27  ;;  %7736 = vmatmul.msk.f32.vlgmr.msra.gmra.mxu1 %vm1721_vm5, %v3544_v27 }
 0x81b   : > { %7737 = vmatmul.msk.f32.vlgmr.msra.gmra.mxu2 %vm1721_vm5, %v3544_v27  ;;  %7738 = vmatmul.msk.f32.vlgmr.msra.gmra.mxu3 %vm1721_vm5, %v3544_v27 }
 0x81c   : > { %7739 = vmatmul.msk.f32.vlgmr.msrb.gmra.mxu0 %vm1721_vm5, %v3544_v27  ;;  %7740 = vmatmul.msk.f32.vlgmr.msrb.gmra.mxu1 %vm1721_vm5, %v3544_v27 }
 0x891   : > { %v3669_v55 = vpop.f32.mrf.mxu0  ;;  %v3689_v25 = vpop.f32.mrf.mxu1 }
 0x892   : > { %v3670_v26 = vadd.f32 %v9285_v21, %v3669_v55  ;;  %v3690_v31 = vadd.f32 %v9286_v59, %v3689_v25 }
 0x894   : > { %v3774_v10 = vmax.f32 %v3670_v26, 0.0  ;;  %v3775_v32 = vmax.f32 %v3690_v31, 0.0 }
 0x896   : > { %v3629_v33 = vpop.f32.mrf.mxu2  ;;  %v3649_v36 = vpop.f32.mrf.mxu3  ;;  %v3780_v42 = vrot.slane %v3774_v10, 4  ;;  %v3786_v8 = vrot.slane %v3775_v32, 4 }
 0x897   : > { %v3630_v40 = vadd.f32 %v9287_v37, %v3629_v33  ;;  %v3650_v43 = vadd.f32 %v9288_v60, %v3649_v36 }
 0x899   : > { %v3772_v45 = vmax.f32 %v3630_v40, 0.0  ;;  %v3773_v47 = vmax.f32 %v3650_v43, 0.0  ;;  %v3749_v1 = vpop.f32.mrf.mxu0  ;;  %v3769_v20 = vpop.f32.mrf.mxu1 }
 0x89a   : > { %v3750_v16 = vadd.f32 %v9289_v39, %v3749_v1  ;;  %v3770_v28 = vadd.f32 %v9290_v23, %v3769_v20 }
 0x89b   : > { %v3781_v48 = vsel %vm3148_vm14, %v3780_v42, %v3772_v45  ;;  %v3787_v49 = vsel %vm3148_vm14, %v3786_v8, %v3773_v47 }
 0x89c   : > { %v3785_v53 = vperm.slane %v3781_v48, %v10634_v50  ;;  %v3791_v22 = vperm.slane %v3787_v49, %v10634_v50  ;;  %v3778_v58 = vmax.f32 %v3750_v16, 0.0  ;;  %v3779_v4 = vmax.f32 %v3770_v28, 0.0  ;;  %v3847_v16 = vld [vmem:[%s12536_s16] sm:$0xff]  ;;  %s12540_s16 = sld [smem:[#allocation11_spill]] }
 0x89e   : > { %v3806_v0 = vrot.slane %v3785_v53, 4  ;;  %v3804_v9 = vrot.slane %v3791_v22, 4  ;;  %v3709_v11 = vpop.f32.mrf.mxu2  ;;  %v3729_v13 = vpop.f32.mrf.mxu3  ;;  %v3792_v3 = vrot.slane %v3778_v58, 4  ;;  %v3798_v2 = vrot.slane %v3779_v4, 4  ;;  %v10788_v4 = vld [vmem:[%s9485_s21 + $0x18] ss:$0 sm:$0xff] }
 0x89f   : > { %v3710_v15 = vadd.f32 %v9291_v35, %v3709_v11  ;;  %v3730_v46 = vadd.f32 %v9292_v51, %v3729_v13 }
 0x8a0   : > { %v3807_v18 = vsel %vm3148_vm14, %v3791_v22, %v3806_v0  ;;  %v3805_v27 = vsel %vm3148_vm14, %v3804_v9, %v3785_v53  ;;  %v10784_v22 = vld [vmem:[%s9485_s21 + $0x10] ss:$0 sm:$0xff] }
 0x8a1   : > { %v3776_v6 = vmax.f32 %v3710_v15, 0.0  ;;  %v3777_v17 = vmax.f32 %v3730_v46, 0.0  ;;  %v3815_v26 = vperm.slane %v3807_v18, %v10644_v12  ;;  %v3811_v31 = vperm.slane %v3805_v27, %v10644_v12 }
 0x8a3   : > { %v3793_v21 = vsel %vm3148_vm14, %v3792_v3, %v3776_v6  ;;  %v3799_v59 = vsel %vm3148_vm14, %v3798_v2, %v3777_v17  ;;  %v3834_v36 = vrot.slane %v3815_v26, 4  ;;  %v3830_v23 = vrot.slane %v3811_v31, 4 }
 0x8a4   : > { %v3797_v55 = vperm.slane %v3793_v21, %v10634_v50  ;;  %v3803_v25 = vperm.slane %v3799_v59, %v10634_v50 }
 0x8a6   : > { %v3818_v37 = vrot.slane %v3797_v55, 4  ;;  %v3816_v60 = vrot.slane %v3803_v25, 4 }
 0x8a8   : > { %v3819_v10 = vsel %vm3148_vm14, %v3803_v25, %v3818_v37  ;;  %v3817_v32 = vsel %vm3148_vm14, %v3816_v60, %v3797_v55 }
 0x8a9   : > { %v3827_v33 = vperm.slane %v3819_v10, %v10644_v12  ;;  %v3823_v39 = vperm.slane %v3817_v32, %v10644_v12 }
 0x8ab   : > { %v3832_v40 = vrot.slane %v3827_v33, 4  ;;  %v3835_v43 = vsel %vm3148_vm14, %v3827_v33, %v3834_v36  ;;  %v3828_v50 = vrot.slane %v3823_v39, 4  ;;  %v3831_v42 = vsel %vm3148_vm14, %v3823_v39, %v3830_v23 }
 0x8ac   : > { %3841 = vrot.lane.b32.xlu2 %v3835_v43, %s9447_s11  ;;  %3837 = vrot.lane.b32.xlu1 %v3831_v42, %s9447_s11  ;;  %s12537_s11 = smov 1  }
 0x8ad   : > { %v3833_v8 = vsel %vm3148_vm14, %v3832_v40, %v3815_v26  ;;  %v3829_v45 = vsel %vm3148_vm14, %v3828_v50, %v3811_v31  ;;  %vm7028_vm14 = vcmask 60416  }
 0x906   : > { %v3842_v47 = vpop.permute.xlu2 %3841 }
 0x907   : > { %v3845_v1 = vsel %vm3268_vm15, %v3833_v8, %v3842_v47 }
 0x908   : > { %3908 = vrot.lane.b32.xlu1 %v3845_v1, %s9442_s26  ;;  %v3881_v60 = vmul.f32 %v3845_v1, %v10422_v24 }
 0x91e   : > { %v3838_v12 = vpop.permute.xlu1 %3837 }
 0x91f   : > { %v3844_v20 = vsel %vm3268_vm15, %v3829_v45, %v3838_v12 }
 0x920   : > { %3890 = vrot.lane.b32.xlu1 %v3844_v20, %s9440_s22  ;;  %3898 = vrot.lane.b32.xlu2 %v3844_v20, %s12503_s23  ;;  %v3880_v37 = vmul.f32 %v3844_v20, %v10419_v56 }
 0x921   : > { %3906 = vrot.lane.b32.xlu0 %v3844_v20, %s9442_s26 }
 0x928   : > { %3884 = vrot.lane.b32.xlu1 %v3845_v1, %s12504_s15  ;;  %3892 = vrot.lane.b32.xlu2 %v3845_v1, %s9440_s22 }
 0x929   : > { %3900 = vrot.lane.b32.xlu0 %v3845_v1, %s12503_s23 }
 0x930   : > { %3864 = vrot.lane.b32.xlu1 %v3844_v20, %s12501_s28  ;;  %3872 = vrot.lane.b32.xlu2 %v3844_v20, %s12537_s11 }
 0x931   : > { %3882 = vrot.lane.b32.xlu0 %v3844_v20, %s12504_s15 }
 0x938   : > { %3858 = vrot.lane.b32.xlu1 %v3845_v1, %s12538_s18  ;;  %3866 = vrot.lane.b32.xlu2 %v3845_v1, %s12501_s28  ;;  %s12541_s28 = sld [smem:[#allocation14_spill]] }
 0x939   : > { %3874 = vrot.lane.b32.xlu0 %v3845_v1, %s12537_s11 }
 0x940   : > { %3916 = vperm.xlu1 %8974, %v3847_v16   ;;  %3848 = vrot.lane.b32.xlu2 %v3844_v20, %s12539_s1 }
 0x941   : > { %3856 = vrot.lane.b32.xlu0 %v3844_v20, %s12538_s18 }
 0x949   : > { %3850 = vrot.lane.b32.xlu0 %v3845_v1, %s12539_s1 }
 0x97a   : > { %v3909_v28 = vpop.permute.xlu1 %3908  ;;  %v3899_v48 = vpop.permute.xlu2 %3898 }
 0x982   : > { %v3893_v9 = vpop.permute.xlu2 %3892 }
 0x98a   : > { %v3873_v21 = vpop.permute.xlu2 %3872 }
 0x992   : > { %v3891_v53 = vpop.permute.xlu1 %3890  ;;  %v3867_v32 = vpop.permute.xlu2 %3866 }
 0x993   : > { %v3907_v49 = vpop.permute.xlu0 %3906  ;;  %v3894_v13 = vsel %vm2941_vm8, %v3891_v53, %v3893_v9  ;;  %v3895_v15 = vsel %vm2941_vm8, %v3893_v9, %v3891_v53 }
 0x994   : > { %v3910_v35 = vsel %vm2963_vm6, %v3907_v49, %v3909_v28  ;;  %v3911_v51 = vsel %vm2963_vm6, %v3909_v28, %v3907_v49  ;;  %v3896_v17 = vmul.f32 %v3894_v13, %v10388_v52  ;;  %v3897_v18 = vmul.f32 %v3895_v15, %v10391_v14 }
 0x995   : > { %v3912_v58 = vmul.f32 %v10784_v22, %v3910_v35  ;;  %v3913_v0 = vmul.f32 %v10788_v4, %v3911_v51 }
 0x997   : > { %3929 = vmatpush.msrb.mxu2 %v3912_v58  ;;  %3949 = vmatpush.msrb.mxu3 %v3913_v0  ;;  %v3846_v58 = vld [vmem:[%s12540_s16] sm:$0xff]  ;;  %s12542_s16 = smov 7  }
 0x99a   : > { %v3885_v27 = vpop.permute.xlu1 %3884  ;;  %v3849_v28 = vpop.permute.xlu2 %3848 }
 0x99b   : > { %v3901_v11 = vpop.permute.xlu0 %3900 }
 0x99c   : > { %v3902_v46 = vsel %vm2952_vm7, %v3899_v48, %v3901_v11  ;;  %v3903_v3 = vsel %vm2952_vm7, %v3901_v11, %v3899_v48 }
 0x99d   : > { %v3904_v2 = vmul.f32 %v3902_v46, %v10382_v61  ;;  %v3905_v6 = vmul.f32 %v3903_v3, %v10385_v63 }
 0x99f   : > { %3930 = vmatpush.msrb.mxu2 %v3904_v2  ;;  %3950 = vmatpush.msrb.mxu3 %v3905_v6  ;;  %v3965_v2 = vld [vmem:[%s12541_s28] sm:$0xff]  ;;  %s9450_s28 = smov 90  }
 0x9a1   : > { %3931 = vmatpush.msrb.mxu2 %v3896_v17  ;;  %3951 = vmatpush.msrb.mxu3 %v3897_v18 }
 0x9a2   : > { %v3865_v10 = vpop.permute.xlu1 %3864 }
 0x9a3   : > { %v3883_v59 = vpop.permute.xlu0 %3882  ;;  %v3868_v36 = vsel %vm2905_vm10, %v3865_v10, %v3867_v32  ;;  %v3869_v39 = vsel %vm2905_vm10, %v3867_v32, %v3865_v10 }
 0x9a4   : > { %v3886_v55 = vsel %vm1173_vm1, %v3883_v59, %v3885_v27  ;;  %v3887_v25 = vsel %vm1173_vm1, %v3885_v27, %v3883_v59  ;;  %v3870_v42 = vmul.f32 %v3869_v39, %v10442_v62  ;;  %v3871_v8 = vmul.f32 %v3868_v36, %v10449_v34 }
 0x9a5   : > { %v3888_v26 = vmul.f32 %v3886_v55, %v10412_v5  ;;  %v3889_v31 = vmul.f32 %v3887_v25, %v10415_v19 }
 0x9a7   : > { %3932 = vmatpush.msrb.mxu2 %v3888_v26  ;;  %3952 = vmatpush.msrb.mxu3 %v3889_v31 }
 0x9a9   : > { %3933 = vmatpush.msrb.mxu2 %v3880_v37  ;;  %3953 = vmatpush.msrb.mxu3 %v3881_v60 }
 0x9aa   : > { %v3859_v45 = vpop.permute.xlu1 %3858 }
 0x9ab   : > { %v3875_v33 = vpop.permute.xlu0 %3874 }
 0x9ac   : > { %v3876_v23 = vsel %vm2916_vm9, %v3873_v21, %v3875_v33  ;;  %v3877_v40 = vsel %vm2916_vm9, %v3875_v33, %v3873_v21 }
 0x9ad   : > { %v3878_v43 = vmul.f32 %v3877_v40, %v10432_v29  ;;  %v3879_v50 = vmul.f32 %v3876_v23, %v10435_v30 }
 0x9af   : > { %3934 = vmatpush.msrb.mxu2 %v3878_v43  ;;  %3954 = vmatpush.msrb.mxu3 %v3879_v50 }
 0x9b1   : > { %3935 = vmatpush.msrb.mxu2 %v3870_v42  ;;  %3955 = vmatpush.msrb.mxu3 %v3871_v8 }
 0x9b2   : > { %v3917_v0 = vpop.permute.xlu1 %3916 }
 0x9b3   : > { %v3857_v47 = vpop.permute.xlu0 %3856 }
 0x9b4   : > { %v3860_v1 = vsel %vm2894_vm11, %v3857_v47, %v3859_v45  ;;  %v3861_v12 = vsel %vm2894_vm11, %v3859_v45, %v3857_v47 }
 0x9b5   : > { %v3862_v20 = vmul.f32 %v3861_v12, %v10456_v38  ;;  %v3863_v16 = vmul.f32 %v3860_v1, %v10464_v41 }
 0x9b7   : > { %3936 = vmatpush.msrb.mxu2 %v3862_v20  ;;  %3956 = vmatpush.msrb.mxu3 %v3863_v16 }
 0x9bb   : > { %v3851_v48 = vpop.permute.xlu0 %3850 }
 0x9bc   : > { %v3852_v49 = vsel %vm2883_vm12, %v3849_v28, %v3851_v48  ;;  %v3853_v35 = vsel %vm2883_vm12, %v3851_v48, %v3849_v28 }
 0x9bd   : > { %v3854_v51 = vmul.f32 %v3853_v35, %v10469_v44  ;;  %v3855_v53 = vmul.f32 %v3852_v49, %v10479_v57 }
 0x9bf   : > { %3937 = vmatpush.msrb.mxu2 %v3854_v51  ;;  %3957 = vmatpush.msrb.mxu3 %v3855_v53 }
 0x9c0   : > { %7741 = vmatmul.msk.f32.vlgmr.msrb.gmra.mxu2 %vm2975_vm13, %v3846_v58  ;;  %7742 = vmatmul.msk.f32.vlgmr.msrb.gmra.mxu3 %vm2975_vm13, %v3846_v58 }
 0xa43   : > { %v3939_v9 = vpop.f32.mrf.mxu2  ;;  %v3959_v11 = vpop.f32.mrf.mxu3 }
 0xa44   : > { %v3940_v13 = vadd.f32 %v3939_v9, %v3917_v0  ;;  %v3960_v15 = vadd.f32 %v3959_v11, %v3917_v0 }
 0xa46   : > { %v10838_v46 = vmax.f32 %v3940_v13, 0.0  ;;  %v10840_v3 = vmax.f32 %v3960_v15, 0.0 }
 0xa48   : > { %4026 = vrot.lane.b32.xlu0 %v10840_v3, %s9442_s26  ;;  %4016 = vrot.lane.b32.xlu1 %v10838_v46, %s12503_s23 }
 0xa49   : > { %4024 = vrot.lane.b32.xlu2 %v10838_v46, %s9442_s26  ;;  %s12544_s26 = sld [smem:[#allocation13_spill]] }
 0xa50   : > { %4008 = vrot.lane.b32.xlu0 %v10838_v46, %s9440_s22  ;;  %4010 = vrot.lane.b32.xlu1 %v10840_v3, %s9440_s22  ;;  %s12543_s22 = sld [smem:[#allocation15_spill]] }
 0xa51   : > { %4018 = vrot.lane.b32.xlu2 %v10840_v3, %s12503_s23  ;;  %s12508_s23 = smov 109  }
 0xa56   : > { %v8083_v36 = vld [vmem:[%s12543_s22 + $0x2a0] sm:$0xf]  ;;  %v8758_v39 = vld [vmem:[%s12543_s22 + $0x2cc] sm:$0xf0] }
 0xa57   : > { %v8854_v23 = vld [vmem:[%s12543_s22 + $0x5cc] sm:$0xf0]  ;;  %v8035_v42 = vld [vmem:[%s12543_s22 + $0x240] sm:$0xf] }
 0xa58   : > { %4002 = vrot.lane.b32.xlu0 %v10840_v3, %s12504_s15  ;;  %3990 = vrot.lane.b32.xlu1 %v10838_v46, %s12537_s11  ;;  %v8746_v45 = vld [vmem:[%s12543_s22 + $0x26c] sm:$0xf0]  ;;  %v8419_v47 = vld [vmem:[%s12543_s22 + $0x540] sm:$0xf] }
 0xa59   : > { %4000 = vrot.lane.b32.xlu2 %v10838_v46, %s12504_s15  ;;  %v8842_v1 = vld [vmem:[%s12543_s22 + $0x56c] sm:$0xf0]  ;;  %v8036_v12 = vor.u32 %v8746_v45, %v8035_v42  ;;  %v7987_v16 = vld [vmem:[%s12543_s22 + $0x1e0] sm:$0xf]  ;;  %v8752_v42 = vld [vmem:[%s12543_s22 + $0x2a4] sm:$0xf] }
 0xa5a   : > { %v8420_v20 = vor.u32 %v8842_v1, %v8419_v47  ;;  %v8830_v28 = vld [vmem:[%s12543_s22 + $0x50c] sm:$0xf0]  ;;  %v7939_v51 = vld [vmem:[%s12543_s22 + $0x180] sm:$0xf]  ;;  %s12510_s15 = smov 126  }
 0xa5b   : > { %v8722_v9 = vld [vmem:[%s12543_s22 + $0x1ac] sm:$0xf0]  ;;  %v8323_v15 = vld [vmem:[%s12543_s22 + $0x480] sm:$0xf] }
 0xa60   : > { %3982 = vrot.lane.b32.xlu0 %v10838_v46, %s12542_s16  ;;  %3984 = vrot.lane.b32.xlu1 %v10840_v3, %s12542_s16  ;;  %s9453_s16 = smov 108  }
 0xa61   : > { %3992 = vrot.lane.b32.xlu2 %v10840_v3, %s12537_s11  ;;  %s9451_s11 = smov 89  }
 0xa68   : > { %3976 = vrot.lane.b32.xlu0 %v10840_v3, %s12538_s18  ;;  %3966 = vrot.lane.b32.xlu1 %v10838_v46, %s12539_s1 }
 0xa69   : > { %3974 = vrot.lane.b32.xlu2 %v10838_v46, %s12538_s18 }
 0xa70   : > { %4034 = vperm.xlu0 %8927, %v3965_v2   ;;  %v8818_v2 = vld [vmem:[%s12543_s22 + $0x4ac] sm:$0xf0] }
 0xa71   : > { %3968 = vrot.lane.b32.xlu2 %v10840_v3, %s12539_s1  ;;  %s12506_s1 = smov 88  }
 0xaa3   : > { %v4025_v6 = vpop.permute.xlu2 %4024 }
 0xaab   : > { %v4019_v17 = vpop.permute.xlu2 %4018 }
 0xab3   : > { %v4001_v21 = vpop.permute.xlu2 %4000 }
 0xaba   : > { %v4027_v18 = vpop.permute.xlu0 %4026  ;;  %v4017_v27 = vpop.permute.xlu1 %4016 }
 0xabb   : > { %v4028_v59 = vsel %vm2963_vm6, %v4025_v6, %v4027_v18  ;;  %v4029_v55 = vsel %vm2963_vm6, %v4027_v18, %v4025_v6  ;;  %v4020_v25 = vsel %vm2952_vm7, %v4017_v27, %v4019_v17  ;;  %v4021_v26 = vsel %vm2952_vm7, %v4019_v17, %v4017_v27  ;;  %v3993_v8 = vpop.permute.xlu2 %3992  ;;  %v7891_v27 = vld [vmem:[%s12543_s22 + $0x120] sm:$0xf] }
 0xabc   : > { %v4030_v31 = vmul.f32 %v10784_v22, %v4028_v59  ;;  %v4031_v37 = vmul.f32 %v10788_v4, %v4029_v55  ;;  %v4022_v60 = vmul.f32 %v4020_v25, %v10382_v61  ;;  %v4023_v10 = vmul.f32 %v4021_v26, %v10385_v63  ;;  %v8467_v22 = vld [vmem:[%s12543_s22 + $0x5a0] sm:$0xf]  ;;  %v8710_v55 = vld [vmem:[%s12543_s22 + $0x14c] sm:$0xf0] }
 0xabd   : > { %v8084_v63 = vor.u32 %v8758_v39, %v8083_v36  ;;  %v8468_v50 = vor.u32 %v8854_v23, %v8467_v22  ;;  %v7940_v18 = vor.u32 %v8722_v9, %v7939_v51  ;;  %v8324_v59 = vor.u32 %v8818_v2, %v8323_v15  ;;  %v8227_v36 = vld [vmem:[%s12543_s22 + $0x3c0] sm:$0xf]  ;;  %v8794_v39 = vld [vmem:[%s12543_s22 + $0x3ec] sm:$0xf0]  ;;  %v8037_v9 = vld [vmem:[%s12543_s22 + $0x270] sm:$0xf0] }
 0xabe   : > { %4047 = vmatpush.msra.mxu0 %v4030_v31  ;;  %4067 = vmatpush.msra.mxu1 %v4031_v37  ;;  %v8275_v31 = vld [vmem:[%s12543_s22 + $0x420] sm:$0xf]  ;;  %v8806_v37 = vld [vmem:[%s12543_s22 + $0x44c] sm:$0xf0]  ;;  %v8421_v15 = vld [vmem:[%s12543_s22 + $0x570] sm:$0xf0] }
 0xabf   : > { %5236 = vmatpush.bf16.msra.mxu2 %v8084_v63  ;;  %5249 = vmatpush.bf16.msra.mxu3 %v8468_v50  ;;  %v8686_v63 = vld [vmem:[%s12543_s22 + $0x8c] sm:$0xf0]  ;;  %v8179_v23 = vld [vmem:[%s12543_s22 + $0x360] sm:$0xf]  ;;  %v8091_v2 = vld [vmem:[%s12543_s22 + $0x2a8] sm:$0xf] }
 0xac0   : > { %4048 = vmatpush.msra.mxu0 %v4022_v60  ;;  %4068 = vmatpush.msra.mxu1 %v4023_v10  ;;  %v8276_v60 = vor.u32 %v8806_v37, %v8275_v31  ;;  %v8698_v10 = vld [vmem:[%s12543_s22 + $0xec] sm:$0xf0]  ;;  %v8843_v31 = vld [vmem:[%s12543_s22 + $0x574] sm:$0xf0]  ;;  %v7989_v37 = vld [vmem:[%s12543_s22 + $0x210] sm:$0xf0] }
 0xac1   : > { %v8770_v51 = vld [vmem:[%s12543_s22 + $0x32c] sm:$0xf0]  ;;  %vm5795_vm6 = vcmp.lt.s32.totalorder %v9735_v7, 89  ;;  %vm5758_vm7 = vcmp.lt.s32.totalorder %v9735_v7, 90 }
 0xac2   : > { %v4009_v32 = vpop.permute.xlu0 %4008  ;;  %v4011_v33 = vpop.permute.xlu1 %4010 }
 0xac3   : > { %v4012_v4 = vsel %vm2941_vm8, %v4009_v32, %v4011_v33  ;;  %v4013_v61 = vsel %vm2941_vm8, %v4011_v33, %v4009_v32  ;;  %5237 = vmatpush.bf16.msra.mxu2 %v8036_v12  ;;  %5250 = vmatpush.bf16.msra.mxu3 %v8420_v20  ;;  %vm5721_vm8 = vcmp.lt.s32.totalorder %v9735_v7, 107 }
 0xac4   : > { %v4014_v40 = vmul.f32 %v4012_v4, %v10388_v52  ;;  %v4015_v43 = vmul.f32 %v4013_v61, %v10391_v14  ;;  %v8734_v52 = vld [vmem:[%s12543_s22 + $0x20c] sm:$0xf0]  ;;  %v8371_v14 = vld [vmem:[%s12543_s22 + $0x4e0] sm:$0xf]  ;;  %v8228_v61 = vor.u32 %v8794_v39, %v8227_v36  ;;  %v8716_v36 = vld [vmem:[%s12543_s22 + $0x184] sm:$0xf] }
 0xac5   : > { %v7988_v48 = vor.u32 %v8734_v52, %v7987_v16  ;;  %v8372_v0 = vor.u32 %v8830_v28, %v8371_v14  ;;  %v7795_v4 = vld [vmem:[%s12543_s22 + $0x60] sm:$0xf]  ;;  %v8848_v16 = vld [vmem:[%s12543_s22 + $0x5a4] sm:$0xf]  ;;  %v8469_v52 = vld [vmem:[%s12543_s22 + $0x5d0] sm:$0xf0] }
 0xac6   : > { %4049 = vmatpush.msra.mxu0 %v4014_v40  ;;  %4069 = vmatpush.msra.mxu1 %v4015_v43  ;;  %v8782_v40 = vld [vmem:[%s12543_s22 + $0x38c] sm:$0xf0]  ;;  %v7747_v14 = vld [vmem:[%s12543_s22] sm:$0xf]  ;;  %v7941_v39 = vld [vmem:[%s12543_s22 + $0x1b0] sm:$0xf0] }
 0xac7   : > { %5238 = vmatpush.bf16.msra.mxu2 %v7988_v48  ;;  %5251 = vmatpush.bf16.msra.mxu3 %v8372_v0  ;;  %v8180_v45 = vor.u32 %v8782_v40, %v8179_v23  ;;  %v8740_v0 = vld [vmem:[%s12543_s22 + $0x244] sm:$0xf]  ;;  %v7947_v23 = vld [vmem:[%s12543_s22 + $0x188] sm:$0xf]  ;;  %v8723_v40 = vld [vmem:[%s12543_s22 + $0x1b4] sm:$0xf0] }
 0xaca   : > { %v4003_v49 = vpop.permute.xlu0 %4002  ;;  %v3991_v35 = vpop.permute.xlu1 %3990 }
 0xacb   : > { %v4004_v53 = vsel %vm1173_vm1, %v4001_v21, %v4003_v49  ;;  %v4005_v58 = vsel %vm1173_vm1, %v4003_v49, %v4001_v21  ;;  %v3994_v6 = vsel %vm2916_vm9, %v3991_v35, %v3993_v8  ;;  %v3995_v17 = vsel %vm2916_vm9, %v3993_v8, %v3991_v35  ;;  %v3975_v21 = vpop.permute.xlu2 %3974  ;;  %5239 = vmatpush.bf16.msra.mxu2 %v7940_v18  ;;  %v8085_v8 = vld [vmem:[%s12543_s22 + $0x2d0] sm:$0xf0]  ;;  %v8674_v49 = vld [vmem:[%s12543_s22 + $0x2c] sm:$0xf0]  ;;  %v8131_v35 = vld [vmem:[%s12543_s22 + $0x300] sm:$0xf] }
 0xacc   : > { %v4006_v11 = vmul.f32 %v4004_v53, %v10412_v5  ;;  %v4007_v13 = vmul.f32 %v4005_v58, %v10415_v19  ;;  %v3998_v5 = vmul.f32 %v10838_v46, %v10419_v56  ;;  %v3999_v19 = vmul.f32 %v10840_v3, %v10422_v24  ;;  %v7843_v3 = vld [vmem:[%s12543_s22 + $0xc0] sm:$0xf]  ;;  %5252 = vmatpush.bf16.msra.mxu3 %v8324_v59  ;;  %v8759_v18 = vld [vmem:[%s12543_s22 + $0x2d4] sm:$0xf0] }
 0xacd   : > { %v3996_v25 = vmul.f32 %v3995_v17, %v10432_v29  ;;  %v3997_v26 = vmul.f32 %v3994_v6, %v10435_v30  ;;  %v7892_v56 = vor.u32 %v8710_v55, %v7891_v27  ;;  %v7844_v22 = vor.u32 %v8698_v10, %v7843_v3  ;;  %v3964_v53 = vld [vmem:[%s12544_s26] sm:$0xff]  ;;  %v8043_v27 = vld [vmem:[%s12543_s22 + $0x248] sm:$0xf]  ;;  %v8831_v10 = vld [vmem:[%s12543_s22 + $0x514] sm:$0xf0]  ;;  %s9454_s26 = smov 107  }
 0xace   : > { %4050 = vmatpush.msra.mxu0 %v4006_v11  ;;  %4070 = vmatpush.msra.mxu1 %v4007_v13  ;;  %v8088_v58 = vor.u32 %v8752_v42, %v8085_v8  ;;  %v7748_v6 = vor.u32 %v8674_v49, %v7747_v14  ;;  %v8132_v17 = vor.u32 %v8770_v51, %v8131_v35  ;;  %v8704_v42 = vld [vmem:[%s12543_s22 + $0x124] sm:$0xf]  ;;  %v7893_v8 = vld [vmem:[%s12543_s22 + $0x150] sm:$0xf0]  ;;  %v8807_v14 = vld [vmem:[%s12543_s22 + $0x454] sm:$0xf0] }
 0xacf   : > { %5240 = vmatpush.bf16.msra.mxu2 %v7892_v56  ;;  %v8040_v59 = vor.u32 %v8740_v0, %v8037_v9  ;;  %v8824_v56 = vld [vmem:[%s12543_s22 + $0x4e4] sm:$0xf]  ;;  %v7845_v35 = vld [vmem:[%s12543_s22 + $0xf0] sm:$0xf0]  ;;  %v7851_v9 = vld [vmem:[%s12543_s22 + $0xc8] sm:$0xf] }
 0xad0   : > { %4051 = vmatpush.msra.mxu0 %v3998_v5  ;;  %4071 = vmatpush.msra.mxu1 %v3999_v19  ;;  %v8475_v5 = vld [vmem:[%s12543_s22 + $0x5a8] sm:$0xf]  ;;  %v8855_v19 = vld [vmem:[%s12543_s22 + $0x5d4] sm:$0xf0]  ;;  %v8692_v49 = vld [vmem:[%s12543_s22 + $0xc4] sm:$0xf] }
 0xad1   : > { %5253 = vmatpush.bf16.msra.mxu3 %v8276_v60  ;;  %v8379_v60 = vld [vmem:[%s12543_s22 + $0x4e8] sm:$0xf]  ;;  %v8788_v51 = vld [vmem:[%s12543_s22 + $0x3c4] sm:$0xf]  ;;  %vm5684_vm9 = vcmp.lt.s32.totalorder %v9735_v7, 108 }
 0xad2   : > { %v3983_v24 = vpop.permute.xlu0 %3982  ;;  %v3985_v46 = vpop.permute.xlu1 %3984  ;;  %4052 = vmatpush.msra.mxu0 %v3996_v25  ;;  %4072 = vmatpush.msra.mxu1 %v3997_v26  ;;  %v8728_v25 = vld [vmem:[%s12543_s22 + $0x1e4] sm:$0xf]  ;;  %v8427_v26 = vld [vmem:[%s12543_s22 + $0x548] sm:$0xf] }
 0xad3   : > { %v3986_v29 = vsel %vm2905_vm10, %v3983_v24, %v3985_v46  ;;  %v3987_v30 = vsel %vm2905_vm10, %v3985_v46, %v3983_v24  ;;  %5241 = vmatpush.bf16.msra.mxu2 %v7844_v22  ;;  %v8373_v24 = vld [vmem:[%s12543_s22 + $0x510] sm:$0xf0]  ;;  %v8428_v3 = vor.u32 %v8843_v31, %v8427_v26  ;;  %v8812_v22 = vld [vmem:[%s12543_s22 + $0x484] sm:$0xf]  ;;  %v8093_v26 = vld [vmem:[%s12543_s22 + $0x2d8] sm:$0xf0] }
 0xad4   : > { %v3988_v32 = vmul.f32 %v3987_v30, %v10442_v62  ;;  %v3989_v33 = vmul.f32 %v3986_v29, %v10449_v34  ;;  %v3969_v62 = vpop.permute.xlu2 %3968  ;;  %v7796_v34 = vor.u32 %v8686_v63, %v7795_v4  ;;  %v7995_v29 = vld [vmem:[%s12543_s22 + $0x1e8] sm:$0xf]  ;;  %v8735_v30 = vld [vmem:[%s12543_s22 + $0x214] sm:$0xf0]  ;;  %v8325_v4 = vld [vmem:[%s12543_s22 + $0x4b0] sm:$0xf0]  ;;  %v8380_v63 = vor.u32 %v8831_v10, %v8379_v60 }
 0xad5   : > { %5254 = vmatpush.bf16.msra.mxu3 %v8228_v61  ;;  %v7996_v61 = vor.u32 %v8735_v30, %v7995_v29  ;;  %v8849_v31 = vld [vmem:[%s12543_s22 + $0x5ac] sm:$0xf]  ;;  %v8045_v30 = vld [vmem:[%s12543_s22 + $0x278] sm:$0xf0]  ;;  %vm5647_vm10 = vcmp.lt.s32.totalorder %v9735_v7, 109 }
 0xad6   : > { %4053 = vmatpush.msra.mxu0 %v3988_v32  ;;  %4073 = vmatpush.msra.mxu1 %v3989_v33  ;;  %v7992_v32 = vor.u32 %v8728_v25, %v7989_v37  ;;  %v8376_v33 = vor.u32 %v8824_v56, %v8373_v24  ;;  %v8753_v25 = vld [vmem:[%s12543_s22 + $0x2ac] sm:$0xf]  ;;  %v8477_v37 = vld [vmem:[%s12543_s22 + $0x5d8] sm:$0xf0] }
 0xad7   : > { %5242 = vmatpush.bf16.msra.mxu2 %v7796_v34  ;;  %v8819_v34 = vld [vmem:[%s12543_s22 + $0x4b4] sm:$0xf0]  ;;  %v8741_v29 = vld [vmem:[%s12543_s22 + $0x24c] sm:$0xf]  ;;  %v8429_v10 = vld [vmem:[%s12543_s22 + $0x578] sm:$0xf0] }
 0xad8   : > { %v8837_v60 = vld [vmem:[%s12543_s22 + $0x54c] sm:$0xf] }
 0xad9   : > { %5255 = vmatpush.bf16.msra.mxu3 %v8180_v45  ;;  %v8800_v45 = vld [vmem:[%s12543_s22 + $0x424] sm:$0xf] }
 0xada   : > { %v3977_v43 = vpop.permute.xlu0 %3976  ;;  %v3967_v50 = vpop.permute.xlu1 %3966 }
 0xadb   : > { %v3978_v47 = vsel %vm2894_vm11, %v3975_v21, %v3977_v43  ;;  %v3979_v1 = vsel %vm2894_vm11, %v3977_v43, %v3975_v21  ;;  %v3970_v12 = vsel %vm2883_vm12, %v3967_v50, %v3969_v62  ;;  %v3971_v20 = vsel %vm2883_vm12, %v3969_v62, %v3967_v50  ;;  %v8747_v21 = vld [vmem:[%s12543_s22 + $0x274] sm:$0xf0]  ;;  %5243 = vmatpush.bf16.msra.mxu2 %v7748_v6  ;;  %v8331_v62 = vld [vmem:[%s12543_s22 + $0x488] sm:$0xf]  ;;  %v7797_v6 = vld [vmem:[%s12543_s22 + $0x90] sm:$0xf0] }
 0xadc   : > { %v3980_v28 = vmul.f32 %v3979_v1, %v10456_v38  ;;  %v3981_v48 = vmul.f32 %v3978_v47, %v10464_v41  ;;  %v3972_v11 = vmul.f32 %v3971_v20, %v10469_v44  ;;  %v3973_v13 = vmul.f32 %v3970_v12, %v10479_v57  ;;  %v8836_v41 = vld [vmem:[%s12543_s22 + $0x544] sm:$0xf]  ;;  %v8277_v47 = vld [vmem:[%s12543_s22 + $0x450] sm:$0xf0]  ;;  %v7899_v20 = vld [vmem:[%s12543_s22 + $0x128] sm:$0xf] }
 0xadd   : > { %v8472_v38 = vor.u32 %v8848_v16, %v8469_v52  ;;  %v8092_v44 = vor.u32 %v8759_v18, %v8091_v2  ;;  %v8476_v57 = vor.u32 %v8855_v19, %v8475_v5  ;;  %v8424_v55 = vor.u32 %v8836_v41, %v8421_v15  ;;  %5256 = vmatpush.bf16.msra.mxu3 %v8132_v17  ;;  %v8711_v16 = vld [vmem:[%s12543_s22 + $0x154] sm:$0xf0]  ;;  %v8283_v52 = vld [vmem:[%s12543_s22 + $0x428] sm:$0xf]  ;;  %v8680_v2 = vld [vmem:[%s12543_s22 + $0x64] sm:$0xf] }
 0xade   : > { %4054 = vmatpush.msra.mxu0 %v3980_v28  ;;  %4074 = vmatpush.msra.mxu1 %v3981_v48  ;;  %v8044_v46 = vor.u32 %v8747_v21, %v8043_v27  ;;  %v7944_v43 = vor.u32 %v8716_v36, %v7941_v39  ;;  %v8328_v50 = vor.u32 %v8812_v22, %v8325_v4  ;;  %v8776_v17 = vld [vmem:[%s12543_s22 + $0x364] sm:$0xf]  ;;  %v8181_v18 = vld [vmem:[%s12543_s22 + $0x390] sm:$0xf0]  ;;  %v8729_v36 = vld [vmem:[%s12543_s22 + $0x1ec] sm:$0xf] }
 0xadf   : > { %5288 = vmatpush.bf16.msrb.mxu2 %v8092_v44  ;;  %v7948_v1 = vor.u32 %v8723_v40, %v7947_v23  ;;  %v8332_v12 = vor.u32 %v8819_v34, %v8331_v62  ;;  %v7896_v28 = vor.u32 %v8704_v42, %v7893_v8  ;;  %v8280_v48 = vor.u32 %v8800_v45, %v8277_v47  ;;  %v8668_v27 = vld [vmem:[%s12543_s22 + $0x4] sm:$0xf]  ;;  %v7749_v21 = vld [vmem:[%s12543_s22 + $0x30] sm:$0xf0]  ;;  %v7997_v39 = vld [vmem:[%s12543_s22 + $0x218] sm:$0xf0] }
 0xae0   : > { %4055 = vmatpush.msra.mxu0 %v3972_v11  ;;  %4075 = vmatpush.msra.mxu1 %v3973_v13  ;;  %v8284_v0 = vor.u32 %v8807_v14, %v8283_v52  ;;  %v8699_v11 = vld [vmem:[%s12543_s22 + $0xf4] sm:$0xf0]  ;;  %v8235_v13 = vld [vmem:[%s12543_s22 + $0x3c8] sm:$0xf]  ;;  %v7848_v41 = vor.u32 %v8692_v49, %v7845_v35  ;;  %v7800_v44 = vor.u32 %v8680_v2, %v7797_v6  ;;  %v8825_v22 = vld [vmem:[%s12543_s22 + $0x4ec] sm:$0xf] }
 0xae1   : > { %7743 = vmatmul.msk.f32.vlgmr.msra.gmra.mxu0 %vm2975_vm13, %v3964_v53  ;;  %7744 = vmatmul.msk.f32.vlgmr.msra.gmra.mxu1 %vm2975_vm13, %v3964_v53  ;;  %v8229_v53 = vld [vmem:[%s12543_s22 + $0x3f0] sm:$0xf0]  ;;  %v7852_v5 = vor.u32 %v8699_v11, %v7851_v9  ;;  %v7752_v56 = vor.u32 %v8668_v27, %v7749_v21  ;;  %v8381_v4 = vld [vmem:[%s12543_s22 + $0x518] sm:$0xf0]  ;;  %v8717_v23 = vld [vmem:[%s12543_s22 + $0x18c] sm:$0xf] }
 0xae2   : > { %5262 = vmatpush.bf16.msrb.mxu0 %v8088_v58  ;;  %5275 = vmatpush.bf16.msrb.mxu1 %v8472_v38  ;;  %v7900_v58 = vor.u32 %v8711_v16, %v7899_v20  ;;  %v8795_v38 = vld [vmem:[%s12543_s22 + $0x3f4] sm:$0xf0]  ;;  %v8232_v15 = vor.u32 %v8788_v51, %v8229_v53  ;;  %v7949_v40 = vld [vmem:[%s12543_s22 + $0x1b8] sm:$0xf0]  ;;  %v8813_v62 = vld [vmem:[%s12543_s22 + $0x48c] sm:$0xf] }
 0xae3   : > { %5301 = vmatpush.bf16.msrb.mxu3 %v8476_v57  ;;  %5289 = vmatpush.bf16.msrb.mxu2 %v8044_v46  ;;  %v8236_v19 = vor.u32 %v8795_v38, %v8235_v13  ;;  %v8184_v57 = vor.u32 %v8776_v17, %v8181_v18  ;;  %v8096_v46 = vor.u32 %v8753_v25, %v8093_v26  ;;  %v8333_v34 = vld [vmem:[%s12543_s22 + $0x4b8] sm:$0xf0]  ;;  %v8705_v42 = vld [vmem:[%s12543_s22 + $0x12c] sm:$0xf]  ;;  %v7803_v49 = vld [vmem:[%s12543_s22 + $0x68] sm:$0xf]  ;;  %v4035_v25 = vpop.permute.xlu0 %4034 }
 0xae4   : > { %v7901_v8 = vld [vmem:[%s12543_s22 + $0x158] sm:$0xf0]  ;;  %v8801_v45 = vld [vmem:[%s12543_s22 + $0x42c] sm:$0xf]  ;;  %v8687_v35 = vld [vmem:[%s12543_s22 + $0x94] sm:$0xf0] }
 0xae5   : > { %v8285_v47 = vld [vmem:[%s12543_s22 + $0x458] sm:$0xf0]  ;;  %v8693_v20 = vld [vmem:[%s12543_s22 + $0xcc] sm:$0xf]  ;;  %v8187_v51 = vld [vmem:[%s12543_s22 + $0x368] sm:$0xf]  ;;  %v7804_v53 = vor.u32 %v8687_v35, %v7803_v49 }
 0xae6   : > { %5263 = vmatpush.bf16.msrb.mxu0 %v8040_v59  ;;  %5276 = vmatpush.bf16.msrb.mxu1 %v8424_v55  ;;  %v8764_v59 = vld [vmem:[%s12543_s22 + $0x304] sm:$0xf]  ;;  %v8133_v55 = vld [vmem:[%s12543_s22 + $0x330] sm:$0xf0]  ;;  %v7853_v16 = vld [vmem:[%s12543_s22 + $0xf8] sm:$0xf0] }
 0xae7   : > { %5302 = vmatpush.bf16.msrb.mxu3 %v8428_v3  ;;  %5290 = vmatpush.bf16.msrb.mxu2 %v7996_v61  ;;  %v8136_v24 = vor.u32 %v8764_v59, %v8133_v55  ;;  %v8480_v3 = vor.u32 %v8849_v31, %v8477_v37  ;;  %v8000_v61 = vor.u32 %v8729_v36, %v7997_v39  ;;  %v8789_v52 = vld [vmem:[%s12543_s22 + $0x3cc] sm:$0xf]  ;;  %v8237_v14 = vld [vmem:[%s12543_s22 + $0x3f8] sm:$0xf0]  ;;  %v7755_v2 = vld [vmem:[%s12543_s22 + $0x8] sm:$0xf] }
 0xae8   : > { %v7805_v9 = vld [vmem:[%s12543_s22 + $0x98] sm:$0xf0]  ;;  %v8777_v38 = vld [vmem:[%s12543_s22 + $0x36c] sm:$0xf]  ;;  %v8675_v6 = vld [vmem:[%s12543_s22 + $0x34] sm:$0xf0] }
 0xae9   : > { %v8139_v17 = vld [vmem:[%s12543_s22 + $0x308] sm:$0xf]  ;;  %v7756_v18 = vor.u32 %v8675_v6, %v7755_v2  ;;  %v8765_v21 = vld [vmem:[%s12543_s22 + $0x30c] sm:$0xf]  ;;  %v8141_v59 = vld [vmem:[%s12543_s22 + $0x338] sm:$0xf0] }
 0xaea   : > { %5264 = vmatpush.bf16.msrb.mxu0 %v7992_v32  ;;  %5277 = vmatpush.bf16.msrb.mxu1 %v8376_v33  ;;  %v8048_v32 = vor.u32 %v8741_v29, %v8045_v30  ;;  %v8432_v33 = vor.u32 %v8837_v60, %v8429_v10  ;;  %v8144_v55 = vor.u32 %v8765_v21, %v8141_v59  ;;  %v8856_v29 = vld [vmem:[%s12543_s22 + $0x5dc] sm:$0xf0]  ;;  %v8754_v30 = vld [vmem:[%s12543_s22 + $0x2b4] sm:$0xf]  ;;  %v8101_v60 = vld [vmem:[%s12543_s22 + $0x2e0] sm:$0xf0] }
 0xaeb   : > { %5303 = vmatpush.bf16.msrb.mxu3 %v8380_v63  ;;  %5291 = vmatpush.bf16.msrb.mxu2 %v7948_v1  ;;  %v8384_v63 = vor.u32 %v8825_v22, %v8381_v4  ;;  %v7904_v1 = vor.u32 %v8705_v42, %v7901_v8  ;;  %v8485_v36 = vld [vmem:[%s12543_s22 + $0x5e0] sm:$0xf0]  ;;  %v8838_v8 = vld [vmem:[%s12543_s22 + $0x554] sm:$0xf]  ;;  %v8291_v21 = vld [vmem:[%s12543_s22 + $0x430] sm:$0xf] }
 0xaec   : > { %v8053_v42 = vld [vmem:[%s12543_s22 + $0x280] sm:$0xf0]  ;;  %v8826_v35 = vld [vmem:[%s12543_s22 + $0x4f4] sm:$0xf]  ;;  %v8808_v59 = vld [vmem:[%s12543_s22 + $0x45c] sm:$0xf0] }
 0xaed   : > { %v8005_v49 = vld [vmem:[%s12543_s22 + $0x220] sm:$0xf0]  ;;  %v8814_v6 = vld [vmem:[%s12543_s22 + $0x494] sm:$0xf]  ;;  %vm5610_vm11 = vcmp.lt.s32.totalorder %v9735_v7, 126 }
 0xaee   : > { %5265 = vmatpush.bf16.msrb.mxu0 %v7944_v43  ;;  %5278 = vmatpush.bf16.msrb.mxu1 %v8328_v50  ;;  %v7952_v43 = vor.u32 %v8717_v23, %v7949_v40  ;;  %v8336_v50 = vor.u32 %v8813_v62, %v8333_v34  ;;  %v8748_v23 = vld [vmem:[%s12543_s22 + $0x27c] sm:$0xf0]  ;;  %v8104_v40 = vor.u32 %v8754_v30, %v8101_v60  ;;  %v8435_v34 = vld [vmem:[%s12543_s22 + $0x550] sm:$0xf]  ;;  %v7957_v2 = vld [vmem:[%s12543_s22 + $0x1c0] sm:$0xf0] }
 0xaef   : > { %5304 = vmatpush.bf16.msrb.mxu3 %v8332_v12  ;;  %5292 = vmatpush.bf16.msrb.mxu2 %v7900_v58  ;;  %v8288_v12 = vor.u32 %v8801_v45, %v8285_v47  ;;  %v8783_v58 = vld [vmem:[%s12543_s22 + $0x394] sm:$0xf0]  ;;  %v8437_v45 = vld [vmem:[%s12543_s22 + $0x580] sm:$0xf0]  ;;  %v8243_v30 = vld [vmem:[%s12543_s22 + $0x3d0] sm:$0xf] }
 0xaf0   : > { %v8188_v11 = vor.u32 %v8783_v58, %v8187_v51  ;;  %v8389_v51 = vld [vmem:[%s12543_s22 + $0x520] sm:$0xf0]  ;;  %v8796_v60 = vld [vmem:[%s12543_s22 + $0x3fc] sm:$0xf0] }
 0xaf2   : > { %5266 = vmatpush.bf16.msrb.mxu0 %v7896_v28  ;;  %5279 = vmatpush.bf16.msrb.mxu1 %v8280_v48  ;;  %v7856_v28 = vor.u32 %v8693_v20, %v7853_v16  ;;  %v8240_v48 = vor.u32 %v8789_v52, %v8237_v14  ;;  %v8736_v20 = vld [vmem:[%s12543_s22 + $0x21c] sm:$0xf0]  ;;  %v8440_v52 = vor.u32 %v8838_v8, %v8437_v45  ;;  %v8387_v14 = vld [vmem:[%s12543_s22 + $0x4f0] sm:$0xf]  ;;  %v8778_v8 = vld [vmem:[%s12543_s22 + $0x374] sm:$0xf] }
 0xaf3   : > { %5305 = vmatpush.bf16.msrb.mxu3 %v8284_v0  ;;  %5293 = vmatpush.bf16.msrb.mxu2 %v7852_v5  ;;  %v8681_v0 = vld [vmem:[%s12543_s22 + $0x6c] sm:$0xf]  ;;  %v8771_v5 = vld [vmem:[%s12543_s22 + $0x334] sm:$0xf0]  ;;  %v8197_v45 = vld [vmem:[%s12543_s22 + $0x3a0] sm:$0xf0] }
 0xaf4   : > { %v7808_v13 = vor.u32 %v8681_v0, %v7805_v9  ;;  %v7955_v0 = vld [vmem:[%s12543_s22 + $0x190] sm:$0xf]  ;;  %v8724_v9 = vld [vmem:[%s12543_s22 + $0x1bc] sm:$0xf0] }
 0xaf6   : > { %5267 = vmatpush.bf16.msrb.mxu0 %v7848_v41  ;;  %5280 = vmatpush.bf16.msrb.mxu1 %v8232_v15  ;;  %v8189_v41 = vld [vmem:[%s12543_s22 + $0x398] sm:$0xf0] }
 0xaf7   : > { %5306 = vmatpush.bf16.msrb.mxu3 %v8236_v19  ;;  %5294 = vmatpush.bf16.msrb.mxu2 %v7804_v53  ;;  %v8192_v15 = vor.u32 %v8777_v38, %v8189_v41  ;;  %v8669_v19 = vld [vmem:[%s12543_s22 + $0xc] sm:$0xf]  ;;  %v8339_v38 = vld [vmem:[%s12543_s22 + $0x490] sm:$0xf]  ;;  %v8820_v41 = vld [vmem:[%s12543_s22 + $0x4bc] sm:$0xf0] }
 0xafa   : > { %5268 = vmatpush.bf16.msrb.mxu0 %v7800_v44  ;;  %5281 = vmatpush.bf16.msrb.mxu1 %v8184_v57  ;;  %v7757_v44 = vld [vmem:[%s12543_s22 + $0x38] sm:$0xf0]  ;;  %v8140_v57 = vor.u32 %v8771_v5, %v8139_v17  ;;  %v8341_v17 = vld [vmem:[%s12543_s22 + $0x4c0] sm:$0xf0]  ;;  %v8340_v5 = vor.u32 %v8820_v41, %v8339_v38  ;;  %v8109_v41 = vld [vmem:[%s12543_s22 + $0x2e8] sm:$0xf0] }
 0xafb   : > { %5307 = vmatpush.bf16.msrb.mxu3 %v8188_v11  ;;  %v7760_v27 = vor.u32 %v8669_v19, %v7757_v44  ;;  %5295 = vmatpush.bf16.msrb.mxu2 %v7756_v18  ;;  %v7956_v18 = vor.u32 %v8724_v9, %v7955_v0  ;;  %v7907_v19 = vld [vmem:[%s12543_s22 + $0x130] sm:$0xf]  ;;  %v8712_v44 = vld [vmem:[%s12543_s22 + $0x15c] sm:$0xf0]  ;;  %v8491_v0 = vld [vmem:[%s12543_s22 + $0x5b8] sm:$0xf] }
 0xafc   : > { %v8857_v9 = vld [vmem:[%s12543_s22 + $0x5e4] sm:$0xf0] }
 0xafe   : > { %5269 = vmatpush.bf16.msrb.mxu0 %v7752_v56  ;;  %5282 = vmatpush.bf16.msrb.mxu1 %v8136_v24  ;;  %v8099_v24 = vld [vmem:[%s12543_s22 + $0x2b0] sm:$0xf] }
 0xaff   : > { %5308 = vmatpush.bf16.msrb.mxu3 %v8140_v57 }
 0xb02   : > { %5314 = vmatpush.bf16.msra.mxu0 %v8096_v46  ;;  %5327 = vmatpush.bf16.msra.mxu1 %v8480_v3  ;;  %v8760_v46 = vld [vmem:[%s12543_s22 + $0x2dc] sm:$0xf0]  ;;  %v8483_v3 = vld [vmem:[%s12543_s22 + $0x5b0] sm:$0xf] }
 0xb03   : > { %v8100_v4 = vor.u32 %v8760_v46, %v8099_v24  ;;  %v7859_v24 = vld [vmem:[%s12543_s22 + $0xd0] sm:$0xf]  ;;  %v8700_v46 = vld [vmem:[%s12543_s22 + $0xfc] sm:$0xf0] }
 0xb06   : > { %5315 = vmatpush.bf16.msra.mxu0 %v8048_v32  ;;  %5328 = vmatpush.bf16.msra.mxu1 %v8432_v33  ;;  %v8850_v33 = vld [vmem:[%s12543_s22 + $0x5b4] sm:$0xf] }
 0xb07   : > { %v8488_v62 = vor.u32 %v8850_v33, %v8485_v36  ;;  %v8790_v33 = vld [vmem:[%s12543_s22 + $0x3d4] sm:$0xf]  ;;  %v8245_v36 = vld [vmem:[%s12543_s22 + $0x400] sm:$0xf0] }
 0xb0a   : > { %5316 = vmatpush.bf16.msra.mxu0 %v8000_v61  ;;  %5329 = vmatpush.bf16.msra.mxu1 %v8384_v63  ;;  %v8484_v61 = vor.u32 %v8856_v29, %v8483_v3  ;;  %v8051_v63 = vld [vmem:[%s12543_s22 + $0x250] sm:$0xf] }
 0xb0b   : > { %v8052_v47 = vor.u32 %v8748_v23, %v8051_v63  ;;  %v7811_v63 = vld [vmem:[%s12543_s22 + $0x70] sm:$0xf]  ;;  %v8688_v23 = vld [vmem:[%s12543_s22 + $0x9c] sm:$0xf0] }
 0xb0e   : > { %5317 = vmatpush.bf16.msra.mxu0 %v7952_v43  ;;  %5330 = vmatpush.bf16.msra.mxu1 %v8336_v50  ;;  %v8844_v43 = vld [vmem:[%s12543_s22 + $0x57c] sm:$0xf0]  ;;  %v8742_v50 = vld [vmem:[%s12543_s22 + $0x254] sm:$0xf] }
 0xb0f   : > { %v8056_v16 = vor.u32 %v8742_v50, %v8053_v42  ;;  %v8682_v50 = vld [vmem:[%s12543_s22 + $0x74] sm:$0xf]  ;;  %v7813_v42 = vld [vmem:[%s12543_s22 + $0xa0] sm:$0xf0] }
 0xb12   : > { %5318 = vmatpush.bf16.msra.mxu0 %v7904_v1  ;;  %5331 = vmatpush.bf16.msra.mxu1 %v8288_v12  ;;  %v8436_v1 = vor.u32 %v8844_v43, %v8435_v34  ;;  %v8003_v12 = vld [vmem:[%s12543_s22 + $0x1f0] sm:$0xf]  ;;  %v8784_v43 = vld [vmem:[%s12543_s22 + $0x39c] sm:$0xf0] }
 0xb13   : > { %v8004_v53 = vor.u32 %v8736_v20, %v8003_v12  ;;  %v8195_v34 = vld [vmem:[%s12543_s22 + $0x370] sm:$0xf]  ;;  %v8676_v20 = vld [vmem:[%s12543_s22 + $0x3c] sm:$0xf0] }
 0xb14   : > { %v8196_v12 = vor.u32 %v8784_v43, %v8195_v34  ;;  %v8347_v34 = vld [vmem:[%s12543_s22 + $0x498] sm:$0xf]  ;;  %v8821_v43 = vld [vmem:[%s12543_s22 + $0x4c4] sm:$0xf0] }
 0xb16   : > { %5319 = vmatpush.bf16.msra.mxu0 %v7856_v28  ;;  %5332 = vmatpush.bf16.msra.mxu1 %v8240_v48  ;;  %v8832_v28 = vld [vmem:[%s12543_s22 + $0x51c] sm:$0xf0]  ;;  %v8730_v48 = vld [vmem:[%s12543_s22 + $0x1f4] sm:$0xf] }
 0xb17   : > { %v8388_v58 = vor.u32 %v8832_v28, %v8387_v14  ;;  %v8008_v11 = vor.u32 %v8730_v48, %v8005_v49  ;;  %v7816_v14 = vor.u32 %v8682_v50, %v7813_v42  ;;  %v8200_v28 = vor.u32 %v8778_v8, %v8197_v45  ;;  %v8670_v48 = vld [vmem:[%s12543_s22 + $0x14] sm:$0xf]  ;;  %v7765_v49 = vld [vmem:[%s12543_s22 + $0x40] sm:$0xf0]  ;;  %v8719_v50 = vld [vmem:[%s12543_s22 + $0x19c] sm:$0xf] }
 0xb18   : > { %v7965_v42 = vld [vmem:[%s12543_s22 + $0x1c8] sm:$0xf0]  ;;  %v8815_v8 = vld [vmem:[%s12543_s22 + $0x49c] sm:$0xf] }
 0xb19   : > { %v8349_v45 = vld [vmem:[%s12543_s22 + $0x4c8] sm:$0xf0] }
 0xb1a   : > { %5320 = vmatpush.bf16.msra.mxu0 %v7808_v13  ;;  %5333 = vmatpush.bf16.msra.mxu1 %v8192_v15  ;;  %v8392_v13 = vor.u32 %v8826_v35, %v8389_v51  ;;  %v8718_v15 = vld [vmem:[%s12543_s22 + $0x194] sm:$0xf]  ;;  %v8149_v51 = vld [vmem:[%s12543_s22 + $0x340] sm:$0xf0] }
 0xb1b   : > { %v7960_v57 = vor.u32 %v8718_v15, %v7957_v2  ;;  %v8766_v35 = vld [vmem:[%s12543_s22 + $0x314] sm:$0xf]  ;;  %v8851_v15 = vld [vmem:[%s12543_s22 + $0x5bc] sm:$0xf]  ;;  %v8493_v2 = vld [vmem:[%s12543_s22 + $0x5e8] sm:$0xf0] }
 0xb1e   : > { %5321 = vmatpush.bf16.msra.mxu0 %v7760_v27  ;;  %5334 = vmatpush.bf16.msra.mxu1 %v8144_v55  ;;  %v8344_v27 = vor.u32 %v8814_v6, %v8341_v17  ;;  %v8706_v55 = vld [vmem:[%s12543_s22 + $0x134] sm:$0xf]  ;;  %v7768_v6 = vor.u32 %v8670_v48, %v7765_v49  ;;  %v8152_v17 = vor.u32 %v8766_v35, %v8149_v51  ;;  %v8707_v48 = vld [vmem:[%s12543_s22 + $0x13c] sm:$0xf]  ;;  %v7917_v49 = vld [vmem:[%s12543_s22 + $0x168] sm:$0xf0] }
 0xb1f   : > { %v8803_v35 = vld [vmem:[%s12543_s22 + $0x43c] sm:$0xf]  ;;  %v8301_v51 = vld [vmem:[%s12543_s22 + $0x468] sm:$0xf0] }
 0xb5e   : > { %v4057_v26 = vpop.f32.mrf.mxu0  ;;  %v4077_v31 = vpop.f32.mrf.mxu1 }
 0xb5f   : > { %v4058_v37 = vadd.f32 %v4057_v26, %v4035_v25  ;;  %v4078_v56 = vadd.f32 %v4077_v31, %v4035_v25  ;;  %v7909_v25 = vld [vmem:[%s12543_s22 + $0x160] sm:$0xf0]  ;;  %v8802_v26 = vld [vmem:[%s12543_s22 + $0x434] sm:$0xf] }
 0xb60   : > { %v8293_v31 = vld [vmem:[%s12543_s22 + $0x460] sm:$0xf0]  ;;  %v7912_v3 = vor.u32 %v8706_v55, %v7909_v25  ;;  %v8743_v55 = vld [vmem:[%s12543_s22 + $0x25c] sm:$0xf]  ;;  %v8061_v25 = vld [vmem:[%s12543_s22 + $0x288] sm:$0xf0] }
 0xb61   : > { %v4080_v10 = vmax.f32 %v4058_v37, 0.0  ;;  %v4081_v32 = vmax.f32 %v4078_v56, 0.0  ;;  %v7908_v37 = vor.u32 %v8712_v44, %v7907_v19  ;;  %v8292_v56 = vor.u32 %v8808_v59, %v8291_v21  ;;  %v8059_v19 = vld [vmem:[%s12543_s22 + $0x258] sm:$0xf]  ;;  %v8749_v44 = vld [vmem:[%s12543_s22 + $0x284] sm:$0xf0] }
 0xb62   : > { %v8296_v29 = vor.u32 %v8802_v26, %v8293_v31  ;;  %v8443_v21 = vld [vmem:[%s12543_s22 + $0x558] sm:$0xf]  ;;  %v8845_v59 = vld [vmem:[%s12543_s22 + $0x584] sm:$0xf0]  ;;  %v8839_v26 = vld [vmem:[%s12543_s22 + $0x55c] sm:$0xf] }
 0xb63   : > { %v11066_v39 = vpack.c.bf16 %v4080_v10, %v4080_v10  ;;  %v11068_v22 = vpack.c.bf16 %v4081_v32, %v4081_v32  ;;  %v8694_v10 = vld [vmem:[%s12543_s22 + $0xd4] sm:$0xf]  ;;  %v7861_v32 = vld [vmem:[%s12543_s22 + $0x100] sm:$0xf0]  ;;  %v8445_v31 = vld [vmem:[%s12543_s22 + $0x588] sm:$0xf0] }
 0xb65   : > { %5244 = vmatmul.bf16.vlgmr.msra.gmra.mxu2 %v11066_v39  ;;  %5257 = vmatmul.bf16.vlgmr.msra.gmra.mxu3 %v11068_v22 }
 0xb66   : > { %5270 = vmatmul.bf16.vlgmr.msrb.gmra.mxu0 %v11066_v39  ;;  %5283 = vmatmul.bf16.vlgmr.msrb.gmra.mxu1 %v11068_v22 }
 0xb67   : > { %5340 = vmatpush.bf16.msra.mxu2 %v8100_v4  ;;  %5353 = vmatpush.bf16.msra.mxu3 %v8484_v61  ;;  %v7860_v4 = vor.u32 %v8700_v46, %v7859_v24  ;;  %v8244_v61 = vor.u32 %v8796_v60, %v8243_v30  ;;  %v8011_v24 = vld [vmem:[%s12543_s22 + $0x1f8] sm:$0xf]  ;;  %v8737_v46 = vld [vmem:[%s12543_s22 + $0x224] sm:$0xf0] }
 0xb68   : > { %5366 = vmatpush.bf16.msrb.mxu0 %v8104_v40  ;;  %5379 = vmatpush.bf16.msrb.mxu1 %v8488_v62  ;;  %v7864_v40 = vor.u32 %v8694_v10, %v7861_v32  ;;  %v8248_v62 = vor.u32 %v8790_v33, %v8245_v36  ;;  %v8395_v30 = vld [vmem:[%s12543_s22 + $0x4f8] sm:$0xf]  ;;  %v8833_v60 = vld [vmem:[%s12543_s22 + $0x524] sm:$0xf0]  ;;  %v8731_v10 = vld [vmem:[%s12543_s22 + $0x1fc] sm:$0xf] }
 0xb69   : > { %v8013_v32 = vld [vmem:[%s12543_s22 + $0x228] sm:$0xf0]  ;;  %v8827_v33 = vld [vmem:[%s12543_s22 + $0x4fc] sm:$0xf] }
 0xb6a   : > { %v8397_v36 = vld [vmem:[%s12543_s22 + $0x528] sm:$0xf0] }
 0xb6b   : > { %5341 = vmatpush.bf16.msra.mxu2 %v8052_v47  ;;  %5354 = vmatpush.bf16.msra.mxu3 %v8436_v1  ;;  %v7763_v47 = vld [vmem:[%s12543_s22 + $0x10] sm:$0xf]  ;;  %v7812_v1 = vor.u32 %v8688_v23, %v7811_v63  ;;  %v7963_v63 = vld [vmem:[%s12543_s22 + $0x198] sm:$0xf]  ;;  %v8725_v23 = vld [vmem:[%s12543_s22 + $0x1c4] sm:$0xf0] }
 0xb6c   : > { %5367 = vmatpush.bf16.msrb.mxu0 %v8056_v16  ;;  %5380 = vmatpush.bf16.msrb.mxu1 %v8440_v52  ;;  %v8147_v16 = vld [vmem:[%s12543_s22 + $0x310] sm:$0xf]  ;;  %v8772_v52 = vld [vmem:[%s12543_s22 + $0x33c] sm:$0xf0] }
 0xb6d   : > { %v8148_v38 = vor.u32 %v8772_v52, %v8147_v16  ;;  %v7968_v16 = vor.u32 %v8719_v50, %v7965_v42  ;;  %v8352_v52 = vor.u32 %v8815_v8, %v8349_v45  ;;  %v8852_v50 = vld [vmem:[%s12543_s22 + $0x5c4] sm:$0xf]  ;;  %v8501_v42 = vld [vmem:[%s12543_s22 + $0x5f0] sm:$0xf0] }
 0xb6f   : > { %5342 = vmatpush.bf16.msra.mxu2 %v8004_v53  ;;  %5355 = vmatpush.bf16.msra.mxu3 %v8388_v58  ;;  %v8107_v53 = vld [vmem:[%s12543_s22 + $0x2b8] sm:$0xf]  ;;  %v8761_v58 = vld [vmem:[%s12543_s22 + $0x2e4] sm:$0xf0] }
 0xb70   : > { %5368 = vmatpush.bf16.msrb.mxu0 %v8008_v11  ;;  %5381 = vmatpush.bf16.msrb.mxu1 %v8392_v13  ;;  %v8755_v11 = vld [vmem:[%s12543_s22 + $0x2bc] sm:$0xf]  ;;  %v7764_v13 = vor.u32 %v8676_v20, %v7763_v47  ;;  %v7964_v47 = vor.u32 %v8725_v23, %v7963_v63  ;;  %v8713_v20 = vld [vmem:[%s12543_s22 + $0x164] sm:$0xf0]  ;;  %v8499_v63 = vld [vmem:[%s12543_s22 + $0x5c0] sm:$0xf] }
 0xb71   : > { %v8858_v23 = vld [vmem:[%s12543_s22 + $0x5ec] sm:$0xf0] }
 0xb73   : > { %5343 = vmatpush.bf16.msra.mxu2 %v7956_v18  ;;  %5356 = vmatpush.bf16.msra.mxu3 %v8340_v5  ;;  %v8108_v18 = vor.u32 %v8761_v58, %v8107_v53  ;;  %v8492_v5 = vor.u32 %v8857_v9, %v8491_v0  ;;  %v7867_v0 = vld [vmem:[%s12543_s22 + $0xd8] sm:$0xf]  ;;  %v8701_v9 = vld [vmem:[%s12543_s22 + $0x104] sm:$0xf0] }
 0xb74   : > { %5369 = vmatpush.bf16.msrb.mxu0 %v7960_v57  ;;  %5382 = vmatpush.bf16.msrb.mxu1 %v8344_v27  ;;  %v8112_v57 = vor.u32 %v8755_v11, %v8109_v41  ;;  %v8496_v27 = vor.u32 %v8851_v15, %v8493_v2  ;;  %v7920_v11 = vor.u32 %v8707_v48, %v7917_v49  ;;  %v8797_v41 = vld [vmem:[%s12543_s22 + $0x404] sm:$0xf0]  ;;  %v8695_v15 = vld [vmem:[%s12543_s22 + $0xdc] sm:$0xf]  ;;  %v7869_v2 = vld [vmem:[%s12543_s22 + $0x108] sm:$0xf0] }
 0xb75   : > { %5296 = vmatmul.bf16.vlgmr.msrb.gmra.mxu2 %v11066_v39  ;;  %5309 = vmatmul.bf16.vlgmr.msrb.gmra.mxu3 %v11068_v22  ;;  %v8744_v48 = vld [vmem:[%s12543_s22 + $0x264] sm:$0xf]  ;;  %v8069_v49 = vld [vmem:[%s12543_s22 + $0x290] sm:$0xf0] }
 0xb76   : > { %5322 = vmatmul.bf16.vlgmr.msra.gmra.mxu0 %v11066_v39  ;;  %5335 = vmatmul.bf16.vlgmr.msra.gmra.mxu1 %v11068_v22 }
 0xb77   : > { %5344 = vmatpush.bf16.msra.mxu2 %v7908_v37  ;;  %5357 = vmatpush.bf16.msra.mxu3 %v8292_v56  ;;  %v8060_v37 = vor.u32 %v8749_v44, %v8059_v19  ;;  %v8444_v56 = vor.u32 %v8845_v59, %v8443_v21  ;;  %v7819_v19 = vld [vmem:[%s12543_s22 + $0x78] sm:$0xf]  ;;  %v8689_v44 = vld [vmem:[%s12543_s22 + $0xa4] sm:$0xf0] }
 0xb78   : > { %5370 = vmatpush.bf16.msrb.mxu0 %v7912_v3  ;;  %5383 = vmatpush.bf16.msrb.mxu1 %v8296_v29  ;;  %v8064_v3 = vor.u32 %v8743_v55, %v8061_v25  ;;  %v8448_v29 = vor.u32 %v8839_v26, %v8445_v31  ;;  %v8203_v21 = vld [vmem:[%s12543_s22 + $0x378] sm:$0xf]  ;;  %v8785_v59 = vld [vmem:[%s12543_s22 + $0x3a4] sm:$0xf0]  ;;  %v8683_v55 = vld [vmem:[%s12543_s22 + $0x7c] sm:$0xf] }
 0xb79   : > { %v7821_v25 = vld [vmem:[%s12543_s22 + $0xa8] sm:$0xf0]  ;;  %v8779_v26 = vld [vmem:[%s12543_s22 + $0x37c] sm:$0xf] }
 0xb7a   : > { %v8205_v31 = vld [vmem:[%s12543_s22 + $0x3a8] sm:$0xf0] }
 0xb7b   : > { %5345 = vmatpush.bf16.msra.mxu2 %v7860_v4  ;;  %5358 = vmatpush.bf16.msra.mxu3 %v8244_v61  ;;  %v8012_v4 = vor.u32 %v8737_v46, %v8011_v24  ;;  %v8396_v61 = vor.u32 %v8833_v60, %v8395_v30  ;;  %v8204_v24 = vor.u32 %v8785_v59, %v8203_v21  ;;  %v8677_v46 = vld [vmem:[%s12543_s22 + $0x44] sm:$0xf0]  ;;  %v8355_v21 = vld [vmem:[%s12543_s22 + $0x4a0] sm:$0xf]  ;;  %v8822_v59 = vld [vmem:[%s12543_s22 + $0x4cc] sm:$0xf0] }
 0xb7c   : > { %5371 = vmatpush.bf16.msrb.mxu0 %v7864_v40  ;;  %5384 = vmatpush.bf16.msrb.mxu1 %v8248_v62  ;;  %v8016_v40 = vor.u32 %v8731_v10, %v8013_v32  ;;  %v8400_v62 = vor.u32 %v8827_v33, %v8397_v36  ;;  %v7824_v30 = vor.u32 %v8683_v55, %v7821_v25  ;;  %v8671_v10 = vld [vmem:[%s12543_s22 + $0x1c] sm:$0xf]  ;;  %v7773_v32 = vld [vmem:[%s12543_s22 + $0x48] sm:$0xf0]  ;;  %v8720_v55 = vld [vmem:[%s12543_s22 + $0x1a4] sm:$0xf] }
 0xb7d   : > { %v8208_v60 = vor.u32 %v8779_v26, %v8205_v31  ;;  %v8767_v33 = vld [vmem:[%s12543_s22 + $0x31c] sm:$0xf]  ;;  %v8157_v36 = vld [vmem:[%s12543_s22 + $0x348] sm:$0xf0]  ;;  %v7776_v8 = vor.u32 %v8671_v10, %v7773_v32  ;;  %v7973_v25 = vld [vmem:[%s12543_s22 + $0x1d0] sm:$0xf0] }
 0xb7e   : > { %v8160_v45 = vor.u32 %v8767_v33, %v8157_v36  ;;  %v8816_v26 = vld [vmem:[%s12543_s22 + $0x4a4] sm:$0xf]  ;;  %v8357_v31 = vld [vmem:[%s12543_s22 + $0x4d0] sm:$0xf0] }
 0xb7f   : > { %5346 = vmatpush.bf16.msra.mxu2 %v7812_v1  ;;  %5359 = vmatpush.bf16.msra.mxu3 %v8196_v12  ;;  %v8348_v1 = vor.u32 %v8821_v43, %v8347_v34  ;;  %v7915_v12 = vld [vmem:[%s12543_s22 + $0x138] sm:$0xf]  ;;  %v8117_v43 = vld [vmem:[%s12543_s22 + $0x2f0] sm:$0xf0]  ;;  %v8708_v10 = vld [vmem:[%s12543_s22 + $0x144] sm:$0xf] }
 0xb80   : > { %5372 = vmatpush.bf16.msrb.mxu0 %v7816_v14  ;;  %5385 = vmatpush.bf16.msrb.mxu1 %v8200_v28  ;;  %v8299_v14 = vld [vmem:[%s12543_s22 + $0x438] sm:$0xf]  ;;  %v8809_v28 = vld [vmem:[%s12543_s22 + $0x464] sm:$0xf0]  ;;  %v7916_v53 = vor.u32 %v8713_v20, %v7915_v12  ;;  %v8067_v12 = vld [vmem:[%s12543_s22 + $0x260] sm:$0xf] }
 0xb81   : > { %v8300_v58 = vor.u32 %v8809_v28, %v8299_v14  ;;  %v8750_v20 = vld [vmem:[%s12543_s22 + $0x28c] sm:$0xf0]  ;;  %v8451_v14 = vld [vmem:[%s12543_s22 + $0x560] sm:$0xf]  ;;  %v7925_v32 = vld [vmem:[%s12543_s22 + $0x170] sm:$0xf0] }
 0xb82   : > { %v8846_v28 = vld [vmem:[%s12543_s22 + $0x58c] sm:$0xf0]  ;;  %v8804_v33 = vld [vmem:[%s12543_s22 + $0x444] sm:$0xf]  ;;  %v8309_v36 = vld [vmem:[%s12543_s22 + $0x470] sm:$0xf0] }
 0xb83   : > { %5347 = vmatpush.bf16.msra.mxu2 %v7764_v13  ;;  %5360 = vmatpush.bf16.msra.mxu3 %v8148_v38  ;;  %v8304_v13 = vor.u32 %v8803_v35, %v8301_v51  ;;  %v8251_v38 = vld [vmem:[%s12543_s22 + $0x3d8] sm:$0xf]  ;;  %v8840_v35 = vld [vmem:[%s12543_s22 + $0x564] sm:$0xf]  ;;  %v8453_v51 = vld [vmem:[%s12543_s22 + $0x590] sm:$0xf0] }
 0xb84   : > { %5373 = vmatpush.bf16.msrb.mxu0 %v7768_v6  ;;  %5386 = vmatpush.bf16.msrb.mxu1 %v8152_v17  ;;  %v8791_v6 = vld [vmem:[%s12543_s22 + $0x3dc] sm:$0xf]  ;;  %v8253_v17 = vld [vmem:[%s12543_s22 + $0x408] sm:$0xf0] }
 0xb86   : > { %5348 = vmatmul.bf16.vlgmr.msra.gmra.mxu2 %v11066_v39  ;;  %5361 = vmatmul.bf16.vlgmr.msra.gmra.mxu3 %v11068_v22 }
 0xb87   : > { %5392 = vmatpush.bf16.msrb.mxu2 %v8108_v18  ;;  %5405 = vmatpush.bf16.msrb.mxu3 %v8492_v5  ;;  %v7868_v18 = vor.u32 %v8701_v9, %v7867_v0  ;;  %v8252_v5 = vor.u32 %v8797_v41, %v8251_v38  ;;  %v8019_v0 = vld [vmem:[%s12543_s22 + $0x200] sm:$0xf]  ;;  %v8738_v9 = vld [vmem:[%s12543_s22 + $0x22c] sm:$0xf0] }
 0xb88   : > { %5418 = vmatpush.bf16.msra.mxu0 %v8112_v57  ;;  %5431 = vmatpush.bf16.msra.mxu1 %v8496_v27  ;;  %v7872_v57 = vor.u32 %v8695_v15, %v7869_v2  ;;  %v8256_v27 = vor.u32 %v8791_v6, %v8253_v17  ;;  %v8403_v38 = vld [vmem:[%s12543_s22 + $0x500] sm:$0xf]  ;;  %v8834_v41 = vld [vmem:[%s12543_s22 + $0x52c] sm:$0xf0]  ;;  %v8732_v15 = vld [vmem:[%s12543_s22 + $0x204] sm:$0xf] }
 0xb89   : > { %5374 = vmatmul.bf16.vlgmr.msrb.gmra.mxu0 %v11066_v39  ;;  %5387 = vmatmul.bf16.vlgmr.msrb.gmra.mxu1 %v11068_v22  ;;  %v8021_v2 = vld [vmem:[%s12543_s22 + $0x230] sm:$0xf0]  ;;  %v8828_v6 = vld [vmem:[%s12543_s22 + $0x504] sm:$0xf] }
 0xb8a   : > { %v8405_v17 = vld [vmem:[%s12543_s22 + $0x530] sm:$0xf0] }
 0xb8b   : > { %5393 = vmatpush.bf16.msrb.mxu2 %v8060_v37  ;;  %5406 = vmatpush.bf16.msrb.mxu3 %v8444_v56  ;;  %v7771_v37 = vld [vmem:[%s12543_s22 + $0x18] sm:$0xf]  ;;  %v7820_v56 = vor.u32 %v8689_v44, %v7819_v19  ;;  %v7971_v19 = vld [vmem:[%s12543_s22 + $0x1a0] sm:$0xf]  ;;  %v8726_v44 = vld [vmem:[%s12543_s22 + $0x1cc] sm:$0xf0] }
 0xb8c   : > { %5419 = vmatpush.bf16.msra.mxu0 %v8064_v3  ;;  %5432 = vmatpush.bf16.msra.mxu1 %v8448_v29  ;;  %v8155_v3 = vld [vmem:[%s12543_s22 + $0x318] sm:$0xf]  ;;  %v8773_v29 = vld [vmem:[%s12543_s22 + $0x344] sm:$0xf0] }
 0xb8d   : > { %v8156_v34 = vor.u32 %v8773_v29, %v8155_v3  ;;  %v7976_v3 = vor.u32 %v8720_v55, %v7973_v25  ;;  %v8360_v29 = vor.u32 %v8816_v26, %v8357_v31  ;;  %v8853_v55 = vld [vmem:[%s12543_s22 + $0x5cc] sm:$0xf]  ;;  %v8509_v25 = vld [vmem:[%s12543_s22 + $0x5f8] sm:$0xf0] }
 0xb8f   : > { %5394 = vmatpush.bf16.msrb.mxu2 %v8012_v4  ;;  %5407 = vmatpush.bf16.msrb.mxu3 %v8396_v61  ;;  %v8115_v4 = vld [vmem:[%s12543_s22 + $0x2c0] sm:$0xf]  ;;  %v8762_v61 = vld [vmem:[%s12543_s22 + $0x2ec] sm:$0xf0] }
 0xb90   : > { %5420 = vmatpush.bf16.msra.mxu0 %v8016_v40  ;;  %5433 = vmatpush.bf16.msra.mxu1 %v8400_v62  ;;  %v8756_v40 = vld [vmem:[%s12543_s22 + $0x2c4] sm:$0xf]  ;;  %v7772_v62 = vor.u32 %v8677_v46, %v7771_v37  ;;  %v7972_v37 = vor.u32 %v8726_v44, %v7971_v19  ;;  %v8714_v46 = vld [vmem:[%s12543_s22 + $0x16c] sm:$0xf0]  ;;  %v8507_v19 = vld [vmem:[%s12543_s22 + $0x5c8] sm:$0xf] }
 0xb91   : > { %v8859_v44 = vld [vmem:[%s12543_s22 + $0x5f4] sm:$0xf0] }
 0xb93   : > { %5395 = vmatpush.bf16.msrb.mxu2 %v7964_v47  ;;  %5408 = vmatpush.bf16.msrb.mxu3 %v8348_v1  ;;  %v8116_v47 = vor.u32 %v8762_v61, %v8115_v4  ;;  %v8500_v1 = vor.u32 %v8858_v23, %v8499_v63  ;;  %v7875_v63 = vld [vmem:[%s12543_s22 + $0xe0] sm:$0xf]  ;;  %v8702_v23 = vld [vmem:[%s12543_s22 + $0x10c] sm:$0xf0] }
 0xb94   : > { %5421 = vmatpush.bf16.msra.mxu0 %v7968_v16  ;;  %5434 = vmatpush.bf16.msra.mxu1 %v8352_v52  ;;  %v8120_v16 = vor.u32 %v8756_v40, %v8117_v43  ;;  %v8504_v52 = vor.u32 %v8852_v50, %v8501_v42  ;;  %v7928_v40 = vor.u32 %v8708_v10, %v7925_v32  ;;  %v8798_v43 = vld [vmem:[%s12543_s22 + $0x40c] sm:$0xf0]  ;;  %v8696_v50 = vld [vmem:[%s12543_s22 + $0xe4] sm:$0xf]  ;;  %v7877_v42 = vld [vmem:[%s12543_s22 + $0x110] sm:$0xf0] }
 0xb95   : > { %v8745_v10 = vld [vmem:[%s12543_s22 + $0x26c] sm:$0xf]  ;;  %v8077_v32 = vld [vmem:[%s12543_s22 + $0x298] sm:$0xf0] }
 0xb97   : > { %5396 = vmatpush.bf16.msrb.mxu2 %v7916_v53  ;;  %5409 = vmatpush.bf16.msrb.mxu3 %v8300_v58  ;;  %v8068_v53 = vor.u32 %v8750_v20, %v8067_v12  ;;  %v8452_v58 = vor.u32 %v8846_v28, %v8451_v14  ;;  %v7827_v12 = vld [vmem:[%s12543_s22 + $0x80] sm:$0xf]  ;;  %v8690_v20 = vld [vmem:[%s12543_s22 + $0xac] sm:$0xf0] }
 0xb98   : > { %5422 = vmatpush.bf16.msra.mxu0 %v7920_v11  ;;  %5435 = vmatpush.bf16.msra.mxu1 %v8304_v13  ;;  %v8072_v11 = vor.u32 %v8744_v48, %v8069_v49  ;;  %v8456_v13 = vor.u32 %v8840_v35, %v8453_v51  ;;  %v8211_v14 = vld [vmem:[%s12543_s22 + $0x380] sm:$0xf]  ;;  %v8786_v28 = vld [vmem:[%s12543_s22 + $0x3ac] sm:$0xf0]  ;;  %v8684_v48 = vld [vmem:[%s12543_s22 + $0x84] sm:$0xf] }
 0xb99   : > { %v7829_v49 = vld [vmem:[%s12543_s22 + $0xb0] sm:$0xf0]  ;;  %v8780_v35 = vld [vmem:[%s12543_s22 + $0x384] sm:$0xf] }
 0xb9a   : > { %v8213_v51 = vld [vmem:[%s12543_s22 + $0x3b0] sm:$0xf0] }
 0xb9b   : > { %5397 = vmatpush.bf16.msrb.mxu2 %v7868_v18  ;;  %5410 = vmatpush.bf16.msrb.mxu3 %v8252_v5  ;;  %v8020_v18 = vor.u32 %v8738_v9, %v8019_v0  ;;  %v8404_v5 = vor.u32 %v8834_v41, %v8403_v38  ;;  %v8212_v0 = vor.u32 %v8786_v28, %v8211_v14  ;;  %v8678_v9 = vld [vmem:[%s12543_s22 + $0x4c] sm:$0xf0]  ;;  %v8363_v14 = vld [vmem:[%s12543_s22 + $0x4a8] sm:$0xf]  ;;  %v8823_v28 = vld [vmem:[%s12543_s22 + $0x4d4] sm:$0xf0] }
 0xb9c   : > { %5423 = vmatpush.bf16.msra.mxu0 %v7872_v57  ;;  %5436 = vmatpush.bf16.msra.mxu1 %v8256_v27  ;;  %v8024_v57 = vor.u32 %v8732_v15, %v8021_v2  ;;  %v8408_v27 = vor.u32 %v8828_v6, %v8405_v17  ;;  %v7832_v38 = vor.u32 %v8684_v48, %v7829_v49  ;;  %v8672_v15 = vld [vmem:[%s12543_s22 + $0x24] sm:$0xf]  ;;  %v7781_v2 = vld [vmem:[%s12543_s22 + $0x50] sm:$0xf0]  ;;  %v8721_v48 = vld [vmem:[%s12543_s22 + $0x1ac] sm:$0xf] }
 0xb9d   : > { %v8216_v41 = vor.u32 %v8780_v35, %v8213_v51  ;;  %v8768_v6 = vld [vmem:[%s12543_s22 + $0x324] sm:$0xf]  ;;  %v8165_v17 = vld [vmem:[%s12543_s22 + $0x350] sm:$0xf0]  ;;  %v7784_v26 = vor.u32 %v8672_v15, %v7781_v2  ;;  %v7981_v49 = vld [vmem:[%s12543_s22 + $0x1d8] sm:$0xf0] }
 0xb9e   : > { %v8168_v31 = vor.u32 %v8768_v6, %v8165_v17  ;;  %v8817_v35 = vld [vmem:[%s12543_s22 + $0x4ac] sm:$0xf]  ;;  %v8365_v51 = vld [vmem:[%s12543_s22 + $0x4d8] sm:$0xf0] }
 0xb9f   : > { %5398 = vmatpush.bf16.msrb.mxu2 %v7820_v56  ;;  %5411 = vmatpush.bf16.msrb.mxu3 %v8204_v24  ;;  %v8356_v56 = vor.u32 %v8822_v59, %v8355_v21  ;;  %v7923_v24 = vld [vmem:[%s12543_s22 + $0x140] sm:$0xf]  ;;  %v8125_v59 = vld [vmem:[%s12543_s22 + $0x2f8] sm:$0xf0]  ;;  %v8709_v15 = vld [vmem:[%s12543_s22 + $0x14c] sm:$0xf] }
 0xba0   : > { %5424 = vmatpush.bf16.msra.mxu0 %v7824_v30  ;;  %5437 = vmatpush.bf16.msra.mxu1 %v8208_v60  ;;  %v8307_v30 = vld [vmem:[%s12543_s22 + $0x440] sm:$0xf]  ;;  %v8810_v60 = vld [vmem:[%s12543_s22 + $0x46c] sm:$0xf0]  ;;  %v7924_v4 = vor.u32 %v8714_v46, %v7923_v24  ;;  %v8075_v24 = vld [vmem:[%s12543_s22 + $0x268] sm:$0xf] }
 0xba1   : > { %v8308_v61 = vor.u32 %v8810_v60, %v8307_v30  ;;  %v8751_v46 = vld [vmem:[%s12543_s22 + $0x294] sm:$0xf0]  ;;  %v8459_v30 = vld [vmem:[%s12543_s22 + $0x568] sm:$0xf]  ;;  %v7933_v2 = vld [vmem:[%s12543_s22 + $0x178] sm:$0xf0] }
 0xba2   : > { %v8847_v60 = vld [vmem:[%s12543_s22 + $0x594] sm:$0xf0]  ;;  %v8805_v6 = vld [vmem:[%s12543_s22 + $0x44c] sm:$0xf]  ;;  %v8317_v17 = vld [vmem:[%s12543_s22 + $0x478] sm:$0xf0] }
 0xba3   : > { %5399 = vmatpush.bf16.msrb.mxu2 %v7772_v62  ;;  %5412 = vmatpush.bf16.msrb.mxu3 %v8156_v34  ;;  %v8312_v62 = vor.u32 %v8804_v33, %v8309_v36  ;;  %v8259_v34 = vld [vmem:[%s12543_s22 + $0x3e0] sm:$0xf]  ;;  %v8841_v33 = vld [vmem:[%s12543_s22 + $0x56c] sm:$0xf]  ;;  %v8461_v36 = vld [vmem:[%s12543_s22 + $0x598] sm:$0xf0] }
 0xba4   : > { %5425 = vmatpush.bf16.msra.mxu0 %v7776_v8  ;;  %5438 = vmatpush.bf16.msra.mxu1 %v8160_v45  ;;  %v8792_v8 = vld [vmem:[%s12543_s22 + $0x3e4] sm:$0xf]  ;;  %v8261_v45 = vld [vmem:[%s12543_s22 + $0x410] sm:$0xf0] }
 0xba6   : > { %5400 = vmatmul.bf16.vlgmr.msrb.gmra.mxu2 %v11066_v39  ;;  %5413 = vmatmul.bf16.vlgmr.msrb.gmra.mxu3 %v11068_v22 }
 0xba7   : > { %5444 = vmatpush.bf16.msra.mxu2 %v8116_v47  ;;  %5457 = vmatpush.bf16.msra.mxu3 %v8500_v1  ;;  %v7876_v47 = vor.u32 %v8702_v23, %v7875_v63  ;;  %v8260_v1 = vor.u32 %v8798_v43, %v8259_v34  ;;  %v8027_v63 = vld [vmem:[%s12543_s22 + $0x208] sm:$0xf]  ;;  %v8739_v23 = vld [vmem:[%s12543_s22 + $0x234] sm:$0xf0] }
 0xba8   : > { %5470 = vmatpush.bf16.msrb.mxu0 %v8120_v16  ;;  %5483 = vmatpush.bf16.msrb.mxu1 %v8504_v52  ;;  %v7880_v16 = vor.u32 %v8696_v50, %v7877_v42  ;;  %v8264_v52 = vor.u32 %v8792_v8, %v8261_v45  ;;  %v8411_v34 = vld [vmem:[%s12543_s22 + $0x508] sm:$0xf]  ;;  %v8835_v43 = vld [vmem:[%s12543_s22 + $0x534] sm:$0xf0]  ;;  %v8733_v50 = vld [vmem:[%s12543_s22 + $0x20c] sm:$0xf] }
 0xba9   : > { %5426 = vmatmul.bf16.vlgmr.msra.gmra.mxu0 %v11066_v39  ;;  %5439 = vmatmul.bf16.vlgmr.msra.gmra.mxu1 %v11068_v22  ;;  %v8029_v42 = vld [vmem:[%s12543_s22 + $0x238] sm:$0xf0]  ;;  %v8829_v8 = vld [vmem:[%s12543_s22 + $0x50c] sm:$0xf] }
 0xbaa   : > { %v8413_v45 = vld [vmem:[%s12543_s22 + $0x538] sm:$0xf0] }
 0xbab   : > { %5445 = vmatpush.bf16.msra.mxu2 %v8068_v53  ;;  %5458 = vmatpush.bf16.msra.mxu3 %v8452_v58  ;;  %v7779_v53 = vld [vmem:[%s12543_s22 + $0x20] sm:$0xf]  ;;  %v7828_v58 = vor.u32 %v8690_v20, %v7827_v12  ;;  %v7979_v12 = vld [vmem:[%s12543_s22 + $0x1a8] sm:$0xf]  ;;  %v8727_v20 = vld [vmem:[%s12543_s22 + $0x1d4] sm:$0xf0] }
 0xbac   : > { %5471 = vmatpush.bf16.msrb.mxu0 %v8072_v11  ;;  %5484 = vmatpush.bf16.msrb.mxu1 %v8456_v13  ;;  %v8163_v11 = vld [vmem:[%s12543_s22 + $0x320] sm:$0xf]  ;;  %v8774_v13 = vld [vmem:[%s12543_s22 + $0x34c] sm:$0xf0] }
 0xbad   : > { %v8164_v21 = vor.u32 %v8774_v13, %v8163_v11  ;;  %v7984_v11 = vor.u32 %v8721_v48, %v7981_v49  ;;  %v8368_v13 = vor.u32 %v8817_v35, %v8365_v51 }
 0xbaf   : > { %5446 = vmatpush.bf16.msra.mxu2 %v8020_v18  ;;  %5459 = vmatpush.bf16.msra.mxu3 %v8404_v5  ;;  %v8123_v18 = vld [vmem:[%s12543_s22 + $0x2c8] sm:$0xf]  ;;  %v8763_v5 = vld [vmem:[%s12543_s22 + $0x2f4] sm:$0xf0] }
 0xbb0   : > { %5472 = vmatpush.bf16.msrb.mxu0 %v8024_v57  ;;  %5485 = vmatpush.bf16.msrb.mxu1 %v8408_v27  ;;  %v8757_v57 = vld [vmem:[%s12543_s22 + $0x2cc] sm:$0xf]  ;;  %v7780_v27 = vor.u32 %v8678_v9, %v7779_v53  ;;  %v7980_v53 = vor.u32 %v8727_v20, %v7979_v12  ;;  %v8715_v9 = vld [vmem:[%s12543_s22 + $0x174] sm:$0xf0] }
 0xbb3   : > { %5447 = vmatpush.bf16.msra.mxu2 %v7972_v37  ;;  %5460 = vmatpush.bf16.msra.mxu3 %v8356_v56  ;;  %v8124_v37 = vor.u32 %v8763_v5, %v8123_v18  ;;  %v8508_v56 = vor.u32 %v8859_v44, %v8507_v19  ;;  %v7883_v19 = vld [vmem:[%s12543_s22 + $0xe8] sm:$0xf]  ;;  %v8703_v44 = vld [vmem:[%s12543_s22 + $0x114] sm:$0xf0] }
 0xbb4   : > { %5473 = vmatpush.bf16.msrb.mxu0 %v7976_v3  ;;  %5486 = vmatpush.bf16.msrb.mxu1 %v8360_v29  ;;  %v8128_v3 = vor.u32 %v8757_v57, %v8125_v59  ;;  %v8512_v29 = vor.u32 %v8853_v55, %v8509_v25  ;;  %v7936_v57 = vor.u32 %v8709_v15, %v7933_v2  ;;  %v8799_v59 = vld [vmem:[%s12543_s22 + $0x414] sm:$0xf0]  ;;  %v8697_v55 = vld [vmem:[%s12543_s22 + $0xec] sm:$0xf]  ;;  %v7885_v25 = vld [vmem:[%s12543_s22 + $0x118] sm:$0xf0] }
 0xbb7   : > { %5448 = vmatpush.bf16.msra.mxu2 %v7924_v4  ;;  %5461 = vmatpush.bf16.msra.mxu3 %v8308_v61  ;;  %v8076_v4 = vor.u32 %v8751_v46, %v8075_v24  ;;  %v8460_v61 = vor.u32 %v8847_v60, %v8459_v30  ;;  %v7835_v24 = vld [vmem:[%s12543_s22 + $0x88] sm:$0xf]  ;;  %v8691_v46 = vld [vmem:[%s12543_s22 + $0xb4] sm:$0xf0] }
 0xbb8   : > { %5474 = vmatpush.bf16.msrb.mxu0 %v7928_v40  ;;  %5487 = vmatpush.bf16.msrb.mxu1 %v8312_v62  ;;  %v8080_v40 = vor.u32 %v8745_v10, %v8077_v32  ;;  %v8464_v62 = vor.u32 %v8841_v33, %v8461_v36  ;;  %v8219_v30 = vld [vmem:[%s12543_s22 + $0x388] sm:$0xf]  ;;  %v8787_v60 = vld [vmem:[%s12543_s22 + $0x3b4] sm:$0xf0]  ;;  %v8685_v10 = vld [vmem:[%s12543_s22 + $0x8c] sm:$0xf] }
 0xbb9   : > { %v7837_v32 = vld [vmem:[%s12543_s22 + $0xb8] sm:$0xf0]  ;;  %v8781_v33 = vld [vmem:[%s12543_s22 + $0x38c] sm:$0xf] }
 0xbba   : > { %v8221_v36 = vld [vmem:[%s12543_s22 + $0x3b8] sm:$0xf0] }
 0xbbb   : > { %5449 = vmatpush.bf16.msra.mxu2 %v7876_v47  ;;  %5462 = vmatpush.bf16.msra.mxu3 %v8260_v1  ;;  %v8028_v47 = vor.u32 %v8739_v23, %v8027_v63  ;;  %v8412_v1 = vor.u32 %v8835_v43, %v8411_v34  ;;  %v7787_v63 = vld [vmem:[%s12543_s22 + $0x28] sm:$0xf]  ;;  %v8679_v23 = vld [vmem:[%s12543_s22 + $0x54] sm:$0xf0] }
 0xbbc   : > { %5475 = vmatpush.bf16.msrb.mxu0 %v7880_v16  ;;  %5488 = vmatpush.bf16.msrb.mxu1 %v8264_v52  ;;  %v8032_v16 = vor.u32 %v8733_v50, %v8029_v42  ;;  %v8416_v52 = vor.u32 %v8829_v8, %v8413_v45  ;;  %v8171_v34 = vld [vmem:[%s12543_s22 + $0x328] sm:$0xf]  ;;  %v8775_v43 = vld [vmem:[%s12543_s22 + $0x354] sm:$0xf0]  ;;  %v8673_v50 = vld [vmem:[%s12543_s22 + $0x2c] sm:$0xf] }
 0xbbd   : > { %v7789_v42 = vld [vmem:[%s12543_s22 + $0x58] sm:$0xf0]  ;;  %v8769_v8 = vld [vmem:[%s12543_s22 + $0x32c] sm:$0xf] }
 0xbbe   : > { %v8173_v45 = vld [vmem:[%s12543_s22 + $0x358] sm:$0xf0]  ;;  %v7792_v12 = vor.u32 %v8673_v50, %v7789_v42 }
 0xbbf   : > { %5450 = vmatpush.bf16.msra.mxu2 %v7828_v58  ;;  %5463 = vmatpush.bf16.msra.mxu3 %v8212_v0  ;;  %v8364_v58 = vor.u32 %v8823_v28, %v8363_v14  ;;  %v7931_v0 = vld [vmem:[%s12543_s22 + $0x148] sm:$0xf]  ;;  %v8176_v20 = vor.u32 %v8769_v8, %v8173_v45 }
 0xbc0   : > { %5476 = vmatpush.bf16.msrb.mxu0 %v7832_v38  ;;  %5489 = vmatpush.bf16.msrb.mxu1 %v8216_v41  ;;  %v8315_v38 = vld [vmem:[%s12543_s22 + $0x448] sm:$0xf]  ;;  %v8811_v41 = vld [vmem:[%s12543_s22 + $0x474] sm:$0xf0]  ;;  %v7932_v18 = vor.u32 %v8715_v9, %v7931_v0 }
 0xbc1   : > { %v8316_v5 = vor.u32 %v8811_v41, %v8315_v38 }
 0xbc3   : > { %5451 = vmatpush.bf16.msra.mxu2 %v7780_v27  ;;  %5464 = vmatpush.bf16.msra.mxu3 %v8164_v21  ;;  %v8320_v27 = vor.u32 %v8805_v6, %v8317_v17  ;;  %v8267_v21 = vld [vmem:[%s12543_s22 + $0x3e8] sm:$0xf] }
 0xbc4   : > { %5477 = vmatpush.bf16.msrb.mxu0 %v7784_v26  ;;  %5490 = vmatpush.bf16.msrb.mxu1 %v8168_v31  ;;  %v8793_v26 = vld [vmem:[%s12543_s22 + $0x3ec] sm:$0xf]  ;;  %v8269_v31 = vld [vmem:[%s12543_s22 + $0x418] sm:$0xf0] }
 0xbc6   : > { %5452 = vmatmul.bf16.vlgmr.msra.gmra.mxu2 %v11066_v39  ;;  %5465 = vmatmul.bf16.vlgmr.msra.gmra.mxu3 %v11068_v22 }
 0xbc7   : > { %5496 = vmatpush.bf16.msrb.mxu2 %v8124_v37  ;;  %5509 = vmatpush.bf16.msrb.mxu3 %v8508_v56  ;;  %v7884_v37 = vor.u32 %v8703_v44, %v7883_v19  ;;  %v8268_v56 = vor.u32 %v8799_v59, %v8267_v21 }
 0xbc8   : > { %5522 = vmatpush.bf16.msra.mxu0 %v8128_v3  ;;  %5535 = vmatpush.bf16.msra.mxu1 %v8512_v29  ;;  %v7888_v3 = vor.u32 %v8697_v55, %v7885_v25  ;;  %v8272_v29 = vor.u32 %v8793_v26, %v8269_v31 }
 0xbc9   : > { %5478 = vmatmul.bf16.vlgmr.msrb.gmra.mxu0 %v11066_v39  ;;  %5491 = vmatmul.bf16.vlgmr.msrb.gmra.mxu1 %v11068_v22 }
 0xbcb   : > { %5497 = vmatpush.bf16.msrb.mxu2 %v8076_v4  ;;  %5510 = vmatpush.bf16.msrb.mxu3 %v8460_v61  ;;  %v7836_v4 = vor.u32 %v8691_v46, %v7835_v24  ;;  %v8220_v61 = vor.u32 %v8787_v60, %v8219_v30 }
 0xbcc   : > { %5523 = vmatpush.bf16.msra.mxu0 %v8080_v40  ;;  %5536 = vmatpush.bf16.msra.mxu1 %v8464_v62  ;;  %v7840_v40 = vor.u32 %v8685_v10, %v7837_v32  ;;  %v8224_v62 = vor.u32 %v8781_v33, %v8221_v36 }
 0xbcf   : > { %5498 = vmatpush.bf16.msrb.mxu2 %v8028_v47  ;;  %5511 = vmatpush.bf16.msrb.mxu3 %v8412_v1  ;;  %v7788_v47 = vor.u32 %v8679_v23, %v7787_v63  ;;  %v8172_v1 = vor.u32 %v8775_v43, %v8171_v34 }
 0xbd0   : > { %5524 = vmatpush.bf16.msra.mxu0 %v8032_v16  ;;  %5537 = vmatpush.bf16.msra.mxu1 %v8416_v52 }
 0xbd3   : > { %5499 = vmatpush.bf16.msrb.mxu2 %v7980_v53  ;;  %5512 = vmatpush.bf16.msrb.mxu3 %v8364_v58 }
 0xbd4   : > { %5525 = vmatpush.bf16.msra.mxu0 %v7984_v11  ;;  %5538 = vmatpush.bf16.msra.mxu1 %v8368_v13 }
 0xbd7   : > { %5500 = vmatpush.bf16.msrb.mxu2 %v7932_v18  ;;  %5513 = vmatpush.bf16.msrb.mxu3 %v8316_v5 }
 0xbd8   : > { %5526 = vmatpush.bf16.msra.mxu0 %v7936_v57  ;;  %5539 = vmatpush.bf16.msra.mxu1 %v8320_v27 }
 0xbdb   : > { %5501 = vmatpush.bf16.msrb.mxu2 %v7884_v37  ;;  %5514 = vmatpush.bf16.msrb.mxu3 %v8268_v56 }
 0xbdc   : > { %5527 = vmatpush.bf16.msra.mxu0 %v7888_v3  ;;  %5540 = vmatpush.bf16.msra.mxu1 %v8272_v29 }
 0xbdf   : > { %5502 = vmatpush.bf16.msrb.mxu2 %v7836_v4  ;;  %5515 = vmatpush.bf16.msrb.mxu3 %v8220_v61 }
 0xbe0   : > { %5528 = vmatpush.bf16.msra.mxu0 %v7840_v40  ;;  %5541 = vmatpush.bf16.msra.mxu1 %v8224_v62 }
 0xbe3   : > { %5503 = vmatpush.bf16.msrb.mxu2 %v7788_v47  ;;  %5516 = vmatpush.bf16.msrb.mxu3 %v8172_v1  ;;  %v5271_v16 = vpop.f32.mrf.mxu0  ;;  %v5284_v52 = vpop.f32.mrf.mxu1 }
 0xbe4   : > { %5529 = vmatpush.bf16.msra.mxu0 %v7792_v12  ;;  %5542 = vmatpush.bf16.msra.mxu1 %v8176_v20  ;;  %v11353_v15 = vadd.f32 %v5284_v52, %v5271_v16 }
 0xbe6   : > { %5504 = vmatmul.bf16.vlgmr.msrb.gmra.mxu2 %v11066_v39  ;;  %5517 = vmatmul.bf16.vlgmr.msrb.gmra.mxu3 %v11068_v22 }
 0xbe7   : > { %5530 = vmatmul.bf16.vlgmr.msra.gmra.mxu0 %v11066_v39  ;;  %5543 = vmatmul.bf16.vlgmr.msra.gmra.mxu1 %v11068_v22 }
 0xbe8   : > { %v5245_v14 = vpop.f32.mrf.mxu2  ;;  %v5258_v28 = vpop.f32.mrf.mxu3 }
 0xbe9   : > { %v11342_v0 = vadd.f32 %v5258_v28, %v5245_v14 }
 0xbeb   : > { %v5273_v48 = vpop.f32.mrf.mxu0  ;;  %v5286_v49 = vpop.f32.mrf.mxu1 }
 0xbf0   : > { %v5247_v35 = vpop.f32.mrf.mxu2  ;;  %v5260_v51 = vpop.f32.mrf.mxu3 }
 0xbf3   : > { %v5323_v53 = vpop.f32.mrf.mxu0  ;;  %v5336_v58 = vpop.f32.mrf.mxu1 }
 0xbf4   : > { %v11344_v9 = vadd.f32 %v5336_v58, %v5323_v53 }
 0xbf6   : > { %v8985_v11 = vpack.i.bf16 %v11344_v9, %v11342_v0 }
 0xbf8   : > { %8986 = vrot.lane.b32.xlu1 %v8985_v11, %s9450_s28  ;;  %8981 = vrot.lane.b32.xlu2 %v8985_v11, %s9451_s11  ;;  %v5297_v39 = vpop.f32.mrf.mxu2  ;;  %v5310_v22 = vpop.f32.mrf.mxu3 }
 0xbf9   : > { %8976 = vrot.lane.b32.xlu0 %v8985_v11, %s12506_s1  ;;  %v11351_v13 = vadd.f32 %v5310_v22, %v5297_v39 }
 0xbfb   : > { %v5325_v38 = vpop.f32.mrf.mxu0  ;;  %v5338_v41 = vpop.f32.mrf.mxu1  ;;  %v9015_v2 = vpack.i.bf16 %v11351_v13, %v11353_v15 }
 0xc00   : > { %8996 = vrot.lane.b32.xlu2 %v8985_v11, %s9453_s16  ;;  %9016 = vrot.lane.b32.xlu1 %v9015_v2, %s12506_s1  ;;  %v5299_v6 = vpop.f32.mrf.mxu2  ;;  %v5312_v17 = vpop.f32.mrf.mxu3  ;;  %s12545_s1 = smov 127  }
 0xc01   : > { %8991 = vrot.lane.b32.xlu0 %v8985_v11, %s9454_s26 }
 0xc06   : > { %v5375_v18 = vpop.f32.mrf.mxu0  ;;  %v5388_v5 = vpop.f32.mrf.mxu1 }
 0xc07   : > { %v11384_v10 = vadd.f32 %v5388_v5, %v5375_v18 }
 0xc08   : > { %9001 = vrot.lane.b32.xlu2 %v8985_v11, %s12508_s23  ;;  %9026 = vrot.lane.b32.xlu1 %v9015_v2, %s9450_s28 }
 0xc09   : > { %9006 = vrot.lane.b32.xlu0 %v8985_v11, %s12510_s15  ;;  %v5349_v19 = vpop.f32.mrf.mxu2  ;;  %v5362_v44 = vpop.f32.mrf.mxu3 }
 0xc0a   : > { %v11370_v26 = vadd.f32 %v5362_v44, %v5349_v19 }
 0xc0e   : > { %v5377_v57 = vpop.f32.mrf.mxu0  ;;  %v5390_v27 = vpop.f32.mrf.mxu1 }
 0xc10   : > { %9021 = vrot.lane.b32.xlu2 %v9015_v2, %s9451_s11  ;;  %9041 = vrot.lane.b32.xlu1 %v9015_v2, %s12508_s23  ;;  %s12546_s23 = smov 88  }
 0xc11   : > { %9011 = vrot.lane.b32.xlu0 %v8985_v11, %s12545_s1  ;;  %v5351_v21 = vpop.f32.mrf.mxu2  ;;  %v5364_v59 = vpop.f32.mrf.mxu3 }
 0xc18   : > { %9036 = vrot.lane.b32.xlu2 %v9015_v2, %s9453_s16  ;;  %9046 = vrot.lane.b32.xlu1 %v9015_v2, %s12510_s15 }
 0xc19   : > { %9031 = vrot.lane.b32.xlu0 %v9015_v2, %s9454_s26 }
 0xc20   : > { %9051 = vrot.lane.b32.xlu2 %v9015_v2, %s12545_s1 }
 0xc26   : > { %v5427_v55 = vpop.f32.mrf.mxu0  ;;  %v5440_v25 = vpop.f32.mrf.mxu1 }
 0xc27   : > { %v11372_v31 = vadd.f32 %v5440_v25, %v5427_v55 }
 0xc29   : > { %v9085_v37 = vpack.i.bf16 %v11372_v31, %v11370_v26  ;;  %v5401_v56 = vpop.f32.mrf.mxu2  ;;  %v5414_v24 = vpop.f32.mrf.mxu3 }
 0xc2a   : > { %v11382_v60 = vadd.f32 %v5414_v24, %v5401_v56 }
 0xc2b   : > { %9086 = vrot.lane.b32.xlu0 %v9085_v37, %s12510_s15  ;;  %9056 = vrot.lane.b32.xlu1 %v9085_v37, %s12546_s23  ;;  %s12547_s15 = smov 109  }
 0xc2c   : > { %9061 = vrot.lane.b32.xlu2 %v9085_v37, %s9451_s11  ;;  %v9095_v32 = vpack.i.bf16 %v11382_v60, %v11384_v10 }
 0xc2e   : > { %v5429_v46 = vpop.f32.mrf.mxu0  ;;  %v5442_v3 = vpop.f32.mrf.mxu1 }
 0xc31   : > { %v5403_v29 = vpop.f32.mrf.mxu2  ;;  %v5416_v30 = vpop.f32.mrf.mxu3 }
 0xc33   : > { %9091 = vrot.lane.b32.xlu0 %v9085_v37, %s12545_s1  ;;  %9071 = vrot.lane.b32.xlu1 %v9085_v37, %s9454_s26 }
 0xc34   : > { %9066 = vrot.lane.b32.xlu2 %v9085_v37, %s9450_s28 }
 0xc3b   : > { %9076 = vrot.lane.b32.xlu1 %v9085_v37, %s9453_s16  ;;  %9096 = vrot.lane.b32.xlu0 %v9095_v32, %s12546_s23 }
 0xc3c   : > { %9081 = vrot.lane.b32.xlu2 %v9085_v37, %s12547_s15 }
 0xc43   : > { %9106 = vrot.lane.b32.xlu1 %v9095_v32, %s9450_s28  ;;  %9101 = vrot.lane.b32.xlu0 %v9095_v32, %s9451_s11 }
 0xc44   : > { %9131 = vrot.lane.b32.xlu2 %v9095_v32, %s12545_s1 }
 0xc46   : > { %v5479_v33 = vpop.f32.mrf.mxu0  ;;  %v5492_v36 = vpop.f32.mrf.mxu1 }
 0xc47   : > { %v11422_v51 = vadd.f32 %v5492_v36, %v5479_v33 }
 0xc49   : > { %v5453_v4 = vpop.f32.mrf.mxu2  ;;  %v5466_v61 = vpop.f32.mrf.mxu3 }
 0xc4a   : > { %v11402_v8 = vadd.f32 %v5466_v61, %v5453_v4 }
 0xc4b   : > { %9111 = vrot.lane.b32.xlu1 %v9095_v32, %s9454_s26  ;;  %9116 = vrot.lane.b32.xlu0 %v9095_v32, %s9453_s16 }
 0xc4e   : > { %v5481_v63 = vpop.f32.mrf.mxu0  ;;  %v5494_v23 = vpop.f32.mrf.mxu1 }
 0xc51   : > { %v5455_v40 = vpop.f32.mrf.mxu2  ;;  %v5468_v62 = vpop.f32.mrf.mxu3 }
 0xc52   : > { %v11398_v34 = vpop.permute.xlu2 %8981 }
 0xc53   : > { %9126 = vrot.lane.b32.xlu1 %v9095_v32, %s12548_s0  ;;  %9121 = vrot.lane.b32.xlu0 %v9095_v32, %s12547_s15  ;;  %v8983_v18 = vunpack.i.l.bf16 %v11398_v34  ;;  %v8984_v44 = vunpack.i.h.bf16 %v11398_v34 }
 0xc5a   : > { %v11400_v43 = vpop.permute.xlu2 %8996 }
 0xc62   : > { %v11411_v20 = vpop.permute.xlu2 %9001 }
 0xc64   : > { %v5531_v50 = vpop.f32.mrf.mxu0  ;;  %v5544_v42 = vpop.f32.mrf.mxu1 }
 0xc65   : > { %v11404_v45 = vadd.f32 %v5544_v42, %v5531_v50 }
 0xc67   : > { %v9145_v47 = vpack.i.bf16 %v11404_v45, %v11402_v8 }
 0xc69   : > { %9146 = vrot.lane.b32.xlu2 %v9145_v47, %s9450_s28  ;;  %9141 = vrot.lane.b32.xlu1 %v9145_v47, %s9451_s11  ;;  %v5505_v1 = vpop.f32.mrf.mxu2  ;;  %v5518_v12 = vpop.f32.mrf.mxu3 }
 0xc6a   : > { %9136 = vrot.lane.b32.xlu0 %v9145_v47, %s12546_s23  ;;  %v11413_v14 = vpop.permute.xlu1 %8986  ;;  %v11420_v35 = vadd.f32 %v5518_v12, %v5505_v1  ;;  %v9022_v53 = vpop.permute.xlu2 %9021  ;;  %v8998_v1 = vunpack.i.l.bf16 %v11400_v43 }
 0xc6b   : > { %v11418_v49 = vpop.permute.xlu0 %8976  ;;  %v9024_v11 = vunpack.i.h.bf16 %v9022_v53  ;;  %v9023_v38 = vunpack.i.l.bf16 %v9022_v53  ;;  %v8988_v25 = vunpack.i.l.bf16 %v11413_v14  ;;  %v8989_v46 = vunpack.i.h.bf16 %v11413_v14 }
 0xc6c   : > { %v5533_v16 = vpop.f32.mrf.mxu0  ;;  %v5546_v52 = vpop.f32.mrf.mxu1  ;;  %v9180_v58 = vpack.i.bf16 %v11420_v35, %v11422_v51  ;;  %v8978_v22 = vunpack.i.l.bf16 %v11418_v49  ;;  %v8979_v6 = vunpack.i.h.bf16 %v11418_v49 }
 0xc6d   : > { %v5806_v27 = vsel %vm5795_vm6, %v8983_v18, %v9023_v38  ;;  %v5805_v21 = vsel %vm5795_vm6, %v9023_v38, %v9024_v11  ;;  %v5804_v59 = vsel %vm5795_vm6, %v9024_v11, %v8984_v44  ;;  %v8999_v11 = vunpack.i.h.bf16 %v11400_v43 }
 0xc6e   : > { %v9003_v38 = vunpack.i.l.bf16 %v11411_v20 }
 0xc71   : > { %9151 = vrot.lane.b32.xlu2 %v9145_v47, %s9454_s26  ;;  %9156 = vrot.lane.b32.xlu1 %v9145_v47, %s9453_s16  ;;  %v5507_v28 = vpop.f32.mrf.mxu2  ;;  %v5520_v48 = vpop.f32.mrf.mxu3 }
 0xc72   : > { %9161 = vrot.lane.b32.xlu0 %v9145_v47, %s12547_s15  ;;  %v9017_v39 = vpop.permute.xlu1 %9016  ;;  %v9037_v37 = vpop.permute.xlu2 %9036 }
 0xc73   : > { %v9019_v41 = vunpack.i.h.bf16 %v9017_v39  ;;  %v9018_v2 = vunpack.i.l.bf16 %v9017_v39  ;;  %v11432_v17 = vpop.permute.xlu0 %8991  ;;  %v9039_v63 = vunpack.i.h.bf16 %v9037_v37  ;;  %v9038_v23 = vunpack.i.l.bf16 %v9037_v37 }
 0xc74   : > { %v8994_v62 = vunpack.i.h.bf16 %v11432_v17  ;;  %v8993_v50 = vunpack.i.l.bf16 %v11432_v17  ;;  %v9004_v39 = vunpack.i.h.bf16 %v11411_v20 }
 0xc75   : > { %v5843_v5 = vsel %vm5832_vm4, %v8978_v22, %v9018_v2  ;;  %v5842_v19 = vsel %vm5832_vm4, %v9018_v2, %v9019_v41  ;;  %v5841_v57 = vsel %vm5832_vm4, %v9019_v41, %v8979_v6 }
 0xc76   : > { %5860 = vmatpush.msra.mxu2 %v5843_v5  ;;  %5880 = vmatpush.msra.mxu3 %v5842_v19  ;;  %v5695_v5 = vsel %vm5684_vm9, %v8998_v1, %v9038_v23  ;;  %v5694_v19 = vsel %vm5684_vm9, %v9038_v23, %v9039_v63 }
 0xc77   : > { %5900 = vmatpush.msrb.mxu0 %v5841_v57 }
 0xc78   : > { %5861 = vmatpush.msra.mxu2 %v5806_v27  ;;  %5881 = vmatpush.msra.mxu3 %v5805_v21  ;;  %v5693_v21 = vsel %vm5684_vm9, %v9039_v63, %v8999_v11 }
 0xc79   : > { %9181 = vrot.lane.b32.xlu1 %v9180_v58, %s9454_s26  ;;  %9166 = vrot.lane.b32.xlu2 %v9180_v58, %s12546_s23  ;;  %s12549_s23 = sld [smem:[#allocation17_spill]] }
 0xc7a   : > { %9176 = vrot.lane.b32.xlu0 %v9180_v58, %s9450_s28  ;;  %5901 = vmatpush.msrb.mxu0 %v5804_v59  ;;  %v9027_v55 = vpop.permute.xlu1 %9026  ;;  %v11482_v4 = vpop.permute.xlu2 %9051  ;;  %s12552_s28 = sld [smem:[#allocation2_spill]] }
 0xc7b   : > { %v9029_v56 = vunpack.i.h.bf16 %v9027_v55  ;;  %v9028_v24 = vunpack.i.l.bf16 %v9027_v55  ;;  %v11463_v3 = vpop.permute.xlu0 %9006  ;;  %v9054_v57 = vunpack.i.h.bf16 %v11482_v4  ;;  %v9053_v27 = vunpack.i.l.bf16 %v11482_v4 }
 0xc7c   : > { %v9008_v59 = vunpack.i.l.bf16 %v11463_v3 }
 0xc7d   : > { %v5769_v29 = vsel %vm5758_vm7, %v8988_v25, %v9028_v24  ;;  %v5768_v30 = vsel %vm5758_vm7, %v9028_v24, %v9029_v56  ;;  %v5767_v32 = vsel %vm5758_vm7, %v9029_v56, %v8989_v46  ;;  %v9009_v24 = vunpack.i.h.bf16 %v11463_v3 }
 0xc7e   : > { %5862 = vmatpush.msra.mxu2 %v5769_v29  ;;  %5882 = vmatpush.msra.mxu3 %v5768_v30  ;;  %v5583_v63 = vsel %vm1173_vm1, %v9053_v27, %v9054_v57 }
 0xc7f   : > { %5902 = vmatpush.msrb.mxu0 %v5767_v32  ;;  %v5549_v61 = vld [vmem:[%s12549_s23] sm:$0xff] }
 0xc81   : > { %9186 = vrot.lane.b32.xlu1 %v9180_v58, %s9453_s16  ;;  %9171 = vrot.lane.b32.xlu2 %v9180_v58, %s9451_s11 }
 0xc82   : > { %9191 = vrot.lane.b32.xlu0 %v9180_v58, %s12547_s15  ;;  %v9042_v36 = vpop.permute.xlu1 %9041 }
 0xc83   : > { %v11480_v33 = vpop.permute.xlu0 %9011  ;;  %v9044_v12 = vunpack.i.h.bf16 %v9042_v36  ;;  %v9043_v52 = vunpack.i.l.bf16 %v9042_v36 }
 0xc84   : > { %v9013_v55 = vunpack.i.l.bf16 %v11480_v33  ;;  %v9014_v29 = vunpack.i.h.bf16 %v11480_v33 }
 0xc85   : > { %v5658_v37 = vsel %vm5647_vm10, %v9003_v38, %v9043_v52  ;;  %v5657_v56 = vsel %vm5647_vm10, %v9043_v52, %v9044_v12  ;;  %v5656_v30 = vsel %vm5647_vm10, %v9044_v12, %v9004_v39 }
 0xc86   : > { %v11493_v28 = vpop.permute.xlu2 %9061  ;;  %v5582_v23 = vsel %vm1173_vm1, %v9054_v57, %v9014_v29 }
 0xc89   : > { %9201 = vrot.lane.b32.xlu1 %v9180_v58, %s12545_s1  ;;  %5602 = vrot.lane.b32.xlu2 %v11402_v8, %s12548_s0 }
 0xc8a   : > { %5566 = vrot.lane.b32.xlu0 %v11402_v8, %s12545_s1  ;;  %v9047_v16 = vpop.permute.xlu1 %9046 }
 0xc8b   : > { %v9032_v40 = vpop.permute.xlu0 %9031  ;;  %v9049_v41 = vunpack.i.h.bf16 %v9047_v16  ;;  %v9048_v2 = vunpack.i.l.bf16 %v9047_v16  ;;  %v9063_v16 = vunpack.i.l.bf16 %v11493_v28 }
 0xc8c   : > { %v9034_v42 = vunpack.i.h.bf16 %v9032_v40  ;;  %v9033_v47 = vunpack.i.l.bf16 %v9032_v40 }
 0xc8d   : > { %v5621_v32 = vsel %vm5610_vm11, %v9008_v59, %v9048_v2  ;;  %v5620_v36 = vsel %vm5610_vm11, %v9048_v2, %v9049_v41  ;;  %v5619_v4 = vsel %vm5610_vm11, %v9049_v41, %v9009_v24 }
 0xc8e   : > { %v5732_v48 = vsel %vm5721_vm8, %v8993_v50, %v9033_v47  ;;  %v5731_v53 = vsel %vm5721_vm8, %v9033_v47, %v9034_v42 }
 0xc8f   : > { %5863 = vmatpush.msra.mxu2 %v5732_v48  ;;  %5883 = vmatpush.msra.mxu3 %v5731_v53 }
 0xc91   : > { %5608 = vrot.lane.b32.xlu1 %v11404_v45, %s12548_s0  ;;  %9196 = vrot.lane.b32.xlu2 %v9180_v58, %s12548_s0  ;;  %v5730_v58 = vsel %vm5721_vm8, %v9034_v42, %v8994_v62  ;;  %s12550_s0 = sld [smem:[#allocation16_spill]]  ;;  %v11561_v42 = vpop.permute.xlu2 %9066 }
 0xc92   : > { %5847 = vperm.xlu0 %8927, %v5549_v61   ;;  %5903 = vmatpush.msrb.mxu0 %v5730_v58  ;;  %v5584_v61 = vsel %vm1173_vm1, %v9013_v55, %v9053_v27  ;;  %v9068_v48 = vunpack.i.l.bf16 %v11561_v42 }
 0xc93   : > { %5864 = vmatpush.msra.mxu2 %v5695_v5  ;;  %5884 = vmatpush.msra.mxu3 %v5694_v19 }
 0xc94   : > { %5904 = vmatpush.msrb.mxu0 %v5693_v21 }
 0xc95   : > { %5865 = vmatpush.msra.mxu2 %v5658_v37  ;;  %5885 = vmatpush.msra.mxu3 %v5657_v56 }
 0xc96   : > { %5905 = vmatpush.msrb.mxu0 %v5656_v30 }
 0xc97   : > { %5866 = vmatpush.msra.mxu2 %v5621_v32  ;;  %5886 = vmatpush.msra.mxu3 %v5620_v36  ;;  %v11559_v40 = vld [vmem:[%s12550_s0] sm:$0xff]  ;;  %s1060_s0 = scalar_lea.vmem %s9630_s27, %s12569_s10 }
 0xc98   : > { %5906 = vmatpush.msrb.mxu0 %v5619_v4 }
 0xc99   : > { %5572 = vrot.lane.b32.xlu2 %v11404_v45, %s12545_s1  ;;  %5867 = vmatpush.msra.mxu2 %v5584_v61  ;;  %v9064_v61 = vunpack.i.h.bf16 %v11493_v28 }
 0xc9a   : > { %5887 = vmatpush.msra.mxu3 %v5583_v63  ;;  %5907 = vmatpush.msrb.mxu0 %v5582_v23 }
 0xc9b   : > { %5868 = vmatpush.msra.mxu2 %v11342_v0 }
 0xc9c   : > { %5888 = vmatpush.msra.mxu3 %v11353_v15  ;;  %5908 = vmatpush.msrb.mxu0 %v11351_v13  ;;  %v5803_v13 = vsel %vm5795_vm6, %v8984_v44, %v9063_v16  ;;  %v5766_v15 = vsel %vm5758_vm7, %v8989_v46, %v9068_v48  ;;  %v11600_v44 = vpop.permute.xlu2 %9081 }
 0xc9d   : > { %v11563_v47 = vpop.permute.xlu0 %9086  ;;  %v11565_v12 = vpop.permute.xlu1 %9056  ;;  %8513 = vmatmul.msk.f32.vlgmr.msra.gmra.mxu2 %vm2975_vm13, %v11559_v40  ;;  %8514 = vmatmul.msk.f32.vlgmr.msra.gmra.mxu3 %vm2975_vm13, %v11559_v40  ;;  %v9083_v2 = vunpack.i.l.bf16 %v11600_v44 }
 0xc9e   : > { %v9058_v52 = vunpack.i.l.bf16 %v11565_v12  ;;  %8515 = vmatmul.msk.f32.vlgmr.msrb.gmra.mxu0 %vm2975_vm13, %v11559_v40  ;;  %v9059_v19 = vunpack.i.h.bf16 %v11565_v12  ;;  %v9088_v37 = vunpack.i.l.bf16 %v11563_v47 }
 0xca0   : > { %v5840_v0 = vsel %vm5832_vm4, %v8979_v6, %v9058_v52  ;;  %v5618_v4 = vsel %vm5610_vm11, %v9009_v24, %v9088_v37 }
 0xca1   : > { %5920 = vmatpush.msrb.mxu1 %v5840_v0 }
 0xca3   : > { %5921 = vmatpush.msrb.mxu1 %v5803_v13 }
 0xca5   : > { %v11591_v53 = vpop.permute.xlu0 %9091  ;;  %v11593_v58 = vpop.permute.xlu1 %9071  ;;  %5922 = vmatpush.msrb.mxu1 %v5766_v15 }
 0xca6   : > { %v9073_v41 = vunpack.i.l.bf16 %v11593_v58  ;;  %v9093_v36 = vunpack.i.l.bf16 %v11591_v53 }
 0xca8   : > { %v5729_v6 = vsel %vm5721_vm8, %v8994_v62, %v9073_v41 }
 0xca9   : > { %5923 = vmatpush.msrb.mxu1 %v5729_v6  ;;  %v11640_v6 = vpop.permute.xlu2 %9131 }
 0xcad   : > { %v11603_v5 = vpop.permute.xlu1 %9076  ;;  %v9097_v46 = vpop.permute.xlu0 %9096 }
 0xcae   : > { %v9078_v57 = vunpack.i.l.bf16 %v11603_v5  ;;  %v9099_v27 = vunpack.i.h.bf16 %v9097_v46  ;;  %v9098_v21 = vunpack.i.l.bf16 %v9097_v46 }
 0xcb0   : > { %v5692_v62 = vsel %vm5684_vm9, %v8999_v11, %v9078_v57  ;;  %v5839_v56 = vsel %vm5832_vm4, %v9058_v52, %v9098_v21  ;;  %v5838_v30 = vsel %vm5832_vm4, %v9098_v21, %v9099_v27  ;;  %v5837_v32 = vsel %vm5832_vm4, %v9099_v27, %v9059_v19 }
 0xcb1   : > { %5924 = vmatpush.msrb.mxu1 %v5692_v62  ;;  %5940 = vmatpush.msrb.mxu2 %v5839_v56  ;;  %v5655_v11 = vsel %vm5647_vm10, %v9004_v39, %v9083_v2  ;;  %v5581_v39 = vsel %vm1173_vm1, %v9014_v29, %v9093_v36  ;;  %v9069_v21 = vunpack.i.h.bf16 %v11561_v42 }
 0xcb2   : > { %5960 = vmatpush.msrb.mxu3 %v5838_v30  ;;  %5980 = vmatpush.msra.mxu0 %v5837_v32 }
 0xcb3   : > { %5925 = vmatpush.msrb.mxu1 %v5655_v11 }
 0xcb5   : > { %5926 = vmatpush.msrb.mxu1 %v5618_v4  ;;  %v9107_v63 = vpop.permute.xlu1 %9106  ;;  %v9102_v23 = vpop.permute.xlu0 %9101 }
 0xcb6   : > { %v9108_v52 = vunpack.i.l.bf16 %v9107_v63  ;;  %v9104_v0 = vunpack.i.h.bf16 %v9102_v23  ;;  %v9103_v13 = vunpack.i.l.bf16 %v9102_v23  ;;  %v9109_v15 = vunpack.i.h.bf16 %v9107_v63 }
 0xcb7   : > { %5927 = vmatpush.msrb.mxu1 %v5581_v39 }
 0xcb8   : > { %v5802_v24 = vsel %vm5795_vm6, %v9063_v16, %v9103_v13  ;;  %v5801_v46 = vsel %vm5795_vm6, %v9103_v13, %v9104_v0  ;;  %v5800_v27 = vsel %vm5795_vm6, %v9104_v0, %v9064_v61  ;;  %v5765_v29 = vsel %vm5758_vm7, %v9068_v48, %v9108_v52 }
 0xcb9   : > { %5928 = vmatpush.msrb.mxu1 %v11344_v9  ;;  %5941 = vmatpush.msrb.mxu2 %v5802_v24  ;;  %v5764_v16 = vsel %vm5758_vm7, %v9108_v52, %v9109_v15  ;;  %v5763_v62 = vsel %vm5758_vm7, %v9109_v15, %v9069_v21  ;;  %v9074_v9 = vunpack.i.h.bf16 %v11593_v58  ;;  %v9079_v13 = vunpack.i.h.bf16 %v11603_v5 }
 0xcba   : > { %5961 = vmatpush.msrb.mxu3 %v5801_v46  ;;  %5981 = vmatpush.msra.mxu0 %v5800_v27  ;;  %v9084_v24 = vunpack.i.h.bf16 %v11600_v44 }
 0xcbb   : > { %8516 = vmatmul.msk.f32.vlgmr.msrb.gmra.mxu1 %vm2975_vm13, %v11559_v40  ;;  %5942 = vmatpush.msrb.mxu2 %v5765_v29 }
 0xcbc   : > { %5962 = vmatpush.msrb.mxu3 %v5764_v16  ;;  %5982 = vmatpush.msra.mxu0 %v5763_v62 }
 0xcbd   : > { %v9112_v56 = vpop.permute.xlu1 %9111  ;;  %v9117_v30 = vpop.permute.xlu0 %9116 }
 0xcbe   : > { %v9114_v32 = vunpack.i.h.bf16 %v9112_v56  ;;  %v9113_v48 = vunpack.i.l.bf16 %v9112_v56  ;;  %v9119_v11 = vunpack.i.h.bf16 %v9117_v30  ;;  %v9118_v4 = vunpack.i.l.bf16 %v9117_v30 }
 0xcbf   : > { %v9133_v30 = vunpack.i.l.bf16 %v11640_v6 }
 0xcc0   : > { %v5728_v23 = vsel %vm5721_vm8, %v9073_v41, %v9113_v48  ;;  %v5727_v52 = vsel %vm5721_vm8, %v9113_v48, %v9114_v32  ;;  %v5726_v0 = vsel %vm5721_vm8, %v9114_v32, %v9074_v9  ;;  %v5691_v39 = vsel %vm5684_vm9, %v9078_v57, %v9118_v4 }
 0xcc1   : > { %5943 = vmatpush.msrb.mxu2 %v5728_v23  ;;  %5963 = vmatpush.msrb.mxu3 %v5727_v52  ;;  %v5690_v15 = vsel %vm5684_vm9, %v9118_v4, %v9119_v11  ;;  %v5689_v41 = vsel %vm5684_vm9, %v9119_v11, %v9079_v13  ;;  %v9134_v57 = vunpack.i.h.bf16 %v11640_v6  ;;  %v9089_v23 = vunpack.i.h.bf16 %v11563_v47 }
 0xcc2   : > { %5983 = vmatpush.msra.mxu0 %v5726_v0  ;;  %v9094_v52 = vunpack.i.h.bf16 %v11591_v53 }
 0xcc3   : > { %v11663_v63 = vpop.permute.xlu2 %9146  ;;  %5944 = vmatpush.msrb.mxu2 %v5691_v39  ;;  %5964 = vmatpush.msrb.mxu3 %v5690_v15  ;;  %v5580_v39 = vsel %vm1173_vm1, %v9093_v36, %v9133_v30  ;;  %v5579_v15 = vsel %vm1173_vm1, %v9133_v30, %v9134_v57 }
 0xcc4   : > { %5984 = vmatpush.msra.mxu0 %v5689_v41 }
 0xcc5   : > { %v9127_v46 = vpop.permute.xlu1 %9126  ;;  %v9122_v27 = vpop.permute.xlu0 %9121 }
 0xcc6   : > { %v9129_v29 = vunpack.i.h.bf16 %v9127_v46  ;;  %v9128_v16 = vunpack.i.l.bf16 %v9127_v46  ;;  %v9124_v62 = vunpack.i.h.bf16 %v9122_v27  ;;  %v9123_v56 = vunpack.i.l.bf16 %v9122_v27 }
 0xcc8   : > { %v5654_v48 = vsel %vm5647_vm10, %v9083_v2, %v9123_v56  ;;  %v5653_v11 = vsel %vm5647_vm10, %v9123_v56, %v9124_v62  ;;  %v5652_v4 = vsel %vm5647_vm10, %v9124_v62, %v9084_v24  ;;  %v5617_v2 = vsel %vm5610_vm11, %v9088_v37, %v9128_v16 }
 0xcc9   : > { %5945 = vmatpush.msrb.mxu2 %v5654_v48  ;;  %5965 = vmatpush.msrb.mxu3 %v5653_v11  ;;  %v5616_v6 = vsel %vm5610_vm11, %v9128_v16, %v9129_v29  ;;  %v5615_v0 = vsel %vm5610_vm11, %v9129_v29, %v9089_v23  ;;  %v5578_v37 = vsel %vm1173_vm1, %v9134_v57, %v9094_v52  ;;  %v9148_v11 = vunpack.i.l.bf16 %v11663_v63 }
 0xcca   : > { %5985 = vmatpush.msra.mxu0 %v5652_v4 }
 0xccb   : > { %v11685_v32 = vpop.permute.xlu2 %9151  ;;  %5946 = vmatpush.msrb.mxu2 %v5617_v2  ;;  %5966 = vmatpush.msrb.mxu3 %v5616_v6  ;;  %v5762_v28 = vsel %vm5758_vm7, %v9069_v21, %v9148_v11 }
 0xccc   : > { %5986 = vmatpush.msra.mxu0 %v5615_v0  ;;  %v9153_v0 = vunpack.i.l.bf16 %v11685_v32 }
 0xccd   : > { %5947 = vmatpush.msrb.mxu2 %v5580_v39  ;;  %5967 = vmatpush.msrb.mxu3 %v5579_v15 }
 0xcce   : > { %5987 = vmatpush.msra.mxu0 %v5578_v37 }
 0xccf   : > { %5948 = vmatpush.msrb.mxu2 %v11370_v26  ;;  %5968 = vmatpush.msrb.mxu3 %v11384_v10 }
 0xcd0   : > { %5988 = vmatpush.msra.mxu0 %v11382_v60  ;;  %8517 = vmatmul.msk.f32.vlgmr.msrb.gmra.mxu2 %vm2975_vm13, %v11559_v40 }
 0xcd1   : > { %8518 = vmatmul.msk.f32.vlgmr.msrb.gmra.mxu3 %vm2975_vm13, %v11559_v40  ;;  %8519 = vmatmul.msk.f32.vlgmr.msra.gmra.mxu0 %vm2975_vm13, %v11559_v40 }
 0xcd3   : > { %v9167_v41 = vpop.permute.xlu2 %9166 }
 0xcd4   : > { %v9169_v36 = vunpack.i.h.bf16 %v9167_v41  ;;  %v9168_v46 = vunpack.i.l.bf16 %v9167_v41 }
 0xcd6   : > { %v5834_v27 = vsel %vm5832_vm4, %v9168_v46, %v9169_v36 }
 0xcd7   : > { %6040 = vmatpush.msra.mxu3 %v5834_v27 }
 0xcdb   : > { %v11730_v26 = vpop.permute.xlu1 %9141  ;;  %v9172_v10 = vpop.permute.xlu2 %9171 }
 0xcdc   : > { %v11732_v60 = vpop.permute.xlu0 %9136  ;;  %v9174_v29 = vunpack.i.h.bf16 %v9172_v10  ;;  %v9173_v16 = vunpack.i.l.bf16 %v9172_v10  ;;  %v9143_v62 = vunpack.i.l.bf16 %v11730_v26  ;;  %v9144_v30 = vunpack.i.h.bf16 %v11730_v26 }
 0xcdd   : > { %v9139_v56 = vunpack.i.h.bf16 %v11732_v60  ;;  %v9138_v57 = vunpack.i.l.bf16 %v11732_v60 }
 0xcde   : > { %v5797_v48 = vsel %vm5795_vm6, %v9173_v16, %v9174_v29  ;;  %v5799_v12 = vsel %vm5795_vm6, %v9064_v61, %v9143_v62  ;;  %v5796_v39 = vsel %vm5795_vm6, %v9174_v29, %v9144_v30 }
 0xcdf   : > { %v5836_v4 = vsel %vm5832_vm4, %v9059_v19, %v9138_v57  ;;  %v5835_v2 = vsel %vm5832_vm4, %v9138_v57, %v9168_v46  ;;  %6041 = vmatpush.msra.mxu3 %v5797_v48  ;;  %v5833_v6 = vsel %vm5832_vm4, %v9169_v36, %v9139_v56  ;;  %v5798_v19 = vsel %vm5795_vm6, %v9143_v62, %v9173_v16 }
 0xce0   : > { %6000 = vmatpush.msra.mxu1 %v5836_v4  ;;  %6020 = vmatpush.msra.mxu2 %v5835_v2  ;;  %v5725_v36 = vsel %vm5721_vm8, %v9074_v9, %v9153_v0  ;;  %v9149_v9 = vunpack.i.h.bf16 %v11663_v63  ;;  %v5844_v53 = vsel %vm5832_vm4, %v9139_v56, %v8978_v22 }
 0xce1   : > { %6060 = vmatpush.msrb.mxu0 %v5833_v6 }
 0xce2   : > { %6001 = vmatpush.msra.mxu1 %v5799_v12  ;;  %6021 = vmatpush.msra.mxu2 %v5798_v19 }
 0xce3   : > { %6061 = vmatpush.msrb.mxu0 %v5796_v39  ;;  %v11762_v15 = vpop.permute.xlu1 %9156  ;;  %v5603_v46 = vpop.permute.xlu2 %5602 }
 0xce4   : > { %v9158_v61 = vunpack.i.l.bf16 %v11762_v15  ;;  %v11769_v37 = vpop.permute.xlu0 %9161  ;;  %6002 = vmatpush.msra.mxu1 %v5762_v28  ;;  %v5614_v58 = vsel %vm5610_vm11, %v9089_v23, %v5603_v46  ;;  %v9154_v23 = vunpack.i.h.bf16 %v11685_v32  ;;  %v9159_v2 = vunpack.i.h.bf16 %v11762_v15 }
 0xce5   : > { %v9163_v41 = vunpack.i.l.bf16 %v11769_v37 }
 0xce6   : > { %6003 = vmatpush.msra.mxu1 %v5725_v36  ;;  %v5688_v42 = vsel %vm5684_vm9, %v9079_v13, %v9158_v61  ;;  %v5696_v14 = vsel %vm5684_vm9, %v9159_v2, %v8998_v1 }
 0xce7   : > { %v5651_v21 = vsel %vm5647_vm10, %v9084_v24, %v9163_v41 }
 0xce8   : > { %6004 = vmatpush.msra.mxu1 %v5688_v42 }
 0xcea   : > { %6005 = vmatpush.msra.mxu1 %v5651_v21 }
 0xceb   : > { %v9182_v27 = vpop.permute.xlu1 %9181  ;;  %v9197_v48 = vpop.permute.xlu2 %9196 }
 0xcec   : > { %v9177_v5 = vpop.permute.xlu0 %9176  ;;  %6006 = vmatpush.msra.mxu1 %v5614_v58  ;;  %v9184_v10 = vunpack.i.h.bf16 %v9182_v27  ;;  %v9183_v13 = vunpack.i.l.bf16 %v9182_v27  ;;  %v9199_v39 = vunpack.i.h.bf16 %v9197_v48  ;;  %v9198_v36 = vunpack.i.l.bf16 %v9197_v48 }
 0xced   : > { %v9179_v29 = vunpack.i.h.bf16 %v9177_v5  ;;  %v9178_v16 = vunpack.i.l.bf16 %v9177_v5  ;;  %v9164_v58 = vunpack.i.h.bf16 %v11769_v37 }
 0xcee   : > { %v5724_v62 = vsel %vm5721_vm8, %v9153_v0, %v9183_v13  ;;  %v5723_v57 = vsel %vm5721_vm8, %v9183_v13, %v9184_v10  ;;  %v5612_v37 = vsel %vm5610_vm11, %v9198_v36, %v9199_v39 }
 0xcef   : > { %v5761_v44 = vsel %vm5758_vm7, %v9148_v11, %v9178_v16  ;;  %v5760_v24 = vsel %vm5758_vm7, %v9178_v16, %v9179_v29  ;;  %v5759_v47 = vsel %vm5758_vm7, %v9179_v29, %v9149_v9  ;;  %v5722_v11 = vsel %vm5721_vm8, %v9184_v10, %v9154_v23 }
 0xcf0   : > { %6022 = vmatpush.msra.mxu2 %v5761_v44  ;;  %6042 = vmatpush.msra.mxu3 %v5760_v24  ;;  %v5613_v10 = vsel %vm5610_vm11, %v5603_v46, %v9198_v36  ;;  %v5659_v17 = vsel %vm5647_vm10, %v9164_v58, %v9003_v38 }
 0xcf1   : > { %6062 = vmatpush.msrb.mxu0 %v5759_v47 }
 0xcf2   : > { %6023 = vmatpush.msra.mxu2 %v5724_v62  ;;  %6043 = vmatpush.msra.mxu3 %v5723_v57 }
 0xcf3   : > { %6063 = vmatpush.msrb.mxu0 %v5722_v11  ;;  %v9187_v4 = vpop.permute.xlu1 %9186  ;;  %v5573_v22 = vpop.permute.xlu2 %5572 }
 0xcf4   : > { %v9189_v6 = vunpack.i.h.bf16 %v9187_v4  ;;  %v9188_v12 = vunpack.i.l.bf16 %v9187_v4  ;;  %v9192_v19 = vpop.permute.xlu0 %9191 }
 0xcf5   : > { %v9194_v0 = vunpack.i.h.bf16 %v9192_v19  ;;  %v9193_v28 = vunpack.i.l.bf16 %v9192_v19 }
 0xcf6   : > { %v5687_v42 = vsel %vm5684_vm9, %v9158_v61, %v9188_v12  ;;  %v5686_v21 = vsel %vm5684_vm9, %v9188_v12, %v9189_v6  ;;  %v5685_v27 = vsel %vm5684_vm9, %v9189_v6, %v9159_v2 }
 0xcf7   : > { %6024 = vmatpush.msra.mxu2 %v5687_v42  ;;  %6044 = vmatpush.msra.mxu3 %v5686_v21  ;;  %v5650_v15 = vsel %vm5647_vm10, %v9163_v41, %v9193_v28  ;;  %v5649_v5 = vsel %vm5647_vm10, %v9193_v28, %v9194_v0  ;;  %v5648_v61 = vsel %vm5647_vm10, %v9194_v0, %v9164_v58 }
 0xcf8   : > { %6064 = vmatpush.msrb.mxu0 %v5685_v27 }
 0xcf9   : > { %6025 = vmatpush.msra.mxu2 %v5650_v15  ;;  %6045 = vmatpush.msra.mxu3 %v5649_v5 }
 0xcfa   : > { %6065 = vmatpush.msrb.mxu0 %v5648_v61 }
 0xcfb   : > { %v9202_v13 = vpop.permute.xlu1 %9201  ;;  %6026 = vmatpush.msra.mxu2 %v5613_v10  ;;  %6046 = vmatpush.msra.mxu3 %v5612_v37 }
 0xcfc   : > { %v9204_v29 = vunpack.i.h.bf16 %v9202_v13  ;;  %v9203_v41 = vunpack.i.l.bf16 %v9202_v13  ;;  %v5567_v16 = vpop.permute.xlu0 %5566 }
 0xcfd   : > { %v5577_v44 = vsel %vm1173_vm1, %v9094_v52, %v5567_v16 }
 0xcfe   : > { %6007 = vmatpush.msra.mxu1 %v5577_v44  ;;  %v5576_v24 = vsel %vm1173_vm1, %v5567_v16, %v9203_v41  ;;  %v5575_v46 = vsel %vm1173_vm1, %v9203_v41, %v9204_v29  ;;  %v5574_v34 = vsel %vm1173_vm1, %v9204_v29, %v5573_v22 }
 0xcff   : > { %6027 = vmatpush.msra.mxu2 %v5576_v24  ;;  %6047 = vmatpush.msra.mxu3 %v5575_v46  ;;  %v6106_v46 = vld [vmem:[%s9620_s9] sm:$0xf] }
 0xd00   : > { %6008 = vmatpush.msra.mxu1 %v11372_v31  ;;  %v5807_v31 = vsel %vm5795_vm6, %v9144_v30, %v8983_v18  ;;  %v5733_v18 = vsel %vm5721_vm8, %v9154_v23, %v8993_v50 }
 0xd01   : > { %8520 = vmatmul.msk.f32.vlgmr.msra.gmra.mxu1 %vm2975_vm13, %v11559_v40  ;;  %6028 = vmatpush.msra.mxu2 %v11402_v8 }
 0xd02   : > { %6080 = vmatpush.msrb.mxu1 %v5844_v53  ;;  %6048 = vmatpush.msra.mxu3 %v11422_v51  ;;  %v5770_v51 = vsel %vm5758_vm7, %v9149_v9, %v8988_v25 }
 0xd03   : > { %8521 = vmatmul.msk.f32.vlgmr.msra.gmra.mxu2 %vm2975_vm13, %v11559_v40  ;;  %8522 = vmatmul.msk.f32.vlgmr.msra.gmra.mxu3 %vm2975_vm13, %v11559_v40  ;;  %v5609_v49 = vpop.permute.xlu1 %5608 }
 0xd04   : > { %6081 = vmatpush.msrb.mxu1 %v5807_v31  ;;  %v5611_v8 = vsel %vm5610_vm11, %v9199_v39, %v5609_v49  ;;  %v5622_v43 = vsel %vm5610_vm11, %v5609_v49, %v9008_v59  ;;  %v5848_v25 = vpop.permute.xlu0 %5847 }
 0xd05   : > { %6066 = vmatpush.msrb.mxu0 %v5611_v8 }
 0xd06   : > { %6082 = vmatpush.msrb.mxu1 %v5770_v51  ;;  %v11978_v51 = vld [vmem:[%s9615_s25] sm:$0xf] }
 0xd07   : > { %6067 = vmatpush.msrb.mxu0 %v5574_v34  ;;  %v7015_v34 = vmul.f32 %v10681_v54, %v10681_v54 }
 0xd08   : > { %6083 = vmatpush.msrb.mxu1 %v5733_v18 }
 0xd09   : > { %6068 = vmatpush.msrb.mxu0 %v11420_v35  ;;  %v5585_v35 = vsel %vm1173_vm1, %v5573_v22, %v9013_v55 }
 0xd0a   : > { %6084 = vmatpush.msrb.mxu1 %v5696_v14  ;;  %8523 = vmatmul.msk.f32.vlgmr.msrb.gmra.mxu0 %vm2975_vm13, %v11559_v40 }
 0xd0c   : > { %6085 = vmatpush.msrb.mxu1 %v5659_v17 }
 0xd0e   : > { %6086 = vmatpush.msrb.mxu1 %v5622_v43 }
 0xd10   : > { %6087 = vmatpush.msrb.mxu1 %v5585_v35 }
 0xd12   : > { %6088 = vmatpush.msrb.mxu1 %v11404_v45 }
 0xd13   : > { %8524 = vmatmul.msk.f32.vlgmr.msrb.gmra.mxu1 %vm2975_vm13, %v11559_v40 }
 0xd1b   : > { %v5910_v20 = vpop.f32.mrf.mxu0 }
 0xd1c   : > { %v11891_v50 = vadd.f32 %v5910_v20, %v5848_v25 }
 0xd1e   : > { %v6095_v38 = vmax.f32 %v11891_v50, 0.0 }
 0xd20   : > { %v5890_v3 = vpop.f32.mrf.mxu3  ;;  %v5870_v32 = vpop.f32.mrf.mxu2 }
 0xd21   : > { %v11893_v1 = vadd.f32 %v5890_v3, %v5848_v25  ;;  %v11910_v60 = vadd.f32 %v5870_v32, %v5848_v25 }
 0xd23   : > { %v6094_v33 = vmax.f32 %v11893_v1, 0.0  ;;  %v6093_v47 = vmax.f32 %v11910_v60, 0.0 }
 0xd25   : > { %v9205_v59 = vpack.i.bf16 %v6095_v38, %v6094_v33 }
 0xd27   : > { %9206 = vrot.lane.b32.xlu1 %v9205_v59, %s9453_s16  ;;  %9211 = vrot.lane.b32.xlu2 %v9205_v59, %s12547_s15 }
 0xd2f   : > { %9216 = vrot.lane.b32.xlu1 %v9205_v59, %s12545_s1 }
 0xd38   : > { %v5930_v45 = vpop.f32.mrf.mxu1 }
 0xd39   : > { %v11904_v55 = vadd.f32 %v5930_v45, %v5848_v25 }
 0xd3b   : > { %v6096_v52 = vmax.f32 %v11904_v55, 0.0 }
 0xd4e   : > { %v5990_v40 = vpop.f32.mrf.mxu0 }
 0xd4f   : > { %v11906_v63 = vadd.f32 %v5990_v40, %v5848_v25 }
 0xd51   : > { %v6099_v26 = vmax.f32 %v11906_v63, 0.0 }
 0xd53   : > { %v9220_v56 = vpack.i.bf16 %v6096_v52, %v6099_v26  ;;  %v5950_v57 = vpop.f32.mrf.mxu2 }
 0xd54   : > { %v5970_v30 = vpop.f32.mrf.mxu3  ;;  %v11940_v42 = vadd.f32 %v5950_v57, %v5848_v25 }
 0xd55   : > { %v11916_v9 = vadd.f32 %v5970_v30, %v5848_v25  ;;  %9221 = vrot.lane.b32.xlu1 %v9220_v56, %s9453_s16  ;;  %9226 = vrot.lane.b32.xlu2 %v9220_v56, %s12547_s15 }
 0xd56   : > { %v6097_v58 = vmax.f32 %v11940_v42, 0.0 }
 0xd57   : > { %v6098_v23 = vmax.f32 %v11916_v9, 0.0  ;;  %v7021_v9 = vmul.f32 1.442695, %v10681_v54 }
 0xd59   : > { %v9235_v62 = vpack.i.bf16 %v6098_v23, %v6093_v47  ;;  %9295 = vpow2.f32 %v7021_v9 }
 0xd5b   : > { %9236 = vrot.lane.b32.xlu0 %v9235_v62, %s9453_s16 }
 0xd5d   : > { %9231 = vrot.lane.b32.xlu1 %v9220_v56, %s12545_s1  ;;  %9241 = vrot.lane.b32.xlu2 %v9235_v62, %s12547_s15 }
 0xd63   : > { %9246 = vrot.lane.b32.xlu0 %v9235_v62, %s12545_s1 }
 0xd7e   : > { %v6010_v48 = vpop.f32.mrf.mxu1 }
 0xd7f   : > { %v11930_v11 = vadd.f32 %v6010_v48, %v5848_v25 }
 0xd81   : > { %v6100_v28 = vmax.f32 %v11930_v11, 0.0  ;;  %v9212_v10 = vpop.permute.xlu2 %9211 }
 0xd82   : > { %v9214_v29 = vunpack.i.h.bf16 %v9212_v10  ;;  %v9213_v41 = vunpack.i.l.bf16 %v9212_v10 }
 0xd84   : > { %v6176_v53 = vsel %vm5647_vm10, %v9213_v41, %v9214_v29 }
 0xd86   : > { %v6030_v4 = vpop.f32.mrf.mxu2  ;;  %v6050_v2 = vpop.f32.mrf.mxu3 }
 0xd87   : > { %v6031_v6 = vadd.f32 %v6030_v4, %v5848_v25  ;;  %v6070_v12 = vpop.f32.mrf.mxu0  ;;  %v11936_v0 = vadd.f32 %v6050_v2, %v5848_v25 }
 0xd88   : > { %v11932_v19 = vadd.f32 %v6070_v12, %v5848_v25 }
 0xd89   : > { %v11934_v39 = vmax.f32 %v6031_v6, 0.0  ;;  %v6102_v27 = vmax.f32 %v11936_v0, 0.0 }
 0xd8a   : > { %v6103_v36 = vmax.f32 %v11932_v19, 0.0 }
 0xd8b   : > { %6195 = vrot.lane.b32.xlu0 %v11934_v39, %s9453_s16  ;;  %v9265_v15 = vpack.i.bf16 %v6102_v27, %v6097_v58 }
 0xd8c   : > { %v9250_v21 = vpack.i.bf16 %v6100_v28, %v6103_v36 }
 0xd8e   : > { %9251 = vrot.lane.b32.xlu1 %v9250_v21, %s9453_s16  ;;  %9256 = vrot.lane.b32.xlu2 %v9250_v21, %s12547_s15 }
 0xd90   : > { %v6090_v5 = vpop.f32.mrf.mxu1 }
 0xd91   : > { %v6091_v61 = vadd.f32 %v6090_v5, %v5848_v25 }
 0xd93   : > { %9266 = vrot.lane.b32.xlu0 %v9265_v15, %s9453_s16  ;;  %v11960_v37 = vmax.f32 %v6091_v61, 0.0 }
 0xd96   : > { %9261 = vrot.lane.b32.xlu1 %v9250_v21, %s12545_s1  ;;  %9271 = vrot.lane.b32.xlu2 %v9265_v15, %s12547_s15 }
 0xd99   : > { %v9207_v13 = vpop.permute.xlu1 %9206 }
 0xd9a   : > { %v9209_v16 = vunpack.i.h.bf16 %v9207_v13  ;;  %v9208_v44 = vunpack.i.l.bf16 %v9207_v13 }
 0xd9b   : > { %9276 = vrot.lane.b32.xlu0 %v9265_v15, %s12545_s1 }
 0xd9c   : > { %v6212_v24 = vsel %vm5684_vm9, %v9208_v44, %v9209_v16 }
 0xd9d   : > { %6255 = vmatpush.msrb.mxu3 %v6212_v24 }
 0xd9e   : > { %6201 = vrot.lane.b32.xlu1 %v11960_v37, %s9453_s16  ;;  %6159 = vrot.lane.b32.xlu2 %v11934_v39, %s12547_s15  ;;  %s12557_s16 = sld [smem:[#allocation4_spill]] }
 0xd9f   : > { %6256 = vmatpush.msrb.mxu3 %v6176_v53 }
 0xda1   : > { %v9217_v31 = vpop.permute.xlu1 %9216 }
 0xda2   : > { %v9219_v49 = vunpack.i.h.bf16 %v9217_v31  ;;  %v9218_v8 = vunpack.i.l.bf16 %v9217_v31 }
 0xda3   : > { %6123 = vrot.lane.b32.xlu0 %v11934_v39, %s12545_s1 }
 0xda4   : > { %v6140_v22 = vsel %vm1173_vm1, %v9218_v8, %v9219_v49 }
 0xda5   : > { %6257 = vmatpush.msrb.mxu3 %v6140_v22 }
 0xda6   : > { %6217 = vperm.xlu1 %8974, %v6106_v46   ;;  %6165 = vrot.lane.b32.xlu2 %v11960_v37, %s12547_s15  ;;  %s12551_s15 = smov 120  }
 0xda7   : > { %6258 = vmatpush.msrb.mxu3 %v6094_v33 }
 0xda8   : > { %8526 = vmatmul.msk.f32.vlgmr.msrb.gmra.mxu3 %vm1721_vm5, %v11978_v51 }
 0xdab   : > { %6129 = vrot.lane.b32.xlu0 %v11960_v37, %s12545_s1 }
 0xdae   : > { %7017 = vrot.lane.b32.xlu2 %v7015_v34, %s12538_s18  ;;  %s8860_s18 = smul.u32 48, %s12569_s10 }
 0xdaf   : > { %v11989_v18 = vpop.permute.xlu2 %9226 }
 0xdb0   : > { %v9229_v17 = vunpack.i.h.bf16 %v11989_v18  ;;  %v9228_v57 = vunpack.i.l.bf16 %v11989_v18  ;;  %s12208_s11 = scalar_lea.vmem %s9625_s13, %s8860_s18  ;;  %s12217_s1 = scalar_lea.vmem %s12552_s28, %s8860_s18 }
 0xdb2   : > { %v6175_v25 = vsel %vm5647_vm10, %v9214_v29, %v9229_v17 }
 0xdb7   : > { %v11999_v20 = vpop.permute.xlu2 %9241 }
 0xdb8   : > { %v9243_v1 = vunpack.i.l.bf16 %v11999_v20  ;;  %v9244_v40 = vunpack.i.h.bf16 %v11999_v20 }
 0xdba   : > { %v6177_v48 = vsel %vm5647_vm10, %v9243_v1, %v9213_v41  ;;  %v6172_v2 = vsel %vm5647_vm10, %v9244_v40, %v9228_v57 }
 0xdc7   : > { %v11991_v14 = vpop.permute.xlu1 %9221 }
 0xdc8   : > { %v9224_v43 = vunpack.i.h.bf16 %v11991_v14  ;;  %v9223_v33 = vunpack.i.l.bf16 %v11991_v14 }
 0xdca   : > { %v6211_v35 = vsel %vm5684_vm9, %v9209_v16, %v9224_v43 }
 0xdcb   : > { %6275 = vmatpush.msra.mxu0 %v6211_v35 }
 0xdcd   : > { %6276 = vmatpush.msra.mxu0 %v6175_v25  ;;  %v12005_v3 = vpop.permute.xlu0 %9236 }
 0xdce   : > { %v9239_v59 = vunpack.i.h.bf16 %v12005_v3  ;;  %v9238_v45 = vunpack.i.l.bf16 %v12005_v3 }
 0xdcf   : > { %v12012_v32 = vpop.permute.xlu1 %9231 }
 0xdd0   : > { %v9234_v56 = vunpack.i.h.bf16 %v12012_v32  ;;  %v6213_v30 = vsel %vm5684_vm9, %v9238_v45, %v9208_v44  ;;  %v6208_v62 = vsel %vm5684_vm9, %v9239_v59, %v9223_v33  ;;  %v9233_v12 = vunpack.i.l.bf16 %v12012_v32 }
 0xdd1   : > { %6235 = vmatpush.msrb.mxu2 %v6213_v30  ;;  %6335 = vmatpush.msra.mxu3 %v6208_v62 }
 0xdd2   : > { %v6139_v4 = vsel %vm1173_vm1, %v9219_v49, %v9234_v56 }
 0xdd3   : > { %6236 = vmatpush.msrb.mxu2 %v6177_v48  ;;  %6277 = vmatpush.msra.mxu0 %v6139_v4 }
 0xdd4   : > { %6336 = vmatpush.msra.mxu3 %v6172_v2 }
 0xdd5   : > { %6278 = vmatpush.msra.mxu0 %v6095_v38  ;;  %v12036_v6 = vpop.permute.xlu0 %9246 }
 0xdd6   : > { %v9249_v21 = vunpack.i.h.bf16 %v12036_v6  ;;  %v9248_v15 = vunpack.i.l.bf16 %v12036_v6  ;;  %8527 = vmatmul.msk.f32.vlgmr.msra.gmra.mxu0 %vm1721_vm5, %v11978_v51 }
 0xdd8   : > { %v6141_v5 = vsel %vm1173_vm1, %v9248_v15, %v9218_v8  ;;  %v6136_v50 = vsel %vm1173_vm1, %v9249_v21, %v9233_v12  ;;  %v7014_v8 = vadd.f32 1.0, %v10681_v54  ;;  %v9296_v54 = vpop.eup %9295 }
 0xdd9   : > { %6237 = vmatpush.msrb.mxu2 %v6141_v5  ;;  %6337 = vmatpush.msra.mxu3 %v6136_v50 }
 0xddb   : > { %6238 = vmatpush.msrb.mxu2 %v6093_v47  ;;  %6338 = vmatpush.msra.mxu3 %v6098_v23 }
 0xddc   : > { %8525 = vmatmul.msk.f32.vlgmr.msrb.gmra.mxu2 %vm1721_vm5, %v11978_v51  ;;  %8530 = vmatmul.msk.f32.vlgmr.msra.gmra.mxu3 %vm1721_vm5, %v11978_v51 }
 0xde8   : > { %v12059_v38 = vpop.permute.xlu2 %9256 }
 0xde9   : > { %v9259_v47 = vunpack.i.h.bf16 %v12059_v38  ;;  %v9258_v30 = vunpack.i.l.bf16 %v12059_v38 }
 0xdeb   : > { %v6171_v44 = vsel %vm5647_vm10, %v9228_v57, %v9259_v47 }
 0xdf0   : > { %v12061_v61 = vpop.permute.xlu2 %9271 }
 0xdf1   : > { %v9273_v24 = vunpack.i.l.bf16 %v12061_v61  ;;  %v9274_v49 = vunpack.i.h.bf16 %v12061_v61 }
 0xdf3   : > { %v6174_v14 = vsel %vm5647_vm10, %v9229_v17, %v9273_v24  ;;  %v6168_v48 = vsel %vm5647_vm10, %v9274_v49, %v9258_v30 }
 0xdf8   : > { %v12063_v10 = vpop.permute.xlu2 %6159 }
 0xdf9   : > { %v6170_v42 = vsel %vm5647_vm10, %v9259_v47, %v12063_v10 }
 0xdfd   : > { %v12065_v13 = vpop.permute.xlu0 %6195 }
 0xe00   : > { %v9252_v29 = vpop.permute.xlu1 %9251  ;;  %v12067_v60 = vpop.permute.xlu2 %6165 }
 0xe01   : > { %v9254_v23 = vunpack.i.h.bf16 %v9252_v29  ;;  %v9253_v46 = vunpack.i.l.bf16 %v9252_v29  ;;  %v6167_v0 = vsel %vm5647_vm10, %v9258_v30, %v12067_v60  ;;  %v6178_v3 = vsel %vm5647_vm10, %v12067_v60, %v9243_v1 }
 0xe03   : > { %v6207_v41 = vsel %vm5684_vm9, %v9223_v33, %v9254_v23 }
 0xe04   : > { %6355 = vmatpush.msrb.mxu0 %v6207_v41 }
 0xe05   : > { %v9267_v16 = vpop.permute.xlu0 %9266 }
 0xe06   : > { %v9269_v53 = vunpack.i.h.bf16 %v9267_v16  ;;  %v9268_v31 = vunpack.i.l.bf16 %v9267_v16  ;;  %6356 = vmatpush.msrb.mxu0 %v6171_v44 }
 0xe08   : > { %v12080_v22 = vpop.permute.xlu1 %9261  ;;  %v7018_v34 = vpop.permute.xlu2 %7017  ;;  %v6210_v35 = vsel %vm5684_vm9, %v9224_v43, %v9268_v31  ;;  %v6209_v25 = vsel %vm5684_vm9, %v9268_v31, %v9239_v59  ;;  %v6204_v33 = vsel %vm5684_vm9, %v9269_v53, %v9253_v46  ;;  %v6173_v43 = vsel %vm5647_vm10, %v9273_v24, %v9244_v40 }
 0xe09   : > { %v9264_v62 = vunpack.i.h.bf16 %v12080_v22  ;;  %v7020_v57 = vsub.f32 %v7014_v8, %v7018_v34  ;;  %6295 = vmatpush.msra.mxu1 %v6210_v35  ;;  %6315 = vmatpush.msra.mxu2 %v6209_v25  ;;  %v9263_v17 = vunpack.i.l.bf16 %v12080_v22  ;;  %v6205_v55 = vsel %vm5684_vm9, %v12065_v13, %v9269_v53 }
 0xe0a   : > { %6415 = vmatpush.msrb.mxu3 %v6204_v33 }
 0xe0b   : > { %v7023_v59 = vsub.f32 %v7020_v57, %v9296_v54  ;;  %6296 = vmatpush.msra.mxu1 %v6174_v14  ;;  %6316 = vmatpush.msra.mxu2 %v6173_v43  ;;  %v6135_v4 = vsel %vm1173_vm1, %v9233_v12, %v9264_v62 }
 0xe0c   : > { %6416 = vmatpush.msrb.mxu3 %v6168_v48  ;;  %6357 = vmatpush.msrb.mxu0 %v6135_v4 }
 0xe0d   : > { %v9277_v18 = vpop.permute.xlu0 %9276  ;;  %7025 = vrot.lane.b32.xlu0 %v7023_v59, %s12551_s15 }
 0xe0e   : > { %v9279_v2 = vunpack.i.h.bf16 %v9277_v18  ;;  %v9278_v5 = vunpack.i.l.bf16 %v9277_v18  ;;  %6358 = vmatpush.msrb.mxu0 %v6099_v26  ;;  %v6206_v26 = vsel %vm5684_vm9, %v9254_v23, %v12065_v13 }
 0xe0f   : > { %8531 = vmatmul.msk.f32.vlgmr.msrb.gmra.mxu0 %vm1721_vm5, %v11978_v51 }
 0xe10   : > { %v6202_v40 = vpop.permute.xlu1 %6201  ;;  %v6138_v12 = vsel %vm1173_vm1, %v9234_v56, %v9278_v5  ;;  %v6137_v50 = vsel %vm1173_vm1, %v9278_v5, %v9249_v21  ;;  %v6132_v61 = vsel %vm1173_vm1, %v9279_v2, %v9263_v17 }
 0xe11   : > { %v6203_v63 = vsel %vm5684_vm9, %v9253_v46, %v6202_v40  ;;  %6297 = vmatpush.msra.mxu1 %v6138_v12  ;;  %6317 = vmatpush.msra.mxu2 %v6137_v50  ;;  %v6214_v56 = vsel %vm5684_vm9, %v6202_v40, %v9238_v45 }
 0xe12   : > { %6417 = vmatpush.msrb.mxu3 %v6132_v61  ;;  %6435 = vmatpush.msra.mxu0 %v6203_v63 }
 0xe13   : > { %6298 = vmatpush.msra.mxu1 %v6096_v52  ;;  %6318 = vmatpush.msra.mxu2 %v6097_v58  ;;  %v6169_v58 = vsel %vm5647_vm10, %v12063_v10, %v9274_v49 }
 0xe14   : > { %6418 = vmatpush.msrb.mxu3 %v6102_v27  ;;  %8528 = vmatmul.msk.f32.vlgmr.msra.gmra.mxu1 %vm1721_vm5, %v11978_v51 }
 0xe15   : > { %8529 = vmatmul.msk.f32.vlgmr.msra.gmra.mxu2 %vm1721_vm5, %v11978_v51  ;;  %6375 = vmatpush.msrb.mxu1 %v6206_v26  ;;  %v6124_v52 = vpop.permute.xlu0 %6123 }
 0xe16   : > { %6395 = vmatpush.msrb.mxu2 %v6205_v55  ;;  %8534 = vmatmul.msk.f32.vlgmr.msrb.gmra.mxu3 %vm1721_vm5, %v11978_v51  ;;  %v6134_v27 = vsel %vm1173_vm1, %v9264_v62, %v6124_v52  ;;  %v6133_v32 = vsel %vm1173_vm1, %v6124_v52, %v9279_v2 }
 0xe17   : > { %6436 = vmatpush.msra.mxu0 %v6167_v0  ;;  %6376 = vmatpush.msrb.mxu1 %v6170_v42 }
 0xe18   : > { %6396 = vmatpush.msrb.mxu2 %v6169_v58  ;;  %v12184_v20 = vpop.permute.xlu1 %6217 }
 0xe19   : > { %6377 = vmatpush.msrb.mxu1 %v6134_v27 }
 0xe1a   : > { %6397 = vmatpush.msrb.mxu2 %v6133_v32 }
 0xe1b   : > { %6378 = vmatpush.msrb.mxu1 %v6100_v28 }
 0xe1c   : > { %6398 = vmatpush.msrb.mxu2 %v11934_v39  ;;  %8532 = vmatmul.msk.f32.vlgmr.msrb.gmra.mxu1 %vm1721_vm5, %v11978_v51 }
 0xe1d   : > { %6455 = vmatpush.msra.mxu1 %v6214_v56  ;;  %8533 = vmatmul.msk.f32.vlgmr.msrb.gmra.mxu2 %vm1721_vm5, %v11978_v51  ;;  %v6130_v21 = vpop.permute.xlu0 %6129 }
 0xe1e   : > { %v6131_v11 = vsel %vm1173_vm1, %v9263_v17, %v6130_v21  ;;  %v6142_v39 = vsel %vm1173_vm1, %v6130_v21, %v9248_v15 }
 0xe1f   : > { %6456 = vmatpush.msra.mxu1 %v6178_v3  ;;  %6437 = vmatpush.msra.mxu0 %v6131_v11 }
 0xe21   : > { %6457 = vmatpush.msra.mxu1 %v6142_v39  ;;  %6438 = vmatpush.msra.mxu0 %v6103_v36 }
 0xe22   : > { %8535 = vmatmul.msk.f32.vlgmr.msra.gmra.mxu0 %vm1721_vm5, %v11978_v51 }
 0xe23   : > { %6458 = vmatpush.msra.mxu1 %v11960_v37 }
 0xe24   : > { %8536 = vmatmul.msk.f32.vlgmr.msra.gmra.mxu1 %vm1721_vm5, %v11978_v51 }
 0xe2b   : > { %v6260_v28 = vpop.f32.mrf.mxu3 }
 0xe2c   : > { %v6261_v1 = vadd.f32 %v6260_v28, %v12184_v20 }
 0xe2e   : > { %v6464_v7 = vsub.f32 0.0, %v6261_v1 }
 0xe30   : > { %v6477_v45 = vmul.f32 1.442695, %v6464_v7 }
 0xe32   : > { %9297 = vpow2.f32 %v6477_v45 }
 0xe38   : > { %v9298_v6 = vpop.eup %9297 }
 0xe39   : > { %v6500_v15 = vadd.f32 1.0, %v9298_v6 }
 0xe3b   : > { %9299 = vrcp.f32 %v6500_v15  ;;  %v6537_v31 = vand.u32 2147483648, %v6500_v15  ;;  %vm6531_vm5 = vweird.f32 %v6500_v15  ;;  %v6535_v8 = vand.u32 2147483647, %v6500_v15 }
 0xe3d   : > { %v6538_v30 = vor.u32 1.1754944e-38, %v6537_v31  ;;  %vm6536_vm13 = vcmp.eq.f32.partialorder %v6535_v8, 8.507059e+37 }
 0xe41   : > { %v9300_v37 = vpop.eup %9299 }
 0xe42   : > { %v6527_v10 = vmul.f32 %v9300_v37, %v6500_v15  ;;  %vm6532_vm1 = vweird.f32 %v9300_v37 }
 0xe43   : > { %vm6533_vm12 = vmor %vm6531_vm5, %vm6532_vm1 }
 0xe44   : > { %v6528_v47 = vsub.f32 1.0, %v6527_v10 }
 0xe46   : > { %v6529_v24 = vmul.f32 %v9300_v37, %v6528_v47 }
 0xe48   : > { %v6530_v53 = vadd.f32 %v9300_v37, %v6529_v24 }
 0xe4a   : > { %v6534_v25 = vsel %vm6533_vm12, %v9300_v37, %v6530_v53 }
 0xe4b   : > { %v6539_v62 = vsel %vm6536_vm13, %v6538_v30, %v6534_v25 }
 0xe4c   : > { %v6772_v57 = vsub.f32 1.0, %v6539_v62  ;;  %v6703_v52 = vrot.slane %v6539_v62, 4 }
 0xe53   : > { %v6280_v19 = vpop.f32.mrf.mxu0 }
 0xe54   : > { %v6281_v36 = vadd.f32 %v6280_v19, %v12184_v20 }
 0xe56   : > { %v6465_v38 = vsub.f32 0.0, %v6281_v36  ;;  %v6727_v36 = vld [vmem:[%s12217_s1] sm:$0xff] }
 0xe57   : > { %v6855_v24 = vsub.f32 1.0, %v6727_v36 }
 0xe58   : > { %v6479_v51 = vmul.f32 1.442695, %v6465_v38 }
 0xe5a   : > { %9301 = vpow2.f32 %v6479_v51 }
 0xe5f   : > { %v6240_v13 = vpop.f32.mrf.mxu2  ;;  %v6340_v29 = vpop.f32.mrf.mxu3 }
 0xe60   : > { %v6241_v60 = vadd.f32 %v6240_v13, %v12184_v20  ;;  %v6341_v9 = vadd.f32 %v6340_v29, %v12184_v20  ;;  %v9302_v46 = vpop.eup %9301 }
 0xe61   : > { %v12190_v34 = vadd.f32 1.0, %v9302_v46 }
 0xe62   : > { %v6463_v23 = vsub.f32 0.0, %v6241_v60  ;;  %v6468_v41 = vsub.f32 0.0, %v6341_v9 }
 0xe63   : > { %v6552_v19 = vand.u32 2147483648, %v12190_v34  ;;  %vm6546_vm10 = vweird.f32 %v12190_v34  ;;  %v6550_v29 = vand.u32 2147483647, %v12190_v34 }
 0xe64   : > { %v6475_v16 = vmul.f32 1.442695, %v6463_v23  ;;  %v6485_v44 = vmul.f32 1.442695, %v6468_v41 }
 0xe65   : > { %v6553_v53 = vor.u32 1.1754944e-38, %v6552_v19  ;;  %vm6551_vm5 = vcmp.eq.f32.partialorder %v6550_v29, 8.507059e+37 }
 0xe66   : > { %9303 = vpow2.f32 %v6475_v16 }
 0xe67   : > { %9305 = vpow2.f32 %v6485_v44 }
 0xe6c   : > { %v9304_v49 = vpop.eup %9303 }
 0xe6d   : > { %v9306_v22 = vpop.eup %9305  ;;  %v6499_v35 = vadd.f32 1.0, %v9304_v49 }
 0xe6e   : > { %v12192_v33 = vadd.f32 1.0, %v9306_v22 }
 0xe6f   : > { %9307 = vrcp.f32 %v6499_v35  ;;  %v6522_v18 = vand.u32 2147483648, %v6499_v35  ;;  %v6520_v5 = vand.u32 2147483647, %v6499_v35  ;;  %vm6516_vm2 = vweird.f32 %v6499_v35 }
 0xe70   : > { %9309 = vrcp.f32 %v12192_v33  ;;  %v6597_v7 = vand.u32 2147483648, %v12192_v33  ;;  %vm6591_vm8 = vweird.f32 %v12192_v33  ;;  %v6595_v15 = vand.u32 2147483647, %v12192_v33 }
 0xe71   : > { %9311 = vrcp.f32 %v12190_v34  ;;  %v6523_v63 = vor.u32 1.1754944e-38, %v6522_v18  ;;  %vm6521_vm4 = vcmp.eq.f32.partialorder %v6520_v5, 8.507059e+37 }
 0xe72   : > { %9313 = vlog2.f32 %v6539_v62  ;;  %v6598_v41 = vor.u32 1.1754944e-38, %v6597_v7  ;;  %vm6596_vm1 = vcmp.eq.f32.partialorder %v6595_v15, 8.507059e+37 }
 0xe73   : > { %9315 = vlog2.f32 %v6772_v57 }
 0xe75   : > { %v9308_v54 = vpop.eup %9307 }
 0xe76   : > { %v12196_v14 = vpop.eup %9309  ;;  %v6512_v43 = vmul.f32 %v9308_v54, %v6499_v35  ;;  %vm6517_vm15 = vweird.f32 %v9308_v54 }
 0xe77   : > { %v12198_v59 = vpop.eup %9311  ;;  %v6587_v4 = vmul.f32 %v12196_v14, %v12192_v33  ;;  %vm6518_vm3 = vmor %vm6516_vm2, %vm6517_vm15  ;;  %vm6592_vm6 = vweird.f32 %v12196_v14 }
 0xe78   : > { %v6513_v48 = vsub.f32 1.0, %v6512_v43  ;;  %v6542_v17 = vmul.f32 %v12198_v59, %v12190_v34  ;;  %v9314_v40 = vpop.eup %9313  ;;  %vm6547_vm7 = vweird.f32 %v12198_v59  ;;  %vm12228_vm9 = vmor %vm6591_vm8, %vm6592_vm6 }
 0xe79   : > { %v6588_v50 = vsub.f32 1.0, %v6587_v4  ;;  %v9316_v55 = vpop.eup %9315  ;;  %v6738_v27 = vmul.f32 0.6931472, %v9314_v40  ;;  %vm12237_vm11 = vmor %vm6546_vm10, %vm6547_vm7 }
 0xe7a   : > { %v6514_v2 = vmul.f32 %v9308_v54, %v6513_v48  ;;  %v6543_v0 = vsub.f32 1.0, %v6542_v17  ;;  %v6786_v3 = vmul.f32 0.6931472, %v9316_v55 }
 0xe7b   : > { %v6589_v21 = vmul.f32 %v12196_v14, %v6588_v50  ;;  %v6760_v39 = vmax.f32 %v6738_v27, -100.0 }
 0xe7c   : > { %v6515_v12 = vadd.f32 %v9308_v54, %v6514_v2  ;;  %v6544_v11 = vmul.f32 %v12198_v59, %v6543_v0  ;;  %v6808_v1 = vmax.f32 %v6786_v3, -100.0 }
 0xe7d   : > { %v6590_v28 = vadd.f32 %v12196_v14, %v6589_v21  ;;  %v6831_v13 = vrot.slane %v6760_v39, 4 }
 0xe7e   : > { %v6519_v42 = vsel %vm6518_vm3, %v9308_v54, %v6515_v12  ;;  %v6545_v6 = vadd.f32 %v12198_v59, %v6544_v11  ;;  %v6873_v60 = vrot.slane %v6808_v1, 4 }
 0xe7f   : > { %v7026_v61 = vpop.permute.xlu0 %7025  ;;  %v6524_v58 = vsel %vm6521_vm4, %v6523_v63, %v6519_v42  ;;  %v6594_v51 = vsel %vm12228_vm9, %v12196_v14, %v6590_v28 }
 0xe80   : > { %v7029_v26 = vsel %vm7028_vm14, %v7026_v61, 0.0  ;;  %v6709_v32 = vsel %vm1115_vm0, %v6524_v58, %v6703_v52  ;;  %9317 = vlog2.f32 %v6524_v58  ;;  %v6771_v56 = vsub.f32 1.0, %v6524_v58 }
 0xe81   : > { %7030 = vadd.xlane.f32.xlu2 %v7029_v26  ;;  %6721 = vst [vmem:[%s12208_s11] sm:$0xff] %v6709_v32  ;;  %v6549_v44 = vsel %vm12237_vm11, %v12198_v59, %v6545_v6  ;;  %v12246_v8 = vsel %vm6596_vm1, %v6598_v41, %v6594_v51 }
 0xe82   : > { %9319 = vlog2.f32 %v6771_v56  ;;  %v12248_v34 = vsel %vm6551_vm5, %v6553_v53, %v6549_v44  ;;  %v6776_v30 = vsub.f32 1.0, %v12246_v8 }
 0xe83   : > { %v6773_v14 = vsub.f32 1.0, %v12248_v34 }
 0xe86   : > { %v9318_v45 = vpop.eup %9317 }
 0xe87   : > { %v6736_v37 = vmul.f32 0.6931472, %v9318_v45 }
 0xe88   : > { %v9320_v10 = vpop.eup %9319 }
 0xe89   : > { %v6759_v47 = vmax.f32 %v6736_v37, -100.0  ;;  %v6784_v23 = vmul.f32 0.6931472, %v9320_v10  ;;  %v12276_v10 = vld [vmem:[%s12557_s16] sm:$0xff] }
 0xe8a   : > { %v6905_v53 = vperm.slane %v12276_v10, 0 }
 0xe8b   : > { %v6807_v31 = vmax.f32 %v6784_v23, -100.0  ;;  %v6837_v49 = vsel %vm1115_vm0, %v6759_v47, %v6831_v13  ;;  %v6705_v23 = vrot.slane %v12246_v8, 4 }
 0xe8c   : > { %v6360_v16 = vpop.f32.mrf.mxu0  ;;  %v6849_v25 = vmul.f32 %v6837_v49, %v6727_v36 }
 0xe8d   : > { %v6361_v46 = vadd.f32 %v6360_v16, %v12184_v20  ;;  %v6879_v35 = vsel %vm1115_vm0, %v6807_v31, %v6873_v60 }
 0xe8e   : > { %v6891_v33 = vmul.f32 %v6879_v35, %v6855_v24 }
 0xe8f   : > { %v6469_v22 = vsub.f32 0.0, %v6361_v46 }
 0xe90   : > { %v6897_v43 = vadd.f32 %v6891_v33, %v6849_v25 }
 0xe91   : > { %v6487_v62 = vmul.f32 1.442695, %v6469_v22  ;;  %v6300_v57 = vpop.f32.mrf.mxu1 }
 0xe92   : > { %v6301_v54 = vadd.f32 %v6300_v57, %v12184_v20  ;;  %6935 = vst [vmem:[#allocation1] ss:$2 sm:$0xff] %v6897_v43  ;;  %v6906_v57 = vperm.slane %v12276_v10, 1 }
 0xe93   : > { %9321 = vpow2.f32 %v6487_v62 }
 0xe94   : > { %9323 = vlog2.f32 %v12246_v8  ;;  %v6466_v59 = vsub.f32 0.0, %v6301_v54 }
 0xe95   : > { %9325 = vlog2.f32 %v6776_v30 }
 0xe96   : > { %9327 = vlog2.f32 %v12248_v34  ;;  %v6481_v48 = vmul.f32 1.442695, %v6466_v59 }
 0xe97   : > { %9329 = vlog2.f32 %v6773_v14 }
 0xe98   : > { %9331 = vpow2.f32 %v6481_v48  ;;  %v6320_v4 = vpop.f32.mrf.mxu2 }
 0xe99   : > { %v9322_v18 = vpop.eup %9321  ;;  %v6321_v17 = vadd.f32 %v6320_v4, %v12184_v20  ;;  %v6420_v2 = vpop.f32.mrf.mxu3  ;;  %v6942_v25 = vld.sshfl [vmem:[#allocation1] sm:$0xff pattern:$0x75316420]  ;;  %v12303_v4 = vld [vmem:[%s12217_s1 + $0x8] sm:$0xff] }
 0xe9a   : > { %v9324_v5 = vpop.eup %9323  ;;  %v12257_v40 = vadd.f32 1.0, %v9322_v18  ;;  %v6421_v12 = vadd.f32 %v6420_v2, %v12184_v20  ;;  %v6380_v50 = vpop.f32.mrf.mxu1  ;;  %v12305_v18 = vmul.f32 %v6942_v25, %v6905_v53 }
 0xe9b   : > { %v9326_v61 = vpop.eup %9325  ;;  %v6467_v63 = vsub.f32 0.0, %v6321_v17  ;;  %v6381_v26 = vadd.f32 %v6380_v50, %v12184_v20  ;;  %v6746_v0 = vmul.f32 0.6931472, %v9324_v5 }
 0xe9c   : > { %v9328_v55 = vpop.eup %9327  ;;  %9333 = vrcp.f32 %v12257_v40  ;;  %v6472_v27 = vsub.f32 0.0, %v6421_v12  ;;  %v6794_v56 = vmul.f32 0.6931472, %v9326_v61  ;;  %v6610_v24 = vand.u32 2147483647, %v12257_v40  ;;  %v12318_v61 = vld [vmem:[%s12217_s1 + $0x10] sm:$0xff] }
 0xe9d   : > { %v9330_v52 = vpop.eup %9329  ;;  %v6483_v42 = vmul.f32 1.442695, %v6467_v63  ;;  %v6470_v58 = vsub.f32 0.0, %v6381_v26  ;;  %v12264_v39 = vmul.f32 0.6931472, %v9328_v55  ;;  %v6764_v6 = vmax.f32 %v6746_v0, -100.0 }
 0xe9e   : > { %v9332_v32 = vpop.eup %9331  ;;  %v6493_v3 = vmul.f32 1.442695, %v6472_v27  ;;  %v12267_v45 = vmul.f32 0.6931472, %v9330_v52  ;;  %v6812_v19 = vmax.f32 %v6794_v56, -100.0  ;;  %v6612_v22 = vand.u32 2147483648, %v12257_v40 }
 0xe9f   : > { %v12262_v21 = vadd.f32 1.0, %v9332_v32  ;;  %9335 = vpow2.f32 %v6483_v42  ;;  %v6440_v11 = vpop.f32.mrf.mxu0  ;;  %v6489_v28 = vmul.f32 1.442695, %v6470_v58  ;;  %v6761_v13 = vmax.f32 %v12264_v39, -100.0 }
 0xea0   : > { %v6400_v1 = vpop.f32.mrf.mxu2  ;;  %v6441_v7 = vadd.f32 %v6440_v11, %v12184_v20  ;;  %v6809_v47 = vmax.f32 %v12267_v45, -100.0  ;;  %v12281_v41 = vrot.slane %v6764_v6, 4  ;;  %v12283_v44 = vrot.slane %v6812_v19, 4 }
 0xea1   : > { %9337 = vrcp.f32 %v12262_v21  ;;  %v6401_v36 = vadd.f32 %v6400_v1, %v12184_v20  ;;  %vm6606_vm12 = vweird.f32 %v12257_v40  ;;  %v6565_v59 = vand.u32 2147483647, %v12262_v21 }
 0xea2   : > { %v12270_v15 = vpop.eup %9333  ;;  %9339 = vpow2.f32 %v6493_v3  ;;  %v6473_v37 = vsub.f32 0.0, %v6441_v7  ;;  %v6460_v60 = vpop.f32.mrf.mxu1  ;;  %v6567_v48 = vand.u32 2147483648, %v12262_v21  ;;  %vm12307_vm14 = vcmp.eq.f32.partialorder %v6610_v24, 8.507059e+37 }
 0xea3   : > { %v6602_v38 = vmul.f32 %v12270_v15, %v12257_v40  ;;  %9341 = vpow2.f32 %v6489_v28  ;;  %v6471_v29 = vsub.f32 0.0, %v6401_v36  ;;  %v6461_v35 = vadd.f32 %v6460_v60, %v12184_v20 }
 0xea4   : > { %v6495_v51 = vmul.f32 1.442695, %v6473_v37  ;;  %vm6607_vm13 = vweird.f32 %v12270_v15  ;;  %v6613_v2 = vor.u32 1.1754944e-38, %v6612_v22  ;;  %v6856_v55 = vsub.f32 1.0, %v12303_v4 }
 0xea5   : > { %v9336_v9 = vpop.eup %9335  ;;  %v6603_v16 = vsub.f32 1.0, %v6602_v38  ;;  %v6491_v62 = vmul.f32 1.442695, %v6471_v29  ;;  %v6474_v5 = vsub.f32 0.0, %v6461_v35  ;;  %vm12312_vm15 = vmor %vm6606_vm12, %vm6607_vm13  ;;  %vm6561_vm3 = vweird.f32 %v12262_v21 }
 0xea6   : > { %v12286_v46 = vadd.f32 1.0, %v9336_v9  ;;  %9343 = vpow2.f32 %v6495_v51  ;;  %vm6566_vm4 = vcmp.eq.f32.partialorder %v6565_v59, 8.507059e+37  ;;  %v6568_v58 = vor.u32 1.1754944e-38, %v6567_v48 }
 0xea7   : > { %v9338_v31 = vpop.eup %9337  ;;  %v6604_v49 = vmul.f32 %v12270_v15, %v6603_v16  ;;  %v6857_v56 = vsub.f32 1.0, %v12318_v61  ;;  %v6497_v3 = vmul.f32 1.442695, %v6474_v5 }
 0xea8   : > { %v9340_v33 = vpop.eup %9339  ;;  %v6557_v30 = vmul.f32 %v9338_v31, %v12262_v21  ;;  %9345 = vrcp.f32 %v12286_v46  ;;  %vm6562_vm2 = vweird.f32 %v9338_v31  ;;  %v6580_v50 = vand.u32 2147483647, %v12286_v46 }
 0xea9   : > { %v6605_v54 = vadd.f32 %v12270_v15, %v6604_v49  ;;  %v12298_v14 = vadd.f32 1.0, %v9340_v33  ;;  %v9342_v43 = vpop.eup %9341  ;;  %v6582_v52 = vand.u32 2147483648, %v12286_v46  ;;  %vm6563_vm6 = vmor %vm6561_vm3, %vm6562_vm2  ;;  %vm6576_vm7 = vweird.f32 %v12286_v46 }
 0xeaa   : > { %v6558_v20 = vsub.f32 1.0, %v6557_v30  ;;  %v12325_v0 = vadd.f32 1.0, %v9342_v43  ;;  %vm12335_vm8 = vcmp.eq.f32.partialorder %v6580_v50, 8.507059e+37 }
 0xeab   : > { %9347 = vrcp.f32 %v12298_v14  ;;  %v6609_v26 = vsel %vm12312_vm15, %v12270_v15, %v6605_v54  ;;  %v6583_v15 = vor.u32 1.1754944e-38, %v6582_v52  ;;  %v6657_v60 = vand.u32 2147483648, %v12298_v14 }
 0xeac   : > { %v6559_v12 = vmul.f32 %v9338_v31, %v6558_v20  ;;  %9349 = vpow2.f32 %v6491_v62  ;;  %v9344_v63 = vpop.eup %9343  ;;  %v12333_v11 = vsel %vm12307_vm14, %v6613_v2, %v6609_v26  ;;  %vm6651_vm10 = vweird.f32 %v12298_v14 }
 0xead   : > { %9351 = vrcp.f32 %v12325_v0  ;;  %v12340_v19 = vadd.f32 1.0, %v9344_v63  ;;  %v6655_v53 = vand.u32 2147483647, %v12298_v14  ;;  %v6777_v22 = vsub.f32 1.0, %v12333_v11 }
 0xeae   : > { %v9346_v42 = vpop.eup %9345  ;;  %v6560_v27 = vadd.f32 %v9338_v31, %v6559_v12  ;;  %v6658_v25 = vor.u32 1.1754944e-38, %v6657_v60  ;;  %v6625_v43 = vand.u32 2147483647, %v12325_v0  ;;  %vm6621_vm13 = vweird.f32 %v12325_v0 }
 0xeaf   : > { %v6572_v32 = vmul.f32 %v9346_v42, %v12286_v46  ;;  %vm6577_vm9 = vweird.f32 %v9346_v42  ;;  %v6627_v46 = vand.u32 2147483648, %v12325_v0  ;;  %vm6656_vm12 = vcmp.eq.f32.partialorder %v6655_v53, 8.507059e+37 }
 0xeb0   : > { %v6564_v28 = vsel %vm6563_vm6, %v9338_v31, %v6560_v27  ;;  %vm6578_vm11 = vmor %vm6576_vm7, %vm6577_vm9  ;;  %vm12381_vm15 = vcmp.eq.f32.partialorder %v6625_v43, 8.507059e+37  ;;  %vm6666_vm9 = vweird.f32 %v12340_v19 }
 0xeb1   : > { %v9348_v21 = vpop.eup %9347  ;;  %v6569_v7 = vsel %vm6566_vm4, %v6568_v58, %v6564_v28  ;;  %v6573_v6 = vsub.f32 1.0, %v6572_v32  ;;  %v6628_v32 = vor.u32 1.1754944e-38, %v6627_v46  ;;  %v6670_v58 = vand.u32 2147483647, %v12340_v19 }
 0xeb2   : > { %v9350_v36 = vpop.eup %9349  ;;  %v6704_v37 = vrot.slane %v6569_v7, 4  ;;  %9353 = vlog2.f32 %v6569_v7  ;;  %v6774_v38 = vsub.f32 1.0, %v6569_v7  ;;  %v6647_v29 = vmul.f32 %v9348_v21, %v12298_v14 }
 0xeb3   : > { %9355 = vlog2.f32 %v12333_v11  ;;  %v6574_v51 = vmul.f32 %v9346_v42, %v6573_v6  ;;  %v12350_v31 = vadd.f32 1.0, %v9350_v36  ;;  %v9352_v49 = vpop.eup %9351  ;;  %vm6652_vm1 = vweird.f32 %v9348_v21 }
 0xeb4   : > { %v6710_v9 = vsel %vm1115_vm0, %v12248_v34, %v6704_v37  ;;  %9357 = vlog2.f32 %v6774_v38  ;;  %v6648_v16 = vsub.f32 1.0, %v6647_v29  ;;  %v6617_v33 = vmul.f32 %v9352_v49, %v12325_v0  ;;  %vm6653_vm5 = vmor %vm6651_vm10, %vm6652_vm1  ;;  %v6943_v0 = vld.sshfl [vmem:[#allocation1 + $0x8] sm:$0xff pattern:$0x75316420] }
 0xeb5   : > { %6722 = vst [vmem:[%s12208_s11 + $0x8] sm:$0xff] %v6710_v9  ;;  %v6575_v24 = vadd.f32 %v9346_v42, %v6574_v51  ;;  %9359 = vpow2.f32 %v6497_v3  ;;  %vm6622_vm14 = vweird.f32 %v9352_v49  ;;  %v6640_v1 = vand.u32 2147483647, %v12350_v31 }
 0xeb6   : > { %v6649_v35 = vmul.f32 %v9348_v21, %v6648_v16  ;;  %9361 = vrcp.f32 %v12340_v19  ;;  %v6618_v40 = vsub.f32 1.0, %v6617_v33  ;;  %vm6623_vm2 = vmor %vm6621_vm13, %vm6622_vm14  ;;  %vm6636_vm4 = vweird.f32 %v12350_v31 }
 0xeb7   : > { %v6579_v34 = vsel %vm6578_vm11, %v9346_v42, %v6575_v24  ;;  %9363 = vrcp.f32 %v12350_v31  ;;  %vm6641_vm7 = vcmp.eq.f32.partialorder %v6640_v1, 8.507059e+37  ;;  %vm6671_vm11 = vcmp.eq.f32.partialorder %v6670_v58, 8.507059e+37 }
 0xeb8   : > { %v9354_v30 = vpop.eup %9353  ;;  %v6584_v62 = vsel %vm12335_vm8, %v6583_v15, %v6579_v34  ;;  %v6650_v54 = vadd.f32 %v9348_v21, %v6649_v35  ;;  %v6619_v52 = vmul.f32 %v9352_v49, %v6618_v40  ;;  %v6911_v58 = vperm.slane %v12276_v10, 6 }
 0xeb9   : > { %v12362_v20 = vpop.eup %9355  ;;  %v6742_v59 = vmul.f32 0.6931472, %v9354_v30  ;;  %v6711_v48 = vsel %vm1115_vm0, %v6584_v62, %v6705_v23  ;;  %9365 = vlog2.f32 %v6584_v62  ;;  %v6775_v17 = vsub.f32 1.0, %v6584_v62 }
 0xeba   : > { %v9358_v2 = vpop.eup %9357  ;;  %9367 = vlog2.f32 %v6777_v22  ;;  %6723 = vst [vmem:[%s12208_s11 + $0x10] sm:$0xff] %v6711_v48  ;;  %v6654_v5 = vsel %vm6653_vm5, %v9348_v21, %v6650_v54  ;;  %v6620_v3 = vadd.f32 %v9352_v49, %v6619_v52  ;;  %v6642_v21 = vand.u32 2147483648, %v12350_v31 }
 0xebb   : > { %v12371_v12 = vpop.eup %9359  ;;  %v6762_v50 = vmax.f32 %v6742_v59, -100.0  ;;  %v6790_v63 = vmul.f32 0.6931472, %v9358_v2  ;;  %9369 = vlog2.f32 %v6775_v17  ;;  %v12373_v8 = vsel %vm6656_vm12, %v6658_v25, %v6654_v5  ;;  %v6730_v2 = vld [vmem:[%s12217_s1 + $0x18] sm:$0xff] }
 0xebc   : > { %v12375_v23 = vpop.eup %9361  ;;  %v6780_v26 = vsub.f32 1.0, %v12373_v8  ;;  %9371 = vlog2.f32 %v12373_v8  ;;  %v6624_v29 = vsel %vm6623_vm2, %v9352_v49, %v6620_v3  ;;  %v6748_v54 = vmul.f32 0.6931472, %v12362_v20 }
 0xebd   : > { %v12379_v14 = vpop.eup %9363  ;;  %v6810_v42 = vmax.f32 %v6790_v63, -100.0  ;;  %v6832_v27 = vrot.slane %v6762_v50, 4  ;;  %v6662_v36 = vmul.f32 %v12375_v23, %v12340_v19  ;;  %v6707_v20 = vrot.slane %v12373_v8, 4 }
 0xebe   : > { %v6632_v28 = vmul.f32 %v12379_v14, %v12350_v31  ;;  %9373 = vlog2.f32 %v6780_v26  ;;  %vm6637_vm3 = vweird.f32 %v12379_v14  ;;  %v12432_v59 = vadd.f32 1.0, %v12371_v12 }
 0xebf   : > { %v9366_v7 = vpop.eup %9365  ;;  %v6838_v6 = vsel %vm1115_vm0, %v6761_v13, %v6832_v27  ;;  %v6874_v15 = vrot.slane %v6810_v42, 4  ;;  %v6629_v13 = vsel %vm12381_vm15, %v6628_v32, %v6624_v29  ;;  %v6663_v45 = vsub.f32 1.0, %v6662_v36  ;;  %vm6638_vm6 = vmor %vm6636_vm4, %vm6637_vm3 }
 0xec0   : > { %v9368_v37 = vpop.eup %9367  ;;  %v6744_v38 = vmul.f32 0.6931472, %v9366_v7  ;;  %v6633_v51 = vsub.f32 1.0, %v6632_v28  ;;  %v6850_v9 = vmul.f32 %v6838_v6, %v12303_v4  ;;  %v6706_v49 = vrot.slane %v6629_v13, 4 }
 0xec1   : > { %v9370_v60 = vpop.eup %9369  ;;  %v6880_v39 = vsel %vm1115_vm0, %v6809_v47, %v6874_v15  ;;  %9375 = vlog2.f32 %v6629_v13  ;;  %v6778_v22 = vsub.f32 1.0, %v6629_v13  ;;  %v6969_v4 = vmul.f32 %v6943_v0, %v6906_v57 }
 0xec2   : > { %v6892_v16 = vmul.f32 %v6880_v39, %v6856_v55  ;;  %v6763_v24 = vmax.f32 %v6744_v38, -100.0  ;;  %v6792_v53 = vmul.f32 0.6931472, %v9370_v60  ;;  %v6634_v35 = vmul.f32 %v12379_v14, %v6633_v51  ;;  %v9372_v30 = vpop.eup %9371 }
 0xec3   : > { %v6712_v33 = vsel %vm1115_vm0, %v12333_v11, %v6706_v49  ;;  %9377 = vlog2.f32 %v6778_v22  ;;  %v12416_v55 = vsel %vm1115_vm0, %v12305_v18, 0.0  ;;  %v6643_v18 = vor.u32 1.1754944e-38, %v6642_v21 }
 0xec4   : > { %v6898_v34 = vadd.f32 %v6892_v16, %v6850_v9  ;;  %v6811_v47 = vmax.f32 %v6792_v53, -100.0  ;;  %v6839_v25 = vsel %vm1115_vm0, %v6763_v24, %v12281_v41  ;;  %6724 = vst [vmem:[%s12208_s11 + $0x18] sm:$0xff] %v6712_v33  ;;  %v9374_v62 = vpop.eup %9373  ;;  %v6635_v43 = vadd.f32 %v12379_v14, %v6634_v35 }
 0xec5   : > { %v6851_v11 = vmul.f32 %v6839_v25, %v12318_v61  ;;  %v6664_v46 = vmul.f32 %v12375_v23, %v6663_v45  ;;  %v6796_v48 = vmul.f32 0.6931472, %v9368_v37  ;;  %v6754_v61 = vmul.f32 0.6931472, %v9372_v30 }
 0xec6   : > { %6937 = vst [vmem:[#allocation1 + $0x10] ss:$2 sm:$0xff] %v6898_v34  ;;  %v6881_v41 = vsel %vm1115_vm0, %v6811_v47, %v12283_v44  ;;  %v6639_v44 = vsel %vm6638_vm6, %v12379_v14, %v6635_v43  ;;  %v6802_v8 = vmul.f32 0.6931472, %v9374_v62  ;;  %vm6667_vm8 = vweird.f32 %v12375_v23  ;;  %v6731_v14 = vld [vmem:[%s12217_s1 + $0x20] sm:$0xff] }
 0xec7   : > { %v6893_v57 = vmul.f32 %v6881_v41, %v6857_v56  ;;  %v9376_v31 = vpop.eup %9375  ;;  %v6644_v56 = vsel %vm6641_vm7, %v6643_v18, %v6639_v44  ;;  %v6665_v26 = vadd.f32 %v12375_v23, %v6664_v46  ;;  %v6672_v42 = vand.u32 2147483648, %v12340_v19  ;;  %vm12447_vm10 = vmor %vm6666_vm9, %vm6667_vm8 }
 0xec8   : > { %v6750_v5 = vmul.f32 0.6931472, %v9376_v31  ;;  %v6713_v40 = vsel %vm1115_vm0, %v6644_v56, %v6707_v20  ;;  %9379 = vlog2.f32 %v6644_v56  ;;  %v6779_v50 = vsub.f32 1.0, %v6644_v56 }
 0xec9   : > { %v6899_v17 = vadd.f32 %v6893_v57, %v6851_v11  ;;  %v9378_v63 = vpop.eup %9377  ;;  %9381 = vrcp.f32 %v12432_v59  ;;  %6725 = vst [vmem:[%s12208_s11 + $0x20] sm:$0xff] %v6713_v40  ;;  %v6858_v27 = vsub.f32 1.0, %v6730_v2  ;;  %v6981_v32 = vsel %vm1115_vm0, %v6969_v4, 0.0 }
 0xeca   : > { %v6766_v12 = vmax.f32 %v6750_v5, -100.0  ;;  %v6798_v52 = vmul.f32 0.6931472, %v9378_v63  ;;  %9383 = vlog2.f32 %v6779_v50  ;;  %v6765_v3 = vmax.f32 %v6748_v54, -100.0 }
 0xecb   : > { %6939 = vst [vmem:[#allocation1 + $0x20] ss:$2 sm:$0xff] %v6899_v17  ;;  %v6768_v28 = vmax.f32 %v6754_v61, -100.0  ;;  %v6813_v6 = vmax.f32 %v6796_v48, -100.0  ;;  %v6816_v15 = vmax.f32 %v6802_v8, -100.0  ;;  %v6859_v36 = vsub.f32 1.0, %v6731_v14 }
 0xecc   : > { %v6814_v1 = vmax.f32 %v6798_v52, -100.0  ;;  %v6834_v21 = vrot.slane %v6766_v12, 4  ;;  %v6669_v37 = vsel %vm12447_vm10, %v12375_v23, %v6665_v26  ;;  %v6673_v51 = vor.u32 1.1754944e-38, %v6672_v42 }
 0xecd   : > { %v6907_v60 = vperm.slane %v12276_v10, 2  ;;  %v6944_v13 = vld.sshfl [vmem:[#allocation1 + $0x10] sm:$0xff pattern:$0x75316420]  ;;  %v6835_v16 = vrot.slane %v6768_v28, 4  ;;  %v6877_v34 = vrot.slane %v6816_v15, 4  ;;  %vm6681_vm5 = vweird.f32 %v12432_v59 }
 0xece   : > { %v9380_v19 = vpop.eup %9379  ;;  %v6840_v38 = vsel %vm1115_vm0, %v6765_v3, %v6834_v21  ;;  %v6876_v29 = vrot.slane %v6814_v1, 4  ;;  %v6674_v53 = vsel %vm6671_vm11, %v6673_v51, %v6669_v37  ;;  %v6685_v25 = vand.u32 2147483647, %v12432_v59  ;;  %v6945_v46 = vld.sshfl [vmem:[#allocation1 + $0x18] sm:$0xff pattern:$0x75316420] }
 0xecf   : > { %v9382_v9 = vpop.eup %9381  ;;  %v6752_v39 = vmul.f32 0.6931472, %v9380_v19  ;;  %v6852_v22 = vmul.f32 %v6840_v38, %v6730_v2  ;;  %v6970_v33 = vmul.f32 %v6944_v13, %v6907_v60  ;;  %v6687_v54 = vand.u32 2147483648, %v12432_v59  ;;  %v6734_v37 = vld [vmem:[%s12557_s16 + $0x8] sm:$0xf] }
 0xed0   : > { %v9384_v0 = vpop.eup %9383  ;;  %v6882_v24 = vsel %vm1115_vm0, %v6813_v6, %v6876_v29  ;;  %v6677_v49 = vmul.f32 %v9382_v9, %v12432_v59  ;;  %v6781_v41 = vsub.f32 1.0, %v6674_v53  ;;  %vm6682_vm1 = vweird.f32 %v9382_v9  ;;  %v6732_v29 = vld [vmem:[%s12217_s1 + $0x28] sm:$0xff] }
 0xed1   : > { %v6894_v23 = vmul.f32 %v6882_v24, %v6858_v27  ;;  %v6767_v35 = vmax.f32 %v6752_v39, -100.0  ;;  %v6800_v45 = vmul.f32 0.6931472, %v9384_v0  ;;  %v6908_v11 = vperm.slane %v12276_v10, 3  ;;  %vm6683_vm12 = vmor %vm6681_vm5, %vm6682_vm1 }
 0xed2   : > { %v6678_v47 = vsub.f32 1.0, %v6677_v49  ;;  %v6909_v18 = vperm.slane %v12276_v10, 4  ;;  %v6983_v48 = vsel %vm1115_vm0, %v6970_v33, 0.0  ;;  %9385 = vlog2.f32 %v6674_v53  ;;  %v6946_v61 = vld.sshfl [vmem:[#allocation1 + $0x20] sm:$0xff pattern:$0x75316420] }
 0xed3   : > { %v6900_v30 = vadd.f32 %v6894_v23, %v6852_v22  ;;  %v6815_v4 = vmax.f32 %v6800_v45, -100.0  ;;  %v6841_v62 = vsel %vm1115_vm0, %v6767_v35, %v6835_v16  ;;  %v6688_v17 = vor.u32 1.1754944e-38, %v6687_v54  ;;  %v6947_v42 = vld.sshfl [vmem:[#allocation1 + $0x28] sm:$0xff pattern:$0x75316420] }
 0xed4   : > { %v6679_v43 = vmul.f32 %v9382_v9, %v6678_v47  ;;  %v6853_v20 = vmul.f32 %v6841_v62, %v6731_v14  ;;  %v6982_v56 = vadd.f32 %v6981_v32, %v12416_v55  ;;  %vm6686_vm13 = vcmp.eq.f32.partialorder %v6685_v25, 8.507059e+37 }
 0xed5   : > { %6941 = vst [vmem:[#allocation1 + $0x30] ss:$2 sm:$0xff] %v6900_v30  ;;  %v6883_v57 = vsel %vm1115_vm0, %v6815_v4, %v6877_v34  ;;  %v6971_v40 = vmul.f32 %v6945_v46, %v6908_v11  ;;  %9387 = vlog2.f32 %v6781_v41  ;;  %v6972_v26 = vmul.f32 %v6946_v61, %v6909_v18 }
 0xed6   : > { %v6895_v44 = vmul.f32 %v6883_v57, %v6859_v36  ;;  %v6680_v31 = vadd.f32 %v9382_v9, %v6679_v43  ;;  %v6984_v50 = vadd.f32 %v6983_v48, %v6982_v56  ;;  %v6910_v52 = vperm.slane %v12276_v10, 5 }
 0xed7   : > { %v6985_v55 = vsel %vm1115_vm0, %v6971_v40, 0.0  ;;  %v6987_v32 = vsel %vm1115_vm0, %v6972_v26, 0.0  ;;  %v6860_v49 = vsub.f32 1.0, %v6732_v29  ;;  %v6913_v22 = vperm.slane %v6734_v37, 0 }
 0xed8   : > { %v6901_v2 = vadd.f32 %v6895_v44, %v6853_v20  ;;  %v6684_v5 = vsel %vm6683_vm12, %v9382_v9, %v6680_v31  ;;  %v9386_v14 = vpop.eup %9385  ;;  %v6986_v27 = vadd.f32 %v6985_v55, %v6984_v50  ;;  %v6973_v21 = vmul.f32 %v6947_v42, %v6910_v52 }
 0xed9   : > { %v6689_v59 = vsel %vm6686_vm13, %v6688_v17, %v6684_v5  ;;  %v6756_v7 = vmul.f32 0.6931472, %v9386_v14  ;;  %v6912_v9 = vperm.slane %v12276_v10, 7  ;;  %v6914_v41 = vperm.slane %v6734_v37, 1 }
 0xeda   : > { %v6708_v63 = vrot.slane %v6689_v59, 4  ;;  %9389 = vlog2.f32 %v6689_v59  ;;  %v6782_v8 = vsub.f32 1.0, %v6689_v59  ;;  %6950 = vst [vmem:[#allocation1] ss:$2 sm:$0xff] %v6901_v2  ;;  %v6988_v15 = vadd.f32 %v6987_v32, %v6986_v27 }
 0xedb   : > { %v9388_v3 = vpop.eup %9387  ;;  %v6989_v39 = vsel %vm1115_vm0, %v6973_v21, 0.0  ;;  %v6769_v13 = vmax.f32 %v6756_v7, -100.0  ;;  %v6915_v44 = vperm.slane %v6734_v37, 2  ;;  %v6916_v31 = vperm.slane %v6734_v37, 3 }
 0xedc   : > { %v6714_v12 = vsel %vm1115_vm0, %v6674_v53, %v6708_v63  ;;  %9391 = vlog2.f32 %v6782_v8  ;;  %v6948_v28 = vld.sshfl [vmem:[#allocation1 + $0x30] sm:$0xff pattern:$0x75316420]  ;;  %v6804_v38 = vmul.f32 0.6931472, %v9388_v3  ;;  %v6990_v53 = vadd.f32 %v6989_v39, %v6988_v15 }
 0xedd   : > { %6726 = vst [vmem:[%s12208_s11 + $0x28] sm:$0xff] %v6714_v12  ;;  %v6974_v19 = vmul.f32 %v6948_v28, %v6911_v58  ;;  %v6949_v24 = vld.sshfl [vmem:[#allocation1 + $0x38] sm:$0xff pattern:$0x75316420] }
 0xede   : > { %v6817_v35 = vmax.f32 %v6804_v38, -100.0  ;;  %v6975_v25 = vmul.f32 %v6949_v24, %v6912_v9 }
 0xedf   : > { %v6991_v23 = vsel %vm1115_vm0, %v6974_v19, 0.0 }
 0xee0   : > { %v9390_v1 = vpop.eup %9389  ;;  %v6992_v10 = vadd.f32 %v6991_v23, %v6990_v53  ;;  %v6993_v43 = vsel %vm1115_vm0, %v6975_v25, 0.0 }
 0xee1   : > { %v6758_v6 = vmul.f32 0.6931472, %v9390_v1  ;;  %v6952_v47 = vld.sshfl [vmem:[#allocation1] sm:$0xff pattern:$0x75316420] }
 0xee2   : > { %v9392_v36 = vpop.eup %9391  ;;  %v6976_v62 = vmul.f32 %v6952_v47, %v6913_v22  ;;  %v6953_v11 = vld.sshfl [vmem:[#allocation1 + $0x8] sm:$0xff pattern:$0x75316420]  ;;  %v6994_v57 = vadd.f32 %v6993_v43, %v6992_v10 }
 0xee3   : > { %v6770_v51 = vmax.f32 %v6758_v6, -100.0  ;;  %v6806_v60 = vmul.f32 0.6931472, %v9392_v36  ;;  %v6977_v46 = vmul.f32 %v6953_v11, %v6914_v41 }
 0xee4   : > { %v6995_v18 = vsel %vm1115_vm0, %v6976_v62, 0.0 }
 0xee5   : > { %v6818_v0 = vmax.f32 %v6806_v60, -100.0  ;;  %v6836_v16 = vrot.slane %v6770_v51, 4  ;;  %v6996_v20 = vadd.f32 %v6995_v18, %v6994_v57  ;;  %v6997_v48 = vsel %vm1115_vm0, %v6977_v46, 0.0 }
 0xee7   : > { %v6842_v45 = vsel %vm1115_vm0, %v6769_v13, %v6836_v16  ;;  %v6878_v34 = vrot.slane %v6818_v0, 4  ;;  %v6998_v56 = vadd.f32 %v6997_v48, %v6996_v20 }
 0xee8   : > { %v6854_v30 = vmul.f32 %v6842_v45, %v6732_v29 }
 0xee9   : > { %v6884_v33 = vsel %vm1115_vm0, %v6817_v35, %v6878_v34 }
 0xeea   : > { %v6896_v4 = vmul.f32 %v6884_v33, %v6860_v49 }
 0xeec   : > { %v6902_v54 = vadd.f32 %v6896_v4, %v6854_v30 }
 0xeee   : > { %6951 = vst [vmem:[#allocation1 + $0x10] ss:$2 sm:$0xff] %v6902_v54 }
 0xef4   : > { %v7031_v8 = vpop.xlane.xlu2 %7030 }
 0xef5   : > { %v6954_v17 = vld.sshfl [vmem:[#allocation1 + $0x10] sm:$0xff pattern:$0x75316420]  ;;  %v6955_v61 = vld.sshfl [vmem:[#allocation1 + $0x18] sm:$0xff pattern:$0x75316420] }
 0xef6   : > { %v6978_v2 = vmul.f32 %v6954_v17, %v6915_v44  ;;  %v6979_v5 = vmul.f32 %v6955_v61, %v6916_v31  ;;  %v7032_v26 = vrot.slane %v7031_v8, 4 }
 0xef8   : > { %v6999_v40 = vsel %vm1115_vm0, %v6978_v2, 0.0  ;;  %v7001_v50 = vsel %vm1115_vm0, %v6979_v5, 0.0  ;;  %v7033_v12 = vadd.f32 %v7032_v26, %v7031_v8  ;;  %vm7042_vm0 = vcmask 0  }
 0xef9   : > { %v7000_v59 = vadd.f32 %v6999_v40, %v6998_v56 }
 0xefa   : > { %v7034_v52 = vrot.slane %v7033_v12, 2 }
 0xefb   : > { %v7002_v63 = vadd.f32 %v7001_v50, %v7000_v59 }
 0xefc   : > { %v7035_v27 = vadd.f32 %v7034_v52, %v7033_v12 }
 0xefd   : > { %7003 = vadd.xlane.f32.xlu1 %v7002_v63 }
 0xefe   : > { %v7036_v3 = vrot.slane %v7035_v27, 1 }
 0xf00   : > { %v7037_v21 = vadd.f32 %v7036_v3, %v7035_v27 }
 0xf70   : > { %v7004_v55 = vpop.xlane.xlu1 %7003 }
 0xf71   : > { %v7005_v14 = vrot.slane %v7004_v55, 4 }
 0xf73   : > { %v7006_v42 = vadd.f32 %v7005_v14, %v7004_v55 }
 0xf75   : > { %v7007_v58 = vrot.slane %v7006_v42, 2 }
 0xf77   : > { %v7008_v32 = vadd.f32 %v7007_v58, %v7006_v42 }
 0xf79   : > { %v7009_v28 = vrot.slane %v7008_v32, 1 }
 0xf7b   : > { %v7010_v1 = vadd.f32 %v7009_v28, %v7008_v32 }
 0xf7d   : > { %8861 = vpush %v7010_v1 }
 0xf7e   : > { %8863 = vpush %v7037_v21 }
 0xfae   : > { %s8862_s26 = spop %8861 }
 0xfaf   : > { %v7012_v7 = vstv %s8862_s26  ;;  %s8864_s23 = spop %8863 }
 0xfb0   : > { %v7013_v6 = vsub.f32 0.0, %v7012_v7  ;;  %v7039_v15 = vstv %s8864_s23 }
 0xfb1   : > { %v7040_v36 = vmul.f32 -0.5, %v7039_v15 }
 0xfb3   : > { %v7041_v37 = vadd.f32 %v7040_v36, %v7013_v6 }
 0xfb5   : > { %7043 = vst.msk [vmem:[%s1060_s0] sm:$0x1] %vm7042_vm0, %v7041_v37 }
 0xfb6 PF: > { %s78_s7 = sadd.s32 1, %s9401_s7  }
 0xfb7   : > { %p75_p4 = scmp.ge.s32.totalorder %s78_s7, 4  }
 0xfb9   :  { %77 = sbr.rel (!%p75_p4) target bundleno = 54 (0x36), region = 244 }

</bundles_post_ra>
